<compile_context>
chip_gen: v6e
topology: v6e:2x2x1
jax: 0.10.0
libtpu: 0.0.40
codegen_flags: <defaults>
</compile_context>

<pallas_src>
import functools

import jax
import jax.numpy as jnp
from jax.experimental import pallas as pl
from jax.experimental.pallas import tpu as pltpu

_EPS = 1e-5
_PREC = jax.lax.Precision.HIGHEST


# ---------------------------------------------------------------------------
# Wrapper-side weight refactoring (tiny, runs once per call in XLA)
# ---------------------------------------------------------------------------
def _make_conv_bands(w_hwio, W):
    """3x3 / pad=1 conv as 3 banded lane-dense matmuls: (3, W*Cin, W*Cout)."""
    f32 = jnp.float32
    _, _, Ci, Cout = w_hwio.shape
    # S[dx, p, x] = 1  iff  p == x + dx - 1  (horizontal zero-pad folded away)
    S = jnp.stack([jnp.eye(W, W, k=1 - dx, dtype=f32) for dx in range(3)])
    b = jnp.einsum("dpx,ydic->ypixc", S, w_hwio.astype(f32), precision=_PREC)
    return b.reshape(3, W * Ci, W * Cout)


def _make_convT_bands(wt, W):
    """ConvTranspose2d(k=3, s=2, p=1, op=1) as per-ky banded matmuls.

    wt is PyTorch layout (Cin, Cout, kH, kW).  Returns (3, W*Cin, 2W*Cout):
    band[1] -> even output rows (from input row y), band[2]/band[0] -> odd
    output rows (from input rows y and y+1 respectively).
    """
    f32 = jnp.float32
    Ci, Cout, _, _ = wt.shape
    # output column q = 2*c - 1 + kx  (out-of-range q dropped by one_hot)
    qpos = 2 * jnp.arange(W)[:, None] + jnp.arange(3)[None, :] - 1        # (W, 3)
    T = jax.nn.one_hot(qpos, 2 * W, dtype=f32)                            # (W, 3, 2W)
    b = jnp.einsum("pkq,ioyk->ypiqo", T, wt.astype(f32), precision=_PREC)
    return b.reshape(3, W * Ci, 2 * W * Cout)


# ---------------------------------------------------------------------------
# Fused kernel
# ---------------------------------------------------------------------------
def _upsample_kernel(x_ref, w1_ref, w2_ref, wt_ref, foldc_ref, aux_ref,
                     o_ref, pad_ref, *, N, H, W, Cin, Cm, Co):
    f32 = jnp.float32
    NH = N * H

    # ---- unpack packed small operands ------------------------------------
    foldT_m = aux_ref[0:Cm, :]                 # (Cm, W*Cm)  channel -> lanes
    foldT_o = aux_ref[Cm:Cm + Co, :]           # (Co, 2W*Co)
    base = Cm + Co
    g1 = aux_ref[base + 0:base + 1, 0:Cm]
    be1 = aux_ref[base + 1:base + 2, 0:Cm]
    g2 = aux_ref[base + 2:base + 3, 0:Cm]
    be2 = aux_ref[base + 3:base + 4, 0:Cm]
    g3 = aux_ref[base + 4:base + 5, 0:Co]
    be3 = aux_ref[base + 5:base + 6, 0:Co]
    fold_m = foldc_ref[:, 0:Cm]                # (W*Cm, Cm)   lanes -> channel
    fold_o = foldc_ref[:, Cm:Cm + Co]          # (2W*Co, Co)

    ones_r = jnp.ones((1, NH), f32)

    def mxu(a, b):
        return jnp.dot(a, b, precision=_PREC, preferred_element_type=f32)

    def conv3x3(src, band_ref):
        # src: (N, H+2, W*Ci) vertically padded, horizontally band-folded.
        out = None
        for dy in range(3):
            a = src[:, dy:dy + H, :].reshape(NH, -1)
            t = mxu(a, band_ref[dy])
            out = t if out is None else out + t
        return out                             # (N*H, W*Cout)

    def bn_scale_shift(s1, s2, count, fold, foldT, g, be):
        # s1/s2: (1, W*C) column sums of y and y*y (computed on the MXU).
        ch1 = mxu(s1, fold)                    # (1, C) per-channel sums
        ch2 = mxu(s2, fold)
        inv = 1.0 / count
        mean = ch1 * inv
        var = ch2 * inv - mean * mean          # biased batch variance
        scale = g * jax.lax.rsqrt(var + _EPS)
        shift = be - mean * scale
        rows = mxu(jnp.concatenate([scale, shift], axis=0), foldT)   # (2, W*C)
        return rows[0:1, :], rows[1:2, :]

    # ---- conv1 -> BN -> ReLU  (conv bias cancelled by train-mode BN) ------
    y1 = conv3x3(x_ref, w1_ref)                                   # (N*H, W*Cm)
    sc, sh = bn_scale_shift(mxu(ones_r, y1), mxu(ones_r, y1 * y1),
                            N * H * W, fold_m, foldT_m, g1, be1)
    h1 = jnp.maximum(y1 * sc + sh, 0.0)

    # ---- conv2 -> BN -> ReLU ----------------------------------------------
    pad_ref[...] = jnp.zeros_like(pad_ref)     # lane-dense: ~a dozen stores
    pad_ref[:, 1:H + 1, :] = h1.reshape(N, H, W * Cm)
    y2 = conv3x3(pad_ref, w2_ref)
    sc, sh = bn_scale_shift(mxu(ones_r, y2), mxu(ones_r, y2 * y2),
                            N * H * W, fold_m, foldT_m, g2, be2)
    h2 = jnp.maximum(y2 * sc + sh, 0.0)                           # (N*H, W*Cm)

    # ---- ConvTranspose2d(s=2) as even/odd-row band matmuls ----------------
    # Reuse pad scratch: rows 1..H <- h2, rows 0 / H+1 stay zero, so rows
    # 2..H+1 give the "next input row" (zero below the last row).
    pad_ref[:, 1:H + 1, :] = h2.reshape(N, H, W * Cm)
    h_nxt = pad_ref[:, 2:H + 2, :].reshape(NH, W * Cm)
    ev = mxu(h2, wt_ref[1])                                       # even rows
    od = mxu(h2, wt_ref[2]) + mxu(h_nxt, wt_ref[0])               # odd rows

    # BN3 + ReLU on the phase slabs BEFORE any interleave.
    sc, sh = bn_scale_shift(mxu(ones_r, ev + od),
                            mxu(ones_r, ev * ev + od * od),
                            N * 2 * H * 2 * W, fold_o, foldT_o, g3, be3)
    o_ref[0, :, :] = jnp.maximum(ev * sc + sh, 0.0)
    o_ref[1, :, :] = jnp.maximum(od * sc + sh, 0.0)


# ---------------------------------------------------------------------------
# Wrapper
# ---------------------------------------------------------------------------
def upsample_layer_forward(x_nchw, skip_nchw, p):
    f32 = jnp.float32
    N, Cin, H, W = x_nchw.shape
    Co = skip_nchw.shape[1]                    # out_ch
    Cm = p["w1"].shape[-1]                     # 2 * out_ch
    assert Cm == 2 * Co and W * Cm == 2 * W * Co

    # Input: NHWC, channels folded into lanes, vertical pad rows added (XLA).
    x = jnp.transpose(x_nchw, (0, 2, 3, 1)).astype(f32)
    x_vp = jnp.pad(x.reshape(N, H, W * Cin), ((0, 0), (1, 1), (0, 0)))

    wband1 = _make_conv_bands(p["w1"], W)      # (3, W*Cin, W*Cm)
    wband2 = _make_conv_bands(p["w2"], W)      # (3, W*Cm,  W*Cm)
    wbandT = _make_convT_bands(p["wt"], W)     # (3, W*Cm, 2W*Co)

    # Channel fold / broadcast matrices + BN affine params packed into 2 ops.
    fold_m = jnp.tile(jnp.eye(Cm, dtype=f32), (W, 1))        # (W*Cm, Cm)
    fold_o = jnp.tile(jnp.eye(Co, dtype=f32), (2 * W, 1))    # (2W*Co, Co)
    foldcat = jnp.concatenate([fold_m, fold_o], axis=1)      # (W*Cm, Cm+Co)

    def row(v):
        r = jnp.zeros((1, W * Cm), f32)
        return r.at[0, :v.shape[0]].set(v.astype(f32))

    aux = jnp.concatenate(
        [fold_m.T, fold_o.T,
         row(p["g1"]), row(p["be1"]), row(p["g2"]), row(p["be2"]),
         row(p["g3"]), row(p["be3"])], axis=0)               # (Cm+Co+6, W*Cm)

    args = (x_vp, wband1, wband2, wbandT, foldcat, aux)

    def full_spec(shape):
        nd = len(shape)
        return pl.BlockSpec(shape, lambda i: (0,) * nd)

    out_sds = jax.ShapeDtypeStruct((2, N * H, 2 * W * Co), f32)
    kernel = functools.partial(_upsample_kernel,
                               N=N, H=H, W=W, Cin=Cin, Cm=Cm, Co=Co)

    out = pl.pallas_call(
        kernel,
        out_shape=out_sds,
        grid=(1,),
        in_specs=[full_spec(a.shape) for a in args],
        out_specs=full_spec(out_sds.shape),
        scratch_shapes=[pltpu.VMEM((N, H + 2, W * Cm), f32)],
        compiler_params=pltpu.CompilerParams(dimension_semantics=("arbitrary",)),
    )(*args)

    # Row interleave + NCHW transpose + channel concat: one fused XLA copy,
    # the skip tensor never enters the kernel.
    up = out.reshape(2, N, H, 2 * W, Co)
    up = jnp.transpose(up, (1, 2, 0, 3, 4)).reshape(N, 2 * H, 2 * W, Co)
    up = jnp.transpose(up, (0, 3, 1, 2))                     # (N, Co, 2H, 2W)
    return jnp.concatenate([up, skip_nchw.astype(f32)], axis=1)


# ---------------------------------------------------------------------------
# Pure-JAX reference (for correctness check)
# ---------------------------------------------------------------------------
def _ref_bn_relu(x, g, b, eps=_EPS):
    m = x.mean(axis=(0, 1, 2))
    v = x.var(axis=(0, 1, 2))
    return jnp.maximum((x - m) * (g / jnp.sqrt(v + eps)) + b, 0.0)


def reference_forward(x_nchw, skip_nchw, p):
    hp = jax.lax.Precision.HIGHEST
    x = jnp.transpose(x_nchw, (0, 2, 3, 1))
    skip = jnp.transpose(skip_nchw, (0, 2, 3, 1))

    def conv(h, w, b):
        y = jax.lax.conv_general_dilated(
            h, w, window_strides=(1, 1), padding="SAME",
            dimension_numbers=("NHWC", "HWIO", "NHWC"), precision=hp)
        return y + b.reshape(1, 1, 1, -1)

    h = _ref_bn_relu(conv(x, p["w1"], p["b1"]), p["g1"], p["be1"])
    h = _ref_bn_relu(conv(h, p["w2"], p["b2"]), p["g2"], p["be2"])
    wf = jnp.transpose(p["wt"][:, :, ::-1, ::-1], (2, 3, 0, 1))
    up = jax.lax.conv_general_dilated(
        h, wf, window_strides=(1, 1), padding=((1, 2), (1, 2)),
        lhs_dilation=(2, 2), dimension_numbers=("NHWC", "HWIO", "NHWC"),
        precision=hp) + p["bt"].reshape(1, 1, 1, -1)
    up = _ref_bn_relu(up, p["g3"], p["be3"])
    cat = jnp.concatenate([up, skip], axis=-1)
    return jnp.transpose(cat, (0, 3, 1, 2))


# ---------------------------------------------------------------------------
# Main
# ---------------------------------------------------------------------------
if __name__ == "__main__":
    in_ch, out_ch = 4, 4
    N, H, W = 2, 16, 16
    mid = out_ch * 2

    key = jax.random.PRNGKey(0)
    ks = jax.random.split(key, 5)

    x = jax.random.normal(ks[0], (N, in_ch, H, W), jnp.float32)
    skip = jax.random.normal(ks[1], (N, out_ch, 2 * H, 2 * W), jnp.float32)

    params = {
        # conv weights stored in (kH, kW, Cin, Cout) layout
        "w1": 0.1 * jax.random.normal(ks[2], (3, 3, in_ch, mid), jnp.float32),
        "b1": 0.05 * jnp.ones((mid,), jnp.float32),
        "w2": 0.1 * jax.random.normal(ks[3], (3, 3, mid, mid), jnp.float32),
        "b2": 0.05 * jnp.ones((mid,), jnp.float32),
        # transposed-conv weight in PyTorch layout (Cin, Cout, kH, kW)
        "wt": 0.1 * jax.random.normal(ks[4], (mid, out_ch, 3, 3), jnp.float32),
        "bt": 0.05 * jnp.ones((out_ch,), jnp.float32),
        # BatchNorm affine params (PyTorch init: gamma=1, beta=0)
        "g1": jnp.ones((mid,), jnp.float32), "be1": jnp.zeros((mid,), jnp.float32),
        "g2": jnp.ones((mid,), jnp.float32), "be2": jnp.zeros((mid,), jnp.float32),
        "g3": jnp.ones((out_ch,), jnp.float32), "be3": jnp.zeros((out_ch,), jnp.float32),
    }

    fwd = jax.jit(upsample_layer_forward)
    y = fwd(x, skip, params)
    jax.block_until_ready(y)

    assert y.shape == (N, 2 * out_ch, 2 * H, 2 * W), y.shape
    assert bool(jnp.all(jnp.isfinite(y)))

    y_ref = reference_forward(x, skip, params)
    err = float(jnp.max(jnp.abs(y - y_ref)))
    assert err < 1e-2, f"max abs err vs JAX reference: {err}"

    print("KERNEL_OK")
</pallas_src>

<mosaic_0001>
module attributes {stable_mosaic.version = 11 : i64} {
  func.func @_upsample_kernel(%arg0: i32, %arg1: memref<2x18x64xf32, #tpu.memory_space<vmem>>, %arg2: memref<3x64x128xf32, #tpu.memory_space<vmem>>, %arg3: memref<3x128x128xf32, #tpu.memory_space<vmem>>, %arg4: memref<3x128x128xf32, #tpu.memory_space<vmem>>, %arg5: memref<128x12xf32, #tpu.memory_space<vmem>>, %arg6: memref<18x128xf32, #tpu.memory_space<vmem>>, %arg7: memref<2x32x128xf32, #tpu.memory_space<vmem>>, %arg8: memref<2x18x128xf32, #tpu.memory_space<vmem>>) attributes {dimension_semantics = [#tpu.dimension_semantics<arbitrary>], iteration_bounds = array<i64: 1>, scalar_prefetch = 0 : i64, scratch_operands = 1 : i64, tpu.core_type = #tpu.core_type<tc>, window_params = [{pipeline_mode = #tpu.pipeline_mode<synchronous>, transform_indices = @transform_0, window_bounds = array<i64: 2, 18, 64>}, {pipeline_mode = #tpu.pipeline_mode<synchronous>, transform_indices = @transform_1, window_bounds = array<i64: 3, 64, 128>}, {pipeline_mode = #tpu.pipeline_mode<synchronous>, transform_indices = @transform_2, window_bounds = array<i64: 3, 128, 128>}, {pipeline_mode = #tpu.pipeline_mode<synchronous>, transform_indices = @transform_3, window_bounds = array<i64: 3, 128, 128>}, {pipeline_mode = #tpu.pipeline_mode<synchronous>, transform_indices = @transform_4, window_bounds = array<i64: 128, 12>}, {pipeline_mode = #tpu.pipeline_mode<synchronous>, transform_indices = @transform_5, window_bounds = array<i64: 18, 128>}, {pipeline_mode = #tpu.pipeline_mode<synchronous>, transform_indices = @transform_6, window_bounds = array<i64: 2, 32, 128>}]} {
    %c0 = arith.constant 0 : index
    %c0_0 = arith.constant 0 : index
    %0 = vector.load %arg6[%c0, %c0_0] : memref<18x128xf32, #tpu.memory_space<vmem>>, vector<8x128xf32>
    %c8 = arith.constant 8 : index
    %c0_1 = arith.constant 0 : index
    %1 = vector.load %arg6[%c8, %c0_1] : memref<18x128xf32, #tpu.memory_space<vmem>>, vector<4x128xf32>
    %c12 = arith.constant 12 : index
    %c0_2 = arith.constant 0 : index
    %2 = vector.load %arg6[%c12, %c0_2] : memref<18x128xf32, #tpu.memory_space<vmem>>, vector<1x8xf32>
    %c13 = arith.constant 13 : index
    %c0_3 = arith.constant 0 : index
    %3 = vector.load %arg6[%c13, %c0_3] : memref<18x128xf32, #tpu.memory_space<vmem>>, vector<1x8xf32>
    %c14 = arith.constant 14 : index
    %c0_4 = arith.constant 0 : index
    %4 = vector.load %arg6[%c14, %c0_4] : memref<18x128xf32, #tpu.memory_space<vmem>>, vector<1x8xf32>
    %c15 = arith.constant 15 : index
    %c0_5 = arith.constant 0 : index
    %5 = vector.load %arg6[%c15, %c0_5] : memref<18x128xf32, #tpu.memory_space<vmem>>, vector<1x8xf32>
    %c16 = arith.constant 16 : index
    %c0_6 = arith.constant 0 : index
    %6 = vector.load %arg6[%c16, %c0_6] : memref<18x128xf32, #tpu.memory_space<vmem>>, vector<1x4xf32>
    %c17 = arith.constant 17 : index
    %c0_7 = arith.constant 0 : index
    %7 = vector.load %arg6[%c17, %c0_7] : memref<18x128xf32, #tpu.memory_space<vmem>>, vector<1x4xf32>
    %c0_8 = arith.constant 0 : index
    %c0_9 = arith.constant 0 : index
    %8 = vector.load %arg5[%c0_8, %c0_9] : memref<128x12xf32, #tpu.memory_space<vmem>>, vector<128x8xf32>
    %c0_10 = arith.constant 0 : index
    %c8_11 = arith.constant 8 : index
    %9 = vector.load %arg5[%c0_10, %c8_11] : memref<128x12xf32, #tpu.memory_space<vmem>>, vector<128x4xf32>
    %cst = arith.constant 1.000000e+00 : f32
    %10 = vector.broadcast %cst : f32 to vector<1x32xf32>
    %c0_12 = arith.constant 0 : index
    %c0_13 = arith.constant 0 : index
    %c0_14 = arith.constant 0 : index
    %11 = vector.load %arg1[%c0_12, %c0_13, %c0_14] : memref<2x18x64xf32, #tpu.memory_space<vmem>>, vector<2x16x64xf32>
    %12 = vector.shape_cast %11 : vector<2x16x64xf32> to vector<32x64xf32>
    %c0_15 = arith.constant 0 : index
    %c0_16 = arith.constant 0 : index
    %c0_17 = arith.constant 0 : index
    %13 = vector.load %arg2[%c0_15, %c0_16, %c0_17] : memref<3x64x128xf32, #tpu.memory_space<vmem>>, vector<1x64x128xf32>
    %14 = vector.shape_cast %13 : vector<1x64x128xf32> to vector<64x128xf32>
    %cst_18 = arith.constant dense<0.000000e+00> : vector<32x128xf32>
    %15 = tpu.matmul %12, %14, %cst_18 {dimension_numbers = #tpu.dot_dimension_numbers<[1], [0], [0], [1], [0, 0, 1, 1], [], []>, precision = #tpu.contract_precision<fp32>} : vector<32x64xf32>, vector<64x128xf32>, vector<32x128xf32> -> vector<32x128xf32>
    %c0_19 = arith.constant 0 : index
    %c1 = arith.constant 1 : index
    %c0_20 = arith.constant 0 : index
    %16 = vector.load %arg1[%c0_19, %c1, %c0_20] : memref<2x18x64xf32, #tpu.memory_space<vmem>>, vector<2x16x64xf32>
    %17 = vector.shape_cast %16 : vector<2x16x64xf32> to vector<32x64xf32>
    %c1_21 = arith.constant 1 : index
    %c0_22 = arith.constant 0 : index
    %c0_23 = arith.constant 0 : index
    %18 = vector.load %arg2[%c1_21, %c0_22, %c0_23] : memref<3x64x128xf32, #tpu.memory_space<vmem>>, vector<1x64x128xf32>
    %19 = vector.shape_cast %18 : vector<1x64x128xf32> to vector<64x128xf32>
    %cst_24 = arith.constant dense<0.000000e+00> : vector<32x128xf32>
    %20 = tpu.matmul %17, %19, %cst_24 {dimension_numbers = #tpu.dot_dimension_numbers<[1], [0], [0], [1], [0, 0, 1, 1], [], []>, precision = #tpu.contract_precision<fp32>} : vector<32x64xf32>, vector<64x128xf32>, vector<32x128xf32> -> vector<32x128xf32>
    %21 = arith.addf %15, %20 : vector<32x128xf32>
    %c0_25 = arith.constant 0 : index
    %c2 = arith.constant 2 : index
    %c0_26 = arith.constant 0 : index
    %22 = vector.load %arg1[%c0_25, %c2, %c0_26] : memref<2x18x64xf32, #tpu.memory_space<vmem>>, vector<2x16x64xf32>
    %23 = vector.shape_cast %22 : vector<2x16x64xf32> to vector<32x64xf32>
    %c2_27 = arith.constant 2 : index
    %c0_28 = arith.constant 0 : index
    %c0_29 = arith.constant 0 : index
    %24 = vector.load %arg2[%c2_27, %c0_28, %c0_29] : memref<3x64x128xf32, #tpu.memory_space<vmem>>, vector<1x64x128xf32>
    %25 = vector.shape_cast %24 : vector<1x64x128xf32> to vector<64x128xf32>
    %cst_30 = arith.constant dense<0.000000e+00> : vector<32x128xf32>
    %26 = tpu.matmul %23, %25, %cst_30 {dimension_numbers = #tpu.dot_dimension_numbers<[1], [0], [0], [1], [0, 0, 1, 1], [], []>, precision = #tpu.contract_precision<fp32>} : vector<32x64xf32>, vector<64x128xf32>, vector<32x128xf32> -> vector<32x128xf32>
    %27 = arith.addf %21, %26 : vector<32x128xf32>
    %cst_31 = arith.constant dense<0.000000e+00> : vector<1x128xf32>
    %28 = tpu.matmul %10, %27, %cst_31 {dimension_numbers = #tpu.dot_dimension_numbers<[1], [0], [0], [1], [0, 0, 1, 1], [], []>, precision = #tpu.contract_precision<fp32>} : vector<1x32xf32>, vector<32x128xf32>, vector<1x128xf32> -> vector<1x128xf32>
    %29 = arith.mulf %27, %27 : vector<32x128xf32>
    %cst_32 = arith.constant dense<0.000000e+00> : vector<1x128xf32>
    %30 = tpu.matmul %10, %29, %cst_32 {dimension_numbers = #tpu.dot_dimension_numbers<[1], [0], [0], [1], [0, 0, 1, 1], [], []>, precision = #tpu.contract_precision<fp32>} : vector<1x32xf32>, vector<32x128xf32>, vector<1x128xf32> -> vector<1x128xf32>
    %cst_33 = arith.constant dense<0.000000e+00> : vector<1x8xf32>
    %31 = tpu.matmul %28, %8, %cst_33 {dimension_numbers = #tpu.dot_dimension_numbers<[1], [0], [0], [1], [0, 0, 1, 1], [], []>, precision = #tpu.contract_precision<fp32>} : vector<1x128xf32>, vector<128x8xf32>, vector<1x8xf32> -> vector<1x8xf32>
    %cst_34 = arith.constant dense<0.000000e+00> : vector<1x8xf32>
    %32 = tpu.matmul %30, %8, %cst_34 {dimension_numbers = #tpu.dot_dimension_numbers<[1], [0], [0], [1], [0, 0, 1, 1], [], []>, precision = #tpu.contract_precision<fp32>} : vector<1x128xf32>, vector<128x8xf32>, vector<1x8xf32> -> vector<1x8xf32>
    %cst_35 = arith.constant 0.001953125 : f32
    %33 = vector.broadcast %cst_35 : f32 to vector<1x8xf32>
    %34 = arith.mulf %31, %33 : vector<1x8xf32>
    %cst_36 = arith.constant 0.001953125 : f32
    %35 = vector.broadcast %cst_36 : f32 to vector<1x8xf32>
    %36 = arith.mulf %32, %35 : vector<1x8xf32>
    %37 = arith.mulf %34, %34 : vector<1x8xf32>
    %38 = arith.subf %36, %37 : vector<1x8xf32>
    %cst_37 = arith.constant 9.99999974E-6 : f32
    %39 = vector.broadcast %cst_37 : f32 to vector<1x8xf32>
    %40 = arith.addf %38, %39 : vector<1x8xf32>
    %41 = math.rsqrt %40 : vector<1x8xf32>
    %42 = arith.mulf %2, %41 : vector<1x8xf32>
    %43 = arith.mulf %34, %42 : vector<1x8xf32>
    %44 = arith.subf %3, %43 : vector<1x8xf32>
    %45 = tpu.concatenate %42, %44 in 0 : vector<1x8xf32>, vector<1x8xf32> -> vector<2x8xf32>
    %cst_38 = arith.constant dense<0.000000e+00> : vector<2x128xf32>
    %46 = tpu.matmul %45, %0, %cst_38 {dimension_numbers = #tpu.dot_dimension_numbers<[1], [0], [0], [1], [0, 0, 1, 1], [], []>, precision = #tpu.contract_precision<fp32>} : vector<2x8xf32>, vector<8x128xf32>, vector<2x128xf32> -> vector<2x128xf32>
    %47 = vector.extract_strided_slice %46 {offsets = [0, 0], sizes = [1, 128], strides = [1, 1]} : vector<2x128xf32> to vector<1x128xf32>
    %48 = vector.extract_strided_slice %46 {offsets = [1, 0], sizes = [1, 128], strides = [1, 1]} : vector<2x128xf32> to vector<1x128xf32>
    %49 = vector.broadcast %47 : vector<1x128xf32> to vector<32x128xf32>
    %50 = arith.mulf %27, %49 : vector<32x128xf32>
    %51 = vector.broadcast %48 : vector<1x128xf32> to vector<32x128xf32>
    %52 = arith.addf %50, %51 : vector<32x128xf32>
    %cst_39 = arith.constant 0.000000e+00 : f32
    %53 = vector.broadcast %cst_39 : f32 to vector<32x128xf32>
    %54 = arith.maximumf %52, %53 : vector<32x128xf32>
    %cst_40 = arith.constant 0.000000e+00 : f32
    %55 = vector.broadcast %cst_40 : f32 to vector<2x18x128xf32>
    %c0_41 = arith.constant 0 : index
    %c0_42 = arith.constant 0 : index
    %c0_43 = arith.constant 0 : index
    %56 = vector.load %arg8[%c0_41, %c0_42, %c0_43] : memref<2x18x128xf32, #tpu.memory_space<vmem>>, vector<2x18x128xf32>
    tpu.vector_store %arg8[%c0_41, %c0_42, %c0_43], %55 {strides = array<i32>} : memref<2x18x128xf32, #tpu.memory_space<vmem>>, vector<2x18x128xf32>,
    %57 = vector.shape_cast %54 : vector<32x128xf32> to vector<2x16x128xf32>
    %c0_44 = arith.constant 0 : index
    %c1_45 = arith.constant 1 : index
    %c0_46 = arith.constant 0 : index
    %58 = vector.load %arg8[%c0_44, %c1_45, %c0_46] : memref<2x18x128xf32, #tpu.memory_space<vmem>>, vector<2x16x128xf32>
    tpu.vector_store %arg8[%c0_44, %c1_45, %c0_46], %57 {strides = array<i32>} : memref<2x18x128xf32, #tpu.memory_space<vmem>>, vector<2x16x128xf32>,
    %c0_47 = arith.constant 0 : index
    %c0_48 = arith.constant 0 : index
    %c0_49 = arith.constant 0 : index
    %59 = vector.load %arg8[%c0_47, %c0_48, %c0_49] : memref<2x18x128xf32, #tpu.memory_space<vmem>>, vector<2x16x128xf32>
    %60 = vector.shape_cast %59 : vector<2x16x128xf32> to vector<32x128xf32>
    %c0_50 = arith.constant 0 : index
    %c0_51 = arith.constant 0 : index
    %c0_52 = arith.constant 0 : index
    %61 = vector.load %arg3[%c0_50, %c0_51, %c0_52] : memref<3x128x128xf32, #tpu.memory_space<vmem>>, vector<1x128x128xf32>
    %62 = vector.shape_cast %61 : vector<1x128x128xf32> to vector<128x128xf32>
    %cst_53 = arith.constant dense<0.000000e+00> : vector<32x128xf32>
    %63 = tpu.matmul %60, %62, %cst_53 {dimension_numbers = #tpu.dot_dimension_numbers<[1], [0], [0], [1], [0, 0, 1, 1], [], []>, precision = #tpu.contract_precision<fp32>} : vector<32x128xf32>, vector<128x128xf32>, vector<32x128xf32> -> vector<32x128xf32>
    %c0_54 = arith.constant 0 : index
    %c1_55 = arith.constant 1 : index
    %c0_56 = arith.constant 0 : index
    %64 = vector.load %arg8[%c0_54, %c1_55, %c0_56] : memref<2x18x128xf32, #tpu.memory_space<vmem>>, vector<2x16x128xf32>
    %65 = vector.shape_cast %64 : vector<2x16x128xf32> to vector<32x128xf32>
    %c1_57 = arith.constant 1 : index
    %c0_58 = arith.constant 0 : index
    %c0_59 = arith.constant 0 : index
    %66 = vector.load %arg3[%c1_57, %c0_58, %c0_59] : memref<3x128x128xf32, #tpu.memory_space<vmem>>, vector<1x128x128xf32>
    %67 = vector.shape_cast %66 : vector<1x128x128xf32> to vector<128x128xf32>
    %cst_60 = arith.constant dense<0.000000e+00> : vector<32x128xf32>
    %68 = tpu.matmul %65, %67, %cst_60 {dimension_numbers = #tpu.dot_dimension_numbers<[1], [0], [0], [1], [0, 0, 1, 1], [], []>, precision = #tpu.contract_precision<fp32>} : vector<32x128xf32>, vector<128x128xf32>, vector<32x128xf32> -> vector<32x128xf32>
    %69 = arith.addf %63, %68 : vector<32x128xf32>
    %c0_61 = arith.constant 0 : index
    %c2_62 = arith.constant 2 : index
    %c0_63 = arith.constant 0 : index
    %70 = vector.load %arg8[%c0_61, %c2_62, %c0_63] : memref<2x18x128xf32, #tpu.memory_space<vmem>>, vector<2x16x128xf32>
    %71 = vector.shape_cast %70 : vector<2x16x128xf32> to vector<32x128xf32>
    %c2_64 = arith.constant 2 : index
    %c0_65 = arith.constant 0 : index
    %c0_66 = arith.constant 0 : index
    %72 = vector.load %arg3[%c2_64, %c0_65, %c0_66] : memref<3x128x128xf32, #tpu.memory_space<vmem>>, vector<1x128x128xf32>
    %73 = vector.shape_cast %72 : vector<1x128x128xf32> to vector<128x128xf32>
    %cst_67 = arith.constant dense<0.000000e+00> : vector<32x128xf32>
    %74 = tpu.matmul %71, %73, %cst_67 {dimension_numbers = #tpu.dot_dimension_numbers<[1], [0], [0], [1], [0, 0, 1, 1], [], []>, precision = #tpu.contract_precision<fp32>} : vector<32x128xf32>, vector<128x128xf32>, vector<32x128xf32> -> vector<32x128xf32>
    %75 = arith.addf %69, %74 : vector<32x128xf32>
    %cst_68 = arith.constant dense<0.000000e+00> : vector<1x128xf32>
    %76 = tpu.matmul %10, %75, %cst_68 {dimension_numbers = #tpu.dot_dimension_numbers<[1], [0], [0], [1], [0, 0, 1, 1], [], []>, precision = #tpu.contract_precision<fp32>} : vector<1x32xf32>, vector<32x128xf32>, vector<1x128xf32> -> vector<1x128xf32>
    %77 = arith.mulf %75, %75 : vector<32x128xf32>
    %cst_69 = arith.constant dense<0.000000e+00> : vector<1x128xf32>
    %78 = tpu.matmul %10, %77, %cst_69 {dimension_numbers = #tpu.dot_dimension_numbers<[1], [0], [0], [1], [0, 0, 1, 1], [], []>, precision = #tpu.contract_precision<fp32>} : vector<1x32xf32>, vector<32x128xf32>, vector<1x128xf32> -> vector<1x128xf32>
    %cst_70 = arith.constant dense<0.000000e+00> : vector<1x8xf32>
    %79 = tpu.matmul %76, %8, %cst_70 {dimension_numbers = #tpu.dot_dimension_numbers<[1], [0], [0], [1], [0, 0, 1, 1], [], []>, precision = #tpu.contract_precision<fp32>} : vector<1x128xf32>, vector<128x8xf32>, vector<1x8xf32> -> vector<1x8xf32>
    %cst_71 = arith.constant dense<0.000000e+00> : vector<1x8xf32>
    %80 = tpu.matmul %78, %8, %cst_71 {dimension_numbers = #tpu.dot_dimension_numbers<[1], [0], [0], [1], [0, 0, 1, 1], [], []>, precision = #tpu.contract_precision<fp32>} : vector<1x128xf32>, vector<128x8xf32>, vector<1x8xf32> -> vector<1x8xf32>
    %cst_72 = arith.constant 0.001953125 : f32
    %81 = vector.broadcast %cst_72 : f32 to vector<1x8xf32>
    %82 = arith.mulf %79, %81 : vector<1x8xf32>
    %cst_73 = arith.constant 0.001953125 : f32
    %83 = vector.broadcast %cst_73 : f32 to vector<1x8xf32>
    %84 = arith.mulf %80, %83 : vector<1x8xf32>
    %85 = arith.mulf %82, %82 : vector<1x8xf32>
    %86 = arith.subf %84, %85 : vector<1x8xf32>
    %cst_74 = arith.constant 9.99999974E-6 : f32
    %87 = vector.broadcast %cst_74 : f32 to vector<1x8xf32>
    %88 = arith.addf %86, %87 : vector<1x8xf32>
    %89 = math.rsqrt %88 : vector<1x8xf32>
    %90 = arith.mulf %4, %89 : vector<1x8xf32>
    %91 = arith.mulf %82, %90 : vector<1x8xf32>
    %92 = arith.subf %5, %91 : vector<1x8xf32>
    %93 = tpu.concatenate %90, %92 in 0 : vector<1x8xf32>, vector<1x8xf32> -> vector<2x8xf32>
    %cst_75 = arith.constant dense<0.000000e+00> : vector<2x128xf32>
    %94 = tpu.matmul %93, %0, %cst_75 {dimension_numbers = #tpu.dot_dimension_numbers<[1], [0], [0], [1], [0, 0, 1, 1], [], []>, precision = #tpu.contract_precision<fp32>} : vector<2x8xf32>, vector<8x128xf32>, vector<2x128xf32> -> vector<2x128xf32>
    %95 = vector.extract_strided_slice %94 {offsets = [0, 0], sizes = [1, 128], strides = [1, 1]} : vector<2x128xf32> to vector<1x128xf32>
    %96 = vector.extract_strided_slice %94 {offsets = [1, 0], sizes = [1, 128], strides = [1, 1]} : vector<2x128xf32> to vector<1x128xf32>
    %97 = vector.broadcast %95 : vector<1x128xf32> to vector<32x128xf32>
    %98 = arith.mulf %75, %97 : vector<32x128xf32>
    %99 = vector.broadcast %96 : vector<1x128xf32> to vector<32x128xf32>
    %100 = arith.addf %98, %99 : vector<32x128xf32>
    %cst_76 = arith.constant 0.000000e+00 : f32
    %101 = vector.broadcast %cst_76 : f32 to vector<32x128xf32>
    %102 = arith.maximumf %100, %101 : vector<32x128xf32>
    %103 = vector.shape_cast %102 : vector<32x128xf32> to vector<2x16x128xf32>
    %c0_77 = arith.constant 0 : index
    %c1_78 = arith.constant 1 : index
    %c0_79 = arith.constant 0 : index
    %104 = vector.load %arg8[%c0_77, %c1_78, %c0_79] : memref<2x18x128xf32, #tpu.memory_space<vmem>>, vector<2x16x128xf32>
    tpu.vector_store %arg8[%c0_77, %c1_78, %c0_79], %103 {strides = array<i32>} : memref<2x18x128xf32, #tpu.memory_space<vmem>>, vector<2x16x128xf32>,
    %c0_80 = arith.constant 0 : index
    %c2_81 = arith.constant 2 : index
    %c0_82 = arith.constant 0 : index
    %105 = vector.load %arg8[%c0_80, %c2_81, %c0_82] : memref<2x18x128xf32, #tpu.memory_space<vmem>>, vector<2x16x128xf32>
    %106 = vector.shape_cast %105 : vector<2x16x128xf32> to vector<32x128xf32>
    %c1_83 = arith.constant 1 : index
    %c0_84 = arith.constant 0 : index
    %c0_85 = arith.constant 0 : index
    %107 = vector.load %arg4[%c1_83, %c0_84, %c0_85] : memref<3x128x128xf32, #tpu.memory_space<vmem>>, vector<1x128x128xf32>
    %108 = vector.shape_cast %107 : vector<1x128x128xf32> to vector<128x128xf32>
    %cst_86 = arith.constant dense<0.000000e+00> : vector<32x128xf32>
    %109 = tpu.matmul %102, %108, %cst_86 {dimension_numbers = #tpu.dot_dimension_numbers<[1], [0], [0], [1], [0, 0, 1, 1], [], []>, precision = #tpu.contract_precision<fp32>} : vector<32x128xf32>, vector<128x128xf32>, vector<32x128xf32> -> vector<32x128xf32>
    %c2_87 = arith.constant 2 : index
    %c0_88 = arith.constant 0 : index
    %c0_89 = arith.constant 0 : index
    %110 = vector.load %arg4[%c2_87, %c0_88, %c0_89] : memref<3x128x128xf32, #tpu.memory_space<vmem>>, vector<1x128x128xf32>
    %111 = vector.shape_cast %110 : vector<1x128x128xf32> to vector<128x128xf32>
    %cst_90 = arith.constant dense<0.000000e+00> : vector<32x128xf32>
    %112 = tpu.matmul %102, %111, %cst_90 {dimension_numbers = #tpu.dot_dimension_numbers<[1], [0], [0], [1], [0, 0, 1, 1], [], []>, precision = #tpu.contract_precision<fp32>} : vector<32x128xf32>, vector<128x128xf32>, vector<32x128xf32> -> vector<32x128xf32>
    %c0_91 = arith.constant 0 : index
    %c0_92 = arith.constant 0 : index
    %c0_93 = arith.constant 0 : index
    %113 = vector.load %arg4[%c0_91, %c0_92, %c0_93] : memref<3x128x128xf32, #tpu.memory_space<vmem>>, vector<1x128x128xf32>
    %114 = vector.shape_cast %113 : vector<1x128x128xf32> to vector<128x128xf32>
    %cst_94 = arith.constant dense<0.000000e+00> : vector<32x128xf32>
    %115 = tpu.matmul %106, %114, %cst_94 {dimension_numbers = #tpu.dot_dimension_numbers<[1], [0], [0], [1], [0, 0, 1, 1], [], []>, precision = #tpu.contract_precision<fp32>} : vector<32x128xf32>, vector<128x128xf32>, vector<32x128xf32> -> vector<32x128xf32>
    %116 = arith.addf %112, %115 : vector<32x128xf32>
    %117 = arith.addf %109, %116 : vector<32x128xf32>
    %cst_95 = arith.constant dense<0.000000e+00> : vector<1x128xf32>
    %118 = tpu.matmul %10, %117, %cst_95 {dimension_numbers = #tpu.dot_dimension_numbers<[1], [0], [0], [1], [0, 0, 1, 1], [], []>, precision = #tpu.contract_precision<fp32>} : vector<1x32xf32>, vector<32x128xf32>, vector<1x128xf32> -> vector<1x128xf32>
    %119 = arith.mulf %109, %109 : vector<32x128xf32>
    %120 = arith.mulf %116, %116 : vector<32x128xf32>
    %121 = arith.addf %119, %120 : vector<32x128xf32>
    %cst_96 = arith.constant dense<0.000000e+00> : vector<1x128xf32>
    %122 = tpu.matmul %10, %121, %cst_96 {dimension_numbers = #tpu.dot_dimension_numbers<[1], [0], [0], [1], [0, 0, 1, 1], [], []>, precision = #tpu.contract_precision<fp32>} : vector<1x32xf32>, vector<32x128xf32>, vector<1x128xf32> -> vector<1x128xf32>
    %cst_97 = arith.constant dense<0.000000e+00> : vector<1x4xf32>
    %123 = tpu.matmul %118, %9, %cst_97 {dimension_numbers = #tpu.dot_dimension_numbers<[1], [0], [0], [1], [0, 0, 1, 1], [], []>, precision = #tpu.contract_precision<fp32>} : vector<1x128xf32>, vector<128x4xf32>, vector<1x4xf32> -> vector<1x4xf32>
    %cst_98 = arith.constant dense<0.000000e+00> : vector<1x4xf32>
    %124 = tpu.matmul %122, %9, %cst_98 {dimension_numbers = #tpu.dot_dimension_numbers<[1], [0], [0], [1], [0, 0, 1, 1], [], []>, precision = #tpu.contract_precision<fp32>} : vector<1x128xf32>, vector<128x4xf32>, vector<1x4xf32> -> vector<1x4xf32>
    %cst_99 = arith.constant 4.8828125E-4 : f32
    %125 = vector.broadcast %cst_99 : f32 to vector<1x4xf32>
    %126 = arith.mulf %123, %125 : vector<1x4xf32>
    %cst_100 = arith.constant 4.8828125E-4 : f32
    %127 = vector.broadcast %cst_100 : f32 to vector<1x4xf32>
    %128 = arith.mulf %124, %127 : vector<1x4xf32>
    %129 = arith.mulf %126, %126 : vector<1x4xf32>
    %130 = arith.subf %128, %129 : vector<1x4xf32>
    %cst_101 = arith.constant 9.99999974E-6 : f32
    %131 = vector.broadcast %cst_101 : f32 to vector<1x4xf32>
    %132 = arith.addf %130, %131 : vector<1x4xf32>
    %133 = math.rsqrt %132 : vector<1x4xf32>
    %134 = arith.mulf %6, %133 : vector<1x4xf32>
    %135 = arith.mulf %126, %134 : vector<1x4xf32>
    %136 = arith.subf %7, %135 : vector<1x4xf32>
    %137 = tpu.concatenate %134, %136 in 0 : vector<1x4xf32>, vector<1x4xf32> -> vector<2x4xf32>
    %cst_102 = arith.constant dense<0.000000e+00> : vector<2x128xf32>
    %138 = tpu.matmul %137, %1, %cst_102 {dimension_numbers = #tpu.dot_dimension_numbers<[1], [0], [0], [1], [0, 0, 1, 1], [], []>, precision = #tpu.contract_precision<fp32>} : vector<2x4xf32>, vector<4x128xf32>, vector<2x128xf32> -> vector<2x128xf32>
    %139 = vector.extract_strided_slice %138 {offsets = [0, 0], sizes = [1, 128], strides = [1, 1]} : vector<2x128xf32> to vector<1x128xf32>
    %140 = vector.extract_strided_slice %138 {offsets = [1, 0], sizes = [1, 128], strides = [1, 1]} : vector<2x128xf32> to vector<1x128xf32>
    %141 = vector.broadcast %139 : vector<1x128xf32> to vector<32x128xf32>
    %142 = arith.mulf %109, %141 : vector<32x128xf32>
    %143 = vector.broadcast %140 : vector<1x128xf32> to vector<32x128xf32>
    %144 = arith.addf %142, %143 : vector<32x128xf32>
    %cst_103 = arith.constant 0.000000e+00 : f32
    %145 = vector.broadcast %cst_103 : f32 to vector<32x128xf32>
    %146 = arith.maximumf %144, %145 : vector<32x128xf32>
    %c0_104 = arith.constant 0 : index
    %c0_105 = arith.constant 0 : index
    %c0_106 = arith.constant 0 : index
    %147 = vector.load %arg7[%c0_104, %c0_105, %c0_106] : memref<2x32x128xf32, #tpu.memory_space<vmem>>, vector<1x32x128xf32>
    %148 = vector.shape_cast %147 : vector<1x32x128xf32> to vector<32x128xf32>
    %149 = vector.shape_cast %146 : vector<32x128xf32> to vector<1x32x128xf32>
    tpu.vector_store %arg7[%c0_104, %c0_105, %c0_106], %149 {strides = array<i32>} : memref<2x32x128xf32, #tpu.memory_space<vmem>>, vector<1x32x128xf32>,
    %150 = vector.broadcast %139 : vector<1x128xf32> to vector<32x128xf32>
    %151 = arith.mulf %116, %150 : vector<32x128xf32>
    %152 = vector.broadcast %140 : vector<1x128xf32> to vector<32x128xf32>
    %153 = arith.addf %151, %152 : vector<32x128xf32>
    %cst_107 = arith.constant 0.000000e+00 : f32
    %154 = vector.broadcast %cst_107 : f32 to vector<32x128xf32>
    %155 = arith.maximumf %153, %154 : vector<32x128xf32>
    %c1_108 = arith.constant 1 : index
    %c0_109 = arith.constant 0 : index
    %c0_110 = arith.constant 0 : index
    %156 = vector.load %arg7[%c1_108, %c0_109, %c0_110] : memref<2x32x128xf32, #tpu.memory_space<vmem>>, vector<1x32x128xf32>
    %157 = vector.shape_cast %156 : vector<1x32x128xf32> to vector<32x128xf32>
    %158 = vector.shape_cast %155 : vector<32x128xf32> to vector<1x32x128xf32>
    tpu.vector_store %arg7[%c1_108, %c0_109, %c0_110], %158 {strides = array<i32>} : memref<2x32x128xf32, #tpu.memory_space<vmem>>, vector<1x32x128xf32>,
    return
  }
  func.func @transform_0(%arg0: i32) -> (i32, i32, i32) {
    %c0_i32 = arith.constant 0 : i32
    %c0_i32_0 = arith.constant 0 : i32
    %c0_i32_1 = arith.constant 0 : i32
    %c0_i32_2 = arith.constant 0 : i32
    return %c0_i32, %c0_i32_0, %c0_i32_1 : i32, i32, i32
  }
  func.func @transform_1(%arg0: i32) -> (i32, i32, i32) {
    %c0_i32 = arith.constant 0 : i32
    %c0_i32_0 = arith.constant 0 : i32
    %c0_i32_1 = arith.constant 0 : i32
    %c0_i32_2 = arith.constant 0 : i32
    return %c0_i32, %c0_i32_0, %c0_i32_1 : i32, i32, i32
  }
  func.func @transform_2(%arg0: i32) -> (i32, i32, i32) {
    %c0_i32 = arith.constant 0 : i32
    %c0_i32_0 = arith.constant 0 : i32
    %c0_i32_1 = arith.constant 0 : i32
    %c0_i32_2 = arith.constant 0 : i32
    return %c0_i32, %c0_i32_0, %c0_i32_1 : i32, i32, i32
  }
  func.func @transform_3(%arg0: i32) -> (i32, i32, i32) {
    %c0_i32 = arith.constant 0 : i32
    %c0_i32_0 = arith.constant 0 : i32
    %c0_i32_1 = arith.constant 0 : i32
    %c0_i32_2 = arith.constant 0 : i32
    return %c0_i32, %c0_i32_0, %c0_i32_1 : i32, i32, i32
  }
  func.func @transform_4(%arg0: i32) -> (i32, i32) {
    %c0_i32 = arith.constant 0 : i32
    %c0_i32_0 = arith.constant 0 : i32
    %c0_i32_1 = arith.constant 0 : i32
    return %c0_i32, %c0_i32_0 : i32, i32
  }
  func.func @transform_5(%arg0: i32) -> (i32, i32) {
    %c0_i32 = arith.constant 0 : i32
    %c0_i32_0 = arith.constant 0 : i32
    %c0_i32_1 = arith.constant 0 : i32
    return %c0_i32, %c0_i32_0 : i32, i32
  }
  func.func @transform_6(%arg0: i32) -> (i32, i32, i32) {
    %c0_i32 = arith.constant 0 : i32
    %c0_i32_0 = arith.constant 0 : i32
    %c0_i32_1 = arith.constant 0 : i32
    %c0_i32_2 = arith.constant 0 : i32
    return %c0_i32, %c0_i32_0, %c0_i32_1 : i32, i32, i32
  }
}

</mosaic_0001>

<bundles_post_ra>
// kernel: tile.14
= control target key start
LH: loop header
LB: loop body
LE: loop exit
PB: predicated region body
PF: predicated region fallthrough
CT: control target
= control target key end

     0   :  { %vm6_vm0 = vcmask 1043458   ;;  %vm10_vm1 = vcmask 1045508   ;;  %vm14_vm2 = vcmask 1047558   ;;  %s19_s6 = smov 3  ;;  %s22_s7 = smov 12  ;;  %vm16_vm3 = vcmask 64512   ;;  %s736_s0 = inlined_call_operand.vmem [shape: f32[16,8,8], index: 0, kind: input, shape index: {}]   ;;  %s737_s1 = inlined_call_operand.vmem [shape: f32[128,8], index: 1, kind: output, shape index: {}]  }
   0x1   :  { %v348_v0 = vld [vmem:[%s736_s0 + $0xf] ss:$16 sm:%s19_s6]   ;;  %s27_s12 = smov 48  ;;  %s32_s13 = smov 192  ;;  %vm38_vm4 = vcmask 1048512   ;;  %vm60_vm5 = vcmask 982912  }
   0x2   :  { %v349_v1 = vld [vmem:[%s736_s0 + $0xf] ss:$16 sm:%s22_s7]   ;;  %s63_s18 = smov 3  ;;  %s66_s21 = smov 12  ;;  %vm82_vm6 = vcmask 917312   ;;  %vm104_vm7 = vcmask 851712  }
   0x3   :  { %v25_v2 = vsel %vm6_vm0, %v349_v1, %v348_v0  ;;  %v350_v3 = vld [vmem:[%s736_s0 + $0xf] ss:$16 sm:%s27_s12]   ;;  %v356_v6 = vld [vmem:[%s736_s0 + $0xd] ss:$16 sm:%s63_s18]   ;;  %s71_s22 = smov 48  ;;  %s76_s27 = smov 192 }
   0x4   :  { %v351_v4 = vld [vmem:[%s736_s0 + $0xf] ss:$16 sm:%s32_s13]   ;;  %v30_v5 = vsel %vm10_vm1, %v350_v3, %v25_v2  ;;  %v357_v8 = vld [vmem:[%s736_s0 + $0xd] ss:$16 sm:%s66_s21]   ;;  %s423_s28 = smov 120   ;;  %s41_s2 = smov 3 }
   0x5   :  { %v35_v7 = vsel %vm14_vm2, %v351_v4, %v30_v5  ;;  %v358_v9 = vld [vmem:[%s736_s0 + $0xd] ss:$16 sm:%s71_s22]   ;;  %v69_v10 = vsel %vm6_vm0, %v357_v8, %v356_v6  ;;  %s44_s3 = smov 12  ;;  %v352_v13 = vld [vmem:[%s736_s0 + $0xe] ss:$16 sm:%s41_s2]   ;;  %s49_s8 = smov 48 }
   0x6   :  { %36 = vrot.lane.b32.xlu0 %v35_v7, %s423_s28  ;;  %v359_v11 = vld [vmem:[%s736_s0 + $0xd] ss:$16 sm:%s76_s27]   ;;  %v74_v12 = vsel %vm10_vm1, %v358_v9, %v69_v10  ;;  %s54_s9 = smov 192  ;;  %s85_s14 = smov 3  ;;  %vm126_vm8 = vcmask 786112   ;;  %vm148_vm9 = vcmask 720512  }
   0x7   :  { %v353_v14 = vld [vmem:[%s736_s0 + $0xe] ss:$16 sm:%s44_s3]   ;;  %v79_v15 = vsel %vm14_vm2, %v359_v11, %v74_v12  ;;  %s424_s15 = smov 104   ;;  %v360_v20 = vld [vmem:[%s736_s0 + $0xc] ss:$16 sm:%s85_s14]   ;;  %s88_s18 = smov 12 }
   0x8   :  { %v47_v16 = vsel %vm6_vm0, %v353_v14, %v352_v13  ;;  %v354_v17 = vld [vmem:[%s736_s0 + $0xe] ss:$16 sm:%s49_s8]   ;;  %80 = vrot.lane.b32.xlu1 %v79_v15, %s424_s15  ;;  %s93_s19 = smov 48  ;;  %s98_s24 = smov 192  ;;  %vm170_vm10 = vcmask 654912   ;;  %vm192_vm11 = vcmask 589312  }
   0x9   :  { %v355_v18 = vld [vmem:[%s736_s0 + $0xe] ss:$16 sm:%s54_s9]   ;;  %v52_v19 = vsel %vm10_vm1, %v354_v17, %v47_v16  ;;  %v361_v22 = vld [vmem:[%s736_s0 + $0xc] ss:$16 sm:%s88_s18]   ;;  %s425_s25 = smov 112   ;;  %s107_s28 = smov 3 }
   0xa   :  { %v57_v21 = vsel %vm14_vm2, %v355_v18, %v52_v19  ;;  %v362_v23 = vld [vmem:[%s736_s0 + $0xc] ss:$16 sm:%s93_s19]   ;;  %v91_v24 = vsel %vm6_vm0, %v361_v22, %v360_v20  ;;  %s110_s29 = smov 12  ;;  %v364_v27 = vld [vmem:[%s736_s0 + $0xb] ss:$16 sm:%s107_s28]   ;;  %s115_s5 = smov 48 }
   0xb   :  { %58 = vrot.lane.b32.xlu0 %v57_v21, %s425_s25  ;;  %v363_v25 = vld [vmem:[%s736_s0 + $0xc] ss:$16 sm:%s98_s24]   ;;  %v96_v26 = vsel %vm10_vm1, %v362_v23, %v91_v24  ;;  %s120_s6 = smov 192  ;;  %s129_s11 = smov 3  ;;  %vm214_vm12 = vcmask 523712   ;;  %vm236_vm13 = vcmask 458112  }
   0xc   :  { %v365_v28 = vld [vmem:[%s736_s0 + $0xb] ss:$16 sm:%s110_s29]   ;;  %v101_v29 = vsel %vm14_vm2, %v363_v25, %v96_v26  ;;  %s426_s12 = smov 96   ;;  %v368_v34 = vld [vmem:[%s736_s0 + $0xa] ss:$16 sm:%s129_s11]   ;;  %s132_s15 = smov 12 }
   0xd   :  { %v113_v30 = vsel %vm6_vm0, %v365_v28, %v364_v27  ;;  %v366_v31 = vld [vmem:[%s736_s0 + $0xb] ss:$16 sm:%s115_s5]   ;;  %102 = vrot.lane.b32.xlu1 %v101_v29, %s426_s12  ;;  %s137_s16 = smov 48  ;;  %s142_s21 = smov 192  ;;  %vm258_vm14 = vcmask 392512   ;;  %vm280_vm15 = vcmask 326912  }
   0xe   :  { %v367_v32 = vld [vmem:[%s736_s0 + $0xb] ss:$16 sm:%s120_s6]   ;;  %v118_v33 = vsel %vm10_vm1, %v366_v31, %v113_v30  ;;  %v369_v36 = vld [vmem:[%s736_s0 + $0xa] ss:$16 sm:%s132_s15]   ;;  %s427_s22 = smov 88   ;;  %s151_s25 = smov 3 }
   0xf   :  { %v123_v35 = vsel %vm14_vm2, %v367_v32, %v118_v33  ;;  %v370_v37 = vld [vmem:[%s736_s0 + $0xa] ss:$16 sm:%s137_s16]   ;;  %v135_v38 = vsel %vm6_vm0, %v369_v36, %v368_v34  ;;  %s154_s26 = smov 12  ;;  %v372_v41 = vld [vmem:[%s736_s0 + $0x9] ss:$16 sm:%s151_s25]   ;;  %s159_s2 = smov 48 }
  0x10   :  { %124 = vrot.lane.b32.xlu0 %v123_v35, %s427_s22  ;;  %v371_v39 = vld [vmem:[%s736_s0 + $0xa] ss:$16 sm:%s142_s21]   ;;  %v140_v40 = vsel %vm10_vm1, %v370_v37, %v135_v38  ;;  %s164_s3 = smov 192  ;;  %s173_s8 = smov 3 }
  0x11   :  { %v373_v42 = vld [vmem:[%s736_s0 + $0x9] ss:$16 sm:%s154_s26]   ;;  %v145_v43 = vsel %vm14_vm2, %v371_v39, %v140_v40  ;;  %s428_s9 = smov 80   ;;  %v376_v48 = vld [vmem:[%s736_s0 + $0x8] ss:$16 sm:%s173_s8]   ;;  %s176_s12 = smov 12 }
  0x12   :  { %v157_v44 = vsel %vm6_vm0, %v373_v42, %v372_v41  ;;  %v374_v45 = vld [vmem:[%s736_s0 + $0x9] ss:$16 sm:%s159_s2]   ;;  %146 = vrot.lane.b32.xlu1 %v145_v43, %s428_s9  ;;  %s181_s13 = smov 48  ;;  %s186_s18 = smov 192 }
  0x13   :  { %v375_v46 = vld [vmem:[%s736_s0 + $0x9] ss:$16 sm:%s164_s3]   ;;  %v162_v47 = vsel %vm10_vm1, %v374_v45, %v157_v44  ;;  %v377_v50 = vld [vmem:[%s736_s0 + $0x8] ss:$16 sm:%s176_s12]   ;;  %s429_s19 = smov 72   ;;  %s195_s22 = smov 3 }
  0x14   :  { %v167_v49 = vsel %vm14_vm2, %v375_v46, %v162_v47  ;;  %v378_v51 = vld [vmem:[%s736_s0 + $0x8] ss:$16 sm:%s181_s13]   ;;  %v179_v52 = vsel %vm6_vm0, %v377_v50, %v376_v48  ;;  %s198_s23 = smov 12  ;;  %v380_v55 = vld [vmem:[%s736_s0 + $0x7] ss:$16 sm:%s195_s22]   ;;  %s203_s28 = smov 48 }
  0x15   :  { %168 = vrot.lane.b32.xlu0 %v167_v49, %s429_s19  ;;  %v379_v53 = vld [vmem:[%s736_s0 + $0x8] ss:$16 sm:%s186_s18]   ;;  %v184_v54 = vsel %vm10_vm1, %v378_v51, %v179_v52  ;;  %s208_s29 = smov 192  ;;  %s217_s5 = smov 3 }
  0x16   :  { %v381_v56 = vld [vmem:[%s736_s0 + $0x7] ss:$16 sm:%s198_s23]   ;;  %v189_v57 = vsel %vm14_vm2, %v379_v53, %v184_v54  ;;  %s430_s6 = smov 64   ;;  %v384_v62 = vld [vmem:[%s736_s0 + $0x6] ss:$16 sm:%s217_s5]   ;;  %s220_s9 = smov 12 }
  0x17   :  { %v201_v58 = vsel %vm6_vm0, %v381_v56, %v380_v55  ;;  %v382_v59 = vld [vmem:[%s736_s0 + $0x7] ss:$16 sm:%s203_s28]   ;;  %190 = vrot.lane.b32.xlu1 %v189_v57, %s430_s6  ;;  %s225_s10 = smov 48  ;;  %s230_s15 = smov 192 }
  0x18   :  { %v383_v60 = vld [vmem:[%s736_s0 + $0x7] ss:$16 sm:%s208_s29]   ;;  %v206_v61 = vsel %vm10_vm1, %v382_v59, %v201_v58  ;;  %v385_v0 = vld [vmem:[%s736_s0 + $0x6] ss:$16 sm:%s220_s9]   ;;  %s431_s16 = smov 56   ;;  %s239_s19 = smov 3 }
  0x19   :  { %v211_v63 = vsel %vm14_vm2, %v383_v60, %v206_v61  ;;  %v386_v1 = vld [vmem:[%s736_s0 + $0x6] ss:$16 sm:%s225_s10]   ;;  %v223_v2 = vsel %vm6_vm0, %v385_v0, %v384_v62  ;;  %s242_s20 = smov 12  ;;  %v388_v5 = vld [vmem:[%s736_s0 + $0x5] ss:$16 sm:%s239_s19]   ;;  %s247_s25 = smov 48 }
  0x1a   :  { %212 = vrot.lane.b32.xlu0 %v211_v63, %s431_s16  ;;  %v387_v3 = vld [vmem:[%s736_s0 + $0x6] ss:$16 sm:%s230_s15]   ;;  %v228_v4 = vsel %vm10_vm1, %v386_v1, %v223_v2  ;;  %s252_s26 = smov 192  ;;  %s261_s2 = smov 3 }
  0x1b   :  { %v389_v6 = vld [vmem:[%s736_s0 + $0x5] ss:$16 sm:%s242_s20]   ;;  %v233_v7 = vsel %vm14_vm2, %v387_v3, %v228_v4  ;;  %s432_s3 = smov 48   ;;  %v392_v12 = vld [vmem:[%s736_s0 + $0x4] ss:$16 sm:%s261_s2]   ;;  %s264_s6 = smov 12 }
  0x1c   :  { %v245_v8 = vsel %vm6_vm0, %v389_v6, %v388_v5  ;;  %v390_v9 = vld [vmem:[%s736_s0 + $0x5] ss:$16 sm:%s247_s25]   ;;  %234 = vrot.lane.b32.xlu1 %v233_v7, %s432_s3  ;;  %s269_s7 = smov 48  ;;  %s274_s12 = smov 192 }
  0x1d   :  { %v391_v10 = vld [vmem:[%s736_s0 + $0x5] ss:$16 sm:%s252_s26]   ;;  %v250_v11 = vsel %vm10_vm1, %v390_v9, %v245_v8  ;;  %v393_v14 = vld [vmem:[%s736_s0 + $0x4] ss:$16 sm:%s264_s6]   ;;  %s433_s13 = smov 40   ;;  %s283_s16 = smov 3 }
  0x1e   :  { %v255_v13 = vsel %vm14_vm2, %v391_v10, %v250_v11  ;;  %v394_v15 = vld [vmem:[%s736_s0 + $0x4] ss:$16 sm:%s269_s7]   ;;  %v267_v16 = vsel %vm6_vm0, %v393_v14, %v392_v12  ;;  %s286_s17 = smov 12  ;;  %v396_v19 = vld [vmem:[%s736_s0 + $0x3] ss:$16 sm:%s283_s16]   ;;  %s291_s22 = smov 48 }
  0x1f   :  { %256 = vrot.lane.b32.xlu0 %v255_v13, %s433_s13  ;;  %v395_v17 = vld [vmem:[%s736_s0 + $0x4] ss:$16 sm:%s274_s12]   ;;  %v272_v18 = vsel %vm10_vm1, %v394_v15, %v267_v16  ;;  %s296_s23 = smov 192  ;;  %s305_s28 = smov 3 }
  0x20   :  { %v397_v20 = vld [vmem:[%s736_s0 + $0x3] ss:$16 sm:%s286_s17]   ;;  %v277_v21 = vsel %vm14_vm2, %v395_v17, %v272_v18  ;;  %s434_s29 = smov 32   ;;  %v400_v26 = vld [vmem:[%s736_s0 + $0x2] ss:$16 sm:%s305_s28]   ;;  %s308_s3 = smov 12 }
  0x21   :  { %v289_v22 = vsel %vm6_vm0, %v397_v20, %v396_v19  ;;  %v398_v23 = vld [vmem:[%s736_s0 + $0x3] ss:$16 sm:%s291_s22]   ;;  %278 = vrot.lane.b32.xlu1 %v277_v21, %s434_s29  ;;  %s313_s4 = smov 48  ;;  %s318_s9 = smov 192 }
  0x22   :  { %v399_v24 = vld [vmem:[%s736_s0 + $0x3] ss:$16 sm:%s296_s23]   ;;  %v294_v25 = vsel %vm10_vm1, %v398_v23, %v289_v22  ;;  %v401_v28 = vld [vmem:[%s736_s0 + $0x2] ss:$16 sm:%s308_s3]   ;;  %s435_s10 = smov 24   ;;  %s327_s13 = smov 3 }
  0x23   :  { %v299_v27 = vsel %vm14_vm2, %v399_v24, %v294_v25  ;;  %v402_v29 = vld [vmem:[%s736_s0 + $0x2] ss:$16 sm:%s313_s4]   ;;  %v311_v30 = vsel %vm6_vm0, %v401_v28, %v400_v26  ;;  %s330_s14 = smov 12  ;;  %v404_v33 = vld [vmem:[%s736_s0 + $0x1] ss:$16 sm:%s327_s13]   ;;  %s335_s19 = smov 48 }
  0x24   :  { %300 = vrot.lane.b32.xlu0 %v299_v27, %s435_s10  ;;  %v403_v31 = vld [vmem:[%s736_s0 + $0x2] ss:$16 sm:%s318_s9]   ;;  %v316_v32 = vsel %vm10_vm1, %v402_v29, %v311_v30  ;;  %s340_s20 = smov 192  ;;  %s2_s25 = smov 3 }
  0x25   :  { %v405_v34 = vld [vmem:[%s736_s0 + $0x1] ss:$16 sm:%s330_s14]   ;;  %v321_v35 = vsel %vm14_vm2, %v403_v31, %v316_v32  ;;  %s436_s26 = smov 16   ;;  %s4_s27 = smov 12  ;;  %v3_v40 = vld [vmem:[%s736_s0] ss:$16 sm:%s2_s25]  }
  0x26   :  { %v333_v36 = vsel %vm6_vm0, %v405_v34, %v404_v33  ;;  %v406_v37 = vld [vmem:[%s736_s0 + $0x1] ss:$16 sm:%s335_s19]   ;;  %322 = vrot.lane.b32.xlu1 %v321_v35, %s436_s26  ;;  %s8_s28 = smov 48  ;;  %s12_s2 = smov 192 }
  0x27   :  { %v407_v38 = vld [vmem:[%s736_s0 + $0x1] ss:$16 sm:%s340_s20]   ;;  %v338_v39 = vsel %vm10_vm1, %v406_v37, %v333_v36  ;;  %v5_v42 = vld [vmem:[%s736_s0] ss:$16 sm:%s4_s27]   ;;  %s437_s7 = smov 8  }
  0x28   :  { %v343_v41 = vsel %vm14_vm2, %v407_v38, %v338_v39  ;;  %v9_v43 = vld [vmem:[%s736_s0] ss:$16 sm:%s8_s28]   ;;  %v7_v44 = vsel %vm6_vm0, %v5_v42, %v3_v40  ;;  %vm302_vm0 = vcmask 261312  }
  0x29   :  { %344 = vrot.lane.b32.xlu0 %v343_v41, %s437_s7  ;;  %v13_v45 = vld [vmem:[%s736_s0] ss:$16 sm:%s12_s2]   ;;  %v11_v46 = vsel %vm10_vm1, %v9_v43, %v7_v44  ;;  %vm324_vm1 = vcmask 195712  }
  0x2a   :  { %v15_v47 = vsel %vm14_vm2, %v13_v45, %v11_v46  ;;  %vm346_vm2 = vcmask 130112  }
  0x2b   :  { %17 = vst.msk [vmem:[%s737_s1] sm:$0xff] %vm16_vm3, %v15_v47  }
  0x78   :  { %v37_v48 = vpop.permute.xlu0 %36  }
  0x79   :  { %39 = vst.msk [vmem:[%s737_s1] sm:$0xff] %vm38_vm4, %v37_v48  }
  0x7a   :  { %v81_v49 = vpop.permute.xlu1 %80  }
  0x7d   :  { %v59_v50 = vpop.permute.xlu0 %58  }
  0x7e   :  { %61 = vst.msk [vmem:[%s737_s1] sm:$0xff] %vm60_vm5, %v59_v50  }
  0x7f   :  { %83 = vst.msk [vmem:[%s737_s1] sm:$0xff] %vm82_vm6, %v81_v49   ;;  %v103_v51 = vpop.permute.xlu1 %102  }
  0x80   :  { %105 = vst.msk [vmem:[%s737_s1] sm:$0xff] %vm104_vm7, %v103_v51  }
  0x82   :  { %v125_v52 = vpop.permute.xlu0 %124  }
  0x83   :  { %127 = vst.msk [vmem:[%s737_s1] sm:$0xff] %vm126_vm8, %v125_v52  }
  0x84   :  { %v147_v53 = vpop.permute.xlu1 %146  }
  0x85   :  { %149 = vst.msk [vmem:[%s737_s1] sm:$0xff] %vm148_vm9, %v147_v53  }
  0x87   :  { %v169_v54 = vpop.permute.xlu0 %168  }
  0x88   :  { %171 = vst.msk [vmem:[%s737_s1] sm:$0xff] %vm170_vm10, %v169_v54  }
  0x89   :  { %v191_v55 = vpop.permute.xlu1 %190  }
  0x8a   :  { %193 = vst.msk [vmem:[%s737_s1] sm:$0xff] %vm192_vm11, %v191_v55  }
  0x8c   :  { %v213_v56 = vpop.permute.xlu0 %212  }
  0x8d   :  { %215 = vst.msk [vmem:[%s737_s1] sm:$0xff] %vm214_vm12, %v213_v56  }
  0x8e   :  { %v235_v57 = vpop.permute.xlu1 %234  }
  0x8f   :  { %237 = vst.msk [vmem:[%s737_s1] sm:$0xff] %vm236_vm13, %v235_v57  }
  0x91   :  { %v257_v58 = vpop.permute.xlu0 %256  }
  0x92   :  { %259 = vst.msk [vmem:[%s737_s1] sm:$0xff] %vm258_vm14, %v257_v58  }
  0x93   :  { %v279_v59 = vpop.permute.xlu1 %278  }
  0x94   :  { %281 = vst.msk [vmem:[%s737_s1] sm:$0xff] %vm280_vm15, %v279_v59  }
  0x96   :  { %v301_v60 = vpop.permute.xlu0 %300  }
  0x97   :  { %303 = vst.msk [vmem:[%s737_s1] sm:$0xff] %vm302_vm0, %v301_v60  }
  0x98   :  { %v323_v61 = vpop.permute.xlu1 %322  }
  0x99   :  { %325 = vst.msk [vmem:[%s737_s1] sm:$0xff] %vm324_vm1, %v323_v61  }
  0x9b   :  { %v345_v62 = vpop.permute.xlu0 %344  }
  0x9c   :  { %347 = vst.msk [vmem:[%s737_s1] sm:$0xff] %vm346_vm2, %v345_v62  }

// kernel: tile.19
= control target key start
LH: loop header
LB: loop body
LE: loop exit
PB: predicated region body
PF: predicated region fallthrough
CT: control target
= control target key end

     0   :  { %vm5_vm0 = vcmask 1041409   ;;  %vm9_vm1 = vcmask 1042434   ;;  %vm13_vm2 = vcmask 1043459   ;;  %s741_s30 = smov 124   ;;  %s742_s8 = smov 116   ;;  %vm15_vm3 = vcmask 31744   ;;  %s1266_s0 = inlined_call_operand.vmem [shape: f32[32,4,4], index: 0, kind: input, shape index: {}]   ;;  %s1267_s1 = inlined_call_operand.vmem [shape: f32[128,4], index: 1, kind: output, shape index: {}]  }
   0x1   :  { %v586_v0 = vld [vmem:[%s1266_s0 + $0x1f] sm:$0x1]   ;;  %v594_v5 = vld [vmem:[%s1266_s0 + $0x1d] sm:$0x1]   ;;  %v590_v11 = vld [vmem:[%s1266_s0 + $0x1e] sm:$0x1]  }
   0x2   :  { %v587_v1 = vld [vmem:[%s1266_s0 + $0x3e] sm:$0x2]   ;;  %v595_v6 = vld [vmem:[%s1266_s0 + $0x3c] sm:$0x2]   ;;  %v591_v14 = vld [vmem:[%s1266_s0 + $0x3d] sm:$0x2]  }
   0x3   :  { %v588_v2 = vld [vmem:[%s1266_s0 + $0x5d] sm:$0x4]   ;;  %v22_v4 = vsel %vm5_vm0, %v587_v1, %v586_v0  ;;  %v596_v7 = vld [vmem:[%s1266_s0 + $0x5b] sm:$0x4]   ;;  %v58_v9 = vsel %vm5_vm0, %v595_v6, %v594_v5  ;;  %v592_v15 = vld [vmem:[%s1266_s0 + $0x5c] sm:$0x4]   ;;  %v40_v18 = vsel %vm5_vm0, %v591_v14, %v590_v11 }
   0x4   :  { %v589_v3 = vld [vmem:[%s1266_s0 + $0x7c] sm:$0x8]   ;;  %v26_v8 = vsel %vm9_vm1, %v588_v2, %v22_v4  ;;  %v597_v10 = vld [vmem:[%s1266_s0 + $0x7a] sm:$0x8]   ;;  %v62_v13 = vsel %vm9_vm1, %v596_v7, %v58_v9  ;;  %v593_v16 = vld [vmem:[%s1266_s0 + $0x7b] sm:$0x8]   ;;  %v44_v22 = vsel %vm9_vm1, %v592_v15, %v40_v18 }
   0x5   :  { %v30_v12 = vsel %vm13_vm2, %v589_v3, %v26_v8  ;;  %v66_v17 = vsel %vm13_vm2, %v597_v10, %v62_v13  ;;  %v598_v19 = vld [vmem:[%s1266_s0 + $0x1c] sm:$0x1]   ;;  %v602_v25 = vld [vmem:[%s1266_s0 + $0x1b] sm:$0x1]   ;;  %v48_v26 = vsel %vm13_vm2, %v593_v16, %v44_v22  ;;  %v606_v33 = vld [vmem:[%s1266_s0 + $0x1a] sm:$0x1]  }
   0x6   :  { %31 = vrot.lane.b32.xlu0 %v30_v12, %s741_s30  ;;  %v599_v20 = vld [vmem:[%s1266_s0 + $0x3b] sm:$0x2]   ;;  %67 = vrot.lane.b32.xlu1 %v66_v17, %s742_s8  ;;  %v603_v28 = vld [vmem:[%s1266_s0 + $0x3a] sm:$0x2]   ;;  %s743_s25 = smov 120   ;;  %s744_s30 = smov 112  }
   0x7   :  { %v600_v21 = vld [vmem:[%s1266_s0 + $0x5a] sm:$0x4]   ;;  %v76_v23 = vsel %vm5_vm0, %v599_v20, %v598_v19  ;;  %v604_v29 = vld [vmem:[%s1266_s0 + $0x59] sm:$0x4]   ;;  %v94_v32 = vsel %vm5_vm0, %v603_v28, %v602_v25  ;;  %v607_v34 = vld [vmem:[%s1266_s0 + $0x39] sm:$0x2]  }
   0x8   :  { %v601_v24 = vld [vmem:[%s1266_s0 + $0x79] sm:$0x8]   ;;  %v80_v27 = vsel %vm9_vm1, %v600_v21, %v76_v23  ;;  %v605_v30 = vld [vmem:[%s1266_s0 + $0x78] sm:$0x8]   ;;  %v608_v35 = vld [vmem:[%s1266_s0 + $0x58] sm:$0x4]   ;;  %v98_v36 = vsel %vm9_vm1, %v604_v29, %v94_v32  ;;  %v112_v37 = vsel %vm5_vm0, %v607_v34, %v606_v33 }
   0x9   :  { %v84_v31 = vsel %vm13_vm2, %v601_v24, %v80_v27  ;;  %v609_v38 = vld [vmem:[%s1266_s0 + $0x77] sm:$0x8]   ;;  %v610_v39 = vld [vmem:[%s1266_s0 + $0x19] sm:$0x1]   ;;  %v102_v40 = vsel %vm13_vm2, %v605_v30, %v98_v36  ;;  %v116_v41 = vsel %vm9_vm1, %v608_v35, %v112_v37  ;;  %v614_v47 = vld [vmem:[%s1266_s0 + $0x18] sm:$0x1]  }
   0xa   :  { %49 = vrot.lane.b32.xlu0 %v48_v26, %s743_s25  ;;  %85 = vrot.lane.b32.xlu1 %v84_v31, %s744_s30  ;;  %v611_v42 = vld [vmem:[%s1266_s0 + $0x38] sm:$0x2]   ;;  %v120_v45 = vsel %vm13_vm2, %v609_v38, %v116_v41  ;;  %v615_v48 = vld [vmem:[%s1266_s0 + $0x37] sm:$0x2]   ;;  %s745_s18 = smov 108   ;;  %s746_s23 = smov 104  }
   0xb   :  { %v612_v43 = vld [vmem:[%s1266_s0 + $0x57] sm:$0x4]   ;;  %v130_v46 = vsel %vm5_vm0, %v611_v42, %v610_v39  ;;  %v616_v49 = vld [vmem:[%s1266_s0 + $0x56] sm:$0x4]   ;;  %v148_v51 = vsel %vm5_vm0, %v615_v48, %v614_v47  ;;  %v618_v53 = vld [vmem:[%s1266_s0 + $0x17] sm:$0x1]  }
   0xc   :  { %v613_v44 = vld [vmem:[%s1266_s0 + $0x76] sm:$0x8]   ;;  %v134_v50 = vsel %vm9_vm1, %v612_v43, %v130_v46  ;;  %v617_v52 = vld [vmem:[%s1266_s0 + $0x75] sm:$0x8]   ;;  %v152_v54 = vsel %vm9_vm1, %v616_v49, %v148_v51  ;;  %v619_v55 = vld [vmem:[%s1266_s0 + $0x36] sm:$0x2]  }
   0xd   :  { %v620_v56 = vld [vmem:[%s1266_s0 + $0x55] sm:$0x4]   ;;  %v138_v57 = vsel %vm13_vm2, %v613_v44, %v134_v50  ;;  %v166_v58 = vsel %vm5_vm0, %v619_v55, %v618_v53  ;;  %v622_v59 = vld [vmem:[%s1266_s0 + $0x16] sm:$0x1]   ;;  %v156_v62 = vsel %vm13_vm2, %v617_v52, %v152_v54  ;;  %v626_v2 = vld [vmem:[%s1266_s0 + $0x15] sm:$0x1]  }
   0xe   :  { %103 = vrot.lane.b32.xlu0 %v102_v40, %s745_s18  ;;  %121 = vrot.lane.b32.xlu1 %v120_v45, %s746_s23  ;;  %v623_v60 = vld [vmem:[%s1266_s0 + $0x35] sm:$0x2]   ;;  %v170_v63 = vsel %vm9_vm1, %v620_v56, %v166_v58  ;;  %v621_v0 = vld [vmem:[%s1266_s0 + $0x74] sm:$0x8]   ;;  %s747_s11 = smov 100   ;;  %s748_s18 = smov 96  }
   0xf   :  { %v624_v61 = vld [vmem:[%s1266_s0 + $0x54] sm:$0x4]   ;;  %v184_v1 = vsel %vm5_vm0, %v623_v60, %v622_v59  ;;  %v627_v5 = vld [vmem:[%s1266_s0 + $0x34] sm:$0x2]   ;;  %v630_v8 = vld [vmem:[%s1266_s0 + $0x14] sm:$0x1]   ;;  %v174_v11 = vsel %vm13_vm2, %v621_v0, %v170_v63 }
  0x10   :  { %v188_v3 = vsel %vm9_vm1, %v624_v61, %v184_v1  ;;  %v625_v4 = vld [vmem:[%s1266_s0 + $0x73] sm:$0x8]   ;;  %v628_v6 = vld [vmem:[%s1266_s0 + $0x53] sm:$0x4]   ;;  %v202_v7 = vsel %vm5_vm0, %v627_v5, %v626_v2  ;;  %v631_v9 = vld [vmem:[%s1266_s0 + $0x33] sm:$0x2]  }
  0x11   :  { %v632_v10 = vld [vmem:[%s1266_s0 + $0x52] sm:$0x4]   ;;  %v220_v12 = vsel %vm5_vm0, %v631_v9, %v630_v8  ;;  %v634_v13 = vld [vmem:[%s1266_s0 + $0x13] sm:$0x1]   ;;  %v192_v14 = vsel %vm13_vm2, %v625_v4, %v188_v3  ;;  %v206_v15 = vsel %vm9_vm1, %v628_v6, %v202_v7  ;;  %v629_v16 = vld [vmem:[%s1266_s0 + $0x72] sm:$0x8]  }
  0x12   :  { %139 = vrot.lane.b32.xlu0 %v138_v57, %s747_s11  ;;  %157 = vrot.lane.b32.xlu1 %v156_v62, %s748_s18  ;;  %v633_v17 = vld [vmem:[%s1266_s0 + $0x71] sm:$0x8]   ;;  %v635_v18 = vld [vmem:[%s1266_s0 + $0x32] sm:$0x2]   ;;  %v224_v19 = vsel %vm9_vm1, %v632_v10, %v220_v12  ;;  %s749_s4 = smov 92   ;;  %s750_s9 = smov 88   ;;  %v210_v27 = vsel %vm13_vm2, %v629_v16, %v206_v15 }
  0x13   :  { %v238_v20 = vsel %vm5_vm0, %v635_v18, %v634_v13  ;;  %v636_v21 = vld [vmem:[%s1266_s0 + $0x51] sm:$0x4]   ;;  %v638_v22 = vld [vmem:[%s1266_s0 + $0x12] sm:$0x1]   ;;  %v642_v26 = vld [vmem:[%s1266_s0 + $0x11] sm:$0x1]   ;;  %v228_v29 = vsel %vm13_vm2, %v633_v17, %v224_v19 }
  0x14   :  { %v639_v23 = vld [vmem:[%s1266_s0 + $0x31] sm:$0x2]   ;;  %v643_v28 = vld [vmem:[%s1266_s0 + $0x30] sm:$0x2]   ;;  %v242_v30 = vsel %vm9_vm1, %v636_v21, %v238_v20  ;;  %v637_v31 = vld [vmem:[%s1266_s0 + $0x70] sm:$0x8]  }
  0x15   :  { %v256_v24 = vsel %vm5_vm0, %v639_v23, %v638_v22  ;;  %v640_v25 = vld [vmem:[%s1266_s0 + $0x50] sm:$0x4]   ;;  %v646_v32 = vld [vmem:[%s1266_s0 + $0x10] sm:$0x1]   ;;  %v274_v36 = vsel %vm5_vm0, %v643_v28, %v642_v26  ;;  %v644_v37 = vld [vmem:[%s1266_s0 + $0x4f] sm:$0x4]   ;;  %v246_v42 = vsel %vm13_vm2, %v637_v31, %v242_v30 }
  0x16   :  { %175 = vrot.lane.b32.xlu0 %v174_v11, %s749_s4  ;;  %193 = vrot.lane.b32.xlu1 %v192_v14, %s750_s9  ;;  %v647_v33 = vld [vmem:[%s1266_s0 + $0x2f] sm:$0x2]   ;;  %v260_v34 = vsel %vm9_vm1, %v640_v25, %v256_v24  ;;  %v641_v35 = vld [vmem:[%s1266_s0 + $0x6f] sm:$0x8]   ;;  %s751_s22 = smov 84   ;;  %s752_s29 = smov 80   ;;  %v278_v46 = vsel %vm9_vm1, %v644_v37, %v274_v36 }
  0x17   :  { %v292_v38 = vsel %vm5_vm0, %v647_v33, %v646_v32  ;;  %v648_v39 = vld [vmem:[%s1266_s0 + $0x4e] sm:$0x4]   ;;  %v650_v40 = vld [vmem:[%s1266_s0 + $0xf] sm:$0x1]   ;;  %v654_v43 = vld [vmem:[%s1266_s0 + $0xe] sm:$0x1]   ;;  %v264_v45 = vsel %vm13_vm2, %v641_v35, %v260_v34 }
  0x18   :  { %v651_v41 = vld [vmem:[%s1266_s0 + $0x2e] sm:$0x2]   ;;  %v655_v44 = vld [vmem:[%s1266_s0 + $0x2d] sm:$0x2]   ;;  %v645_v47 = vld [vmem:[%s1266_s0 + $0x6e] sm:$0x8]   ;;  %v296_v48 = vsel %vm9_vm1, %v648_v39, %v292_v38 }
  0x19   :  { %v649_v49 = vld [vmem:[%s1266_s0 + $0x6d] sm:$0x8]   ;;  %v310_v50 = vsel %vm5_vm0, %v651_v41, %v650_v40  ;;  %v652_v51 = vld [vmem:[%s1266_s0 + $0x4d] sm:$0x4]   ;;  %s753_s11 = smov 76   ;;  %v328_v52 = vsel %vm5_vm0, %v655_v44, %v654_v43  ;;  %s754_s18 = smov 72   ;;  %v282_v56 = vsel %vm13_vm2, %v645_v47, %v278_v46 }
  0x1a   :  { %211 = vrot.lane.b32.xlu0 %v210_v27, %s751_s22  ;;  %229 = vrot.lane.b32.xlu1 %v228_v29, %s752_s29  ;;  %v656_v53 = vld [vmem:[%s1266_s0 + $0x4c] sm:$0x4]   ;;  %v658_v54 = vld [vmem:[%s1266_s0 + $0xd] sm:$0x1]   ;;  %v300_v59 = vsel %vm13_vm2, %v649_v49, %v296_v48  ;;  %v314_v60 = vsel %vm9_vm1, %v652_v51, %v310_v50  ;;  %s755_s29 = smov 68   ;;  %s756_s7 = smov 64  }
  0x1b   :  { %v659_v55 = vld [vmem:[%s1266_s0 + $0x2c] sm:$0x2]   ;;  %v662_v57 = vld [vmem:[%s1266_s0 + $0xc] sm:$0x1]   ;;  %v653_v61 = vld [vmem:[%s1266_s0 + $0x6c] sm:$0x8]   ;;  %v332_v62 = vsel %vm9_vm1, %v656_v53, %v328_v52 }
  0x1c   :  { %v663_v58 = vld [vmem:[%s1266_s0 + $0x2b] sm:$0x2]   ;;  %v657_v63 = vld [vmem:[%s1266_s0 + $0x6b] sm:$0x8]   ;;  %v346_v0 = vsel %vm5_vm0, %v659_v55, %v658_v54  ;;  %v660_v1 = vld [vmem:[%s1266_s0 + $0x4b] sm:$0x4]   ;;  %v318_v6 = vsel %vm13_vm2, %v653_v61, %v314_v60 }
  0x1d   :  { %v364_v2 = vsel %vm5_vm0, %v663_v58, %v662_v57  ;;  %v664_v3 = vld [vmem:[%s1266_s0 + $0x4a] sm:$0x4]   ;;  %v666_v4 = vld [vmem:[%s1266_s0 + $0xb] sm:$0x1]   ;;  %v670_v7 = vld [vmem:[%s1266_s0 + $0xa] sm:$0x1]   ;;  %v336_v9 = vsel %vm13_vm2, %v657_v63, %v332_v62  ;;  %v350_v10 = vsel %vm9_vm1, %v660_v1, %v346_v0 }
  0x1e   :  { %247 = vrot.lane.b32.xlu0 %v246_v42, %s753_s11  ;;  %265 = vrot.lane.b32.xlu1 %v264_v45, %s754_s18  ;;  %v667_v5 = vld [vmem:[%s1266_s0 + $0x2a] sm:$0x2]   ;;  %v671_v8 = vld [vmem:[%s1266_s0 + $0x29] sm:$0x2]   ;;  %v368_v12 = vsel %vm9_vm1, %v664_v3, %v364_v2  ;;  %s757_s18 = smov 60   ;;  %s758_s25 = smov 56  }
  0x1f   :  { %v661_v11 = vld [vmem:[%s1266_s0 + $0x6a] sm:$0x8]   ;;  %v665_v13 = vld [vmem:[%s1266_s0 + $0x69] sm:$0x8]   ;;  %v382_v14 = vsel %vm5_vm0, %v667_v5, %v666_v4  ;;  %v668_v15 = vld [vmem:[%s1266_s0 + $0x49] sm:$0x4]   ;;  %v400_v16 = vsel %vm5_vm0, %v671_v8, %v670_v7 }
  0x20   :  { %v672_v17 = vld [vmem:[%s1266_s0 + $0x48] sm:$0x4]   ;;  %v674_v18 = vld [vmem:[%s1266_s0 + $0x9] sm:$0x1]   ;;  %v354_v20 = vsel %vm13_vm2, %v661_v11, %v350_v10  ;;  %v678_v21 = vld [vmem:[%s1266_s0 + $0x8] sm:$0x1]   ;;  %v372_v23 = vsel %vm13_vm2, %v665_v13, %v368_v12  ;;  %v386_v24 = vsel %vm9_vm1, %v668_v15, %v382_v14 }
  0x21   :  { %v675_v19 = vld [vmem:[%s1266_s0 + $0x28] sm:$0x2]   ;;  %v679_v22 = vld [vmem:[%s1266_s0 + $0x27] sm:$0x2]   ;;  %v669_v25 = vld [vmem:[%s1266_s0 + $0x68] sm:$0x8]   ;;  %v404_v26 = vsel %vm9_vm1, %v672_v17, %v400_v16 }
  0x22   :  { %283 = vrot.lane.b32.xlu0 %v282_v56, %s755_s29  ;;  %301 = vrot.lane.b32.xlu1 %v300_v59, %s756_s7  ;;  %v673_v27 = vld [vmem:[%s1266_s0 + $0x67] sm:$0x8]   ;;  %v418_v28 = vsel %vm5_vm0, %v675_v19, %v674_v18  ;;  %v676_v29 = vld [vmem:[%s1266_s0 + $0x47] sm:$0x4]   ;;  %s759_s7 = smov 52   ;;  %v436_v30 = vsel %vm5_vm0, %v679_v22, %v678_v21  ;;  %s760_s14 = smov 48   ;;  %v390_v34 = vsel %vm13_vm2, %v669_v25, %v386_v24 }
  0x23   :  { %v680_v31 = vld [vmem:[%s1266_s0 + $0x46] sm:$0x4]   ;;  %v682_v32 = vld [vmem:[%s1266_s0 + $0x7] sm:$0x1]   ;;  %v686_v35 = vld [vmem:[%s1266_s0 + $0x6] sm:$0x1]   ;;  %v408_v37 = vsel %vm13_vm2, %v673_v27, %v404_v26  ;;  %v422_v38 = vsel %vm9_vm1, %v676_v29, %v418_v28 }
  0x24   :  { %v683_v33 = vld [vmem:[%s1266_s0 + $0x26] sm:$0x2]   ;;  %v687_v36 = vld [vmem:[%s1266_s0 + $0x25] sm:$0x2]   ;;  %v677_v39 = vld [vmem:[%s1266_s0 + $0x66] sm:$0x8]   ;;  %v440_v40 = vsel %vm9_vm1, %v680_v31, %v436_v30 }
  0x25   :  { %v681_v41 = vld [vmem:[%s1266_s0 + $0x65] sm:$0x8]   ;;  %v454_v42 = vsel %vm5_vm0, %v683_v33, %v682_v32  ;;  %v684_v43 = vld [vmem:[%s1266_s0 + $0x45] sm:$0x4]   ;;  %v472_v45 = vsel %vm5_vm0, %v687_v36, %v686_v35  ;;  %v688_v46 = vld [vmem:[%s1266_s0 + $0x44] sm:$0x4]   ;;  %v426_v49 = vsel %vm13_vm2, %v677_v39, %v422_v38 }
  0x26   :  { %319 = vrot.lane.b32.xlu0 %v318_v6, %s757_s18  ;;  %337 = vrot.lane.b32.xlu1 %v336_v9, %s758_s25  ;;  %s761_s25 = smov 44   ;;  %v685_v44 = vld [vmem:[%s1266_s0 + $0x64] sm:$0x8]   ;;  %v690_v47 = vld [vmem:[%s1266_s0 + $0x5] sm:$0x1]   ;;  %s762_s5 = smov 40   ;;  %v444_v53 = vsel %vm13_vm2, %v681_v41, %v440_v40  ;;  %v458_v54 = vsel %vm9_vm1, %v684_v43, %v454_v42  ;;  %v476_v58 = vsel %vm9_vm1, %v688_v46, %v472_v45 }
  0x27   :  { %v691_v48 = vld [vmem:[%s1266_s0 + $0x24] sm:$0x2]   ;;  %v689_v50 = vld [vmem:[%s1266_s0 + $0x63] sm:$0x8]   ;;  %v694_v51 = vld [vmem:[%s1266_s0 + $0x4] sm:$0x1]   ;;  %v462_v3 = vsel %vm13_vm2, %v685_v44, %v458_v54 }
  0x28   :  { %v695_v52 = vld [vmem:[%s1266_s0 + $0x23] sm:$0x2]   ;;  %v692_v55 = vld [vmem:[%s1266_s0 + $0x43] sm:$0x4]   ;;  %v584_v57 = vld [vmem:[%s1266_s0 + $0x3e] sm:$0x4]   ;;  %v490_v59 = vsel %vm5_vm0, %v691_v48, %v690_v47  ;;  %v480_v7 = vsel %vm13_vm2, %v689_v50, %v476_v58 }
  0x29   :  { %v696_v56 = vld [vmem:[%s1266_s0 + $0x42] sm:$0x4]   ;;  %v585_v60 = vld [vmem:[%s1266_s0 + $0x5d] sm:$0x8]   ;;  %s763_s24 = smov 36   ;;  %v508_v63 = vsel %vm5_vm0, %v695_v52, %v694_v51  ;;  %s764_s29 = smov 32   ;;  %v494_v8 = vsel %vm9_vm1, %v692_v55, %v490_v59 }
  0x2a   :  { %355 = vrot.lane.b32.xlu0 %v354_v20, %s759_s7  ;;  %373 = vrot.lane.b32.xlu1 %v372_v23, %s760_s14  ;;  %v2_v61 = vld [vmem:[%s1266_s0] sm:$0x1]   ;;  %v698_v0 = vld [vmem:[%s1266_s0 + $0x3] sm:$0x1]   ;;  %v512_v11 = vsel %vm9_vm1, %v696_v56, %v508_v63  ;;  %s765_s11 = smov 28   ;;  %s766_s18 = smov 24  }
  0x2b   :  { %v583_v62 = vld [vmem:[%s1266_s0 + $0x1f] sm:$0x2]   ;;  %v699_v1 = vld [vmem:[%s1266_s0 + $0x22] sm:$0x2]   ;;  %v702_v4 = vld [vmem:[%s1266_s0 + $0x2] sm:$0x1]  }
  0x2c   :  { %v6_v2 = vsel %vm5_vm0, %v583_v62, %v2_v61  ;;  %v703_v5 = vld [vmem:[%s1266_s0 + $0x21] sm:$0x2]   ;;  %v693_v9 = vld [vmem:[%s1266_s0 + $0x62] sm:$0x8]   ;;  %v697_v12 = vld [vmem:[%s1266_s0 + $0x61] sm:$0x8]   ;;  %v526_v13 = vsel %vm5_vm0, %v699_v1, %v698_v0 }
  0x2d   :  { %v10_v6 = vsel %vm9_vm1, %v584_v57, %v6_v2  ;;  %v700_v14 = vld [vmem:[%s1266_s0 + $0x41] sm:$0x4]   ;;  %v544_v15 = vsel %vm5_vm0, %v703_v5, %v702_v4  ;;  %v704_v16 = vld [vmem:[%s1266_s0 + $0x40] sm:$0x4]   ;;  %v706_v17 = vld [vmem:[%s1266_s0 + $0x1] sm:$0x1]   ;;  %v498_v19 = vsel %vm13_vm2, %v693_v9, %v494_v8  ;;  %v516_v20 = vsel %vm13_vm2, %v697_v12, %v512_v11 }
  0x2e   :  { %391 = vrot.lane.b32.xlu0 %v390_v34, %s761_s25  ;;  %409 = vrot.lane.b32.xlu1 %v408_v37, %s762_s5  ;;  %v14_v10 = vsel %vm13_vm2, %v585_v60, %v10_v6  ;;  %v707_v18 = vld [vmem:[%s1266_s0 + $0x20] sm:$0x2]   ;;  %v530_v21 = vsel %vm9_vm1, %v700_v14, %v526_v13  ;;  %v701_v22 = vld [vmem:[%s1266_s0 + $0x60] sm:$0x8]   ;;  %v548_v23 = vsel %vm9_vm1, %v704_v16, %v544_v15  ;;  %s767_s25 = smov 20   ;;  %s768_s26 = smov 16  }
  0x2f   :  { %16 = vst.msk [vmem:[#allocation0] sm:$0xf] %vm15_vm3, %v14_v10   ;;  %v705_v24 = vld [vmem:[%s1266_s0 + $0x5f] sm:$0x8]   ;;  %v562_v25 = vsel %vm5_vm0, %v707_v18, %v706_v17  ;;  %v708_v26 = vld [vmem:[%s1266_s0 + $0x3f] sm:$0x4]   ;;  %v534_v27 = vsel %vm13_vm2, %v701_v22, %v530_v21 }
  0x30   :  { %v552_v28 = vsel %vm13_vm2, %v705_v24, %v548_v23  ;;  %v566_v29 = vsel %vm9_vm1, %v708_v26, %v562_v25  ;;  %v709_v30 = vld [vmem:[%s1266_s0 + $0x5e] sm:$0x8]   ;;  %s769_s0 = smov 12   ;;  %s771_s30 = smov 4   ;;  %vm33_vm4 = vcmask 1048544   ;;  %vm51_vm5 = vcmask 1015744  }
  0x31   :  { %v570_v31 = vsel %vm13_vm2, %v709_v30, %v566_v29  ;;  %vm69_vm6 = vcmask 982944   ;;  %vm87_vm7 = vcmask 950144   ;;  %vm105_vm8 = vcmask 917344  }
  0x32   :  { %427 = vrot.lane.b32.xlu0 %v426_v49, %s763_s24  ;;  %445 = vrot.lane.b32.xlu1 %v444_v53, %s764_s29  ;;  %s770_s29 = smov 8   ;;  %vm123_vm9 = vcmask 884544   ;;  %vm141_vm10 = vcmask 851744   ;;  %vm159_vm11 = vcmask 818944   ;;  %vm177_vm12 = vcmask 786144  }
  0x33   :  { %vm195_vm13 = vcmask 753344   ;;  %vm213_vm14 = vcmask 720544   ;;  %vm231_vm15 = vcmask 687744   ;;  %vm249_vm0 = vcmask 654944  }
  0x34   :  { %vm267_vm1 = vcmask 622144   ;;  %vm285_vm2 = vcmask 589344   ;;  %vm303_vm3 = vcmask 556544  }
  0x36   :  { %463 = vrot.lane.b32.xlu0 %v462_v3, %s765_s11  ;;  %481 = vrot.lane.b32.xlu1 %v480_v7, %s766_s18 }
  0x3a   :  { %499 = vrot.lane.b32.xlu0 %v498_v19, %s767_s25  ;;  %517 = vrot.lane.b32.xlu1 %v516_v20, %s768_s26 }
  0x3e   :  { %535 = vrot.lane.b32.xlu0 %v534_v27, %s769_s0  ;;  %553 = vrot.lane.b32.xlu1 %v552_v28, %s770_s29 }
  0x42   :  { %571 = vrot.lane.b32.xlu0 %v570_v31, %s771_s30 }
  0x78   :  { %v32_v32 = vpop.permute.xlu0 %31   ;;  %v68_v33 = vpop.permute.xlu1 %67  }
  0x79   :  { %34 = vst.msk [vmem:[#allocation0] sm:$0xf] %vm33_vm4, %v32_v32   ;;  %vm321_vm4 = vcmask 523744  }
  0x7c   :  { %v50_v34 = vpop.permute.xlu0 %49   ;;  %v86_v35 = vpop.permute.xlu1 %85  }
  0x7d   :  { %52 = vst.msk [vmem:[#allocation0] sm:$0xf] %vm51_vm5, %v50_v34   ;;  %vm339_vm5 = vcmask 490944  }
  0x7e   :  { %70 = vst.msk [vmem:[#allocation0] sm:$0xf] %vm69_vm6, %v68_v33   ;;  %vm357_vm6 = vcmask 458144  }
  0x7f   :  { %88 = vst.msk [vmem:[#allocation0] sm:$0xf] %vm87_vm7, %v86_v35   ;;  %vm375_vm7 = vcmask 425344  }
  0x80   :  { %v104_v36 = vpop.permute.xlu0 %103   ;;  %v122_v37 = vpop.permute.xlu1 %121  }
  0x81   :  { %106 = vst.msk [vmem:[#allocation0] sm:$0xf] %vm105_vm8, %v104_v36   ;;  %vm393_vm8 = vcmask 392544  }
  0x82   :  { %124 = vst.msk [vmem:[#allocation0] sm:$0xf] %vm123_vm9, %v122_v37   ;;  %vm411_vm9 = vcmask 359744  }
  0x84   :  { %v140_v38 = vpop.permute.xlu0 %139   ;;  %v158_v39 = vpop.permute.xlu1 %157  }
  0x85   :  { %142 = vst.msk [vmem:[#allocation0] sm:$0xf] %vm141_vm10, %v140_v38   ;;  %vm429_vm10 = vcmask 326944  }
  0x86   :  { %160 = vst.msk [vmem:[#allocation0] sm:$0xf] %vm159_vm11, %v158_v39   ;;  %vm447_vm11 = vcmask 294144  }
  0x88   :  { %v176_v40 = vpop.permute.xlu0 %175   ;;  %v194_v41 = vpop.permute.xlu1 %193  }
  0x89   :  { %178 = vst.msk [vmem:[#allocation0] sm:$0xf] %vm177_vm12, %v176_v40   ;;  %vm465_vm12 = vcmask 261344  }
  0x8a   :  { %196 = vst.msk [vmem:[#allocation0] sm:$0xf] %vm195_vm13, %v194_v41   ;;  %vm483_vm13 = vcmask 228544  }
  0x8c   :  { %v212_v42 = vpop.permute.xlu0 %211   ;;  %v230_v43 = vpop.permute.xlu1 %229  }
  0x8d   :  { %214 = vst.msk [vmem:[#allocation0] sm:$0xf] %vm213_vm14, %v212_v42   ;;  %vm501_vm14 = vcmask 195744  }
  0x8e   :  { %232 = vst.msk [vmem:[#allocation0] sm:$0xf] %vm231_vm15, %v230_v43   ;;  %vm519_vm15 = vcmask 162944  }
  0x90   :  { %v248_v44 = vpop.permute.xlu0 %247   ;;  %v266_v45 = vpop.permute.xlu1 %265  }
  0x91   :  { %250 = vst.msk [vmem:[#allocation0] sm:$0xf] %vm249_vm0, %v248_v44   ;;  %vm537_vm0 = vcmask 130144  }
  0x92   :  { %268 = vst.msk [vmem:[#allocation0] sm:$0xf] %vm267_vm1, %v266_v45   ;;  %vm555_vm1 = vcmask 97344  }
  0x94   :  { %v284_v46 = vpop.permute.xlu0 %283   ;;  %v302_v47 = vpop.permute.xlu1 %301  }
  0x95   :  { %286 = vst.msk [vmem:[#allocation0] sm:$0xf] %vm285_vm2, %v284_v46   ;;  %vm573_vm2 = vcmask 64544  }
  0x96   :  { %304 = vst.msk [vmem:[#allocation0] sm:$0xf] %vm303_vm3, %v302_v47  }
  0x98   :  { %v320_v48 = vpop.permute.xlu0 %319   ;;  %v338_v49 = vpop.permute.xlu1 %337  }
  0x99   :  { %322 = vst.msk [vmem:[#allocation0] sm:$0xf] %vm321_vm4, %v320_v48  }
  0x9a   :  { %340 = vst.msk [vmem:[#allocation0] sm:$0xf] %vm339_vm5, %v338_v49  }
  0x9c   :  { %v356_v50 = vpop.permute.xlu0 %355   ;;  %v374_v51 = vpop.permute.xlu1 %373  }
  0x9d   :  { %358 = vst.msk [vmem:[#allocation0] sm:$0xf] %vm357_vm6, %v356_v50  }
  0x9e   :  { %376 = vst.msk [vmem:[#allocation0] sm:$0xf] %vm375_vm7, %v374_v51  }
  0xa0   :  { %v392_v52 = vpop.permute.xlu0 %391   ;;  %v410_v53 = vpop.permute.xlu1 %409  }
  0xa1   :  { %394 = vst.msk [vmem:[#allocation0] sm:$0xf] %vm393_vm8, %v392_v52  }
  0xa2   :  { %412 = vst.msk [vmem:[#allocation0] sm:$0xf] %vm411_vm9, %v410_v53  }
  0xa4   :  { %v428_v54 = vpop.permute.xlu0 %427   ;;  %v446_v55 = vpop.permute.xlu1 %445  }
  0xa5   :  { %430 = vst.msk [vmem:[#allocation0] sm:$0xf] %vm429_vm10, %v428_v54  }
  0xa6   :  { %448 = vst.msk [vmem:[#allocation0] sm:$0xf] %vm447_vm11, %v446_v55  }
  0xa8   :  { %v464_v56 = vpop.permute.xlu0 %463   ;;  %v482_v57 = vpop.permute.xlu1 %481  }
  0xa9   :  { %466 = vst.msk [vmem:[#allocation0] sm:$0xf] %vm465_vm12, %v464_v56  }
  0xaa   :  { %484 = vst.msk [vmem:[#allocation0] sm:$0xf] %vm483_vm13, %v482_v57  }
  0xac   :  { %v500_v58 = vpop.permute.xlu0 %499   ;;  %v518_v59 = vpop.permute.xlu1 %517  }
  0xad   :  { %502 = vst.msk [vmem:[#allocation0] sm:$0xf] %vm501_vm14, %v500_v58  }
  0xae   :  { %520 = vst.msk [vmem:[#allocation0] sm:$0xf] %vm519_vm15, %v518_v59  }
  0xb0   :  { %v536_v60 = vpop.permute.xlu0 %535   ;;  %v554_v61 = vpop.permute.xlu1 %553  }
  0xb1   :  { %538 = vst.msk [vmem:[#allocation0] sm:$0xf] %vm537_vm0, %v536_v60  }
  0xb2   :  { %556 = vst.msk [vmem:[#allocation0] sm:$0xf] %vm555_vm1, %v554_v61  }
  0xb4   :  { %v572_v62 = vpop.permute.xlu0 %571  }
  0xb5   :  { %574 = vst.msk [vmem:[#allocation0] sm:$0xf] %vm573_vm2, %v572_v62  }
  0xbc   :  { %v579_v63 = vld [vmem:[#allocation0] sm:$0xf] }
  0xbd   :  { %582 = vst [vmem:[%s1267_s1] sm:$0xf] %v579_v63 }

// kernel: upsample_layer_forward.1
= control target key start
LH: loop header
LB: loop body
LE: loop exit
PB: predicated region body
PF: predicated region fallthrough
CT: control target
= control target key end

     0   :  { %vm72_vm0 = vcmask 523264   ;;  %vm20609_vm1 = vmmov 0   ;;  %vm2124_vm2 = vcmask 261120   ;;  %vm4396_vm3 = vcmask 1040384   ;;  %s20612_s17 = smov 120   ;;  %s26743_s1 = inlined_call_operand.vmem [shape: f32[3,64,128], index: 1, kind: input, shape index: {}]   ;;  %s26744_s0 = inlined_call_operand.vmem [shape: f32[2,18,64], index: 0, kind: input, shape index: {}]   ;;  %s26745_s4 = inlined_call_operand.vmem [shape: f32[128,12], index: 4, kind: input, shape index: {}]   ;;  %s26746_s5 = inlined_call_operand.vmem [shape: f32[18,128], index: 5, kind: input, shape index: {}]   ;;  %s26747_s2 = inlined_call_operand.vmem [shape: f32[3,128,128], index: 2, kind: input, shape index: {}]   ;;  %s26748_s3 = inlined_call_operand.vmem [shape: f32[3,128,128], index: 3, kind: input, shape index: {}]   ;;  %s26749_s6 = inlined_call_operand.vmem [shape: f32[2,32,128], index: 6, kind: output, shape index: {}]  }
   0x1   :  { %v15211_v0 = vld [vmem:[%s26743_s1 + $0x78] sm:$0xff]  ;;  %v15210_v1 = vld [vmem:[%s26743_s1 + $0x70] sm:$0xff]  ;;  %v15209_v2 = vld [vmem:[%s26743_s1 + $0x68] sm:$0xff]  ;;  %vm4398_vm4 = vcmask 64512   ;;  %vm14709_vm5 = vcmask 1043456   ;;  %vm14705_vm6 = vcmask 31744  }
   0x2   :  { %v20657_v3 = vand.u32 4294901760, %v15211_v0  ;;  %v20659_v4 = vand.u32 4294901760, %v15210_v1  ;;  %v20661_v5 = vand.u32 4294901760, %v15209_v2  ;;  %v15208_v6 = vld [vmem:[%s26743_s1 + $0x60] sm:$0xff]  ;;  %v15207_v7 = vld [vmem:[%s26743_s1 + $0x58] sm:$0xff]  ;;  %v15206_v8 = vld [vmem:[%s26743_s1 + $0x50] sm:$0xff] }
   0x3   :  { %v20672_v9 = vand.u32 4294901760, %v15208_v6  ;;  %v20674_v10 = vand.u32 4294901760, %v15207_v7  ;;  %v20676_v11 = vand.u32 4294901760, %v15206_v8  ;;  %v15205_v12 = vld [vmem:[%s26743_s1 + $0x48] sm:$0xff]  ;;  %v15204_v13 = vld [vmem:[%s26743_s1 + $0x40] sm:$0xff] }
   0x4   :  { %v59_v14 = vld [vmem:[%s26744_s0 + $0x1] sm:$0xff]  ;;  %17070 = vmatprep.subr.mxu0 %v20657_v3  ;;  %v20689_v15 = vsub.f32 %v15211_v0, %v20657_v3  ;;  %v20692_v16 = vsub.f32 %v15210_v1, %v20659_v4  ;;  %v20694_v17 = vand.u32 4294901760, %v15205_v12  ;;  %v20697_v18 = vsub.f32 %v15209_v2, %v20661_v5  ;;  %v60_v19 = vld [vmem:[%s26744_s0 + $0x9] sm:$0xff]  ;;  %v61_v37 = vld [vmem:[%s26744_s0 + $0x19] sm:$0xff] }
   0x5   :  { %17071 = vmatpush3.msra.mxu0 %v20657_v3  ;;  %v20703_v20 = vand.u32 4294901760, %v15204_v13  ;;  %v20706_v21 = vsub.f32 %v15208_v6, %v20672_v9  ;;  %v74_v22 = vsel %vm72_vm0, %v59_v14, 0  ;;  %v20710_v23 = vsub.f32 %v15207_v7, %v20674_v10  ;;  %v62_v42 = vld [vmem:[%s26744_s0 + $0x21] sm:$0xff]  ;;  %v49_v14 = vld [vmem:[%s26744_s0 + $0x18] sm:$0xff] }
   0x6   :  { %17072 = vmatprep.subr.mxu0 %v20659_v4  ;;  %v20714_v24 = vand.u32 4294901760, %v20689_v15  ;;  %v20717_v25 = vand.u32 4294901760, %v20692_v16  ;;  %v20720_v26 = vand.u32 4294901760, %v20697_v18  ;;  %v20722_v27 = vand.u32 4294901760, %v74_v22 }
   0x7   :  { %17073 = vmatpush3.msra.mxu0 %v20659_v4  ;;  %v20726_v28 = vand.u32 4294901760, %v20706_v21  ;;  %v20729_v29 = vand.u32 4294901760, %v20710_v23  ;;  %v77_v30 = vsel %vm72_vm0, %v60_v19, 0  ;;  %v20733_v31 = vsub.f32 %v15206_v8, %v20676_v11 }
   0x8   :  { %17074 = vmatprep.subr.mxu0 %v20661_v5  ;;  %v218_v32 = vsub.f32 %v20689_v15, %v20714_v24  ;;  %v225_v33 = vsub.f32 %v20692_v16, %v20717_v25  ;;  %v232_v34 = vsub.f32 %v20697_v18, %v20720_v26  ;;  %v20743_v35 = vsub.f32 %v74_v22, %v20722_v27 }
   0x9   :  { %17075 = vmatpush3.msra.mxu0 %v20661_v5  ;;  %v20746_v36 = vand.u32 4294901760, %v77_v30  ;;  %17108 = vmatprep.mubr.f32.mxu1 %v20722_v27  ;;  %v239_v40 = vsub.f32 %v20706_v21, %v20726_v28  ;;  %v246_v44 = vsub.f32 %v20710_v23, %v20729_v29  ;;  %v20766_v46 = vand.u32 4294901760, %v20733_v31 }
   0xa   :  { %17076 = vmatprep.subr.mxu0 %v20672_v9  ;;  %v219_v38 = vand.u32 4294901760, %v218_v32  ;;  %v226_v39 = vand.u32 4294901760, %v225_v33  ;;  %v160_v41 = vand.u32 4294901760, %v20743_v35  ;;  %v233_v43 = vand.u32 4294901760, %v232_v34  ;;  %v1431_v34 = vld [vmem:[%s26744_s0 + $0x1a] sm:$0xff] }
   0xb   :  { %17077 = vmatpush3.msra.mxu0 %v20672_v9  ;;  %v20763_v45 = vsub.f32 %v77_v30, %v20746_v36  ;;  %v20773_v48 = vsub.f32 %v15205_v12, %v20694_v17  ;;  %v20776_v49 = vsub.f32 %v15204_v13, %v20703_v20  ;;  %v80_v50 = vsel %vm72_vm0, %v61_v37, 0  ;;  %v1432_v37 = vld [vmem:[%s26744_s0 + $0x22] sm:$0xff] }
   0xc   :  { %17078 = vmatprep.subr.mxu0 %v20674_v10  ;;  %17092 = vmatprep.subr.mxu1 %v219_v38  ;;  %v161_v47 = vsub.f32 %v20743_v35, %v160_v41  ;;  %v20781_v52 = vand.u32 4294901760, %v80_v50  ;;  %v83_v53 = vsel %vm72_vm0, %v62_v42, 0  ;;  %v240_v54 = vand.u32 4294901760, %v239_v40  ;;  %v55_v40 = vld [vmem:[%s26743_s1 + $0x20] sm:$0xff] }
   0xd   :  { %17079 = vmatpush3.msra.mxu0 %v20674_v10  ;;  %17093 = vmatpush3.msra.mxu1 %v219_v38  ;;  %v170_v51 = vand.u32 4294901760, %v20763_v45  ;;  %v20786_v55 = vand.u32 4294901760, %v20773_v48  ;;  %v20788_v56 = vand.u32 4294901760, %v83_v53  ;;  %v253_v58 = vsub.f32 %v20733_v31, %v20766_v46 }
   0xe   :  { %17080 = vmatprep.subr.mxu0 %v20676_v11  ;;  %17094 = vmatprep.subr.mxu1 %v226_v39  ;;  %v20797_v59 = vand.u32 4294901760, %v20776_v49  ;;  %v162_v60 = vand.u32 4294901760, %v161_v47  ;;  %v247_v61 = vand.u32 4294901760, %v246_v44  ;;  %v20801_v62 = vsub.f32 %v80_v50, %v20781_v52  ;;  %v53_v47 = vld [vmem:[%s26743_s1 + $0x10] sm:$0xff] }
   0xf   :  { %17081 = vmatpush3.msra.mxu0 %v20676_v11  ;;  %17095 = vmatpush3.msra.mxu1 %v226_v39  ;;  %v171_v57 = vsub.f32 %v20763_v45, %v170_v51  ;;  %v260_v0 = vsub.f32 %v20773_v48, %v20786_v55  ;;  %v20808_v1 = vsub.f32 %v83_v53, %v20788_v56  ;;  %v254_v2 = vand.u32 4294901760, %v253_v58 }
  0x10   :  { %17082 = vmatprep.subr.mxu0 %v20694_v17  ;;  %17096 = vmatprep.subr.mxu1 %v233_v43  ;;  %v267_v6 = vsub.f32 %v20776_v49, %v20797_v59  ;;  %v180_v7 = vand.u32 4294901760, %v20801_v62  ;;  %v20897_v38 = vsel %vm72_vm0, %v1432_v37, 0  ;;  %v20990_v53 = vand.u32 4294901760, %v53_v47 }
  0x11   :  { %17083 = vmatpush3.msra.mxu0 %v20694_v17  ;;  %17097 = vmatpush3.msra.mxu1 %v233_v43  ;;  %v172_v63 = vand.u32 4294901760, %v171_v57  ;;  %v261_v8 = vand.u32 4294901760, %v260_v0  ;;  %v190_v12 = vand.u32 4294901760, %v20808_v1  ;;  %v54_v43 = vld [vmem:[%s26743_s1 + $0x18] sm:$0xff] }
  0x12   :  { %17084 = vmatprep.subr.mxu0 %v20703_v20  ;;  %17098 = vmatprep.subr.mxu1 %v240_v54  ;;  %v268_v13 = vand.u32 4294901760, %v267_v6  ;;  %v181_v19 = vsub.f32 %v20801_v62, %v180_v7 }
  0x13   :  { %17085 = vmatpush3.msra.mxu0 %v20703_v20  ;;  %17099 = vmatpush3.msra.mxu1 %v240_v54  ;;  %v191_v22 = vsub.f32 %v20808_v1, %v190_v12  ;;  %v52_v54 = vld [vmem:[%s26743_s1 + $0x8] sm:$0xff] }
  0x14   :  { %17086 = vmatprep.mubr.f32.mxu0 %v162_v60  ;;  %17100 = vmatprep.subr.mxu1 %v247_v61  ;;  %v182_v30 = vand.u32 4294901760, %v181_v19  ;;  %v51_v60 = vld [vmem:[%s26743_s1] sm:$0xff] }
  0x15   :  { %17114 = vmatprep.subr.mxu0 %v20689_v15  ;;  %17087 = vmatmul.mubr.f32.vlgmr.msra.gmra.mxu0 %v172_v63  ;;  %v21026_v63 = vand.u32 4294901760, %v52_v54 }
  0x16   :  { %17101 = vmatpush3.msra.mxu1 %v247_v61  ;;  %17115 = vmatpush3.msra.mxu0 %v20689_v15  ;;  %v50_v15 = vld [vmem:[%s26744_s0 + $0x20] sm:$0xff] }
  0x17   :  { %17102 = vmatprep.subr.mxu1 %v254_v2  ;;  %17116 = vmatprep.subr.mxu0 %v20692_v16  ;;  %v20839_v32 = vsel %vm72_vm0, %v50_v15, 0 }
  0x18   :  { %17103 = vmatpush3.msra.mxu1 %v254_v2  ;;  %17117 = vmatpush3.msra.mxu0 %v20692_v16  ;;  %v20834_v16 = vsel %vm72_vm0, %v49_v14, 0  ;;  %v21029_v0 = vand.u32 4294901760, %v20839_v32  ;;  %v21037_v2 = vsub.f32 %v53_v47, %v20990_v53 }
  0x19   :  { %17104 = vmatprep.subr.mxu1 %v261_v8  ;;  %17118 = vmatprep.subr.mxu0 %v20697_v18  ;;  %v21006_v58 = vand.u32 4294901760, %v20834_v16 }
  0x1a   :  { %17105 = vmatpush3.msra.mxu1 %v261_v8  ;;  %17119 = vmatpush3.msra.mxu0 %v20697_v18  ;;  %v192_v18 = vand.u32 4294901760, %v191_v22  ;;  %v21060_v15 = vsub.f32 %v20839_v32, %v21029_v0  ;;  %v21063_v22 = vsub.f32 %v52_v54, %v21026_v63 }
  0x1b   :  { %17106 = vmatprep.subr.mxu1 %v268_v13  ;;  %17120 = vmatprep.subr.mxu0 %v20706_v21 }
  0x1c   :  { %17107 = vmatpush3.msra.mxu1 %v268_v13  ;;  %17121 = vmatpush3.msra.mxu0 %v20706_v21  ;;  %v1429_v21 = vld [vmem:[%s26744_s0 + $0x2] sm:$0xff] }
  0x1d   :  { %17109 = vmatmul.mubr.f32.vlgmr.msra.gmra.mxu1 %v20746_v36  ;;  %17122 = vmatprep.subr.mxu0 %v20710_v23 }
  0x1e   :  { %17136 = vmatprep.subr.mxu1 %v20657_v3  ;;  %17123 = vmatpush3.msra.mxu0 %v20710_v23  ;;  %v1430_v23 = vld [vmem:[%s26744_s0 + $0xa] sm:$0xff] }
  0x1f   :  { %17137 = vmatpush3.msra.mxu1 %v20657_v3  ;;  %17124 = vmatprep.subr.mxu0 %v20733_v31  ;;  %v20871_v33 = vsel %vm72_vm0, %v1430_v23, 0  ;;  %v868_v23 = vand.u32 4294901760, %v21060_v15 }
  0x20   :  { %17138 = vmatprep.subr.mxu1 %v20659_v4  ;;  %17089 = vmatprep.mubr.f32.mxu0 %v182_v30 }
  0x21   :  { %17125 = vmatpush3.msra.mxu0 %v20733_v31  ;;  %17139 = vmatpush3.msra.mxu1 %v20659_v4  ;;  %v20866_v31 = vsel %vm72_vm0, %v1429_v21, 0 }
  0x22   :  { %17090 = vmatmul.mubr.f32.gmra.mxu0 %v192_v18  ;;  %17126 = vmatprep.subr.mxu0 %v20773_v48 }
  0x23   :  { %17140 = vmatprep.subr.mxu1 %v20661_v5  ;;  %17127 = vmatpush3.msra.mxu0 %v20773_v48 }
  0x24   :  { %17141 = vmatpush3.msra.mxu1 %v20661_v5  ;;  %17128 = vmatprep.subr.mxu0 %v20776_v49 }
  0x25   :  { %17142 = vmatprep.subr.mxu1 %v20672_v9  ;;  %17129 = vmatpush3.msra.mxu0 %v20776_v49  ;;  %v20976_v49 = vand.u32 4294901760, %v54_v43 }
  0x26   :  { %17130 = vmatprep.mubr.f32.mxu0 %v20743_v35  ;;  %17143 = vmatpush3.msra.mxu1 %v20672_v9  ;;  %v56_v35 = vld [vmem:[%s26743_s1 + $0x28] sm:$0xff] }
  0x27   :  { %17111 = vmatprep.mubr.f32.mxu1 %v20781_v52  ;;  %17131 = vmatmul.mubr.f32.vlgmr.msra.gmra.mxu0 %v20763_v45 }
  0x28   :  { %17144 = vmatprep.subr.mxu1 %v20674_v10  ;;  %17158 = vmatprep.subr.mxu0 %v20714_v24 }
  0x29   :  { %17112 = vmatmul.mubr.f32.gmra.mxu1 %v20788_v56  ;;  %17159 = vmatpush3.msra.mxu0 %v20714_v24  ;;  %v20890_v24 = vsel %vm72_vm0, %v1431_v34, 0  ;;  %v21089_v34 = vand.u32 4294901760, %v21063_v22 }
  0x2a   :  { %17145 = vmatpush3.msra.mxu1 %v20674_v10  ;;  %17160 = vmatprep.subr.mxu0 %v20717_v25 }
  0x2b   :  { %17146 = vmatprep.subr.mxu1 %v20676_v11  ;;  %17133 = vmatprep.mubr.f32.mxu0 %v20801_v62  ;;  %v21020_v62 = vsub.f32 %v54_v43, %v20976_v49 }
  0x2c   :  { %17147 = vmatpush3.msra.mxu1 %v20676_v11  ;;  %17161 = vmatpush3.msra.mxu0 %v20717_v25  ;;  %v58_v25 = vld [vmem:[%s26743_s1 + $0x38] sm:$0xff] }
  0x2d   :  { %17134 = vmatmul.mubr.f32.gmra.mxu0 %v20808_v1  ;;  %17148 = vmatprep.subr.mxu1 %v20694_v17  ;;  %v20917_v39 = vand.u32 4294901760, %v58_v25  ;;  %v21054_v14 = vand.u32 4294901760, %v21020_v62 }
  0x2e   :  { %17162 = vmatprep.subr.mxu0 %v20720_v26  ;;  %17149 = vmatpush3.msra.mxu1 %v20694_v17 }
  0x2f   :  { %17163 = vmatpush3.msra.mxu0 %v20720_v26  ;;  %17150 = vmatprep.subr.mxu1 %v20703_v20  ;;  %v57_v26 = vld [vmem:[%s26743_s1 + $0x30] sm:$0xff]  ;;  %v924_v21 = vsub.f32 %v21020_v62, %v21054_v14 }
  0x30   :  { %17164 = vmatprep.subr.mxu0 %v20726_v28  ;;  %17151 = vmatpush3.msra.mxu1 %v20703_v20 }
  0x31   :  { %17152 = vmatprep.mubr.f32.mxu1 %v160_v41  ;;  %17165 = vmatpush3.msra.mxu0 %v20726_v28  ;;  %v20924_v28 = vand.u32 4294901760, %v57_v26  ;;  %v20944_v41 = vsub.f32 %v58_v25, %v20917_v39 }
  0x32   :  { %17153 = vmatmul.mubr.f32.vlgmr.msra.gmra.mxu1 %v170_v51  ;;  %17166 = vmatprep.subr.mxu0 %v20729_v29 }
  0x33   :  { %17180 = vmatprep.subr.mxu1 %v20657_v3  ;;  %17167 = vmatpush3.msra.mxu0 %v20729_v29  ;;  %v47_v29 = vld [vmem:[%s26744_s0] sm:$0xff]  ;;  %v20957_v44 = vsub.f32 %v57_v26, %v20924_v28 }
  0x34   :  { %17181 = vmatpush3.msra.mxu1 %v20657_v3  ;;  %17168 = vmatprep.subr.mxu0 %v20766_v46  ;;  %v48_v3 = vld [vmem:[%s26744_s0 + $0x8] sm:$0xff]  ;;  %v752_v42 = vsel %vm72_vm0, %v47_v29, 0 }
  0x35   :  { %17182 = vmatprep.subr.mxu1 %v20659_v4  ;;  %17155 = vmatprep.mubr.f32.mxu1 %v180_v7  ;;  %v755_v45 = vsel %vm72_vm0, %v48_v3, 0  ;;  %v20972_v48 = vand.u32 4294901760, %v752_v42  ;;  %v21041_v7 = vand.u32 4294901760, %v51_v60  ;;  %v925_v3 = vand.u32 4294901760, %v924_v21 }
  0x36   :  { %17169 = vmatpush3.msra.mxu0 %v20766_v46  ;;  %17183 = vmatpush3.msra.mxu1 %v20659_v4  ;;  %v20948_v4 = vand.u32 4294901760, %v56_v35  ;;  %v20962_v46 = vand.u32 4294901760, %v55_v40  ;;  %v20981_v51 = vand.u32 4294901760, %v755_v45 }
  0x37   :  { %17156 = vmatmul.mubr.f32.gmra.mxu1 %v190_v12  ;;  %17170 = vmatprep.subr.mxu0 %v20786_v55  ;;  %v21003_v57 = vsub.f32 %v752_v42, %v20972_v48  ;;  %v21046_v12 = vsub.f32 %v20834_v16, %v21006_v58  ;;  %v21070_v16 = vand.u32 4294901760, %v21037_v2  ;;  %v21078_v32 = vsub.f32 %v51_v60, %v21041_v7 }
  0x38   :  { %17184 = vmatprep.subr.mxu1 %v20661_v5  ;;  %17171 = vmatpush3.msra.mxu0 %v20786_v55  ;;  %v20979_v50 = vsub.f32 %v56_v35, %v20948_v4  ;;  %v20996_v55 = vsub.f32 %v55_v40, %v20962_v46  ;;  %v21017_v61 = vsub.f32 %v755_v45, %v20981_v51 }
  0x39   :  { %17185 = vmatpush3.msra.mxu1 %v20661_v5  ;;  %17172 = vmatprep.subr.mxu0 %v20797_v59  ;;  %v20967_v5 = vand.u32 4294901760, %v20944_v41  ;;  %v838_v8 = vand.u32 4294901760, %v21003_v57  ;;  %v858_v30 = vand.u32 4294901760, %v21046_v12  ;;  %v931_v25 = vsub.f32 %v21037_v2, %v21070_v16 }
  0x3a   :  { %17186 = vmatprep.subr.mxu1 %v20672_v9  ;;  %17173 = vmatpush3.msra.mxu0 %v20797_v59  ;;  %v21011_v59 = vand.u32 4294901760, %v20979_v50  ;;  %v21034_v1 = vand.u32 4294901760, %v20996_v55  ;;  %v848_v13 = vand.u32 4294901760, %v21017_v61  ;;  %v21100_v35 = vand.u32 4294901760, %v21078_v32 }
  0x3b   :  { %17174 = vmatprep.mubr.f32.mxu0 %v20722_v27  ;;  %17187 = vmatpush3.msra.mxu1 %v20672_v9  ;;  %v20986_v9 = vand.u32 4294901760, %v20957_v44  ;;  %v938_v40 = vsub.f32 %v21063_v22, %v21089_v34  ;;  %v932_v42 = vand.u32 4294901760, %v931_v25  ;;  %v21324_v25 = vand.u32 4294901760, %v20890_v24 }
  0x3c   :  { %17175 = vmatmul.mubr.f32.vlgmr.msra.gmra.mxu0 %v20746_v36  ;;  %17188 = vmatprep.subr.mxu1 %v20674_v10  ;;  %v849_v18 = vsub.f32 %v21017_v61, %v848_v13  ;;  %v945_v45 = vsub.f32 %v21078_v32, %v21100_v35 }
  0x3d   :  { %17202 = vmatprep.subr.mxu0 %v20917_v39  ;;  %17189 = vmatpush3.msra.mxu1 %v20674_v10  ;;  %v896_v10 = vsub.f32 %v20944_v41, %v20967_v5  ;;  %v939_v54 = vand.u32 4294901760, %v938_v40 }
  0x3e   :  { %17203 = vmatpush3.msra.mxu0 %v20917_v39  ;;  %17190 = vmatprep.subr.mxu1 %v20676_v11  ;;  %v850_v29 = vand.u32 4294901760, %v849_v18 }
  0x3f   :  { %17204 = vmatprep.subr.mxu0 %v20924_v28  ;;  %17177 = vmatprep.mubr.f32.mxu0 %v20781_v52  ;;  %v897_v6 = vand.u32 4294901760, %v896_v10  ;;  %v946_v10 = vand.u32 4294901760, %v945_v45 }
  0x40   :  { %17191 = vmatpush3.msra.mxu1 %v20676_v11  ;;  %17205 = vmatpush3.msra.mxu0 %v20924_v28  ;;  %v903_v11 = vsub.f32 %v20957_v44, %v20986_v9 }
  0x41   :  { %17178 = vmatmul.mubr.f32.gmra.mxu0 %v20788_v56  ;;  %17192 = vmatprep.subr.mxu1 %v20694_v17 }
  0x42   :  { %17206 = vmatprep.subr.mxu0 %v20948_v4  ;;  %17193 = vmatpush3.msra.mxu1 %v20694_v17  ;;  %v910_v17 = vsub.f32 %v20979_v50, %v21011_v59  ;;  %v904_v19 = vand.u32 4294901760, %v903_v11 }
  0x43   :  { %17207 = vmatpush3.msra.mxu0 %v20948_v4  ;;  %17194 = vmatprep.subr.mxu1 %v20703_v20 }
  0x44   :  { %17208 = vmatprep.subr.mxu0 %v20962_v46  ;;  %17195 = vmatpush3.msra.mxu1 %v20703_v20  ;;  %v917_v20 = vsub.f32 %v20996_v55, %v21034_v1 }
  0x45   :  { %17196 = vmatprep.mubr.f32.mxu1 %v20722_v27  ;;  %17209 = vmatpush3.msra.mxu0 %v20962_v46  ;;  %v839_v27 = vsub.f32 %v21003_v57, %v838_v8 }
  0x46   :  { %17197 = vmatmul.mubr.f32.vlgmr.msra.gmra.mxu1 %v20746_v36  ;;  %17210 = vmatprep.subr.mxu0 %v20976_v49  ;;  %v911_v36 = vand.u32 4294901760, %v910_v17  ;;  %v918_v37 = vand.u32 4294901760, %v917_v20  ;;  %v15212_v17 = vld [vmem:[%s26743_s1 + $0x80] sm:$0xff] }
  0x47   :  { %17224 = vmatprep.subr.mxu1 %v897_v6  ;;  %17211 = vmatpush3.msra.mxu0 %v20976_v49  ;;  %v840_v26 = vand.u32 4294901760, %v839_v27 }
  0x48   :  { %17225 = vmatpush3.msra.mxu1 %v897_v6  ;;  %17212 = vmatprep.subr.mxu0 %v20990_v53  ;;  %v21239_v6 = vand.u32 4294901760, %v20871_v33 }
  0x49   :  { %17226 = vmatprep.subr.mxu1 %v904_v19  ;;  %17199 = vmatprep.mubr.f32.mxu1 %v20781_v52  ;;  %v859_v52 = vsub.f32 %v21046_v12, %v858_v30 }
  0x4a   :  { %17213 = vmatpush3.msra.mxu0 %v20990_v53  ;;  %17227 = vmatpush3.msra.mxu1 %v904_v19 }
  0x4b   :  { %17200 = vmatmul.mubr.f32.gmra.mxu1 %v20788_v56  ;;  %17214 = vmatprep.subr.mxu0 %v21026_v63  ;;  %v869_v56 = vsub.f32 %v21060_v15, %v868_v23  ;;  %v860_v43 = vand.u32 4294901760, %v859_v52 }
  0x4c   :  { %17228 = vmatprep.subr.mxu1 %v911_v36  ;;  %17215 = vmatpush3.msra.mxu0 %v21026_v63 }
  0x4d   :  { %17229 = vmatpush3.msra.mxu1 %v911_v36  ;;  %17216 = vmatprep.subr.mxu0 %v21041_v7  ;;  %v870_v47 = vand.u32 4294901760, %v869_v56 }
  0x4e   :  { %17230 = vmatprep.subr.mxu1 %v918_v37  ;;  %17217 = vmatpush3.msra.mxu0 %v21041_v7 }
  0x4f   :  { %17218 = vmatprep.mubr.f32.mxu0 %v840_v26  ;;  %17231 = vmatpush3.msra.mxu1 %v918_v37 }
  0x50   :  { %17219 = vmatmul.mubr.f32.vlgmr.msra.gmra.mxu0 %v850_v29  ;;  %17232 = vmatprep.subr.mxu1 %v925_v3 }
  0x51   :  { %17246 = vmatprep.subr.mxu0 %v20944_v41  ;;  %17233 = vmatpush3.msra.mxu1 %v925_v3  ;;  %v21337_v3 = vand.u32 4294901760, %v20897_v38 }
  0x52   :  { %17247 = vmatpush3.msra.mxu0 %v20944_v41  ;;  %17234 = vmatprep.subr.mxu1 %v932_v42  ;;  %v15219_v41 = vld [vmem:[%s26743_s1 + $0xb8] sm:$0xff] }
  0x53   :  { %17248 = vmatprep.subr.mxu0 %v20957_v44  ;;  %17221 = vmatprep.mubr.f32.mxu0 %v860_v43 }
  0x54   :  { %17235 = vmatpush3.msra.mxu1 %v932_v42  ;;  %17249 = vmatpush3.msra.mxu0 %v20957_v44  ;;  %v15218_v44 = vld [vmem:[%s26743_s1 + $0xb0] sm:$0xff]  ;;  %v21346_v42 = vsub.f32 %v20890_v24, %v21324_v25 }
  0x55   :  { %17222 = vmatmul.mubr.f32.gmra.mxu0 %v870_v47  ;;  %17236 = vmatprep.subr.mxu1 %v939_v54  ;;  %v21354_v47 = vsub.f32 %v20897_v38, %v21337_v3 }
  0x56   :  { %17250 = vmatprep.subr.mxu0 %v20979_v50  ;;  %17237 = vmatpush3.msra.mxu1 %v939_v54  ;;  %v1549_v54 = vand.u32 4294901760, %v21346_v42 }
  0x57   :  { %17251 = vmatpush3.msra.mxu0 %v20979_v50  ;;  %17238 = vmatprep.subr.mxu1 %v946_v10  ;;  %v21180_v50 = vand.u32 4294901760, %v15218_v44 }
  0x58   :  { %17252 = vmatprep.subr.mxu0 %v20996_v55  ;;  %17239 = vmatpush3.msra.mxu1 %v946_v10  ;;  %v1550_v38 = vsub.f32 %v21346_v42, %v1549_v54 }
  0x59   :  { %17240 = vmatprep.mubr.f32.mxu1 %v20972_v48  ;;  %17253 = vmatpush3.msra.mxu0 %v20996_v55 }
  0x5a   :  { %17241 = vmatmul.mubr.f32.vlgmr.msra.gmra.mxu1 %v20981_v51  ;;  %17254 = vmatprep.subr.mxu0 %v21020_v62 }
  0x5b   :  { %17268 = vmatprep.subr.mxu1 %v20917_v39  ;;  %17255 = vmatpush3.msra.mxu0 %v21020_v62  ;;  %v21221_v62 = vand.u32 4294901760, %v20866_v31 }
  0x5c   :  { %17269 = vmatpush3.msra.mxu1 %v20917_v39  ;;  %17256 = vmatprep.subr.mxu0 %v21037_v2 }
  0x5d   :  { %17270 = vmatprep.subr.mxu1 %v20924_v28  ;;  %17243 = vmatprep.mubr.f32.mxu1 %v21006_v58 }
  0x5e   :  { %17257 = vmatpush3.msra.mxu0 %v21037_v2  ;;  %17271 = vmatpush3.msra.mxu1 %v20924_v28  ;;  %v15213_v2 = vld [vmem:[%s26743_s1 + $0x88] sm:$0xff] }
  0x5f   :  { %17244 = vmatmul.mubr.f32.gmra.mxu1 %v21029_v0  ;;  %17258 = vmatprep.subr.mxu0 %v21063_v22 }
  0x60   :  { %17272 = vmatprep.subr.mxu1 %v20948_v4  ;;  %17259 = vmatpush3.msra.mxu0 %v21063_v22  ;;  %v21279_v22 = vand.u32 4294901760, %v15212_v17 }
  0x61   :  { %17273 = vmatpush3.msra.mxu1 %v20948_v4  ;;  %17260 = vmatprep.subr.mxu0 %v21078_v32 }
  0x62   :  { %17274 = vmatprep.subr.mxu1 %v20962_v46  ;;  %17261 = vmatpush3.msra.mxu0 %v21078_v32 }
  0x63   :  { %17262 = vmatprep.mubr.f32.mxu0 %v21003_v57  ;;  %17275 = vmatpush3.msra.mxu1 %v20962_v46 }
  0x64   :  { %17263 = vmatmul.mubr.f32.vlgmr.msra.gmra.mxu0 %v21017_v61  ;;  %17276 = vmatprep.subr.mxu1 %v20976_v49  ;;  %v15214_v61 = vld [vmem:[%s26743_s1 + $0x90] sm:$0xff] }
  0x65   :  { %17290 = vmatprep.subr.mxu0 %v20967_v5  ;;  %17277 = vmatpush3.msra.mxu1 %v20976_v49 }
  0x66   :  { %17291 = vmatpush3.msra.mxu0 %v20967_v5  ;;  %17278 = vmatprep.subr.mxu1 %v20990_v53  ;;  %v21173_v5 = vand.u32 4294901760, %v15219_v41 }
  0x67   :  { %17292 = vmatprep.subr.mxu0 %v20986_v9  ;;  %17265 = vmatprep.mubr.f32.mxu0 %v21046_v12 }
  0x68   :  { %17279 = vmatpush3.msra.mxu1 %v20990_v53  ;;  %17293 = vmatpush3.msra.mxu0 %v20986_v9  ;;  %v15217_v9 = vld [vmem:[%s26743_s1 + $0xa8] sm:$0xff]  ;;  %v21194_v55 = vsub.f32 %v15219_v41, %v21173_v5  ;;  %v1559_v41 = vand.u32 4294901760, %v21354_v47 }
  0x69   :  { %17266 = vmatmul.mubr.f32.gmra.mxu0 %v21060_v15  ;;  %17280 = vmatprep.subr.mxu1 %v21026_v63  ;;  %v21198_v57 = vand.u32 4294901760, %v15217_v9 }
  0x6a   :  { %17294 = vmatprep.subr.mxu0 %v21011_v59  ;;  %17281 = vmatpush3.msra.mxu1 %v21026_v63 }
  0x6b   :  { %17295 = vmatpush3.msra.mxu0 %v21011_v59  ;;  %17282 = vmatprep.subr.mxu1 %v21041_v7  ;;  %v21206_v59 = vsub.f32 %v15218_v44, %v21180_v50  ;;  %v1560_v44 = vsub.f32 %v21354_v47, %v1559_v41 }
  0x6c   :  { %17296 = vmatprep.subr.mxu0 %v21034_v1  ;;  %17283 = vmatpush3.msra.mxu1 %v21041_v7 }
  0x6d   :  { %17284 = vmatprep.mubr.f32.mxu1 %v838_v8  ;;  %17297 = vmatpush3.msra.mxu0 %v21034_v1  ;;  %v21228_v1 = vsub.f32 %v15217_v9, %v21198_v57  ;;  %v21243_v8 = vand.u32 4294901760, %v15214_v61  ;;  %v1551_v9 = vand.u32 4294901760, %v1550_v38 }
  0x6e   :  { %17285 = vmatmul.mubr.f32.vlgmr.msra.gmra.mxu1 %v848_v13  ;;  %17298 = vmatprep.subr.mxu0 %v21054_v14  ;;  %v21257_v13 = vsub.f32 %v20866_v31, %v21221_v62 }
  0x6f   :  { %17312 = vmatprep.subr.mxu1 %v20917_v39  ;;  %17299 = vmatpush3.msra.mxu0 %v21054_v14  ;;  %v21261_v14 = vand.u32 4294901760, %v15213_v2  ;;  %v21264_v19 = vand.u32 4294901760, %v21228_v1 }
  0x70   :  { %17313 = vmatpush3.msra.mxu1 %v20917_v39  ;;  %17300 = vmatprep.subr.mxu0 %v21070_v16  ;;  %v15216_v39 = vld [vmem:[%s26743_s1 + $0xa0] sm:$0xff] }
  0x71   :  { %17314 = vmatprep.subr.mxu1 %v20924_v28  ;;  %17287 = vmatprep.mubr.f32.mxu1 %v858_v30  ;;  %v21210_v60 = vand.u32 4294901760, %v15216_v39  ;;  %v21298_v32 = vsub.f32 %v15213_v2, %v21261_v14 }
  0x72   :  { %17301 = vmatpush3.msra.mxu0 %v21070_v16  ;;  %17315 = vmatpush3.msra.mxu1 %v20924_v28  ;;  %v15215_v28 = vld [vmem:[%s26743_s1 + $0x98] sm:$0xff]  ;;  %v21285_v16 = vsub.f32 %v15214_v61, %v21243_v8 }
  0x73   :  { %17288 = vmatmul.mubr.f32.gmra.mxu1 %v868_v23  ;;  %17302 = vmatprep.subr.mxu0 %v21089_v34  ;;  %v21225_v11 = vand.u32 4294901760, %v15215_v28  ;;  %v21246_v12 = vsub.f32 %v15216_v39, %v21210_v60  ;;  %v21311_v23 = vsub.f32 %v15212_v17, %v21279_v22  ;;  %v21321_v37 = vand.u32 4294901760, %v21298_v32 }
  0x74   :  { %17316 = vmatprep.subr.mxu1 %v20948_v4  ;;  %17303 = vmatpush3.msra.mxu0 %v21089_v34  ;;  %v21308_v21 = vand.u32 4294901760, %v21285_v16  ;;  %v1561_v39 = vand.u32 4294901760, %v1560_v44 }
  0x75   :  { %17317 = vmatpush3.msra.mxu1 %v20948_v4  ;;  %17304 = vmatprep.subr.mxu0 %v21100_v35  ;;  %v21215_v4 = vand.u32 4294901760, %v21194_v55  ;;  %v21267_v15 = vsub.f32 %v15215_v28, %v21225_v11  ;;  %v21282_v20 = vand.u32 4294901760, %v21246_v12  ;;  %v21334_v29 = vand.u32 4294901760, %v21311_v23 }
  0x76   :  { %17318 = vmatprep.subr.mxu1 %v20962_v46  ;;  %17305 = vmatpush3.msra.mxu0 %v21100_v35  ;;  %v1622_v35 = vsub.f32 %v21285_v16, %v21308_v21  ;;  %v1629_v40 = vsub.f32 %v21298_v32, %v21321_v37 }
  0x77   :  { %17306 = vmatprep.mubr.f32.mxu0 %v20972_v48  ;;  %17319 = vmatpush3.msra.mxu1 %v20962_v46  ;;  %v21233_v46 = vand.u32 4294901760, %v21206_v59  ;;  %v21295_v30 = vand.u32 4294901760, %v21267_v15  ;;  %v1636_v45 = vsub.f32 %v21311_v23, %v21334_v29 }
  0x78   :  { %17307 = vmatmul.mubr.f32.vlgmr.msra.gmra.mxu0 %v20981_v51  ;;  %17320 = vmatprep.subr.mxu1 %v20976_v49  ;;  %v1630_v24 = vand.u32 4294901760, %v1629_v40 }
  0x79   :  { %17334 = vmatprep.subr.mxu0 %v21173_v5  ;;  %17321 = vmatpush3.msra.mxu1 %v20976_v49  ;;  %v1587_v49 = vsub.f32 %v21194_v55, %v21215_v4  ;;  %v1594_v31 = vsub.f32 %v21206_v59, %v21233_v46  ;;  %v1615_v34 = vsub.f32 %v21267_v15, %v21295_v30  ;;  %v1637_v10 = vand.u32 4294901760, %v1636_v45 }
  0x7a   :  { %17335 = vmatpush3.msra.mxu0 %v21173_v5  ;;  %17322 = vmatprep.subr.mxu1 %v20990_v53 }
  0x7b   :  { %17336 = vmatprep.subr.mxu0 %v21180_v50  ;;  %17309 = vmatprep.mubr.f32.mxu0 %v21006_v58  ;;  %v1588_v27 = vand.u32 4294901760, %v1587_v49  ;;  %v1595_v36 = vand.u32 4294901760, %v1594_v31  ;;  %v1616_v56 = vand.u32 4294901760, %v1615_v34 }
  0x7c   :  { %17323 = vmatpush3.msra.mxu1 %v20990_v53  ;;  %17337 = vmatpush3.msra.mxu0 %v21180_v50  ;;  %v21275_v53 = vsub.f32 %v20871_v33, %v21239_v6  ;;  %v1529_v33 = vand.u32 4294901760, %v21257_v13 }
  0x7d   :  { %17310 = vmatmul.mubr.f32.gmra.mxu0 %v21029_v0  ;;  %17324 = vmatprep.subr.mxu1 %v21026_v63 }
  0x7e   :  { %17338 = vmatprep.subr.mxu0 %v21198_v57  ;;  %17325 = vmatpush3.msra.mxu1 %v21026_v63  ;;  %v1601_v63 = vsub.f32 %v21228_v1, %v21264_v19  ;;  %v1539_v18 = vand.u32 4294901760, %v21275_v53 }
  0x7f   :  { %17339 = vmatpush3.msra.mxu0 %v21198_v57  ;;  %17326 = vmatprep.subr.mxu1 %v21041_v7 }
  0x80   :  { %17340 = vmatprep.subr.mxu0 %v21210_v60  ;;  %17327 = vmatpush3.msra.mxu1 %v21041_v7  ;;  %v1608_v7 = vsub.f32 %v21246_v12, %v21282_v20  ;;  %v1540_v26 = vsub.f32 %v21275_v53, %v1539_v18 }
  0x81   :  { %17328 = vmatprep.mubr.f32.mxu1 %v20972_v48  ;;  %17341 = vmatpush3.msra.mxu0 %v21210_v60  ;;  %v1530_v48 = vsub.f32 %v21257_v13, %v1529_v33 }
  0x82   :  { %17329 = vmatmul.mubr.f32.vlgmr.msra.gmra.mxu1 %v20981_v51  ;;  %17342 = vmatprep.subr.mxu0 %v21225_v11  ;;  %v1602_v51 = vand.u32 4294901760, %v1601_v63  ;;  %v1609_v52 = vand.u32 4294901760, %v1608_v7  ;;  %v1541_v43 = vand.u32 4294901760, %v1540_v26 }
  0x83   :  { %17356 = vmatprep.subr.mxu1 %v1588_v27  ;;  %17343 = vmatpush3.msra.mxu0 %v21225_v11 }
  0x84   :  { %17357 = vmatpush3.msra.mxu1 %v1588_v27  ;;  %17344 = vmatprep.subr.mxu0 %v21243_v8 }
  0x85   :  { %17358 = vmatprep.subr.mxu1 %v1595_v36  ;;  %17331 = vmatprep.mubr.f32.mxu1 %v21006_v58  ;;  %v1531_v58 = vand.u32 4294901760, %v1530_v48 }
  0x86   :  { %17345 = vmatpush3.msra.mxu0 %v21243_v8  ;;  %17359 = vmatpush3.msra.mxu1 %v1595_v36 }
  0x87   :  { %17332 = vmatmul.mubr.f32.gmra.mxu1 %v21029_v0  ;;  %17346 = vmatprep.subr.mxu0 %v21261_v14  ;;  %v1623_v0 = vand.u32 4294901760, %v1622_v35 }
  0x88   :  { %17360 = vmatprep.subr.mxu1 %v1602_v51  ;;  %17347 = vmatpush3.msra.mxu0 %v21261_v14 }
  0x89   :  { %17361 = vmatpush3.msra.mxu1 %v1602_v51  ;;  %17348 = vmatprep.subr.mxu0 %v21279_v22 }
  0x8a   :  { %17362 = vmatprep.subr.mxu1 %v1609_v52  ;;  %17349 = vmatpush3.msra.mxu0 %v21279_v22 }
  0x8b   :  { %17363 = vmatpush3.msra.mxu1 %v1609_v52  ;;  %17350 = vmatprep.mubr.f32.mxu0 %v1531_v58 }
  0x8c   :  { %17364 = vmatprep.subr.mxu1 %v1616_v56  ;;  %17378 = vmatprep.subr.mxu0 %v21194_v55 }
  0x8d   :  { %17351 = vmatmul.mubr.f32.vlgmr.msra.gmra.mxu0 %v1541_v43  ;;  %17365 = vmatpush3.msra.mxu1 %v1616_v56 }
  0x8e   :  { %17379 = vmatpush3.msra.mxu0 %v21194_v55  ;;  %17366 = vmatprep.subr.mxu1 %v1623_v0 }
  0x8f   :  { %17380 = vmatprep.subr.mxu0 %v21206_v59  ;;  %17367 = vmatpush3.msra.mxu1 %v1623_v0 }
  0x90   :  { %17381 = vmatpush3.msra.mxu0 %v21206_v59  ;;  %17368 = vmatprep.subr.mxu1 %v1630_v24 }
  0x91   :  { %17382 = vmatprep.subr.mxu0 %v21228_v1  ;;  %17369 = vmatpush3.msra.mxu1 %v1630_v24 }
  0x92   :  { %17383 = vmatpush3.msra.mxu0 %v21228_v1  ;;  %17370 = vmatprep.subr.mxu1 %v1637_v10 }
  0x93   :  { %17384 = vmatprep.subr.mxu0 %v21246_v12  ;;  %17371 = vmatpush3.msra.mxu1 %v1637_v10 }
  0x94   :  { %17372 = vmatprep.mubr.f32.mxu1 %v21221_v62  ;;  %17385 = vmatpush3.msra.mxu0 %v21246_v12 }
  0x95   :  { %17373 = vmatmul.mubr.f32.vlgmr.msra.gmra.mxu1 %v21239_v6  ;;  %17386 = vmatprep.subr.mxu0 %v21267_v15 }
  0x96   :  { %17400 = vmatprep.subr.mxu1 %v21173_v5  ;;  %17387 = vmatpush3.msra.mxu0 %v21267_v15 }
  0x97   :  { %17401 = vmatpush3.msra.mxu1 %v21173_v5  ;;  %17388 = vmatprep.subr.mxu0 %v21285_v16 }
  0x98   :  { %17402 = vmatprep.subr.mxu1 %v21180_v50  ;;  %17353 = vmatprep.mubr.f32.mxu0 %v1551_v9 }
  0x99   :  { %17389 = vmatpush3.msra.mxu0 %v21285_v16  ;;  %17403 = vmatpush3.msra.mxu1 %v21180_v50 }
  0x9a   :  { %17354 = vmatmul.mubr.f32.gmra.mxu0 %v1561_v39  ;;  %17390 = vmatprep.subr.mxu0 %v21298_v32 }
  0x9b   :  { %17404 = vmatprep.subr.mxu1 %v21198_v57  ;;  %17391 = vmatpush3.msra.mxu0 %v21298_v32 }
  0x9c   :  { %17405 = vmatpush3.msra.mxu1 %v21198_v57  ;;  %17392 = vmatprep.subr.mxu0 %v21311_v23 }
  0x9d   :  { %17406 = vmatprep.subr.mxu1 %v21210_v60  ;;  %17393 = vmatpush3.msra.mxu0 %v21311_v23 }
  0x9e   :  { %17394 = vmatprep.mubr.f32.mxu0 %v21257_v13  ;;  %17407 = vmatpush3.msra.mxu1 %v21210_v60 }
  0x9f   :  { %17375 = vmatprep.mubr.f32.mxu1 %v21324_v25  ;;  %17395 = vmatmul.mubr.f32.vlgmr.msra.gmra.mxu0 %v21275_v53 }
  0xa0   :  { %17408 = vmatprep.subr.mxu1 %v21225_v11  ;;  %17422 = vmatprep.subr.mxu0 %v21215_v4 }
  0xa1   :  { %17376 = vmatmul.mubr.f32.gmra.mxu1 %v21337_v3  ;;  %17423 = vmatpush3.msra.mxu0 %v21215_v4 }
  0xa2   :  { %17409 = vmatpush3.msra.mxu1 %v21225_v11  ;;  %17424 = vmatprep.subr.mxu0 %v21233_v46 }
  0xa3   :  { %17410 = vmatprep.subr.mxu1 %v21243_v8  ;;  %17397 = vmatprep.mubr.f32.mxu0 %v21346_v42 }
  0xa4   :  { %17411 = vmatpush3.msra.mxu1 %v21243_v8  ;;  %17425 = vmatpush3.msra.mxu0 %v21233_v46 }
  0xa5   :  { %17398 = vmatmul.mubr.f32.gmra.mxu0 %v21354_v47  ;;  %17412 = vmatprep.subr.mxu1 %v21261_v14 }
  0xa6   :  { %17426 = vmatprep.subr.mxu0 %v21264_v19  ;;  %17413 = vmatpush3.msra.mxu1 %v21261_v14 }
  0xa7   :  { %17427 = vmatpush3.msra.mxu0 %v21264_v19  ;;  %17414 = vmatprep.subr.mxu1 %v21279_v22 }
  0xa8   :  { %17428 = vmatprep.subr.mxu0 %v21282_v20  ;;  %17415 = vmatpush3.msra.mxu1 %v21279_v22 }
  0xa9   :  { %17416 = vmatprep.mubr.f32.mxu1 %v1529_v33  ;;  %17429 = vmatpush3.msra.mxu0 %v21282_v20 }
  0xaa   :  { %17417 = vmatmul.mubr.f32.vlgmr.msra.gmra.mxu1 %v1539_v18  ;;  %17430 = vmatprep.subr.mxu0 %v21295_v30 }
  0xab   :  { %17444 = vmatprep.subr.mxu1 %v21173_v5  ;;  %17431 = vmatpush3.msra.mxu0 %v21295_v30 }
  0xac   :  { %17445 = vmatpush3.msra.mxu1 %v21173_v5  ;;  %17432 = vmatprep.subr.mxu0 %v21308_v21 }
  0xad   :  { %17446 = vmatprep.subr.mxu1 %v21180_v50  ;;  %17419 = vmatprep.mubr.f32.mxu1 %v1549_v54 }
  0xae   :  { %17433 = vmatpush3.msra.mxu0 %v21308_v21  ;;  %17447 = vmatpush3.msra.mxu1 %v21180_v50  ;;  %v26750_v50 = vmov 0.0  }
  0xaf   :  { %17420 = vmatmul.mubr.f32.gmra.mxu1 %v1559_v41  ;;  %17434 = vmatprep.subr.mxu0 %v21321_v37  ;;  %4868 = vst [vmem:[#allocation2] sm:$0xff] %v26750_v50  ;;  %4869 = vst [vmem:[#allocation2 + $0x8] sm:$0xff] %v26750_v50 }
  0xb0   :  { %17448 = vmatprep.subr.mxu1 %v21198_v57  ;;  %17435 = vmatpush3.msra.mxu0 %v21321_v37  ;;  %4870 = vst [vmem:[#allocation2 + $0x10] sm:$0x3] %v26750_v50  ;;  %4871 = vst [vmem:[#allocation2 + $0x18] sm:$0xff] %v26750_v50 }
  0xb1   :  { %17449 = vmatpush3.msra.mxu1 %v21198_v57  ;;  %17436 = vmatprep.subr.mxu0 %v21334_v29  ;;  %4872 = vst [vmem:[#allocation2 + $0x20] sm:$0xff] %v26750_v50  ;;  %4873 = vst [vmem:[#allocation2 + $0x28] sm:$0x3] %v26750_v50 }
  0xb2   :  { %17450 = vmatprep.subr.mxu1 %v21210_v60  ;;  %17437 = vmatpush3.msra.mxu0 %v21334_v29 }
  0xb3   :  { %17438 = vmatprep.mubr.f32.mxu0 %v21221_v62  ;;  %17451 = vmatpush3.msra.mxu1 %v21210_v60 }
  0xb4   :  { %17439 = vmatmul.mubr.f32.vlgmr.msra.gmra.mxu0 %v21239_v6  ;;  %17452 = vmatprep.subr.mxu1 %v21225_v11 }
  0xb5   :  { %17453 = vmatpush3.msra.mxu1 %v21225_v11  ;;  %17441 = vmatprep.mubr.f32.mxu0 %v21324_v25 }
  0xb6   :  { %17454 = vmatprep.subr.mxu1 %v21243_v8  ;;  %17460 = vmatprep.mubr.f32.mxu1 %v21221_v62 }
  0xb7   :  { %17455 = vmatpush3.msra.mxu1 %v21243_v8  ;;  %17466 = vmatprep.subr.mxu0 %v26750_v50 }
  0xb8   :  { %17442 = vmatmul.mubr.f32.gmra.mxu0 %v21337_v3  ;;  %17456 = vmatprep.subr.mxu1 %v21261_v14 }
  0xb9   :  { %17457 = vmatpush3.msra.mxu1 %v21261_v14  ;;  %17474 = vmatprep.mubr.msk.f32.mxu0 %vm20609_vm1, %v26750_v50 }
  0xba   :  { %17458 = vmatprep.subr.mxu1 %v21279_v22 }
  0xbb   :  { %17459 = vmatpush3.msra.mxu1 %v21279_v22 }
  0xbc   :  { %17461 = vmatmul.mubr.f32.vlgmr.msra.gmra.mxu1 %v21239_v6  ;;  %17477 = vmatprep.subr.mxu1 %v26750_v50 }
  0xbd   :  { %17463 = vmatprep.mubr.f32.mxu1 %v21324_v25 }
  0xc0   :  { %17464 = vmatmul.mubr.f32.gmra.mxu1 %v21337_v3 }
  0xc1   :  { %17485 = vmatprep.mubr.msk.f32.mxu1 %vm20609_vm1, %v26750_v50 }
  0xd5   :  { %v21452_v5 = vpop.f32.mrf.mxu0 }
  0xd7   :  { %v164_v55 = vpop.f32.mrf.mxu0 }
  0xdd   :  { %v17110_v59 = vpop.f32.mrf.mxu1 }
  0xde   :  { %v312_v24 = vadd.f32 %v17110_v59, %v21452_v5 }
  0xdf   :  { %v305_v4 = vpop.f32.mrf.mxu1 }
  0xe0   :  { %v306_v10 = vadd.f32 %v305_v4, %v164_v55 }
  0xe2   :  { %v17091_v57 = vpop.f32.mrf.mxu0 }
  0xe4   :  { %v184_v28 = vpop.f32.mrf.mxu0 }
  0xe7   :  { %v17132_v60 = vpop.f32.mrf.mxu0 }
  0xe8   :  { %v419_v41 = vadd.f32 %v17132_v60, %v312_v24 }
  0xe9   :  { %v17113_v61 = vpop.f32.mrf.mxu1  ;;  %v411_v62 = vpop.f32.mrf.mxu0 }
  0xea   :  { %v324_v38 = vadd.f32 %v17113_v61, %v17091_v57  ;;  %v412_v9 = vadd.f32 %v411_v62, %v306_v10 }
  0xeb   :  { %v317_v11 = vpop.f32.mrf.mxu1 }
  0xec   :  { %v318_v39 = vadd.f32 %v317_v11, %v184_v28 }
  0xed   :  { %v17135_v1 = vpop.f32.mrf.mxu0 }
  0xef   :  { %v425_v2 = vpop.f32.mrf.mxu0 }
  0xf2   :  { %v17154_v46 = vpop.f32.mrf.mxu1 }
  0xf3   :  { %v522_v50 = vadd.f32 %v17154_v46, %v419_v41 }
  0xf4   :  { %v513_v6 = vpop.f32.mrf.mxu1 }
  0xf7   :  { %v17157_v12 = vpop.f32.mrf.mxu1 }
  0xf9   :  { %v529_v17 = vpop.f32.mrf.mxu1 }
  0xfc   :  { %v17176_v8 = vpop.f32.mrf.mxu0 }
  0xfe   :  { %v632_v49 = vpop.f32.mrf.mxu0 }
 0x101   :  { %v17179_v13 = vpop.f32.mrf.mxu0 }
 0x103   :  { %v644_v19 = vpop.f32.mrf.mxu0 }
 0x106   :  { %v17198_v14 = vpop.f32.mrf.mxu1 }
 0x108   :  { %v729_v15 = vpop.f32.mrf.mxu1 }
 0x10b   :  { %v17201_v53 = vpop.f32.mrf.mxu1 }
 0x10d   :  { %v741_v20 = vpop.f32.mrf.mxu1 }
 0x110   :  { %v17220_v31 = vpop.f32.mrf.mxu0 }
 0x112   :  { %v842_v22 = vpop.f32.mrf.mxu0 }
 0x115   :  { %v17223_v16 = vpop.f32.mrf.mxu0 }
 0x117   :  { %v21466_v33 = vpop.f32.mrf.mxu0 }
 0x11a   :  { %v17242_v27 = vpop.f32.mrf.mxu1 }
 0x11c   :  { %v983_v63 = vpop.f32.mrf.mxu1 }
 0x11f   :  { %v21468_v32 = vpop.f32.mrf.mxu1 }
 0x121   :  { %v21472_v18 = vpop.f32.mrf.mxu1 }
 0x124   :  { %v17264_v30 = vpop.f32.mrf.mxu0 }
 0x126   :  { %v21470_v36 = vpop.f32.mrf.mxu0 }
 0x129   :  { %v21474_v7 = vpop.f32.mrf.mxu0 }
 0x12b   :  { %v21478_v23 = vpop.f32.mrf.mxu0 }
 0x12c   :  { %27007 = vst [vmem:[#allocation3_spill] sm:$0xff] %v21478_v23 }
 0x12e   :  { %v21476_v21 = vpop.f32.mrf.mxu1 }
 0x130   :  { %v21480_v48 = vpop.f32.mrf.mxu1 }
 0x133   :  { %v21484_v34 = vpop.f32.mrf.mxu1 }
 0x134   :  { %27009 = vst [vmem:[#allocation5_spill] sm:$0xff] %v21484_v34 }
 0x135   :  { %v21488_v25 = vpop.f32.mrf.mxu1 }
 0x136   :  { %27011 = vst [vmem:[#allocation7_spill] sm:$0xff] %v21488_v25 }
 0x138   :  { %v21482_v51 = vpop.f32.mrf.mxu0 }
 0x139   :  { %27008 = vst [vmem:[#allocation4_spill] sm:$0xff] %v21482_v51 }
 0x13a   :  { %v21486_v37 = vpop.f32.mrf.mxu0 }
 0x13b   :  { %27010 = vst [vmem:[#allocation6_spill] sm:$0xff] %v21486_v37 }
 0x13d   :  { %v21490_v26 = vpop.f32.mrf.mxu0 }
 0x13e   :  { %27012 = vst [vmem:[#allocation8_spill] sm:$0xff] %v21490_v26  ;;  %v639_v26 = vadd.f32 %v17176_v8, %v522_v50 }
 0x13f   :  { %v21494_v35 = vpop.f32.mrf.mxu0 }
 0x140   :  { %27014 = vst [vmem:[#allocation10_spill] sm:$0xff] %v21494_v35  ;;  %v736_v23 = vadd.f32 %v17198_v14, %v639_v26  ;;  %v20610_v26 = vmov 0  }
 0x142   :  { %v21492_v52 = vpop.f32.mrf.mxu1  ;;  %v853_v55 = vadd.f32 %v17220_v31, %v736_v23 }
 0x143   :  { %27013 = vst [vmem:[#allocation9_spill] sm:$0xff] %v21492_v52  ;;  %v426_v52 = vadd.f32 %v425_v2, %v318_v39 }
 0x144   :  { %v21496_v29 = vpop.f32.mrf.mxu1  ;;  %v990_v62 = vadd.f32 %v17242_v27, %v853_v55 }
 0x145   :  { %27015 = vst [vmem:[#allocation11_spill] sm:$0xff] %v21496_v29  ;;  %v514_v29 = vadd.f32 %v513_v6, %v412_v9  ;;  %v530_v51 = vadd.f32 %v529_v17, %v426_v52 }
 0x146   :  { %v1097_v2 = vadd.f32 %v17264_v30, %v990_v62  ;;  %v27018_v30 = vld [vmem:[#allocation4_spill] sm:$0xff] }
 0x147   :  { %v21498_v58 = vpop.f32.mrf.mxu1  ;;  %v633_v34 = vadd.f32 %v632_v49, %v514_v29  ;;  %v645_v4 = vadd.f32 %v644_v19, %v530_v51 }
 0x148   :  { %27016 = vst [vmem:[#allocation12_spill] sm:$0xff] %v21498_v58  ;;  %v433_v58 = vadd.f32 %v17135_v1, %v324_v38  ;;  %v1200_v31 = vadd.f32 %v21476_v21, %v1097_v2  ;;  %v27019_v21 = vld [vmem:[#allocation3_spill] sm:$0xff] }
 0x149   :  { %v21500_v42 = vpop.f32.mrf.mxu1  ;;  %v730_v59 = vadd.f32 %v729_v15, %v633_v34  ;;  %v742_v50 = vadd.f32 %v741_v20, %v645_v4 }
 0x14a   :  { %27017 = vst [vmem:[#allocation13_spill] sm:$0xff] %v21500_v42  ;;  %v538_v37 = vadd.f32 %v17157_v12, %v433_v58  ;;  %v1317_v23 = vadd.f32 %v27018_v30, %v1200_v31  ;;  %v27022_v58 = vld [vmem:[#allocation9_spill] sm:$0xff] }
 0x14b   :  { %v843_v28 = vadd.f32 %v842_v22, %v730_v59  ;;  %v863_v14 = vadd.f32 %v21466_v33, %v742_v50  ;;  %v27028_v59 = vld [vmem:[#allocation10_spill] sm:$0xff] }
 0x14c   :  { %v651_v5 = vadd.f32 %v17179_v13, %v538_v37  ;;  %v27025_v24 = vld [vmem:[#allocation11_spill] sm:$0xff] }
 0x14d   :  { %v17352_v3 = vpop.f32.mrf.mxu0  ;;  %v984_v6 = vadd.f32 %v983_v63, %v843_v28  ;;  %v996_v20 = vadd.f32 %v21472_v18, %v863_v14 }
 0x14e   :  { %v748_v61 = vadd.f32 %v17201_v53, %v651_v5 }
 0x14f   :  { %v1533_v56 = vpop.f32.mrf.mxu0  ;;  %v1090_v19 = vadd.f32 %v21470_v36, %v984_v6  ;;  %v2126_v36 = vsel %vm2124_vm2, 1.0, %v20610_v26  ;;  %v1104_v52 = vadd.f32 %v27019_v21, %v996_v20  ;;  %v26752_v21 = vmov 1.0  }
 0x150   :  { %v873_v46 = vadd.f32 %v17223_v16, %v748_v61  ;;  %v21519_v38 = vsub.f32 %v2126_v36, %v2126_v36 }
 0x151   :  { %v1192_v63 = vadd.f32 %v21480_v48, %v1090_v19 }
 0x152   :  { %v1002_v15 = vadd.f32 %v21468_v32, %v873_v46  ;;  %27026 = vst [vmem:[#allocation4_spill] sm:$0xff] %v21519_v38  ;;  %v21531_v50 = vand.u32 4294901760, %v21519_v38  ;;  %v27032_v46 = vld [vmem:[#allocation13_spill] sm:$0xff] }
 0x154   :  { %v1111_v16 = vadd.f32 %v21474_v7, %v1002_v15  ;;  %v1414_v7 = vadd.f32 %v27022_v58, %v1317_v23  ;;  %v2200_v14 = vsub.f32 %v21519_v38, %v21531_v50 }
 0x155   :  { %v17374_v43 = vpop.f32.mrf.mxu1 }
 0x156   :  { %v1681_v1 = vadd.f32 %v17374_v43, %v17352_v3  ;;  %v27021_v3 = vld [vmem:[#allocation6_spill] sm:$0xff] }
 0x157   :  { %v1674_v45 = vpop.f32.mrf.mxu1  ;;  %v1311_v18 = vadd.f32 %v27021_v3, %v1192_v63  ;;  %27031 = vst [vmem:[#allocation6_spill] sm:$0xff] %v21531_v50 }
 0x158   :  { %v1675_v49 = vadd.f32 %v1674_v45, %v1533_v56  ;;  %v27024_v45 = vld [vmem:[#allocation8_spill] sm:$0xff] }
 0x15a   :  { %v17355_v40 = vpop.f32.mrf.mxu0 }
 0x15c   :  { %v1553_v0 = vpop.f32.mrf.mxu0 }
 0x15f   :  { %v17396_v47 = vpop.f32.mrf.mxu0 }
 0x160   :  { %v1788_v17 = vadd.f32 %v17396_v47, %v1681_v1 }
 0x161   :  { %v17377_v54 = vpop.f32.mrf.mxu1  ;;  %v1780_v44 = vpop.f32.mrf.mxu0 }
 0x162   :  { %v1693_v13 = vadd.f32 %v17377_v54, %v17355_v40  ;;  %v1781_v53 = vadd.f32 %v1780_v44, %v1675_v49  ;;  %v1408_v54 = vadd.f32 %v27025_v24, %v1311_v18 }
 0x163   :  { %v1686_v35 = vpop.f32.mrf.mxu1 }
 0x164   :  { %v1687_v22 = vadd.f32 %v1686_v35, %v1553_v0  ;;  %v27020_v35 = vld [vmem:[#allocation5_spill] sm:$0xff]  ;;  %v27023_v0 = vld [vmem:[#allocation7_spill] sm:$0xff] }
 0x165   :  { %v17399_v25 = vpop.f32.mrf.mxu0  ;;  %v1216_v29 = vadd.f32 %v27020_v35, %v1111_v16  ;;  %v21566_v16 = vand.u32 4294901760, %v2200_v14 }
 0x166   :  { %v1802_v33 = vadd.f32 %v17399_v25, %v1693_v13  ;;  %v1208_v25 = vadd.f32 %v27023_v0, %v1104_v52 }
 0x167   :  { %v1794_v60 = vpop.f32.mrf.mxu0  ;;  %v1329_v47 = vadd.f32 %v27024_v45, %v1216_v29  ;;  %27036 = vst [vmem:[#allocation8_spill] sm:$0xff] %v21566_v16 }
 0x168   :  { %v1795_v48 = vadd.f32 %v1794_v60, %v1687_v22  ;;  %v1323_v55 = vadd.f32 %v27028_v59, %v1208_v25  ;;  %v27029_v60 = vld [vmem:[#allocation12_spill] sm:$0xff] }
 0x16a   :  { %v17418_v42 = vpop.f32.mrf.mxu1  ;;  %v1420_v6 = vadd.f32 %v27032_v46, %v1323_v55  ;;  %v46_v55 = vld [vmem:[%s26745_s4 + $0x78] sm:$0xff] }
 0x16b   :  { %v1891_v27 = vadd.f32 %v17418_v42, %v1788_v17 }
 0x16c   :  { %v1882_v57 = vpop.f32.mrf.mxu1 }
 0x16d   :  { %v1883_v37 = vadd.f32 %v1882_v57, %v1781_v53  ;;  %v1426_v57 = vadd.f32 %v27029_v60, %v1329_v47  ;;  %v27035_v53 = vmov 0.0   ;;  %v45_v60 = vld [vmem:[%s26745_s4 + $0x70] sm:$0xff] }
 0x16f   :  { %v17421_v8 = vpop.f32.mrf.mxu1 }
 0x170   :  { %v1907_v40 = vadd.f32 %v17421_v8, %v1802_v33 }
 0x171   :  { %v1898_v51 = vpop.f32.mrf.mxu1 }
 0x172   :  { %v1899_v44 = vadd.f32 %v1898_v51, %v1795_v48 }
 0x174   :  { %v17440_v11 = vpop.f32.mrf.mxu0 }
 0x175   :  { %v2008_v32 = vadd.f32 %v17440_v11, %v1891_v27 }
 0x176   :  { %v2001_v12 = vpop.f32.mrf.mxu0 }
 0x177   :  { %v2002_v42 = vadd.f32 %v2001_v12, %v1883_v37 }
 0x178   :  { %v17443_v34 = vpop.f32.mrf.mxu0 }
 0x179   :  { %v2020_v9 = vadd.f32 %v17443_v34, %v1907_v40 }
 0x17a   :  { %v2013_v10 = vpop.f32.mrf.mxu0 }
 0x17b   :  { %v2014_v61 = vadd.f32 %v2013_v10, %v1899_v44 }
 0x17c   :  { %v17462_v56 = vpop.f32.mrf.mxu1 }
 0x17d   :  { %v2105_v43 = vadd.f32 %v17462_v56, %v2008_v32 }
 0x17e   :  { %v2098_v41 = vpop.f32.mrf.mxu1 }
 0x17f   :  { %v21521_v39 = vadd.f32 %v2105_v43, %v1414_v7  ;;  %v2099_v5 = vadd.f32 %v2098_v41, %v2002_v42 }
 0x180   :  { %v17465_v4 = vpop.f32.mrf.mxu1 }
 0x181   :  { %27027 = vst [vmem:[#allocation3_spill] sm:$0xff] %v21521_v39  ;;  %v21525_v28 = vadd.f32 %v2099_v5, %v1408_v54  ;;  %v2117_v62 = vadd.f32 %v17465_v4, %v2020_v9  ;;  %v21528_v11 = vand.u32 4294901760, %v21521_v39  ;;  %v2614_v3 = vmul.f32 %v21521_v39, %v21521_v39  ;;  %v44_v4 = vld [vmem:[%s26745_s4 + $0x68] sm:$0xff] }
 0x182   :  { %v2110_v1 = vpop.f32.mrf.mxu1 }
 0x183   :  { %27030 = vst [vmem:[#allocation5_spill] sm:$0xff] %v21525_v28  ;;  %v21534_v2 = vadd.f32 %v2117_v62, %v1426_v57  ;;  %v2111_v8 = vadd.f32 %v2110_v1, %v2014_v61  ;;  %v21537_v12 = vand.u32 4294901760, %v21525_v28  ;;  %v21546_v13 = vsub.f32 %v21521_v39, %v21528_v11  ;;  %v43_v62 = vld [vmem:[%s26745_s4 + $0x60] sm:$0xff] }
 0x184   :  { %v2613_v58 = vmul.f32 %v21525_v28, %v21525_v28  ;;  %v21616_v56 = vand.u32 4294901760, %v2614_v3  ;;  %v21687_v57 = vand.u32 4294901760, %v46_v55  ;;  %v21698_v61 = vand.u32 4294901760, %v45_v60 }
 0x185   :  { %27033 = vst [vmem:[#allocation9_spill] sm:$0xff] %v21534_v2  ;;  %v21539_v49 = vadd.f32 %v2111_v8, %v1420_v6  ;;  %v21542_v17 = vand.u32 4294901760, %v21534_v2  ;;  %v21558_v31 = vsub.f32 %v21525_v28, %v21537_v12  ;;  %v2248_v20 = vand.u32 4294901760, %v21546_v13 }
 0x186   :  { %v2616_v52 = vmul.f32 %v21534_v2, %v21534_v2  ;;  %v21626_v40 = vand.u32 4294901760, %v2613_v58  ;;  %v21634_v42 = vsub.f32 %v2614_v3, %v21616_v56  ;;  %27037 = vst [vmem:[#allocation11_spill] sm:$0xff] %v21687_v57  ;;  %27038 = vst [vmem:[#allocation10_spill] sm:$0xff] %v21698_v61  ;;  %v21709_v1 = vand.u32 4294901760, %v44_v4 }
 0x187   :  { %27034 = vst [vmem:[#allocation7_spill] sm:$0xff] %v21539_v49  ;;  %17467 = vmatpush3.msra.mxu0 %v21542_v17  ;;  %v21552_v15 = vand.u32 4294901760, %v21539_v49  ;;  %v2233_v19 = vsub.f32 %v21534_v2, %v21542_v17  ;;  %v2255_v23 = vand.u32 4294901760, %v21558_v31  ;;  %v2249_v33 = vsub.f32 %v21546_v13, %v2248_v20 }
 0x188   :  { %17468 = vmatprep.subr.mxu0 %v27035_v53  ;;  %v2615_v35 = vmul.f32 %v21539_v49, %v21539_v49  ;;  %v21599_v29 = vand.u32 4294901760, %v2616_v52  ;;  %v21642_v0 = vsub.f32 %v2613_v58, %v21626_v40  ;;  %v2737_v47 = vand.u32 4294901760, %v21634_v42  ;;  %27040 = vst [vmem:[#allocation13_spill] sm:$0xff] %v21709_v1 }
 0x189   :  { %17469 = vmatpush3.msra.mxu0 %v21552_v15  ;;  %v2234_v22 = vand.u32 4294901760, %v2233_v19  ;;  %v2240_v27 = vsub.f32 %v21539_v49, %v21552_v15  ;;  %v2256_v32 = vsub.f32 %v21558_v31, %v2255_v23  ;;  %v2250_v26 = vand.u32 4294901760, %v2249_v33  ;;  %v41_v33 = vld [vmem:[%s26745_s4 + $0x50] sm:$0xff] }
 0x18a   :  { %17470 = vmatprep.subr.mxu0 %v27035_v53  ;;  %v21606_v18 = vand.u32 4294901760, %v2615_v35  ;;  %v21614_v7 = vsub.f32 %v2616_v52, %v21599_v29  ;;  %v2744_v54 = vand.u32 4294901760, %v21642_v0  ;;  %v2738_v41 = vsub.f32 %v21634_v42, %v2737_v47  ;;  %v40_v52 = vld [vmem:[%s26745_s4 + $0x48] sm:$0xff] }
 0x18b   :  { %17471 = vmatpush3.msra.mxu0 %v21528_v11  ;;  %v2235_v63 = vsub.f32 %v2233_v19, %v2234_v22  ;;  %v2241_v30 = vand.u32 4294901760, %v2240_v27  ;;  %v2257_v36 = vand.u32 4294901760, %v2256_v32  ;;  %v21715_v46 = vsub.f32 %v45_v60, %v21698_v61  ;;  %v35_v60 = vld [vmem:[%s26745_s4 + $0x20] sm:$0xff] }
 0x18c   :  { %17472 = vmatprep.subr.mxu0 %v27035_v53  ;;  %v21624_v48 = vsub.f32 %v2615_v35, %v21606_v18  ;;  %v2723_v43 = vand.u32 4294901760, %v21614_v7  ;;  %v2745_v9 = vsub.f32 %v21642_v0, %v2744_v54  ;;  %v2739_v5 = vand.u32 4294901760, %v2738_v41  ;;  %v36_v41 = vld [vmem:[%s26745_s4 + $0x28] sm:$0xff] }
 0x18d   :  { %17473 = vmatpush3.msra.mxu0 %v21537_v12  ;;  %v2236_v51 = vand.u32 4294901760, %v2235_v63  ;;  %v2242_v34 = vsub.f32 %v2240_v27, %v2241_v30  ;;  %27041 = vst [vmem:[#allocation14_spill] sm:$0xff] %v21715_v46  ;;  %v21717_v6 = vand.u32 4294901760, %v43_v62  ;;  %v21810_v32 = vand.u32 4294901760, %v41_v33 }
 0x18e   :  { %17488 = vmatprep.subr.mxu0 %v27035_v53  ;;  %17475 = vmatmul.mubr.f32.vlgmr.msra.gmra.mxu0 %v21566_v16  ;;  %v2730_v25 = vand.u32 4294901760, %v21624_v48  ;;  %v2724_v45 = vsub.f32 %v21614_v7, %v2723_v43  ;;  %v2746_v59 = vand.u32 4294901760, %v2745_v9  ;;  %v21830_v3 = vand.u32 4294901760, %v40_v52 }
 0x18f   :  { %17478 = vmatpush3.msra.mxu1 %v2236_v51  ;;  %17489 = vmatpush3.msra.mxu0 %v2233_v19  ;;  %v2243_v37 = vand.u32 4294901760, %v2242_v34  ;;  %27042 = vst [vmem:[#allocation15_spill] sm:$0xff] %v21717_v6  ;;  %v42_v51 = vld [vmem:[%s26745_s4 + $0x58] sm:$0xff]  ;;  %27055 = vst [vmem:[#allocation28_spill] sm:$0xff] %v21810_v32 }
 0x190   :  { %17479 = vmatprep.subr.mxu1 %v27035_v53  ;;  %17490 = vmatprep.subr.mxu0 %v27035_v53  ;;  %v2731_v24 = vsub.f32 %v21624_v48, %v2730_v25  ;;  %v2725_v10 = vand.u32 4294901760, %v2724_v45  ;;  %v21802_v34 = vand.u32 4294901760, %v42_v51  ;;  %27059 = vst [vmem:[#allocation32_spill] sm:$0xff] %v21830_v3  ;;  %v37_v45 = vld [vmem:[%s26745_s4 + $0x30] sm:$0xff] }
 0x191   :  { %17480 = vmatpush3.msra.mxu1 %v2243_v37  ;;  %17491 = vmatpush3.msra.mxu0 %v2240_v27 }
 0x192   :  { %17481 = vmatprep.subr.mxu1 %v27035_v53  ;;  %17492 = vmatprep.subr.mxu0 %v27035_v53  ;;  %v2732_v44 = vand.u32 4294901760, %v2731_v24  ;;  %27053 = vst [vmem:[#allocation26_spill] sm:$0xff] %v21802_v34  ;;  %v21808_v37 = vsub.f32 %v42_v51, %v21802_v34 }
 0x193   :  { %17482 = vmatpush3.msra.mxu1 %v2250_v26  ;;  %17493 = vmatpush3.msra.mxu0 %v21546_v13  ;;  %v21736_v13 = vsub.f32 %v43_v62, %v21717_v6 }
 0x194   :  { %17483 = vmatprep.subr.mxu1 %v27035_v53  ;;  %17494 = vmatprep.subr.mxu0 %v27035_v53  ;;  %27054 = vst [vmem:[#allocation27_spill] sm:$0xff] %v21808_v37  ;;  %v21815_v26 = vand.u32 4294901760, %v21808_v37 }
 0x195   :  { %17484 = vmatpush3.msra.mxu1 %v2257_v36  ;;  %17495 = vmatpush3.msra.mxu0 %v21558_v31  ;;  %27046 = vst [vmem:[#allocation19_spill] sm:$0xff] %v21736_v13  ;;  %v21757_v31 = vand.u32 4294901760, %v21736_v13  ;;  %v21818_v36 = vsub.f32 %v41_v33, %v21810_v32 }
 0x196   :  { %17486 = vmatmul.mubr.msk.f32.vlgmr.msra.gmra.mxu1 %vm2124_vm2, %v26752_v21  ;;  %17496 = vmatprep.mubr.msk.f32.mxu0 %vm20609_vm1, %v27035_v53  ;;  %27056 = vst [vmem:[#allocation29_spill] sm:$0xff] %v21815_v26  ;;  %v3225_v35 = vsub.f32 %v21808_v37, %v21815_v26 }
 0x197   :  { %17499 = vmatprep.subr.mxu1 %v27035_v53  ;;  %17510 = vmatprep.subr.mxu0 %v27035_v53  ;;  %27048 = vst [vmem:[#allocation21_spill] sm:$0xff] %v21757_v31  ;;  %v3218_v63 = vsub.f32 %v21736_v13, %v21757_v31  ;;  %27057 = vst [vmem:[#allocation30_spill] sm:$0xff] %v21818_v36 }
 0x198   :  { %17497 = vmatmul.mubr.f32.vlgmr.msra.gmra.mxu0 %v21519_v38  ;;  %17500 = vmatpush3.msra.mxu1 %v21542_v17  ;;  %v21835_v58 = vand.u32 4294901760, %v3225_v35 }
 0x199   :  { %17511 = vmatpush3.msra.mxu0 %v2234_v22  ;;  %17501 = vmatprep.subr.mxu1 %v27035_v53 }
 0x19a   :  { %17512 = vmatprep.subr.mxu0 %v27035_v53  ;;  %17502 = vmatpush3.msra.mxu1 %v21552_v15  ;;  %27060 = vst [vmem:[#allocation33_spill] sm:$0xff] %v21835_v58 }
 0x19b   :  { %17513 = vmatpush3.msra.mxu0 %v2241_v30  ;;  %17503 = vmatprep.subr.mxu1 %v27035_v53 }
 0x19c   :  { %17514 = vmatprep.subr.mxu0 %v27035_v53  ;;  %17504 = vmatpush3.msra.mxu1 %v21528_v11 }
 0x19d   :  { %17515 = vmatpush3.msra.mxu0 %v2248_v20  ;;  %17505 = vmatprep.subr.mxu1 %v27035_v53 }
 0x19e   :  { %17516 = vmatprep.subr.mxu0 %v27035_v53  ;;  %17506 = vmatpush3.msra.mxu1 %v21537_v12 }
 0x19f   :  { %17507 = vmatprep.mubr.msk.f32.mxu1 %vm20609_vm1, %v27035_v53  ;;  %17517 = vmatpush3.msra.mxu0 %v2255_v23  ;;  %v21785_v23 = vand.u32 4294901760, %v3218_v63  ;;  %v34_v63 = vld [vmem:[%s26745_s4 + $0x18] sm:$0xff] }
 0x1a0   :  { %17508 = vmatmul.mubr.f32.vlgmr.msra.gmra.mxu1 %v21531_v50  ;;  %17518 = vmatprep.mubr.msk.f32.mxu0 %vm20609_vm1, %v27035_v53  ;;  %v21926_v35 = vand.u32 4294901760, %v34_v63 }
 0x1a1   :  { %17521 = vmatprep.subr.mxu1 %v27035_v53  ;;  %17532 = vmatprep.subr.mxu0 %v27035_v53  ;;  %27052 = vst [vmem:[#allocation25_spill] sm:$0xff] %v21785_v23 }
 0x1a2   :  { %17519 = vmatmul.mubr.msk.f32.vlgmr.msra.gmra.mxu0 %vm2124_vm2, %v26752_v21  ;;  %17522 = vmatpush3.msra.mxu1 %v21542_v17  ;;  %v21733_v17 = vand.u32 4294901760, %v21715_v46  ;;  %27080 = vst [vmem:[#allocation53_spill] sm:$0xff] %v21926_v35 }
 0x1a3   :  { %17533 = vmatpush3.msra.mxu0 %v21599_v29  ;;  %17523 = vmatprep.subr.mxu1 %v27035_v53 }
 0x1a4   :  { %17534 = vmatprep.subr.mxu0 %v27035_v53  ;;  %17524 = vmatpush3.msra.mxu1 %v21552_v15  ;;  %27045 = vst [vmem:[#allocation18_spill] sm:$0xff] %v21733_v17  ;;  %v3204_v19 = vsub.f32 %v21715_v46, %v21733_v17 }
 0x1a5   :  { %17535 = vmatpush3.msra.mxu0 %v21606_v18  ;;  %17525 = vmatprep.subr.mxu1 %v27035_v53 }
 0x1a6   :  { %17536 = vmatprep.subr.mxu0 %v27035_v53  ;;  %17526 = vmatpush3.msra.mxu1 %v21528_v11  ;;  %v21707_v11 = vsub.f32 %v46_v55, %v21687_v57  ;;  %v21770_v20 = vand.u32 4294901760, %v3204_v19  ;;  %v21894_v55 = vand.u32 4294901760, %v36_v41  ;;  %v21908_v19 = vand.u32 4294901760, %v35_v60 }
 0x1a7   :  { %17537 = vmatpush3.msra.mxu0 %v21616_v56  ;;  %17527 = vmatprep.subr.mxu1 %v27035_v53 }
 0x1a8   :  { %17538 = vmatprep.subr.mxu0 %v27035_v53  ;;  %17528 = vmatpush3.msra.mxu1 %v21537_v12  ;;  %27039 = vst [vmem:[#allocation12_spill] sm:$0xff] %v21707_v11  ;;  %v21723_v8 = vand.u32 4294901760, %v21707_v11  ;;  %v21726_v12 = vsub.f32 %v44_v4, %v21709_v1  ;;  %27050 = vst [vmem:[#allocation23_spill] sm:$0xff] %v21770_v20 }
 0x1a9   :  { %17529 = vmatprep.mubr.msk.f32.mxu1 %vm20609_vm1, %v27035_v53  ;;  %17539 = vmatpush3.msra.mxu0 %v21626_v40  ;;  %27073 = vst [vmem:[#allocation46_spill] sm:$0xff] %v21894_v55  ;;  %27076 = vst [vmem:[#allocation49_spill] sm:$0xff] %v21908_v19 }
 0x1aa   :  { %17530 = vmatmul.mubr.msk.f32.vlgmr.msra.gmra.mxu1 %vm2124_vm2, %v26752_v21  ;;  %17540 = vmatprep.mubr.msk.f32.mxu0 %vm20609_vm1, %v27035_v53  ;;  %27043 = vst [vmem:[#allocation16_spill] sm:$0xff] %v21723_v8  ;;  %27044 = vst [vmem:[#allocation17_spill] sm:$0xff] %v21726_v12  ;;  %v3197_v14 = vsub.f32 %v21707_v11, %v21723_v8  ;;  %v21746_v15 = vand.u32 4294901760, %v21726_v12 }
 0x1ab   :  { %17543 = vmatprep.subr.mxu1 %v27035_v53  ;;  %17554 = vmatprep.subr.mxu0 %v27035_v53 }
 0x1ac   :  { %17541 = vmatmul.mubr.f32.vlgmr.msra.gmra.mxu0 %v21566_v16  ;;  %17544 = vmatpush3.msra.mxu1 %v2725_v10  ;;  %27047 = vst [vmem:[#allocation20_spill] sm:$0xff] %v21746_v15  ;;  %v21762_v22 = vand.u32 4294901760, %v3197_v14  ;;  %v3211_v27 = vsub.f32 %v21726_v12, %v21746_v15  ;;  %v21875_v10 = vand.u32 4294901760, %v37_v45 }
 0x1ad   :  { %17555 = vmatpush3.msra.mxu0 %v21614_v7  ;;  %17545 = vmatprep.subr.mxu1 %v27035_v53 }
 0x1ae   :  { %17556 = vmatprep.subr.mxu0 %v27035_v53  ;;  %17546 = vmatpush3.msra.mxu1 %v2732_v44  ;;  %27049 = vst [vmem:[#allocation22_spill] sm:$0xff] %v21762_v22  ;;  %v21779_v30 = vand.u32 4294901760, %v3211_v27  ;;  %27069 = vst [vmem:[#allocation42_spill] sm:$0xff] %v21875_v10  ;;  %v21912_v27 = vsub.f32 %v36_v41, %v21894_v55 }
 0x1af   :  { %17557 = vmatpush3.msra.mxu0 %v21624_v48  ;;  %17547 = vmatprep.subr.mxu1 %v27035_v53 }
 0x1b0   :  { %17558 = vmatprep.subr.mxu0 %v27035_v53  ;;  %17548 = vmatpush3.msra.mxu1 %v2739_v5  ;;  %27051 = vst [vmem:[#allocation24_spill] sm:$0xff] %v21779_v30  ;;  %27077 = vst [vmem:[#allocation50_spill] sm:$0xff] %v21912_v27 }
 0x1b1   :  { %17559 = vmatpush3.msra.mxu0 %v21634_v42  ;;  %17549 = vmatprep.subr.mxu1 %v27035_v53 }
 0x1b2   :  { %17560 = vmatprep.subr.mxu0 %v27035_v53  ;;  %17550 = vmatpush3.msra.mxu1 %v2746_v59  ;;  %v21891_v59 = vsub.f32 %v37_v45, %v21875_v10 }
 0x1b3   :  { %17561 = vmatpush3.msra.mxu0 %v21642_v0  ;;  %17551 = vmatprep.mubr.msk.f32.mxu1 %vm20609_vm1, %v27035_v53 }
 0x1b4   :  { %17562 = vmatprep.mubr.msk.f32.mxu0 %vm20609_vm1, %v27035_v53  ;;  %17565 = vmatprep.subr.mxu1 %v27035_v53  ;;  %27072 = vst [vmem:[#allocation45_spill] sm:$0xff] %v21891_v59  ;;  %v21906_v14 = vand.u32 4294901760, %v21891_v59 }
 0x1b5   :  { %17576 = vmatprep.subr.mxu0 %v27035_v53  ;;  %17552 = vmatmul.mubr.msk.f32.vlgmr.msra.gmra.mxu1 %vm2124_vm2, %v26752_v21 }
 0x1b6   :  { %17563 = vmatmul.mubr.f32.vlgmr.msra.gmra.mxu0 %v21519_v38  ;;  %17566 = vmatpush3.msra.mxu1 %v21599_v29  ;;  %27075 = vst [vmem:[#allocation48_spill] sm:$0xff] %v21906_v14  ;;  %v3260_v33 = vsub.f32 %v21891_v59, %v21906_v14  ;;  %v31_v38 = vld [vmem:[%s26745_s4] sm:$0xff] }
 0x1b7   :  { %17577 = vmatpush3.msra.mxu0 %v2723_v43  ;;  %17567 = vmatprep.subr.mxu1 %v27035_v53 }
 0x1b8   :  { %17578 = vmatprep.subr.mxu0 %v27035_v53  ;;  %17568 = vmatpush3.msra.mxu1 %v21606_v18 }
 0x1b9   :  { %17579 = vmatpush3.msra.mxu0 %v2730_v25  ;;  %17569 = vmatprep.subr.mxu1 %v27035_v53 }
 0x1ba   :  { %17580 = vmatprep.subr.mxu0 %v27035_v53  ;;  %17570 = vmatpush3.msra.mxu1 %v21616_v56 }
 0x1bb   :  { %17581 = vmatpush3.msra.mxu0 %v2737_v47  ;;  %17571 = vmatprep.subr.mxu1 %v27035_v53 }
 0x1bc   :  { %17582 = vmatprep.subr.mxu0 %v27035_v53  ;;  %17572 = vmatpush3.msra.mxu1 %v21626_v40 }
 0x1bd   :  { %17583 = vmatpush3.msra.mxu0 %v2744_v54  ;;  %17573 = vmatprep.mubr.msk.f32.mxu1 %vm20609_vm1, %v27035_v53 }
 0x1be   :  { %17587 = vmatprep.subr.mxu1 %v27035_v53  ;;  %17574 = vmatmul.mubr.f32.vlgmr.msra.gmra.mxu1 %v21531_v50 }
 0x1bf   :  { %17588 = vmatpush3.msra.mxu1 %v21599_v29  ;;  %17584 = vmatprep.mubr.msk.f32.mxu0 %vm20609_vm1, %v27035_v53  ;;  %v21828_v29 = vand.u32 4294901760, %v21818_v36 }
 0x1c0   :  { %17589 = vmatprep.subr.mxu1 %v27035_v53  ;;  %17585 = vmatmul.mubr.msk.f32.vlgmr.msra.gmra.mxu0 %vm2124_vm2, %v26752_v21 }
 0x1c1   :  { %17590 = vmatpush3.msra.mxu1 %v21606_v18  ;;  %17595 = vmatprep.mubr.msk.f32.mxu1 %vm20609_vm1, %v27035_v53  ;;  %27058 = vst [vmem:[#allocation31_spill] sm:$0xff] %v21828_v29  ;;  %v39_v18 = vld [vmem:[%s26745_s4 + $0x40] sm:$0xff]  ;;  %v3232_v7 = vsub.f32 %v21818_v36, %v21828_v29 }
 0x1c2   :  { %17591 = vmatprep.subr.mxu1 %v27035_v53  ;;  %17598 = vmatprep.subr.mxu0 %v27035_v53  ;;  %v21842_v48 = vand.u32 4294901760, %v39_v18 }
 0x1c3   :  { %17592 = vmatpush3.msra.mxu1 %v21616_v56  ;;  %17599 = vmatpush3.msra.mxu0 %v21687_v57  ;;  %v21840_v56 = vsub.f32 %v40_v52, %v21830_v3  ;;  %v21850_v42 = vand.u32 4294901760, %v3232_v7  ;;  %v21924_v52 = vsub.f32 %v35_v60, %v21908_v19  ;;  %v33_v7 = vld [vmem:[%s26745_s4 + $0x10] sm:$0xff]  ;;  %v32_v60 = vld [vmem:[%s26745_s4 + $0x8] sm:$0xff] }
 0x1c4   :  { %17593 = vmatprep.subr.mxu1 %v27035_v53  ;;  %17600 = vmatprep.subr.mxu0 %v27035_v53  ;;  %27062 = vst [vmem:[#allocation35_spill] sm:$0xff] %v21842_v48  ;;  %v21856_v0 = vsub.f32 %v39_v18, %v21842_v48  ;;  %v21931_v18 = vand.u32 4294901760, %v21912_v27  ;;  %v21946_v41 = vand.u32 4294901760, %v33_v7 }
 0x1c5   :  { %17594 = vmatpush3.msra.mxu1 %v21626_v40  ;;  %17601 = vmatpush3.msra.mxu0 %v21698_v61  ;;  %27061 = vst [vmem:[#allocation34_spill] sm:$0xff] %v21840_v56  ;;  %v38_v40 = vld [vmem:[%s26745_s4 + $0x38] sm:$0xff]  ;;  %27063 = vst [vmem:[#allocation36_spill] sm:$0xff] %v21850_v42  ;;  %v21853_v43 = vand.u32 4294901760, %v21840_v56  ;;  %v21941_v45 = vand.u32 4294901760, %v21924_v52 }
 0x1c6   :  { %17596 = vmatmul.mubr.msk.f32.vlgmr.msra.gmra.mxu1 %vm2124_vm2, %v26752_v21  ;;  %17633 = vmatprep.subr.mxu1 %v27035_v53  ;;  %27065 = vst [vmem:[#allocation38_spill] sm:$0xff] %v21856_v0  ;;  %v21858_v25 = vand.u32 4294901760, %v38_v40  ;;  %v21870_v24 = vand.u32 4294901760, %v21856_v0  ;;  %27079 = vst [vmem:[#allocation52_spill] sm:$0xff] %v21924_v52  ;;  %v21965_v21 = vand.u32 4294901760, %v32_v60 }
 0x1c7   :  { %17634 = vmatpush3.msra.mxu1 %v21762_v22  ;;  %17602 = vmatprep.subr.mxu0 %v27035_v53  ;;  %27064 = vst [vmem:[#allocation37_spill] sm:$0xff] %v21853_v43  ;;  %v3239_v47 = vsub.f32 %v21840_v56, %v21853_v43  ;;  %27081 = vst [vmem:[#allocation54_spill] sm:$0xff] %v21931_v18 }
 0x1c8   :  { %17635 = vmatprep.subr.mxu1 %v27035_v53  ;;  %17603 = vmatpush3.msra.mxu0 %v21709_v1  ;;  %27066 = vst [vmem:[#allocation39_spill] sm:$0xff] %v21858_v25  ;;  %27067 = vst [vmem:[#allocation40_spill] sm:$0xff] %v21870_v24  ;;  %v21873_v54 = vsub.f32 %v38_v40, %v21858_v25  ;;  %v3246_v9 = vsub.f32 %v21856_v0, %v21870_v24  ;;  %v21938_v40 = vand.u32 4294901760, %v3260_v33 }
 0x1c9   :  { %17636 = vmatpush3.msra.mxu1 %v21770_v20  ;;  %17604 = vmatprep.subr.mxu0 %v27035_v53  ;;  %v21883_v44 = vand.u32 4294901760, %v3239_v47  ;;  %27083 = vst [vmem:[#allocation56_spill] sm:$0xff] %v21941_v45  ;;  %v21944_v47 = vsub.f32 %v34_v63, %v21926_v35  ;;  %27085 = vst [vmem:[#allocation58_spill] sm:$0xff] %v21946_v41  ;;  %v21963_v33 = vsub.f32 %v33_v7, %v21946_v41 }
 0x1ca   :  { %17637 = vmatprep.subr.mxu1 %v27035_v53  ;;  %17605 = vmatpush3.msra.mxu0 %v21717_v6  ;;  %27068 = vst [vmem:[#allocation41_spill] sm:$0xff] %v21873_v54  ;;  %v21888_v5 = vand.u32 4294901760, %v21873_v54  ;;  %v21901_v4 = vand.u32 4294901760, %v3246_v9  ;;  %27082 = vst [vmem:[#allocation55_spill] sm:$0xff] %v21938_v40  ;;  %v3267_v9 = vsub.f32 %v21912_v27, %v21931_v18 }
 0x1cb   :  { %17638 = vmatpush3.msra.mxu1 %v21779_v30  ;;  %17606 = vmatprep.subr.mxu0 %v27035_v53  ;;  %27070 = vst [vmem:[#allocation43_spill] sm:$0xff] %v21883_v44  ;;  %27084 = vst [vmem:[#allocation57_spill] sm:$0xff] %v21944_v47  ;;  %v21960_v63 = vand.u32 4294901760, %v21944_v47  ;;  %v21980_v2 = vand.u32 4294901760, %v21963_v33  ;;  %v21983_v49 = vsub.f32 %v32_v60, %v21965_v21 }
 0x1cc   :  { %17639 = vmatprep.subr.mxu1 %v27035_v53  ;;  %17665 = vmatprep.mubr.msk.f32.mxu1 %vm20609_vm1, %v27035_v53  ;;  %27071 = vst [vmem:[#allocation44_spill] sm:$0xff] %v21888_v5  ;;  %27074 = vst [vmem:[#allocation47_spill] sm:$0xff] %v21901_v4  ;;  %v3253_v62 = vsub.f32 %v21873_v54, %v21888_v5  ;;  %v21969_v50 = vand.u32 4294901760, %v3267_v9  ;;  %v21987_v9 = vand.u32 4294901760, %v31_v38 }
 0x1cd   :  { %17640 = vmatpush3.msra.mxu1 %v21785_v23  ;;  %17630 = vmatprep.mubr.msk.f32.mxu0 %vm20609_vm1, %v27035_v53  ;;  %27086 = vst [vmem:[#allocation59_spill] sm:$0xff] %v21960_v63  ;;  %27087 = vst [vmem:[#allocation60_spill] sm:$0xff] %v21963_v33  ;;  %v3281_v7 = vsub.f32 %v21944_v47, %v21960_v63  ;;  %v3288_v39 = vsub.f32 %v21963_v33, %v21980_v2  ;;  %v21996_v28 = vand.u32 4294901760, %v21983_v49 }
 0x1ce   :  { %17641 = vmatprep.subr.mxu1 %v27035_v53  ;;  %17607 = vmatpush3.msra.mxu0 %v21802_v34  ;;  %v21919_v51 = vand.u32 4294901760, %v3253_v62  ;;  %v3274_v62 = vsub.f32 %v21924_v52, %v21941_v45  ;;  %27088 = vst [vmem:[#allocation61_spill] sm:$0xff] %v21965_v21  ;;  %27089 = vst [vmem:[#allocation62_spill] sm:$0xff] %v21969_v50  ;;  %v22001_v60 = vsub.f32 %v31_v38, %v21987_v9 }
 0x1cf   :  { %17608 = vmatprep.subr.mxu0 %v27035_v53  ;;  %17642 = vmatpush3.msra.mxu1 %v21835_v58  ;;  %27091 = vst [vmem:[#allocation64_spill] sm:$0xff] %v21980_v2  ;;  %27092 = vst [vmem:[#allocation65_spill] sm:$0xff] %v21983_v49 }
 0x1d0   :  { %17609 = vmatpush3.msra.mxu0 %v21810_v32  ;;  %17643 = vmatprep.subr.mxu1 %v27035_v53  ;;  %27078 = vst [vmem:[#allocation51_spill] sm:$0xff] %v21919_v51  ;;  %v21975_v16 = vand.u32 4294901760, %v3274_v62  ;;  %27093 = vst [vmem:[#allocation66_spill] sm:$0xff] %v21987_v9  ;;  %v21991_v62 = vand.u32 4294901760, %v3281_v7  ;;  %v3295_v7 = vsub.f32 %v21983_v49, %v21996_v28 }
 0x1d1   :  { %17610 = vmatprep.subr.mxu0 %v27035_v53  ;;  %17644 = vmatpush3.msra.mxu1 %v21850_v42  ;;  %27095 = vst [vmem:[#allocation68_spill] sm:$0xff] %v21996_v28  ;;  %27096 = vst [vmem:[#allocation69_spill] sm:$0xff] %v22001_v60 }
 0x1d2   :  { %17611 = vmatpush3.msra.mxu0 %v21830_v3  ;;  %17645 = vmatprep.subr.mxu1 %v27035_v53  ;;  %27090 = vst [vmem:[#allocation63_spill] sm:$0xff] %v21975_v16  ;;  %27094 = vst [vmem:[#allocation67_spill] sm:$0xff] %v21991_v62  ;;  %v22015_v38 = vand.u32 4294901760, %v3295_v7 }
 0x1d3   :  { %17612 = vmatprep.subr.mxu0 %v27035_v53  ;;  %17646 = vmatpush3.msra.mxu1 %v21883_v44 }
 0x1d4   :  { %17613 = vmatpush3.msra.mxu0 %v21842_v48  ;;  %17647 = vmatprep.subr.mxu1 %v27035_v53  ;;  %27099 = vst [vmem:[#allocation72_spill] sm:$0xff] %v22015_v38 }
 0x1d5   :  { %17614 = vmatprep.subr.mxu0 %v27035_v53  ;;  %17648 = vmatpush3.msra.mxu1 %v21901_v4 }
 0x1d6   :  { %17615 = vmatpush3.msra.mxu0 %v21858_v25  ;;  %17649 = vmatprep.subr.mxu1 %v27035_v53 }
 0x1d7   :  { %17616 = vmatprep.subr.mxu0 %v27035_v53  ;;  %17650 = vmatpush3.msra.mxu1 %v21919_v51 }
 0x1d8   :  { %17617 = vmatpush3.msra.mxu0 %v21875_v10  ;;  %17651 = vmatprep.subr.mxu1 %v27035_v53 }
 0x1d9   :  { %17618 = vmatprep.subr.mxu0 %v27035_v53  ;;  %17652 = vmatpush3.msra.mxu1 %v21938_v40  ;;  %v22012_v40 = vand.u32 4294901760, %v22001_v60 }
 0x1da   :  { %17619 = vmatpush3.msra.mxu0 %v21894_v55  ;;  %17653 = vmatprep.subr.mxu1 %v27035_v53 }
 0x1db   :  { %17620 = vmatprep.subr.mxu0 %v27035_v53  ;;  %17654 = vmatpush3.msra.mxu1 %v21969_v50  ;;  %v22005_v50 = vand.u32 4294901760, %v3288_v39  ;;  %27098 = vst [vmem:[#allocation71_spill] sm:$0xff] %v22012_v40  ;;  %v3302_v39 = vsub.f32 %v22001_v60, %v22012_v40 }
 0x1dc   :  { %17621 = vmatpush3.msra.mxu0 %v21908_v19  ;;  %17655 = vmatprep.subr.mxu1 %v27035_v53 }
 0x1dd   :  { %17622 = vmatprep.subr.mxu0 %v27035_v53  ;;  %17656 = vmatpush3.msra.mxu1 %v21975_v16  ;;  %27097 = vst [vmem:[#allocation70_spill] sm:$0xff] %v22005_v50  ;;  %v22022_v16 = vand.u32 4294901760, %v3302_v39 }
 0x1de   :  { %17623 = vmatpush3.msra.mxu0 %v21926_v35  ;;  %17657 = vmatprep.subr.mxu1 %v27035_v53 }
 0x1df   :  { %17624 = vmatprep.subr.mxu0 %v27035_v53  ;;  %17658 = vmatpush3.msra.mxu1 %v21991_v62  ;;  %27100 = vst [vmem:[#allocation73_spill] sm:$0xff] %v22022_v16 }
 0x1e0   :  { %17625 = vmatpush3.msra.mxu0 %v21946_v41  ;;  %17659 = vmatprep.subr.mxu1 %v27035_v53 }
 0x1e1   :  { %17626 = vmatprep.subr.mxu0 %v27035_v53  ;;  %17660 = vmatpush3.msra.mxu1 %v22005_v50 }
 0x1e2   :  { %17627 = vmatpush3.msra.mxu0 %v21965_v21  ;;  %17661 = vmatprep.subr.mxu1 %v27035_v53 }
 0x1e3   :  { %17628 = vmatprep.subr.mxu0 %v27035_v53  ;;  %17662 = vmatpush3.msra.mxu1 %v22015_v38 }
 0x1e4   :  { %17629 = vmatpush3.msra.mxu0 %v21987_v9  ;;  %17663 = vmatprep.subr.mxu1 %v27035_v53 }
 0x1e5   :  { %17668 = vmatprep.subr.mxu0 %v27035_v53  ;;  %17664 = vmatpush3.msra.mxu1 %v22022_v16 }
 0x1e6   :  { %17703 = vmatprep.subr.mxu1 %v27035_v53 }
 0x24e   :  { %v2203_v62 = vpop.f32.mrf.mxu0 }
 0x250   :  { %v17476_v7 = vpop.f32.mrf.mxu0 }
 0x256   :  { %v2294_v51 = vpop.f32.mrf.mxu1 }
 0x257   :  { %v2295_v42 = vadd.f32 %v2294_v51, %v2203_v62 }
 0x258   :  { %v17487_v4 = vpop.f32.mrf.mxu1  ;;  %v2374_v50 = vpop.f32.mrf.mxu0 }
 0x259   :  { %v2375_v30 = vadd.f32 %v2374_v50, %v2295_v42 }
 0x25a   :  { %v17498_v44 = vpop.f32.mrf.mxu0 }
 0x260   :  { %v2451_v58 = vpop.f32.mrf.mxu1 }
 0x261   :  { %v2452_v39 = vadd.f32 %v2451_v58, %v2375_v30 }
 0x262   :  { %v17509_v23 = vpop.f32.mrf.mxu1  ;;  %v2534_v40 = vpop.f32.mrf.mxu0 }
 0x263   :  { %v2535_v28 = vadd.f32 %v2534_v40, %v2452_v39 }
 0x264   :  { %v17520_v38 = vpop.f32.mrf.mxu0 }
 0x26a   :  { %v2609_v20 = vpop.f32.mrf.mxu1 }
 0x26b   :  { %v2610_v2 = vadd.f32 %v2609_v20, %v2535_v28 }
 0x26c   :  { %v17531_v22 = vpop.f32.mrf.mxu1  ;;  %v2692_v16 = vpop.f32.mrf.mxu0 }
 0x26d   :  { %v22027_v63 = vand.u32 4294901760, %v2610_v2 }
 0x26e   :  { %v17542_v45 = vpop.f32.mrf.mxu0 }
 0x26f   :  { %v22030_v7 = vsub.f32 %v2610_v2, %v22027_v63  ;;  %17666 = vmatmul.mubr.f32.vlgmr.msra.gmra.mxu1 %v22027_v63  ;;  %v22044_v2 = vld [vmem:[#allocation2] sm:$0xff] }
 0x270   :  { %17704 = vmatpush3.msra.mxu1 %v21687_v57  ;;  %17735 = vmatprep.mubr.msk.f32.mxu1 %vm20609_vm1, %v27035_v53  ;;  %27101 = vst [vmem:[#allocation74_spill] sm:$0xff] %v22044_v2 }
 0x271   :  { %v3185_v50 = vand.u32 4294901760, %v22030_v7  ;;  %17705 = vmatprep.subr.mxu1 %v27035_v53 }
 0x272   :  { %17706 = vmatpush3.msra.mxu1 %v21698_v61 }
 0x273   :  { %v3186_v28 = vsub.f32 %v22030_v7, %v3185_v50  ;;  %17707 = vmatprep.subr.mxu1 %v27035_v53 }
 0x274   :  { %17708 = vmatpush3.msra.mxu1 %v21709_v1 }
 0x275   :  { %17709 = vmatprep.subr.mxu1 %v22044_v2  ;;  %v3187_v22 = vand.u32 4294901760, %v3186_v28  ;;  %v2783_v20 = vpop.f32.mrf.mxu1  ;;  %v27104_v28 = vld [vmem:[#allocation22_spill] sm:$0xff] }
 0x276   :  { %17710 = vmatpush3.msra.mxu1 %v21717_v6  ;;  %v2784_v30 = vadd.f32 %v2783_v20, %v2692_v16  ;;  %v2863_v23 = vpop.f32.mrf.mxu0  ;;  %v27106_v20 = vld [vmem:[#allocation23_spill] sm:$0xff] }
 0x277   :  { %17711 = vmatprep.subr.mxu1 %v22044_v2  ;;  %17631 = vmatmul.mubr.f32.vlgmr.msra.gmra.mxu0 %v3187_v22  ;;  %v17553_v58 = vpop.f32.mrf.mxu1  ;;  %v27105_v22 = vld [vmem:[#allocation64_spill] sm:$0xff] }
 0x278   :  { %17669 = vmatpush3.msra.mxu0 %v21707_v11  ;;  %17712 = vmatpush3.msra.mxu1 %v21802_v34  ;;  %v2864_v53 = vadd.f32 %v2863_v23, %v2784_v30  ;;  %v17564_v42 = vpop.f32.mrf.mxu0  ;;  %v27107_v30 = vld [vmem:[#allocation68_spill] sm:$0xff]  ;;  %v27109_v58 = vld [vmem:[#allocation71_spill] sm:$0xff] }
 0x279   :  { %17670 = vmatprep.subr.mxu0 %v22044_v2  ;;  %17713 = vmatprep.subr.mxu1 %v22044_v2  ;;  %v27108_v23 = vld [vmem:[#allocation24_spill] sm:$0xff]  ;;  %v27111_v42 = vld [vmem:[#allocation33_spill] sm:$0xff] }
 0x27a   :  { %17671 = vmatpush3.msra.mxu0 %v21715_v46  ;;  %17714 = vmatpush3.msra.mxu1 %v21810_v32 }
 0x27b   :  { %17672 = vmatprep.subr.mxu0 %v22044_v2  ;;  %17715 = vmatprep.subr.mxu1 %v22044_v2 }
 0x27c   :  { %17673 = vmatpush3.msra.mxu0 %v21726_v12  ;;  %17716 = vmatpush3.msra.mxu1 %v21830_v3 }
 0x27d   :  { %17674 = vmatprep.subr.mxu0 %v22044_v2  ;;  %17717 = vmatprep.subr.mxu1 %v22044_v2 }
 0x27e   :  { %17675 = vmatpush3.msra.mxu0 %v21736_v13  ;;  %17718 = vmatpush3.msra.mxu1 %v21842_v48  ;;  %v2940_v16 = vpop.f32.mrf.mxu1 }
 0x27f   :  { %17676 = vmatprep.subr.mxu0 %v22044_v2  ;;  %17719 = vmatprep.subr.mxu1 %v22044_v2  ;;  %v2941_v44 = vadd.f32 %v2940_v16, %v2864_v53  ;;  %v27110_v53 = vld [vmem:[#allocation25_spill] sm:$0xff]  ;;  %v27112_v16 = vld [vmem:[#allocation36_spill] sm:$0xff] }
 0x280   :  { %17677 = vmatpush3.msra.mxu0 %v21808_v37  ;;  %17720 = vmatpush3.msra.mxu1 %v21858_v25  ;;  %v17575_v4 = vpop.f32.mrf.mxu1  ;;  %v3023_v51 = vpop.f32.mrf.mxu0 }
 0x281   :  { %17678 = vmatprep.subr.mxu0 %v22044_v2  ;;  %17721 = vmatprep.subr.mxu1 %v22044_v2  ;;  %v3024_v40 = vadd.f32 %v3023_v51, %v2941_v44  ;;  %v27114_v44 = vld [vmem:[#allocation47_spill] sm:$0xff] }
 0x282   :  { %17679 = vmatpush3.msra.mxu0 %v21818_v36  ;;  %17722 = vmatpush3.msra.mxu1 %v21875_v10  ;;  %v17586_v45 = vpop.f32.mrf.mxu0  ;;  %v27115_v4 = vld [vmem:[#allocation51_spill] sm:$0xff] }
 0x283   :  { %17680 = vmatprep.subr.mxu0 %v22044_v2  ;;  %17723 = vmatprep.subr.mxu1 %v22044_v2  ;;  %v27116_v51 = vld [vmem:[#allocation55_spill] sm:$0xff] }
 0x284   :  { %17681 = vmatpush3.msra.mxu0 %v21840_v56  ;;  %17724 = vmatpush3.msra.mxu1 %v21894_v55 }
 0x285   :  { %17682 = vmatprep.subr.mxu0 %v22044_v2  ;;  %17725 = vmatprep.subr.mxu1 %v22044_v2 }
 0x286   :  { %17683 = vmatpush3.msra.mxu0 %v21856_v0  ;;  %17726 = vmatpush3.msra.mxu1 %v21908_v19  ;;  %v3098_v62 = vpop.f32.mrf.mxu1 }
 0x287   :  { %17684 = vmatprep.subr.mxu0 %v22044_v2  ;;  %17727 = vmatprep.subr.mxu1 %v22044_v2  ;;  %v22081_v38 = vadd.f32 %v3098_v62, %v3024_v40  ;;  %v27117_v40 = vld [vmem:[#allocation62_spill] sm:$0xff]  ;;  %v27118_v62 = vld [vmem:[#allocation63_spill] sm:$0xff] }
 0x288   :  { %17685 = vmatpush3.msra.mxu0 %v21873_v54  ;;  %17728 = vmatpush3.msra.mxu1 %v21926_v35  ;;  %v17597_v39 = vpop.f32.mrf.mxu1 }
 0x289   :  { %17686 = vmatprep.subr.mxu0 %v22044_v2  ;;  %17729 = vmatprep.subr.mxu1 %v22044_v2  ;;  %v22220_v45 = vand.u32 4294901760, %v22081_v38  ;;  %v27119_v39 = vld [vmem:[#allocation67_spill] sm:$0xff] }
 0x28a   :  { %17687 = vmatpush3.msra.mxu0 %v21891_v59  ;;  %17730 = vmatpush3.msra.mxu1 %v21946_v41 }
 0x28b   :  { %17688 = vmatprep.subr.mxu0 %v22044_v2  ;;  %17731 = vmatprep.subr.mxu1 %v22044_v2 }
 0x28c   :  { %17689 = vmatpush3.msra.mxu0 %v21912_v27  ;;  %17732 = vmatpush3.msra.mxu1 %v21965_v21 }
 0x28d   :  { %17690 = vmatprep.subr.mxu0 %v22044_v2  ;;  %17733 = vmatprep.subr.mxu1 %v22044_v2 }
 0x28e   :  { %17691 = vmatpush3.msra.mxu0 %v21924_v52  ;;  %17734 = vmatpush3.msra.mxu1 %v21987_v9 }
 0x28f   :  { %17692 = vmatprep.subr.mxu0 %v22044_v2  ;;  %17736 = vmatmul.mubr.f32.vlgmr.msra.gmra.mxu1 %v3185_v50  ;;  %v27103_v50 = vld [vmem:[#allocation59_spill] sm:$0xff] }
 0x290   :  { %17773 = vmatprep.subr.mxu1 %v22044_v2  ;;  %17693 = vmatpush3.msra.mxu0 %v21944_v47 }
 0x291   :  { %17774 = vmatpush3.msra.mxu1 %v21687_v57  ;;  %17694 = vmatprep.subr.mxu0 %v22044_v2 }
 0x292   :  { %17775 = vmatprep.subr.mxu1 %v22044_v2  ;;  %17695 = vmatpush3.msra.mxu0 %v21963_v33 }
 0x293   :  { %17776 = vmatpush3.msra.mxu1 %v21698_v61  ;;  %17696 = vmatprep.subr.mxu0 %v22044_v2 }
 0x294   :  { %17777 = vmatprep.subr.mxu1 %v22044_v2  ;;  %17697 = vmatpush3.msra.mxu0 %v21983_v49 }
 0x295   :  { %17778 = vmatpush3.msra.mxu1 %v21709_v1  ;;  %17698 = vmatprep.subr.mxu0 %v22044_v2 }
 0x296   :  { %17779 = vmatprep.subr.mxu1 %v22044_v2  ;;  %17699 = vmatpush3.msra.mxu0 %v22001_v60 }
 0x297   :  { %17700 = vmatprep.mubr.msk.f32.mxu0 %vm20609_vm1, %v22044_v2  ;;  %17780 = vmatpush3.msra.mxu1 %v21717_v6 }
 0x298   :  { %17701 = vmatmul.mubr.f32.vlgmr.msra.gmra.mxu0 %v22030_v7  ;;  %17738 = vmatprep.subr.mxu0 %v22044_v2  ;;  %v27102_v7 = vld [vmem:[#allocation56_spill] sm:$0xff] }
 0x299   :  { %17781 = vmatprep.subr.mxu1 %v22044_v2  ;;  %17739 = vmatpush3.msra.mxu0 %v21723_v8 }
 0x29a   :  { %17782 = vmatpush3.msra.mxu1 %v21802_v34  ;;  %17740 = vmatprep.subr.mxu0 %v22044_v2 }
 0x29b   :  { %17783 = vmatprep.subr.mxu1 %v22044_v2  ;;  %17741 = vmatpush3.msra.mxu0 %v21733_v17 }
 0x29c   :  { %17784 = vmatpush3.msra.mxu1 %v21810_v32  ;;  %17742 = vmatprep.subr.mxu0 %v22044_v2 }
 0x29d   :  { %17785 = vmatprep.subr.mxu1 %v22044_v2  ;;  %17743 = vmatpush3.msra.mxu0 %v21746_v15 }
 0x29e   :  { %17786 = vmatpush3.msra.mxu1 %v21830_v3  ;;  %17744 = vmatprep.subr.mxu0 %v22044_v2 }
 0x29f   :  { %17787 = vmatprep.subr.mxu1 %v22044_v2  ;;  %17745 = vmatpush3.msra.mxu0 %v21757_v31 }
 0x2a0   :  { %17788 = vmatpush3.msra.mxu1 %v21842_v48  ;;  %17746 = vmatprep.subr.mxu0 %v22044_v2 }
 0x2a1   :  { %17789 = vmatprep.subr.mxu1 %v22044_v2  ;;  %17747 = vmatpush3.msra.mxu0 %v21815_v26 }
 0x2a2   :  { %17790 = vmatpush3.msra.mxu1 %v21858_v25  ;;  %17748 = vmatprep.subr.mxu0 %v22044_v2 }
 0x2a3   :  { %17791 = vmatprep.subr.mxu1 %v22044_v2  ;;  %17749 = vmatpush3.msra.mxu0 %v21828_v29 }
 0x2a4   :  { %17792 = vmatpush3.msra.mxu1 %v21875_v10  ;;  %17750 = vmatprep.subr.mxu0 %v22044_v2 }
 0x2a5   :  { %17793 = vmatprep.subr.mxu1 %v22044_v2  ;;  %17751 = vmatpush3.msra.mxu0 %v21853_v43 }
 0x2a6   :  { %17794 = vmatpush3.msra.mxu1 %v21894_v55  ;;  %17752 = vmatprep.subr.mxu0 %v22044_v2 }
 0x2a7   :  { %17795 = vmatprep.subr.mxu1 %v22044_v2  ;;  %17753 = vmatpush3.msra.mxu0 %v21870_v24 }
 0x2a8   :  { %17796 = vmatpush3.msra.mxu1 %v21908_v19  ;;  %17754 = vmatprep.subr.mxu0 %v22044_v2 }
 0x2a9   :  { %17797 = vmatprep.subr.mxu1 %v22044_v2  ;;  %17755 = vmatpush3.msra.mxu0 %v21888_v5 }
 0x2aa   :  { %17798 = vmatpush3.msra.mxu1 %v21926_v35  ;;  %17756 = vmatprep.subr.mxu0 %v22044_v2 }
 0x2ab   :  { %17799 = vmatprep.subr.mxu1 %v22044_v2  ;;  %17757 = vmatpush3.msra.mxu0 %v21906_v14 }
 0x2ac   :  { %17800 = vmatpush3.msra.mxu1 %v21946_v41  ;;  %17758 = vmatprep.subr.mxu0 %v22044_v2 }
 0x2ad   :  { %17801 = vmatprep.subr.mxu1 %v22044_v2  ;;  %17759 = vmatpush3.msra.mxu0 %v21931_v18 }
 0x2ae   :  { %17802 = vmatpush3.msra.mxu1 %v21965_v21  ;;  %17760 = vmatprep.subr.mxu0 %v22044_v2 }
 0x2af   :  { %17803 = vmatprep.subr.mxu1 %v22044_v2  ;;  %17761 = vmatpush3.msra.mxu0 %v27102_v7 }
 0x2b0   :  { %17804 = vmatpush3.msra.mxu1 %v21987_v9  ;;  %17805 = vmatprep.mubr.msk.f32.mxu1 %vm20609_vm1, %v22044_v2 }
 0x2b1   :  { %17762 = vmatprep.subr.mxu0 %v22044_v2  ;;  %17806 = vmatmul.mubr.f32.vlgmr.msra.gmra.mxu1 %v22027_v63 }
 0x2b2   :  { %17843 = vmatprep.subr.mxu1 %v22044_v2  ;;  %17763 = vmatpush3.msra.mxu0 %v27103_v50 }
 0x2b3   :  { %17844 = vmatpush3.msra.mxu1 %v27104_v28  ;;  %17764 = vmatprep.subr.mxu0 %v22044_v2 }
 0x2b4   :  { %17845 = vmatprep.subr.mxu1 %v22044_v2  ;;  %17765 = vmatpush3.msra.mxu0 %v27105_v22 }
 0x2b5   :  { %17846 = vmatpush3.msra.mxu1 %v27106_v20  ;;  %17766 = vmatprep.subr.mxu0 %v22044_v2 }
 0x2b6   :  { %17847 = vmatprep.subr.mxu1 %v22044_v2  ;;  %17767 = vmatpush3.msra.mxu0 %v27107_v30 }
 0x2b7   :  { %17848 = vmatpush3.msra.mxu1 %v27108_v23  ;;  %17768 = vmatprep.subr.mxu0 %v22044_v2 }
 0x2b8   :  { %17849 = vmatprep.subr.mxu1 %v22044_v2  ;;  %17769 = vmatpush3.msra.mxu0 %v27109_v58 }
 0x2b9   :  { %17770 = vmatprep.mubr.msk.f32.mxu0 %vm20609_vm1, %v22044_v2  ;;  %17850 = vmatpush3.msra.mxu1 %v27110_v53 }
 0x2ba   :  { %17771 = vmatmul.mubr.f32.vlgmr.msra.gmra.mxu0 %v22027_v63  ;;  %17808 = vmatprep.subr.mxu0 %v22044_v2  ;;  %v27113_v63 = vld [vmem:[#allocation43_spill] sm:$0xff] }
 0x2bb   :  { %17851 = vmatprep.subr.mxu1 %v22044_v2  ;;  %17809 = vmatpush3.msra.mxu0 %v21687_v57 }
 0x2bc   :  { %17852 = vmatpush3.msra.mxu1 %v27111_v42  ;;  %17810 = vmatprep.subr.mxu0 %v22044_v2 }
 0x2bd   :  { %17853 = vmatprep.subr.mxu1 %v22044_v2  ;;  %17811 = vmatpush3.msra.mxu0 %v21698_v61 }
 0x2be   :  { %17854 = vmatpush3.msra.mxu1 %v27112_v16  ;;  %17812 = vmatprep.subr.mxu0 %v22044_v2 }
 0x2bf   :  { %17855 = vmatprep.subr.mxu1 %v22044_v2  ;;  %17813 = vmatpush3.msra.mxu0 %v21709_v1 }
 0x2c0   :  { %17856 = vmatpush3.msra.mxu1 %v27113_v63  ;;  %17814 = vmatprep.subr.mxu0 %v22044_v2 }
 0x2c1   :  { %17857 = vmatprep.subr.mxu1 %v22044_v2  ;;  %17815 = vmatpush3.msra.mxu0 %v21717_v6 }
 0x2c2   :  { %17858 = vmatpush3.msra.mxu1 %v27114_v44  ;;  %17816 = vmatprep.subr.mxu0 %v22044_v2  ;;  %v15227_v44 = vld [vmem:[%s26747_s2 + $0x88] sm:$0xff] }
 0x2c3   :  { %17859 = vmatprep.subr.mxu1 %v22044_v2  ;;  %17817 = vmatpush3.msra.mxu0 %v21802_v34  ;;  %v22652_v63 = vand.u32 4294901760, %v15227_v44 }
 0x2c4   :  { %17860 = vmatpush3.msra.mxu1 %v27115_v4  ;;  %17818 = vmatprep.subr.mxu0 %v22044_v2 }
 0x2c5   :  { %17861 = vmatprep.subr.mxu1 %v22044_v2  ;;  %17819 = vmatpush3.msra.mxu0 %v21810_v32 }
 0x2c6   :  { %17862 = vmatpush3.msra.mxu1 %v27116_v51  ;;  %17820 = vmatprep.subr.mxu0 %v22044_v2  ;;  %v27120_v51 = vld [vmem:[#allocation70_spill] sm:$0xff] }
 0x2c7   :  { %17863 = vmatprep.subr.mxu1 %v22044_v2  ;;  %17821 = vmatpush3.msra.mxu0 %v21830_v3 }
 0x2c8   :  { %17864 = vmatpush3.msra.mxu1 %v27117_v40  ;;  %17822 = vmatprep.subr.mxu0 %v22044_v2  ;;  %v22232_v40 = vsub.f32 %v22081_v38, %v22220_v45  ;;  %v27122_v38 = vld [vmem:[#allocation73_spill] sm:$0xff] }
 0x2c9   :  { %17865 = vmatprep.subr.mxu1 %v22044_v2  ;;  %17823 = vmatpush3.msra.mxu0 %v21842_v48 }
 0x2ca   :  { %17866 = vmatpush3.msra.mxu1 %v27118_v62  ;;  %17824 = vmatprep.subr.mxu0 %v22044_v2  ;;  %v27121_v62 = vld [vmem:[#allocation72_spill] sm:$0xff] }
 0x2cb   :  { %17867 = vmatprep.subr.mxu1 %v22044_v2  ;;  %17825 = vmatpush3.msra.mxu0 %v21858_v25 }
 0x2cc   :  { %17868 = vmatpush3.msra.mxu1 %v27119_v39  ;;  %17826 = vmatprep.subr.mxu0 %v22044_v2  ;;  %v26806_v39 = vand.u32 4294901760, %v22232_v40 }
 0x2cd   :  { %17869 = vmatprep.subr.mxu1 %v22044_v2  ;;  %17827 = vmatpush3.msra.mxu0 %v21875_v10 }
 0x2ce   :  { %17870 = vmatpush3.msra.mxu1 %v27120_v51  ;;  %17828 = vmatprep.subr.mxu0 %v22044_v2 }
 0x2cf   :  { %17871 = vmatprep.subr.mxu1 %v22044_v2  ;;  %17829 = vmatpush3.msra.mxu0 %v21894_v55 }
 0x2d0   :  { %17872 = vmatpush3.msra.mxu1 %v27121_v62  ;;  %17830 = vmatprep.subr.mxu0 %v22044_v2  ;;  %v3827_v62 = vsub.f32 %v22232_v40, %v26806_v39 }
 0x2d1   :  { %17873 = vmatprep.subr.mxu1 %v22044_v2  ;;  %17831 = vmatpush3.msra.mxu0 %v21908_v19 }
 0x2d2   :  { %17874 = vmatpush3.msra.mxu1 %v27122_v38  ;;  %17875 = vmatprep.mubr.msk.f32.mxu1 %vm20609_vm1, %v22044_v2  ;;  %v3828_v39 = vand.u32 4294901760, %v3827_v62  ;;  %v27123_v62 = vand.u32 4294901760, %v22232_v40 }
 0x2d3   :  { %17832 = vmatprep.subr.mxu0 %v22044_v2  ;;  %17876 = vmatmul.mubr.f32.vlgmr.msra.gmra.mxu1 %v22220_v45 }
 0x2d4   :  { %17913 = vmatprep.subr.mxu1 %v22044_v2  ;;  %17833 = vmatpush3.msra.mxu0 %v21926_v35 }
 0x2d5   :  { %17914 = vmatpush3.msra.mxu1 %v21687_v57  ;;  %17834 = vmatprep.subr.mxu0 %v22044_v2 }
 0x2d6   :  { %17915 = vmatprep.subr.mxu1 %v22044_v2  ;;  %17835 = vmatpush3.msra.mxu0 %v21946_v41 }
 0x2d7   :  { %17916 = vmatpush3.msra.mxu1 %v21698_v61  ;;  %17836 = vmatprep.subr.mxu0 %v22044_v2 }
 0x2d8   :  { %17917 = vmatprep.subr.mxu1 %v22044_v2  ;;  %17837 = vmatpush3.msra.mxu0 %v21965_v21 }
 0x2d9   :  { %17918 = vmatpush3.msra.mxu1 %v21709_v1  ;;  %17838 = vmatprep.subr.mxu0 %v22044_v2 }
 0x2da   :  { %17919 = vmatprep.subr.mxu1 %v22044_v2  ;;  %17839 = vmatpush3.msra.mxu0 %v21987_v9 }
 0x2db   :  { %17840 = vmatprep.mubr.msk.f32.mxu0 %vm20609_vm1, %v22044_v2  ;;  %17920 = vmatpush3.msra.mxu1 %v21717_v6 }
 0x2dc   :  { %17841 = vmatmul.mubr.f32.vlgmr.msra.gmra.mxu0 %v3828_v39  ;;  %17878 = vmatprep.subr.mxu0 %v22044_v2 }
 0x2dd   :  { %17921 = vmatprep.subr.mxu1 %v22044_v2  ;;  %17879 = vmatpush3.msra.mxu0 %v21707_v11 }
 0x2de   :  { %17922 = vmatpush3.msra.mxu1 %v21802_v34  ;;  %17880 = vmatprep.subr.mxu0 %v22044_v2 }
 0x2df   :  { %17923 = vmatprep.subr.mxu1 %v22044_v2  ;;  %17881 = vmatpush3.msra.mxu0 %v21715_v46 }
 0x2e0   :  { %17924 = vmatpush3.msra.mxu1 %v21810_v32  ;;  %17882 = vmatprep.subr.mxu0 %v22044_v2 }
 0x2e1   :  { %17925 = vmatprep.subr.mxu1 %v22044_v2  ;;  %17883 = vmatpush3.msra.mxu0 %v21726_v12 }
 0x2e2   :  { %17926 = vmatpush3.msra.mxu1 %v21830_v3  ;;  %17884 = vmatprep.subr.mxu0 %v22044_v2 }
 0x2e3   :  { %17927 = vmatprep.subr.mxu1 %v22044_v2  ;;  %17885 = vmatpush3.msra.mxu0 %v21736_v13 }
 0x2e4   :  { %17928 = vmatpush3.msra.mxu1 %v21842_v48  ;;  %17886 = vmatprep.subr.mxu0 %v22044_v2 }
 0x2e5   :  { %17929 = vmatprep.subr.mxu1 %v22044_v2  ;;  %17887 = vmatpush3.msra.mxu0 %v21808_v37 }
 0x2e6   :  { %17930 = vmatpush3.msra.mxu1 %v21858_v25  ;;  %17888 = vmatprep.subr.mxu0 %v22044_v2 }
 0x2e7   :  { %17931 = vmatprep.subr.mxu1 %v22044_v2  ;;  %17889 = vmatpush3.msra.mxu0 %v21818_v36  ;;  %v15232_v36 = vld [vmem:[%s26747_s2 + $0xb0] sm:$0xff] }
 0x2e8   :  { %17932 = vmatpush3.msra.mxu1 %v21875_v10  ;;  %17890 = vmatprep.subr.mxu0 %v22044_v2 }
 0x2e9   :  { %17933 = vmatprep.subr.mxu1 %v22044_v2  ;;  %17891 = vmatpush3.msra.mxu0 %v21840_v56 }
 0x2ea   :  { %17934 = vmatpush3.msra.mxu1 %v21894_v55  ;;  %17892 = vmatprep.subr.mxu0 %v22044_v2 }
 0x2eb   :  { %17935 = vmatprep.subr.mxu1 %v22044_v2  ;;  %17893 = vmatpush3.msra.mxu0 %v21856_v0 }
 0x2ec   :  { %17936 = vmatpush3.msra.mxu1 %v21908_v19  ;;  %17894 = vmatprep.subr.mxu0 %v22044_v2 }
 0x2ed   :  { %17937 = vmatprep.subr.mxu1 %v22044_v2  ;;  %17895 = vmatpush3.msra.mxu0 %v21873_v54  ;;  %v15233_v54 = vld [vmem:[%s26747_s2 + $0xb8] sm:$0xff] }
 0x2ee   :  { %17938 = vmatpush3.msra.mxu1 %v21926_v35  ;;  %17896 = vmatprep.subr.mxu0 %v22044_v2 }
 0x2ef   :  { %17939 = vmatprep.subr.mxu1 %v22044_v2  ;;  %17897 = vmatpush3.msra.mxu0 %v21891_v59 }
 0x2f0   :  { %17940 = vmatpush3.msra.mxu1 %v21946_v41  ;;  %17898 = vmatprep.subr.mxu0 %v22044_v2 }
 0x2f1   :  { %17941 = vmatprep.subr.mxu1 %v22044_v2  ;;  %17899 = vmatpush3.msra.mxu0 %v21912_v27 }
 0x2f2   :  { %17942 = vmatpush3.msra.mxu1 %v21965_v21  ;;  %17900 = vmatprep.subr.mxu0 %v22044_v2 }
 0x2f3   :  { %17943 = vmatprep.subr.mxu1 %v22044_v2  ;;  %17901 = vmatpush3.msra.mxu0 %v21924_v52 }
 0x2f4   :  { %17944 = vmatpush3.msra.mxu1 %v21987_v9  ;;  %17945 = vmatprep.mubr.msk.f32.mxu1 %vm20609_vm1, %v22044_v2 }
 0x2f5   :  { %17902 = vmatprep.subr.mxu0 %v22044_v2  ;;  %17946 = vmatmul.mubr.f32.vlgmr.msra.gmra.mxu1 %v27123_v62 }
 0x2f6   :  { %17983 = vmatprep.subr.mxu1 %v22044_v2  ;;  %17903 = vmatpush3.msra.mxu0 %v21944_v47 }
 0x2f7   :  { %17984 = vmatpush3.msra.mxu1 %v21687_v57  ;;  %17904 = vmatprep.subr.mxu0 %v22044_v2 }
 0x2f8   :  { %17985 = vmatprep.subr.mxu1 %v22044_v2  ;;  %17905 = vmatpush3.msra.mxu0 %v21963_v33 }
 0x2f9   :  { %17986 = vmatpush3.msra.mxu1 %v21698_v61  ;;  %17906 = vmatprep.subr.mxu0 %v22044_v2 }
 0x2fa   :  { %17987 = vmatprep.subr.mxu1 %v22044_v2  ;;  %17907 = vmatpush3.msra.mxu0 %v21983_v49 }
 0x2fb   :  { %17988 = vmatpush3.msra.mxu1 %v21709_v1  ;;  %17908 = vmatprep.subr.mxu0 %v22044_v2 }
 0x2fc   :  { %17989 = vmatprep.subr.mxu1 %v22044_v2  ;;  %17909 = vmatpush3.msra.mxu0 %v22001_v60 }
 0x2fd   :  { %17910 = vmatprep.mubr.msk.f32.mxu0 %vm20609_vm1, %v22044_v2  ;;  %17990 = vmatpush3.msra.mxu1 %v21717_v6 }
 0x2fe   :  { %17911 = vmatmul.mubr.f32.vlgmr.msra.gmra.mxu0 %v22232_v40  ;;  %17948 = vmatprep.subr.mxu0 %v22044_v2 }
 0x2ff   :  { %17991 = vmatprep.subr.mxu1 %v22044_v2  ;;  %17949 = vmatpush3.msra.mxu0 %v21723_v8 }
 0x300   :  { %17992 = vmatpush3.msra.mxu1 %v21802_v34  ;;  %17950 = vmatprep.subr.mxu0 %v22044_v2 }
 0x301   :  { %17993 = vmatprep.subr.mxu1 %v22044_v2  ;;  %17951 = vmatpush3.msra.mxu0 %v21733_v17 }
 0x302   :  { %17994 = vmatpush3.msra.mxu1 %v21810_v32  ;;  %17952 = vmatprep.subr.mxu0 %v22044_v2 }
 0x303   :  { %17995 = vmatprep.subr.mxu1 %v22044_v2  ;;  %17953 = vmatpush3.msra.mxu0 %v21746_v15 }
 0x304   :  { %17996 = vmatpush3.msra.mxu1 %v21830_v3  ;;  %17954 = vmatprep.subr.mxu0 %v22044_v2 }
 0x305   :  { %17997 = vmatprep.subr.mxu1 %v22044_v2  ;;  %17955 = vmatpush3.msra.mxu0 %v21757_v31 }
 0x306   :  { %17998 = vmatpush3.msra.mxu1 %v21842_v48  ;;  %17956 = vmatprep.subr.mxu0 %v22044_v2  ;;  %v15226_v48 = vld [vmem:[%s26747_s2 + $0x80] sm:$0xff] }
 0x307   :  { %17999 = vmatprep.subr.mxu1 %v22044_v2  ;;  %17957 = vmatpush3.msra.mxu0 %v21815_v26  ;;  %v22667_v3 = vand.u32 4294901760, %v15226_v48 }
 0x308   :  { %18000 = vmatpush3.msra.mxu1 %v21858_v25  ;;  %17958 = vmatprep.subr.mxu0 %v22044_v2 }
 0x309   :  { %18001 = vmatprep.subr.mxu1 %v22044_v2  ;;  %17959 = vmatpush3.msra.mxu0 %v21828_v29  ;;  %v22677_v32 = vsub.f32 %v15226_v48, %v22667_v3 }
 0x30a   :  { %18002 = vmatpush3.msra.mxu1 %v21875_v10  ;;  %17960 = vmatprep.subr.mxu0 %v22044_v2 }
 0x30b   :  { %18003 = vmatprep.subr.mxu1 %v22044_v2  ;;  %17961 = vmatpush3.msra.mxu0 %v21853_v43 }
 0x30c   :  { %18004 = vmatpush3.msra.mxu1 %v21894_v55  ;;  %17962 = vmatprep.subr.mxu0 %v22044_v2  ;;  %v15228_v55 = vld [vmem:[%s26747_s2 + $0x90] sm:$0xff] }
 0x30d   :  { %18005 = vmatprep.subr.mxu1 %v22044_v2  ;;  %17963 = vmatpush3.msra.mxu0 %v21870_v24  ;;  %v22637_v10 = vand.u32 4294901760, %v15228_v55 }
 0x30e   :  { %18006 = vmatpush3.msra.mxu1 %v21908_v19  ;;  %17964 = vmatprep.subr.mxu0 %v22044_v2 }
 0x30f   :  { %18007 = vmatprep.subr.mxu1 %v22044_v2  ;;  %17965 = vmatpush3.msra.mxu0 %v21888_v5 }
 0x310   :  { %18008 = vmatpush3.msra.mxu1 %v21926_v35  ;;  %17966 = vmatprep.subr.mxu0 %v22044_v2 }
 0x311   :  { %18009 = vmatprep.subr.mxu1 %v22044_v2  ;;  %17967 = vmatpush3.msra.mxu0 %v21906_v14 }
 0x312   :  { %18010 = vmatpush3.msra.mxu1 %v21946_v41  ;;  %17968 = vmatprep.subr.mxu0 %v22044_v2  ;;  %v15229_v41 = vld [vmem:[%s26747_s2 + $0x98] sm:$0xff] }
 0x313   :  { %18011 = vmatprep.subr.mxu1 %v22044_v2  ;;  %17969 = vmatpush3.msra.mxu0 %v21931_v18  ;;  %v22619_v35 = vand.u32 4294901760, %v15229_v41 }
 0x314   :  { %18012 = vmatpush3.msra.mxu1 %v21965_v21  ;;  %17970 = vmatprep.subr.mxu0 %v22044_v2 }
 0x315   :  { %18013 = vmatprep.subr.mxu1 %v22044_v2  ;;  %17971 = vmatpush3.msra.mxu0 %v27102_v7 }
 0x316   :  { %18014 = vmatpush3.msra.mxu1 %v21987_v9  ;;  %18015 = vmatprep.mubr.msk.f32.mxu1 %vm20609_vm1, %v22044_v2  ;;  %v15230_v9 = vld [vmem:[%s26747_s2 + $0xa0] sm:$0xff] }
 0x317   :  { %17972 = vmatprep.subr.mxu0 %v22044_v2  ;;  %18016 = vmatmul.mubr.f32.vlgmr.msra.gmra.mxu1 %v22220_v45  ;;  %v22603_v51 = vand.u32 4294901760, %v15230_v9 }
 0x318   :  { %17973 = vmatpush3.msra.mxu0 %v27103_v50  ;;  %17980 = vmatprep.mubr.msk.f32.mxu0 %vm20609_vm1, %v22044_v2 }
 0x319   :  { %17974 = vmatprep.subr.mxu0 %v22044_v2  ;;  %18023 = vmatprep.subr.mxu1 %v22044_v2 }
 0x31a   :  { %17975 = vmatpush3.msra.mxu0 %v27105_v22  ;;  %18025 = vmatprep.mubr.msk.f32.mxu1 %vm20609_vm1, %v22044_v2 }
 0x31b   :  { %17976 = vmatprep.subr.mxu0 %v22044_v2 }
 0x31c   :  { %17977 = vmatpush3.msra.mxu0 %v27107_v30 }
 0x31d   :  { %17978 = vmatprep.subr.mxu0 %v22044_v2 }
 0x31e   :  { %17979 = vmatpush3.msra.mxu0 %v27109_v58 }
 0x31f   :  { %17981 = vmatmul.mubr.f32.vlgmr.msra.gmra.mxu0 %v22220_v45  ;;  %18018 = vmatprep.subr.mxu0 %v22044_v2  ;;  %v23_v45 = vld [vmem:[%s26746_s5] sm:$0xff] }
 0x320   :  { %18020 = vmatprep.mubr.msk.f32.mxu0 %vm20609_vm1, %v22044_v2  ;;  %v22410_v58 = vand.u32 4294901760, %v23_v45 }
 0x322   :  { %27124 = vst [vmem:[#allocation75_spill] sm:$0xff] %v22410_v58  ;;  %v22413_v43 = vsub.f32 %v23_v45, %v22410_v58  ;;  %18019 = vmatpush3.msra.mxu0 %v22410_v58 }
 0x323   :  { %18028 = vmatprep.subr.mxu0 %v22044_v2 }
 0x324   :  { %27125 = vst [vmem:[#allocation76_spill] sm:$0xff] %v22413_v43 }
 0x32f   :  { %v3340_v40 = vpop.f32.mrf.mxu1 }
 0x331   :  { %v17667_v39 = vpop.f32.mrf.mxu1 }
 0x337   :  { %v3189_v62 = vpop.f32.mrf.mxu0 }
 0x338   :  { %v3341_v22 = vadd.f32 %v3340_v40, %v3189_v62 }
 0x339   :  { %v17632_v50 = vpop.f32.mrf.mxu0 }
 0x33a   :  { %v22418_v50 = vand.u32 4294901760, %v22413_v43 }
 0x33c   :  { %27126 = vst [vmem:[#allocation77_spill] sm:$0xff] %v22418_v50 }
 0x34f   :  { %v3533_v7 = vpop.f32.mrf.mxu1 }
 0x351   :  { %v17737_v18 = vpop.f32.mrf.mxu1 }
 0x358   :  { %v3444_v14 = vpop.f32.mrf.mxu0 }
 0x359   :  { %v3445_v30 = vadd.f32 %v3444_v14, %v3341_v22 }
 0x35a   :  { %v17702_v5 = vpop.f32.mrf.mxu0 }
 0x35b   :  { %v3534_v24 = vadd.f32 %v3533_v7, %v3445_v30  ;;  %v4512_v5 = vsub.f32 %v22413_v43, %v22418_v50 }
 0x35d   :  { %v22422_v7 = vand.u32 4294901760, %v4512_v5 }
 0x35f   :  { %27127 = vst [vmem:[#allocation78_spill] sm:$0xff] %v22422_v7  ;;  %18024 = vmatpush3.msra.mxu1 %v22422_v7 }
 0x360   :  { %18033 = vmatprep.subr.mxu1 %v22044_v2 }
 0x371   :  { %v3739_v18 = vpop.f32.mrf.mxu1 }
 0x373   :  { %v17807_v14 = vpop.f32.mrf.mxu1 }
 0x37a   :  { %v3652_v22 = vpop.f32.mrf.mxu0 }
 0x37b   :  { %v3653_v30 = vadd.f32 %v3652_v22, %v3534_v24 }
 0x37c   :  { %v17772_v40 = vpop.f32.mrf.mxu0 }
 0x37d   :  { %v3740_v39 = vadd.f32 %v3739_v18, %v3653_v30 }
 0x37f   :  { %v4384_v47 = vmul.f32 0.001953125, %v3740_v39 }
 0x381   :  { %v4386_v22 = vmul.f32 %v4384_v47, %v4384_v47 }
 0x393   :  { %v3981_v62 = vpop.f32.mrf.mxu1 }
 0x395   :  { %v17877_v45 = vpop.f32.mrf.mxu1 }
 0x39c   :  { %v3830_v29 = vpop.f32.mrf.mxu0 }
 0x39d   :  { %v3982_v14 = vadd.f32 %v3981_v62, %v3830_v29  ;;  %v15241_v62 = vld [vmem:[%s26747_s2 + $0xf8] sm:$0xff] }
 0x39e   :  { %v17842_v26 = vpop.f32.mrf.mxu0  ;;  %v22451_v45 = vand.u32 4294901760, %v15241_v62 }
 0x3b5   :  { %v4174_v31 = vpop.f32.mrf.mxu1 }
 0x3b7   :  { %v17947_v15 = vpop.f32.mrf.mxu1 }
 0x3b8   :  { %v25_v15 = vld [vmem:[%s26746_s5 + $0xc] sm:$0x1] }
 0x3be   :  { %v4085_v17 = vpop.f32.mrf.mxu0 }
 0x3bf   :  { %v4086_v49 = vadd.f32 %v4085_v17, %v3982_v14  ;;  %v15240_v14 = vld [vmem:[%s26747_s2 + $0xf0] sm:$0xff] }
 0x3c0   :  { %v17912_v8 = vpop.f32.mrf.mxu0 }
 0x3c1   :  { %v4175_v33 = vadd.f32 %v4174_v31, %v4086_v49  ;;  %v26_v49 = vld [vmem:[%s26746_s5 + $0xd] sm:$0x1] }
 0x3d7   :  { %v4380_v60 = vpop.f32.mrf.mxu1 }
 0x3d9   :  { %v18017_v5 = vpop.f32.mrf.mxu1 }
 0x3da   :  { %v22457_v5 = vsub.f32 %v15241_v62, %v22451_v45 }
 0x3df   :  { %v4293_v7 = vpop.f32.mrf.mxu0 }
 0x3e0   :  { %v4294_v52 = vadd.f32 %v4293_v7, %v4175_v33 }
 0x3e1   :  { %v17982_v27 = vpop.f32.mrf.mxu0 }
 0x3e2   :  { %v4381_v24 = vadd.f32 %v4380_v60, %v4294_v52 }
 0x3e4   :  { %v4385_v18 = vmul.f32 0.001953125, %v4381_v24  ;;  %v22459_v24 = vand.u32 4294901760, %v15240_v14 }
 0x3e6   :  { %v4387_v30 = vsub.f32 %v4385_v18, %v4386_v22  ;;  %v15239_v22 = vld [vmem:[%s26747_s2 + $0xe8] sm:$0xff]  ;;  %v22467_v18 = vand.u32 4294901760, %v22457_v5 }
 0x3e8   :  { %v4388_v40 = vadd.f32 1e-05, %v4387_v30  ;;  %v22470_v30 = vsub.f32 %v15240_v14, %v22459_v24 }
 0x3ea   :  { %20585 = vrsqrt.f32 %v4388_v40  ;;  %v22472_v40 = vand.u32 4294901760, %v15239_v22 }
 0x3f7   :  { %v20586_v8 = vpop.eup %20585 }
 0x3f8   :  { %v4390_v26 = vmul.f32 %v20586_v8, %v25_v15  ;;  %v15238_v15 = vld [vmem:[%s26747_s2 + $0xe0] sm:$0xff]  ;;  %v5044_v8 = vsub.f32 %v22457_v5, %v22467_v18 }
 0x3fa   :  { %v4391_v17 = vmul.f32 %v4390_v26, %v4384_v47 }
 0x3fc   :  { %v4392_v31 = vsub.f32 %v26_v49, %v4391_v17  ;;  %v22485_v49 = vsub.f32 %v15239_v22, %v22472_v40  ;;  %v22487_v17 = vand.u32 4294901760, %v15238_v15 }
 0x3fe   :  { %v4394_v29 = vrot.slane %v4392_v31, 7  ;;  %v15237_v31 = vld [vmem:[%s26747_s2 + $0xd8] sm:$0xff] }
 0x400   :  { %v4397_v27 = vsel %vm4396_vm3, %v4390_v26, %v4394_v29  ;;  %v22482_v26 = vand.u32 4294901760, %v22470_v30  ;;  %v5045_v29 = vand.u32 4294901760, %v5044_v8 }
 0x401   :  { %v4400_v52 = vsel %vm4398_vm4, %v4397_v27, 0 }
 0x402   :  { %v4468_v33 = vand.u32 4294901760, %v4400_v52  ;;  %v5051_v27 = vsub.f32 %v22470_v30, %v22482_v26 }
 0x404   :  { %v4469_v60 = vsub.f32 %v4400_v52, %v4468_v33  ;;  %18026 = vmatmul.mubr.f32.vlgmr.msra.gmra.mxu1 %v4468_v33  ;;  %v22497_v52 = vand.u32 4294901760, %v22485_v49 }
 0x405   :  { %18034 = vmatpush3.msra.mxu1 %v22410_v58  ;;  %18035 = vmatprep.mubr.msk.f32.mxu1 %vm20609_vm1, %v22044_v2 }
 0x406   :  { %v4470_v7 = vand.u32 4294901760, %v4469_v60  ;;  %18043 = vmatprep.subr.mxu1 %v22044_v2 }
 0x408   :  { %18036 = vmatmul.mubr.f32.vlgmr.msra.gmra.mxu1 %v4470_v7  ;;  %v4471_v47 = vsub.f32 %v4469_v60, %v4470_v7  ;;  %v15236_v7 = vld [vmem:[%s26747_s2 + $0xd0] sm:$0xff] }
 0x409   :  { %18044 = vmatpush3.msra.mxu1 %v22410_v58  ;;  %18045 = vmatprep.mubr.msk.f32.mxu1 %vm20609_vm1, %v22044_v2  ;;  %v22514_v14 = vand.u32 4294901760, %v15236_v7 }
 0x40a   :  { %v4472_v39 = vand.u32 4294901760, %v4471_v47  ;;  %18086 = vmatprep.subr.mxu1 %v5045_v29  ;;  %v5052_v47 = vand.u32 4294901760, %v5051_v27 }
 0x40c   :  { %18021 = vmatmul.mubr.f32.vlgmr.msra.gmra.mxu0 %v4472_v39  ;;  %18046 = vmatmul.mubr.f32.vlgmr.msra.gmra.mxu1 %v4468_v33  ;;  %v5058_v39 = vsub.f32 %v22485_v49, %v22497_v52 }
 0x40d   :  { %18029 = vmatpush3.msra.mxu0 %v22413_v43  ;;  %18030 = vmatprep.mubr.msk.f32.mxu0 %vm20609_vm1, %v22044_v2 }
 0x40e   :  { %18038 = vmatprep.subr.mxu0 %v22044_v2  ;;  %18087 = vmatpush3.msra.mxu1 %v5045_v29  ;;  %v5059_v8 = vand.u32 4294901760, %v5058_v39  ;;  %v15234_v29 = vld [vmem:[%s26747_s2 + $0xc0] sm:$0xff] }
 0x40f   :  { %18088 = vmatprep.subr.mxu1 %v5052_v47  ;;  %v22544_v59 = vand.u32 4294901760, %v15234_v29 }
 0x410   :  { %18031 = vmatmul.mubr.f32.vlgmr.msra.gmra.mxu0 %v4469_v60  ;;  %v22503_v60 = vand.u32 4294901760, %v15237_v31  ;;  %18089 = vmatpush3.msra.mxu1 %v5052_v47 }
 0x411   :  { %18039 = vmatpush3.msra.mxu0 %v22418_v50  ;;  %18040 = vmatprep.mubr.msk.f32.mxu0 %vm20609_vm1, %v22044_v2  ;;  %v22526_v50 = vsub.f32 %v15236_v7, %v22514_v14  ;;  %v22559_v0 = vsub.f32 %v15234_v29, %v22544_v59 }
 0x412   :  { %18048 = vmatprep.subr.mxu0 %v22451_v45  ;;  %v22517_v22 = vsub.f32 %v15237_v31, %v22503_v60  ;;  %18090 = vmatprep.subr.mxu1 %v5059_v8 }
 0x413   :  { %v22539_v58 = vand.u32 4294901760, %v22526_v50  ;;  %18091 = vmatpush3.msra.mxu1 %v5059_v8  ;;  %v22561_v8 = vand.u32 4294901760, %v15233_v54  ;;  %v22571_v12 = vand.u32 4294901760, %v22559_v0 }
 0x414   :  { %18041 = vmatmul.mubr.f32.vlgmr.msra.gmra.mxu0 %v4468_v33  ;;  %v22500_v33 = vsub.f32 %v15238_v15, %v22487_v17  ;;  %v15235_v15 = vld [vmem:[%s26747_s2 + $0xc8] sm:$0xff]  ;;  %v22532_v31 = vand.u32 4294901760, %v22517_v22 }
 0x415   :  { %18049 = vmatpush3.msra.mxu0 %v22451_v45  ;;  %v22528_v43 = vand.u32 4294901760, %v15235_v15  ;;  %v22574_v29 = vsub.f32 %v15233_v54, %v22561_v8  ;;  %v5093_v46 = vsub.f32 %v22559_v0, %v22571_v12 }
 0x416   :  { %18050 = vmatprep.subr.mxu0 %v22459_v24  ;;  %v22512_v62 = vand.u32 4294901760, %v22500_v33  ;;  %v5072_v47 = vsub.f32 %v22517_v22, %v22532_v31 }
 0x417   :  { %18051 = vmatpush3.msra.mxu0 %v22459_v24  ;;  %v22542_v7 = vsub.f32 %v15235_v15, %v22528_v43  ;;  %v22586_v11 = vand.u32 4294901760, %v22574_v29 }
 0x418   :  { %18052 = vmatprep.subr.mxu0 %v22472_v40  ;;  %v5065_v27 = vsub.f32 %v22500_v33, %v22512_v62  ;;  %v5073_v56 = vand.u32 4294901760, %v5072_v47  ;;  %v15231_v47 = vld [vmem:[%s26747_s2 + $0xa8] sm:$0xff] }
 0x419   :  { %18053 = vmatpush3.msra.mxu0 %v22472_v40  ;;  %v22556_v15 = vand.u32 4294901760, %v22542_v7  ;;  %v22588_v54 = vand.u32 4294901760, %v15231_v47 }
 0x41a   :  { %18054 = vmatprep.subr.mxu0 %v22487_v17  ;;  %v5066_v39 = vand.u32 4294901760, %v5065_v27  ;;  %v5079_v27 = vsub.f32 %v22526_v50, %v22539_v58 }
 0x41b   :  { %18055 = vmatpush3.msra.mxu0 %v22487_v17  ;;  %v5086_v13 = vsub.f32 %v22542_v7, %v22556_v15  ;;  %v22601_v21 = vsub.f32 %v15231_v47, %v22588_v54  ;;  %v22617_v47 = vsub.f32 %v15230_v9, %v22603_v51 }
 0x41c   :  { %18056 = vmatprep.subr.mxu0 %v22503_v60  ;;  %18092 = vmatprep.subr.mxu1 %v5066_v39  ;;  %v5080_v37 = vand.u32 4294901760, %v5079_v27 }
 0x41d   :  { %18057 = vmatpush3.msra.mxu0 %v22503_v60  ;;  %18093 = vmatpush3.msra.mxu1 %v5066_v39  ;;  %v22577_v39 = vand.u32 4294901760, %v15232_v36  ;;  %v5087_v27 = vand.u32 4294901760, %v5086_v13  ;;  %v5094_v13 = vand.u32 4294901760, %v5093_v46  ;;  %v22631_v9 = vand.u32 4294901760, %v22617_v47 }
 0x41e   :  { %18058 = vmatprep.subr.mxu0 %v22514_v14  ;;  %18094 = vmatprep.subr.mxu1 %v5073_v56 }
 0x41f   :  { %18059 = vmatpush3.msra.mxu0 %v22514_v14  ;;  %18095 = vmatpush3.msra.mxu1 %v5073_v56  ;;  %v22592_v38 = vsub.f32 %v15232_v36, %v22577_v39  ;;  %v5100_v56 = vsub.f32 %v22574_v29, %v22586_v11  ;;  %27129 = vst [vmem:[#allocation80_spill] sm:$0xff] %v22631_v9 }
 0x420   :  { %18060 = vmatprep.subr.mxu0 %v22528_v43  ;;  %18096 = vmatprep.subr.mxu1 %v5080_v37  ;;  %v5121_v25 = vsub.f32 %v22617_v47, %v22631_v9 }
 0x421   :  { %18061 = vmatpush3.msra.mxu0 %v22528_v43  ;;  %18097 = vmatpush3.msra.mxu1 %v5080_v37  ;;  %v22607_v36 = vand.u32 4294901760, %v22592_v38  ;;  %v5101_v46 = vand.u32 4294901760, %v5100_v56  ;;  %v22614_v37 = vand.u32 4294901760, %v22601_v21  ;;  %v22634_v56 = vsub.f32 %v15229_v41, %v22619_v35 }
 0x422   :  { %18062 = vmatprep.subr.mxu0 %v22544_v59  ;;  %18098 = vmatprep.subr.mxu1 %v5087_v27 }
 0x423   :  { %18063 = vmatpush3.msra.mxu0 %v22544_v59  ;;  %18099 = vmatpush3.msra.mxu1 %v5087_v27  ;;  %27128 = vst [vmem:[#allocation79_spill] sm:$0xff] %v22614_v37  ;;  %v5107_v19 = vsub.f32 %v22592_v38, %v22607_v36  ;;  %v5114_v27 = vsub.f32 %v22601_v21, %v22614_v37  ;;  %v22646_v41 = vand.u32 4294901760, %v22634_v56 }
 0x424   :  { %18064 = vmatprep.subr.mxu0 %v22561_v8  ;;  %18100 = vmatprep.subr.mxu1 %v5094_v13 }
 0x425   :  { %18065 = vmatpush3.msra.mxu0 %v22561_v8  ;;  %18101 = vmatpush3.msra.mxu1 %v5094_v13  ;;  %v5108_v4 = vand.u32 4294901760, %v5107_v19  ;;  %v5115_v13 = vand.u32 4294901760, %v5114_v27  ;;  %27130 = vst [vmem:[#allocation81_spill] sm:$0xff] %v22646_v41  ;;  %v22650_v19 = vsub.f32 %v15228_v55, %v22637_v10  ;;  %v5128_v27 = vsub.f32 %v22634_v56, %v22646_v41 }
 0x426   :  { %18066 = vmatprep.subr.mxu0 %v22577_v39  ;;  %18102 = vmatprep.subr.mxu1 %v5101_v46  ;;  %v22665_v55 = vsub.f32 %v15227_v44, %v22652_v63 }
 0x427   :  { %18067 = vmatpush3.msra.mxu0 %v22577_v39  ;;  %18103 = vmatpush3.msra.mxu1 %v5101_v46  ;;  %v5122_v46 = vand.u32 4294901760, %v5121_v25  ;;  %v22662_v16 = vand.u32 4294901760, %v22650_v19  ;;  %v5129_v42 = vand.u32 4294901760, %v5128_v27  ;;  %v22684_v27 = vand.u32 4294901760, %v22677_v32 }
 0x428   :  { %18068 = vmatprep.subr.mxu0 %v22588_v54  ;;  %18104 = vmatprep.subr.mxu1 %v5108_v4 }
 0x429   :  { %18069 = vmatpush3.msra.mxu0 %v22588_v54  ;;  %18105 = vmatpush3.msra.mxu1 %v5108_v4  ;;  %27131 = vst [vmem:[#allocation82_spill] sm:$0xff] %v22662_v16  ;;  %v5135_v25 = vsub.f32 %v22650_v19, %v22662_v16  ;;  %v22674_v4 = vand.u32 4294901760, %v22665_v55  ;;  %27133 = vst [vmem:[#allocation84_spill] sm:$0xff] %v22684_v27  ;;  %v5149_v48 = vsub.f32 %v22677_v32, %v22684_v27 }
 0x42a   :  { %18070 = vmatprep.subr.mxu0 %v22603_v51  ;;  %18106 = vmatprep.subr.mxu1 %v5115_v13 }
 0x42b   :  { %18071 = vmatpush3.msra.mxu0 %v22603_v51  ;;  %18107 = vmatpush3.msra.mxu1 %v5115_v13  ;;  %27132 = vst [vmem:[#allocation83_spill] sm:$0xff] %v22674_v4  ;;  %v5136_v44 = vand.u32 4294901760, %v5135_v25  ;;  %v5142_v13 = vsub.f32 %v22665_v55, %v22674_v4 }
 0x42c   :  { %18072 = vmatprep.subr.mxu0 %v22619_v35  ;;  %18108 = vmatprep.subr.mxu1 %v5122_v46 }
 0x42d   :  { %18073 = vmatpush3.msra.mxu0 %v22619_v35  ;;  %18109 = vmatpush3.msra.mxu1 %v5122_v46  ;;  %v5143_v53 = vand.u32 4294901760, %v5142_v13  ;;  %v5150_v46 = vand.u32 4294901760, %v5149_v48 }
 0x42e   :  { %18074 = vmatprep.subr.mxu0 %v22637_v10  ;;  %18110 = vmatprep.subr.mxu1 %v5129_v42 }
 0x42f   :  { %18075 = vmatpush3.msra.mxu0 %v22637_v10  ;;  %18111 = vmatpush3.msra.mxu1 %v5129_v42  ;;  %v4848_v42 = vlaneseq }
 0x430   :  { %18076 = vmatprep.subr.mxu0 %v22652_v63  ;;  %18112 = vmatprep.subr.mxu1 %v5136_v44 }
 0x431   :  { %18077 = vmatpush3.msra.mxu0 %v22652_v63  ;;  %18113 = vmatpush3.msra.mxu1 %v5136_v44  ;;  %v4849_v44 = vshrl.u32 %v4848_v42, 7 }
 0x432   :  { %18078 = vmatprep.subr.mxu0 %v22667_v3  ;;  %18114 = vmatprep.subr.mxu1 %v5143_v53 }
 0x433   :  { %18079 = vmatpush3.msra.mxu0 %v22667_v3  ;;  %18115 = vmatpush3.msra.mxu1 %v5143_v53  ;;  %v22692_v16 = vsub.s32 1, %v4849_v44 }
 0x434   :  { %18124 = vmatprep.subr.mxu0 %v22457_v5  ;;  %18116 = vmatprep.subr.mxu1 %v5150_v46 }
 0x435   :  { %18117 = vmatpush3.msra.mxu1 %v5150_v46  ;;  %v22690_v46 = vsub.s32 0, %v4849_v44  ;;  %27135 = vst [vmem:[#allocation86_spill] sm:$0xff] %v22692_v16 }
 0x436   :  { %18162 = vmatprep.subr.mxu1 %v22451_v45 }
 0x437   :  { %27134 = vst [vmem:[#allocation85_spill] sm:$0xff] %v22690_v46 }
 0x4c4   :  { %v4550_v25 = vpop.f32.mrf.mxu1 }
 0x4c6   :  { %v18027_v34 = vpop.f32.mrf.mxu1 }
 0x4c8   :  { %v4698_v23 = vpop.f32.mrf.mxu1 }
 0x4ca   :  { %v18037_v6 = vpop.f32.mrf.mxu1 }
 0x4cc   :  { %v4474_v20 = vpop.f32.mrf.mxu0  ;;  %v4844_v1 = vpop.f32.mrf.mxu1 }
 0x4cd   :  { %v4551_v61 = vadd.f32 %v4550_v25, %v4474_v20  ;;  %v27137_v20 = vld [vmem:[#allocation3_spill] sm:$0xff] }
 0x4ce   :  { %v18022_v28 = vpop.f32.mrf.mxu0  ;;  %v18047_v13 = vpop.f32.mrf.mxu1 }
 0x4cf   :  { %v27136_v28 = vld [vmem:[#allocation5_spill] sm:$0xff] }
 0x4d0   :  { %v4624_v57 = vpop.f32.mrf.mxu0 }
 0x4d1   :  { %v4625_v2 = vadd.f32 %v4624_v57, %v4551_v61  ;;  %v27138_v57 = vld [vmem:[#allocation7_spill] sm:$0xff] }
 0x4d2   :  { %v18032_v27 = vpop.f32.mrf.mxu0 }
 0x4d3   :  { %v4699_v48 = vadd.f32 %v4698_v23, %v4625_v2  ;;  %v27139_v27 = vld [vmem:[#allocation9_spill] sm:$0xff] }
 0x4d4   :  { %v4772_v53 = vpop.f32.mrf.mxu0 }
 0x4d5   :  { %v4773_v4 = vadd.f32 %v4772_v53, %v4699_v48 }
 0x4d6   :  { %v18042_v34 = vpop.f32.mrf.mxu0 }
 0x4d7   :  { %v4845_v41 = vadd.f32 %v4844_v1, %v4773_v4 }
 0x4d9   :  { %v4851_v6 = vrot.slane %v4845_v41, %v22690_v46  ;;  %v4859_v9 = vrot.slane %v4845_v41, %v22692_v16 }
 0x4db   :  { %v4852_v13 = vmul.f32 %v4851_v6, %v27136_v28  ;;  %v4853_v25 = vmul.f32 %v4851_v6, %v27137_v20  ;;  %v4854_v61 = vmul.f32 %v4851_v6, %v27138_v57  ;;  %v4855_v2 = vmul.f32 %v4851_v6, %v27139_v27 }
 0x4dd   :  { %v4860_v23 = vadd.f32 %v4859_v9, %v4852_v13  ;;  %v4861_v42 = vadd.f32 %v4859_v9, %v4853_v25  ;;  %v4862_v48 = vadd.f32 %v4859_v9, %v4854_v61  ;;  %v4863_v53 = vadd.f32 %v4859_v9, %v4855_v2 }
 0x4df   :  { %v4864_v44 = vmax.f32 %v4860_v23, 0.0  ;;  %v4865_v37 = vmax.f32 %v4861_v42, 0.0  ;;  %v4866_v34 = vmax.f32 %v4862_v48, 0.0  ;;  %v4867_v1 = vmax.f32 %v4863_v53, 0.0 }
 0x4e1   :  { %4874 = vst [vmem:[#allocation2 + $0x1] sm:$0xff] %v4864_v44  ;;  %4875 = vst [vmem:[#allocation2 + $0x9] sm:$0xff] %v4865_v37  ;;  %v22700_v41 = vand.u32 4294901760, %v4864_v44  ;;  %v22702_v4 = vand.u32 4294901760, %v4865_v37  ;;  %v22704_v28 = vand.u32 4294901760, %v4866_v34  ;;  %v22706_v20 = vand.u32 4294901760, %v4867_v1 }
 0x4e2   :  { %4876 = vst [vmem:[#allocation2 + $0x19] sm:$0xff] %v4866_v34  ;;  %4877 = vst [vmem:[#allocation2 + $0x21] sm:$0xff] %v4867_v1 }
 0x4e3   :  { %18118 = vmatprep.mubr.f32.mxu1 %v22700_v41  ;;  %v22710_v9 = vsub.f32 %v4865_v37, %v22702_v4  ;;  %v5001_v6 = vsub.f32 %v4864_v44, %v22700_v41  ;;  %v22714_v13 = vsub.f32 %v4866_v34, %v22704_v28  ;;  %v22717_v25 = vsub.f32 %v4867_v1, %v22706_v20 }
 0x4e4   :  { %18119 = vmatmul.mubr.f32.vlgmr.msra.gmra.mxu1 %v22702_v4 }
 0x4e5   :  { %18163 = vmatpush3.msra.mxu1 %v22451_v45  ;;  %18121 = vmatprep.mubr.f32.mxu1 %v22704_v28  ;;  %v5002_v57 = vand.u32 4294901760, %v5001_v6  ;;  %v5012_v61 = vand.u32 4294901760, %v22710_v9  ;;  %v5022_v37 = vand.u32 4294901760, %v22714_v13  ;;  %v5032_v23 = vand.u32 4294901760, %v22717_v25 }
 0x4e6   :  { %18164 = vmatprep.subr.mxu1 %v22459_v24 }
 0x4e7   :  { %18165 = vmatpush3.msra.mxu1 %v22459_v24  ;;  %v5003_v27 = vsub.f32 %v5001_v6, %v5002_v57  ;;  %v5013_v2 = vsub.f32 %v22710_v9, %v5012_v61  ;;  %v5023_v42 = vsub.f32 %v22714_v13, %v5022_v37  ;;  %v5033_v44 = vsub.f32 %v22717_v25, %v5032_v23 }
 0x4e8   :  { %18166 = vmatprep.subr.mxu1 %v22472_v40  ;;  %18122 = vmatmul.mubr.f32.gmra.mxu1 %v22706_v20 }
 0x4e9   :  { %18167 = vmatpush3.msra.mxu1 %v22472_v40  ;;  %18194 = vmatprep.mubr.f32.mxu1 %v5002_v57  ;;  %v5004_v48 = vand.u32 4294901760, %v5003_v27  ;;  %v5014_v53 = vand.u32 4294901760, %v5013_v2  ;;  %v5024_v34 = vand.u32 4294901760, %v5023_v42  ;;  %v5034_v1 = vand.u32 4294901760, %v5033_v44  ;;  %v27143_v57 = vld [vmem:[#allocation82_spill] sm:$0xff]  ;;  %v4886_v2 = vld [vmem:[%s26747_s2 + $0x20] sm:$0xff] }
 0x4ea   :  { %18168 = vmatprep.subr.mxu1 %v22487_v17 }
 0x4eb   :  { %18169 = vmatpush3.msra.mxu1 %v22487_v17  ;;  %18080 = vmatprep.mubr.f32.mxu0 %v5004_v48 }
 0x4ec   :  { %18170 = vmatprep.subr.mxu1 %v22503_v60  ;;  %18081 = vmatmul.mubr.f32.vlgmr.msra.gmra.mxu0 %v5014_v53 }
 0x4ed   :  { %18125 = vmatpush3.msra.mxu0 %v22457_v5  ;;  %18171 = vmatpush3.msra.mxu1 %v22503_v60 }
 0x4ee   :  { %18083 = vmatprep.mubr.f32.mxu0 %v5024_v34  ;;  %18126 = vmatprep.subr.mxu0 %v22470_v30 }
 0x4ef   :  { %18172 = vmatprep.subr.mxu1 %v22514_v14  ;;  %18127 = vmatpush3.msra.mxu0 %v22470_v30 }
 0x4f0   :  { %18173 = vmatpush3.msra.mxu1 %v22514_v14  ;;  %18128 = vmatprep.subr.mxu0 %v22485_v49 }
 0x4f1   :  { %18174 = vmatprep.subr.mxu1 %v22528_v43  ;;  %18084 = vmatmul.mubr.f32.gmra.mxu0 %v5034_v1 }
 0x4f2   :  { %18129 = vmatpush3.msra.mxu0 %v22485_v49  ;;  %18175 = vmatpush3.msra.mxu1 %v22528_v43 }
 0x4f3   :  { %18130 = vmatprep.subr.mxu0 %v22500_v33  ;;  %18156 = vmatprep.mubr.f32.mxu0 %v5001_v6 }
 0x4f4   :  { %18176 = vmatprep.subr.mxu1 %v22544_v59  ;;  %18131 = vmatpush3.msra.mxu0 %v22500_v33 }
 0x4f5   :  { %18177 = vmatpush3.msra.mxu1 %v22544_v59  ;;  %18132 = vmatprep.subr.mxu0 %v22517_v22 }
 0x4f6   :  { %18178 = vmatprep.subr.mxu1 %v22561_v8  ;;  %18133 = vmatpush3.msra.mxu0 %v22517_v22 }
 0x4f7   :  { %18179 = vmatpush3.msra.mxu1 %v22561_v8  ;;  %18134 = vmatprep.subr.mxu0 %v22526_v50 }
 0x4f8   :  { %18180 = vmatprep.subr.mxu1 %v22577_v39  ;;  %18135 = vmatpush3.msra.mxu0 %v22526_v50 }
 0x4f9   :  { %18181 = vmatpush3.msra.mxu1 %v22577_v39  ;;  %18136 = vmatprep.subr.mxu0 %v22542_v7 }
 0x4fa   :  { %18182 = vmatprep.subr.mxu1 %v22588_v54  ;;  %18137 = vmatpush3.msra.mxu0 %v22542_v7 }
 0x4fb   :  { %18183 = vmatpush3.msra.mxu1 %v22588_v54  ;;  %18138 = vmatprep.subr.mxu0 %v22559_v0 }
 0x4fc   :  { %18184 = vmatprep.subr.mxu1 %v22603_v51  ;;  %18139 = vmatpush3.msra.mxu0 %v22559_v0  ;;  %v4896_v0 = vld [vmem:[%s26747_s2 + $0x70] sm:$0xff] }
 0x4fd   :  { %18185 = vmatpush3.msra.mxu1 %v22603_v51  ;;  %18140 = vmatprep.subr.mxu0 %v22574_v29  ;;  %v22843_v50 = vand.u32 4294901760, %v4896_v0 }
 0x4fe   :  { %18186 = vmatprep.subr.mxu1 %v22619_v35  ;;  %18141 = vmatpush3.msra.mxu0 %v22574_v29 }
 0x4ff   :  { %18187 = vmatpush3.msra.mxu1 %v22619_v35  ;;  %18142 = vmatprep.subr.mxu0 %v22592_v38  ;;  %v22862_v5 = vsub.f32 %v4896_v0, %v22843_v50 }
 0x500   :  { %18188 = vmatprep.subr.mxu1 %v22637_v10  ;;  %18143 = vmatpush3.msra.mxu0 %v22592_v38  ;;  %v4895_v38 = vld [vmem:[%s26747_s2 + $0x68] sm:$0xff] }
 0x501   :  { %18189 = vmatpush3.msra.mxu1 %v22637_v10  ;;  %18144 = vmatprep.subr.mxu0 %v22601_v21  ;;  %v22889_v49 = vand.u32 4294901760, %v22862_v5 }
 0x502   :  { %18190 = vmatprep.subr.mxu1 %v22652_v63  ;;  %18145 = vmatpush3.msra.mxu0 %v22601_v21  ;;  %v4897_v21 = vld [vmem:[%s26747_s2 + $0x78] sm:$0xff] }
 0x503   :  { %18191 = vmatpush3.msra.mxu1 %v22652_v63  ;;  %18146 = vmatprep.subr.mxu0 %v22617_v47 }
 0x504   :  { %18192 = vmatprep.subr.mxu1 %v22667_v3  ;;  %18147 = vmatpush3.msra.mxu0 %v22617_v47  ;;  %v27142_v47 = vld [vmem:[#allocation81_spill] sm:$0xff] }
 0x505   :  { %18193 = vmatpush3.msra.mxu1 %v22667_v3  ;;  %18148 = vmatprep.subr.mxu0 %v22634_v56 }
 0x506   :  { %18195 = vmatmul.mubr.f32.vlgmr.msra.gmra.mxu1 %v5012_v61  ;;  %18238 = vmatprep.subr.mxu1 %v22451_v45 }
 0x507   :  { %18149 = vmatpush3.msra.mxu0 %v22634_v56  ;;  %18197 = vmatprep.mubr.f32.mxu1 %v5022_v37 }
 0x508   :  { %18239 = vmatpush3.msra.mxu1 %v22451_v45  ;;  %18150 = vmatprep.subr.mxu0 %v22650_v19  ;;  %v22852_v45 = vand.u32 4294901760, %v4895_v38 }
 0x509   :  { %18240 = vmatprep.subr.mxu1 %v22459_v24  ;;  %18151 = vmatpush3.msra.mxu0 %v22650_v19 }
 0x50a   :  { %18241 = vmatpush3.msra.mxu1 %v22459_v24  ;;  %18152 = vmatprep.subr.mxu0 %v22665_v55  ;;  %v4893_v24 = vld [vmem:[%s26747_s2 + $0x58] sm:$0xff] }
 0x50b   :  { %18198 = vmatmul.mubr.f32.gmra.mxu1 %v5032_v23  ;;  %18242 = vmatprep.subr.mxu1 %v22472_v40  ;;  %v27144_v23 = vld [vmem:[#allocation83_spill] sm:$0xff] }
 0x50c   :  { %18153 = vmatpush3.msra.mxu0 %v22665_v55  ;;  %18243 = vmatpush3.msra.mxu1 %v22472_v40  ;;  %v22881_v40 = vand.u32 4294901760, %v4893_v24 }
 0x50d   :  { %18270 = vmatprep.mubr.f32.mxu1 %v22700_v41  ;;  %18154 = vmatprep.subr.mxu0 %v22677_v32 }
 0x50e   :  { %18244 = vmatprep.subr.mxu1 %v22487_v17  ;;  %18155 = vmatpush3.msra.mxu0 %v22677_v32  ;;  %v22829_v32 = vand.u32 4294901760, %v4897_v21 }
 0x50f   :  { %18245 = vmatpush3.msra.mxu1 %v22487_v17  ;;  %18157 = vmatmul.mubr.f32.vlgmr.msra.gmra.mxu0 %v22710_v9 }
 0x510   :  { %18200 = vmatprep.subr.mxu0 %v22467_v18  ;;  %18246 = vmatprep.subr.mxu1 %v22503_v60 }
 0x511   :  { %18159 = vmatprep.mubr.f32.mxu0 %v22714_v13  ;;  %18201 = vmatpush3.msra.mxu0 %v22467_v18 }
 0x512   :  { %18247 = vmatpush3.msra.mxu1 %v22503_v60  ;;  %18202 = vmatprep.subr.mxu0 %v22482_v26  ;;  %v4890_v60 = vld [vmem:[%s26747_s2 + $0x40] sm:$0xff] }
 0x513   :  { %18248 = vmatprep.subr.mxu1 %v22514_v14  ;;  %18203 = vmatpush3.msra.mxu0 %v22482_v26  ;;  %v4892_v26 = vld [vmem:[%s26747_s2 + $0x50] sm:$0xff]  ;;  %v22934_v29 = vand.u32 4294901760, %v4890_v60 }
 0x514   :  { %18249 = vmatpush3.msra.mxu1 %v22514_v14  ;;  %18160 = vmatmul.mubr.f32.gmra.mxu0 %v22717_v25  ;;  %v22906_v33 = vand.u32 4294901760, %v4892_v26  ;;  %v4878_v14 = vld [vmem:[#allocation2] sm:$0xff]  ;;  %v4887_v25 = vld [vmem:[%s26747_s2 + $0x28] sm:$0xff] }
 0x515   :  { %18204 = vmatprep.subr.mxu0 %v22497_v52  ;;  %18250 = vmatprep.subr.mxu1 %v22528_v43  ;;  %v22965_v6 = vsub.f32 %v4890_v60, %v22934_v29  ;;  %v22989_v53 = vand.u32 4294901760, %v4887_v25 }
 0x516   :  { %18205 = vmatpush3.msra.mxu0 %v22497_v52  ;;  %18232 = vmatprep.mubr.f32.mxu0 %v22700_v41  ;;  %v4891_v52 = vld [vmem:[%s26747_s2 + $0x48] sm:$0xff] }
 0x517   :  { %18251 = vmatpush3.msra.mxu1 %v22528_v43  ;;  %18206 = vmatprep.subr.mxu0 %v22512_v62  ;;  %v22848_v43 = vsub.f32 %v4897_v21, %v22829_v32  ;;  %v22920_v22 = vand.u32 4294901760, %v4891_v52  ;;  %v22995_v34 = vand.u32 4294901760, %v22965_v6  ;;  %v4885_v21 = vld [vmem:[%s26747_s2 + $0x18] sm:$0xff]  ;;  %v23019_v60 = vsub.f32 %v4887_v25, %v22989_v53 }
 0x518   :  { %18252 = vmatprep.subr.mxu1 %v22544_v59  ;;  %18207 = vmatpush3.msra.mxu0 %v22512_v62  ;;  %v5821_v62 = vsub.f32 %v22862_v5, %v22889_v49 }
 0x519   :  { %18253 = vmatpush3.msra.mxu1 %v22544_v59  ;;  %18208 = vmatprep.subr.mxu0 %v22532_v31  ;;  %v4894_v59 = vld [vmem:[%s26747_s2 + $0x60] sm:$0xff]  ;;  %v22870_v18 = vand.u32 4294901760, %v22848_v43  ;;  %v22952_v19 = vsub.f32 %v4891_v52, %v22920_v22 }
 0x51a   :  { %18254 = vmatprep.subr.mxu1 %v22561_v8  ;;  %18209 = vmatpush3.msra.mxu0 %v22532_v31  ;;  %v22872_v30 = vand.u32 4294901760, %v4894_v59  ;;  %v5822_v56 = vand.u32 4294901760, %v5821_v62 }
 0x51b   :  { %18255 = vmatpush3.msra.mxu1 %v22561_v8  ;;  %18210 = vmatprep.subr.mxu0 %v22539_v58  ;;  %v22932_v8 = vsub.f32 %v4892_v26, %v22906_v33  ;;  %v22980_v27 = vand.u32 4294901760, %v22952_v19 }
 0x51c   :  { %18256 = vmatprep.subr.mxu1 %v22577_v39  ;;  %18211 = vmatpush3.msra.mxu0 %v22539_v58  ;;  %v22877_v58 = vsub.f32 %v4895_v38, %v22852_v45  ;;  %v22896_v17 = vsub.f32 %v4894_v59, %v22872_v30  ;;  %v23005_v59 = vand.u32 4294901760, %v4886_v2 }
 0x51d   :  { %18257 = vmatpush3.msra.mxu1 %v22577_v39  ;;  %18212 = vmatprep.subr.mxu0 %v22556_v15  ;;  %v4889_v39 = vld [vmem:[%s26747_s2 + $0x38] sm:$0xff]  ;;  %v5856_v26 = vsub.f32 %v22952_v19, %v22980_v27 }
 0x51e   :  { %18258 = vmatprep.subr.mxu1 %v22588_v54  ;;  %18213 = vmatpush3.msra.mxu0 %v22556_v15  ;;  %v22925_v7 = vand.u32 4294901760, %v22896_v17  ;;  %v27141_v15 = vld [vmem:[#allocation80_spill] sm:$0xff]  ;;  %v22957_v41 = vand.u32 4294901760, %v4889_v39 }
 0x51f   :  { %18259 = vmatpush3.msra.mxu1 %v22588_v54  ;;  %18214 = vmatprep.subr.mxu0 %v22571_v12  ;;  %v22941_v54 = vand.u32 4294901760, %v4878_v14 }
 0x520   :  { %18260 = vmatprep.subr.mxu1 %v22603_v51  ;;  %18215 = vmatpush3.msra.mxu0 %v22571_v12  ;;  %v5814_v12 = vsub.f32 %v22848_v43, %v22870_v18  ;;  %v5835_v55 = vsub.f32 %v22896_v17, %v22925_v7  ;;  %v22987_v48 = vsub.f32 %v4889_v39, %v22957_v41 }
 0x521   :  { %18261 = vmatpush3.msra.mxu1 %v22603_v51  ;;  %18216 = vmatprep.subr.mxu0 %v22586_v11  ;;  %v22904_v51 = vand.u32 4294901760, %v22877_v58  ;;  %v22976_v37 = vsub.f32 %v4878_v14, %v22941_v54  ;;  %v5863_v14 = vsub.f32 %v22965_v6, %v22995_v34 }
 0x522   :  { %18262 = vmatprep.subr.mxu1 %v22619_v35  ;;  %18217 = vmatpush3.msra.mxu0 %v22586_v11  ;;  %v22911_v11 = vsub.f32 %v4893_v24, %v22881_v40  ;;  %v5815_v31 = vand.u32 4294901760, %v5814_v12  ;;  %v5836_v42 = vand.u32 4294901760, %v5835_v55  ;;  %v27145_v24 = vld [vmem:[#allocation84_spill] sm:$0xff]  ;;  %v4884_v12 = vld [vmem:[%s26747_s2 + $0x10] sm:$0xff]  ;;  %v23016_v52 = vand.u32 4294901760, %v22987_v48 }
 0x523   :  { %18263 = vmatpush3.msra.mxu1 %v22619_v35  ;;  %18218 = vmatprep.subr.mxu0 %v22607_v36  ;;  %v27140_v35 = vld [vmem:[#allocation79_spill] sm:$0xff]  ;;  %v26917_v38 = vand.u32 4294901760, %v22976_v37  ;;  %v23039_v39 = vand.u32 4294901760, %v4884_v12  ;;  %v23050_v55 = vand.u32 4294901760, %v23019_v60  ;;  %v5864_v25 = vand.u32 4294901760, %v5863_v14 }
 0x524   :  { %18264 = vmatprep.subr.mxu1 %v22637_v10  ;;  %18219 = vmatpush3.msra.mxu0 %v22607_v36  ;;  %v4888_v36 = vld [vmem:[%s26747_s2 + $0x30] sm:$0xff] }
 0x525   :  { %18265 = vmatpush3.msra.mxu1 %v22637_v10  ;;  %18220 = vmatprep.subr.mxu0 %v27140_v35  ;;  %v5828_v10 = vsub.f32 %v22877_v58, %v22904_v51  ;;  %v22967_v13 = vand.u32 4294901760, %v4888_v36 }
 0x526   :  { %18266 = vmatprep.subr.mxu1 %v22652_v63  ;;  %18221 = vmatpush3.msra.mxu0 %v27140_v35  ;;  %v23021_v35 = vand.u32 4294901760, %v4885_v21 }
 0x527   :  { %18267 = vmatpush3.msra.mxu1 %v22652_v63  ;;  %18222 = vmatprep.subr.mxu0 %v27141_v15  ;;  %v22944_v63 = vand.u32 4294901760, %v22911_v11  ;;  %v5829_v9 = vand.u32 4294901760, %v5828_v10  ;;  %v22998_v1 = vsub.f32 %v4888_v36, %v22967_v13  ;;  %v5773_v10 = vsub.f32 %v22976_v37, %v26917_v38  ;;  %v4881_v38 = vld [vmem:[#allocation2 + $0x20] sm:$0xff] }
 0x528   :  { %18268 = vmatprep.subr.mxu1 %v22667_v3  ;;  %18223 = vmatpush3.msra.mxu0 %v27141_v15  ;;  %v4883_v15 = vld [vmem:[%s26747_s2 + $0x8] sm:$0xff]  ;;  %v5857_v36 = vand.u32 4294901760, %v5856_v26 }
 0x529   :  { %18269 = vmatpush3.msra.mxu1 %v22667_v3  ;;  %18224 = vmatprep.subr.mxu0 %v27142_v47  ;;  %v22962_v3 = vand.u32 4294901760, %v22932_v8  ;;  %v5842_v61 = vsub.f32 %v22911_v11, %v22944_v63 }
 0x52a   :  { %18271 = vmatmul.mubr.f32.vlgmr.msra.gmra.mxu1 %v22702_v4  ;;  %18314 = vmatprep.subr.mxu1 %v5815_v31 }
 0x52b   :  { %18225 = vmatpush3.msra.mxu0 %v27142_v47  ;;  %18273 = vmatprep.mubr.f32.mxu1 %v22704_v28  ;;  %v5849_v44 = vsub.f32 %v22932_v8, %v22962_v3  ;;  %v5843_v0 = vand.u32 4294901760, %v5842_v61  ;;  %v4882_v47 = vld [vmem:[%s26747_s2] sm:$0xff]  ;;  %v5774_v61 = vand.u32 4294901760, %v5773_v10 }
 0x52c   :  { %18315 = vmatpush3.msra.mxu1 %v5815_v31  ;;  %18226 = vmatprep.subr.mxu0 %v27143_v57  ;;  %v23027_v31 = vand.u32 4294901760, %v22998_v1 }
 0x52d   :  { %18316 = vmatprep.subr.mxu1 %v5822_v56  ;;  %18227 = vmatpush3.msra.mxu0 %v27143_v57  ;;  %v5850_v62 = vand.u32 4294901760, %v5849_v44 }
 0x52e   :  { %18317 = vmatpush3.msra.mxu1 %v5822_v56  ;;  %18228 = vmatprep.subr.mxu0 %v27144_v23  ;;  %v5870_v56 = vsub.f32 %v22987_v48, %v23016_v52  ;;  %v5877_v57 = vsub.f32 %v22998_v1, %v23027_v31 }
 0x52f   :  { %18274 = vmatmul.mubr.f32.gmra.mxu1 %v22706_v20  ;;  %18318 = vmatprep.subr.mxu1 %v5829_v9 }
 0x530   :  { %18229 = vmatpush3.msra.mxu0 %v27144_v23  ;;  %18319 = vmatpush3.msra.mxu1 %v5829_v9  ;;  %v23053_v9 = vsub.f32 %v4885_v21, %v23021_v35  ;;  %v23065_v23 = vsub.f32 %v4884_v12, %v23039_v39  ;;  %v5871_v44 = vand.u32 4294901760, %v5870_v56  ;;  %v5884_v21 = vsub.f32 %v23019_v60, %v23050_v55 }
 0x531   :  { %18346 = vmatprep.mubr.f32.mxu1 %v22941_v54  ;;  %18230 = vmatprep.subr.mxu0 %v27145_v24 }
 0x532   :  { %18320 = vmatprep.subr.mxu1 %v5836_v42  ;;  %18231 = vmatpush3.msra.mxu0 %v27145_v24  ;;  %v5878_v24 = vand.u32 4294901760, %v5877_v57  ;;  %v23084_v12 = vand.u32 4294901760, %v23065_v23  ;;  %v5885_v14 = vand.u32 4294901760, %v5884_v21 }
 0x533   :  { %18321 = vmatpush3.msra.mxu1 %v5836_v42  ;;  %18233 = vmatmul.mubr.f32.vlgmr.msra.gmra.mxu0 %v22702_v4  ;;  %v23037_v4 = vsub.f32 %v4886_v2, %v23005_v59  ;;  %v23067_v42 = vand.u32 4294901760, %v4882_v47 }
 0x534   :  { %18276 = vmatprep.subr.mxu0 %v22829_v32  ;;  %18322 = vmatprep.subr.mxu1 %v5843_v0 }
 0x535   :  { %18235 = vmatprep.mubr.f32.mxu0 %v22704_v28  ;;  %18277 = vmatpush3.msra.mxu0 %v22829_v32  ;;  %v23055_v28 = vand.u32 4294901760, %v4883_v15  ;;  %v23062_v2 = vand.u32 4294901760, %v23037_v4 }
 0x536   :  { %18323 = vmatpush3.msra.mxu1 %v5843_v0  ;;  %18278 = vmatprep.subr.mxu0 %v22843_v50 }
 0x537   :  { %18324 = vmatprep.subr.mxu1 %v5850_v62  ;;  %18279 = vmatpush3.msra.mxu0 %v22843_v50  ;;  %v23077_v0 = vsub.f32 %v4883_v15, %v23055_v28  ;;  %v5891_v26 = vsub.f32 %v23037_v4, %v23062_v2 }
 0x538   :  { %18325 = vmatpush3.msra.mxu1 %v5850_v62  ;;  %18236 = vmatmul.mubr.f32.gmra.mxu0 %v22706_v20  ;;  %v23074_v20 = vand.u32 4294901760, %v23053_v9  ;;  %v23087_v62 = vsub.f32 %v4882_v47, %v23067_v42  ;;  %v5905_v47 = vsub.f32 %v23065_v23, %v23084_v12 }
 0x539   :  { %18280 = vmatprep.subr.mxu0 %v22852_v45  ;;  %18326 = vmatprep.subr.mxu1 %v5857_v36  ;;  %v23094_v10 = vand.u32 4294901760, %v23077_v0 }
 0x53a   :  { %18281 = vmatpush3.msra.mxu0 %v22852_v45  ;;  %18308 = vmatprep.mubr.f32.mxu0 %v5774_v61  ;;  %v5898_v15 = vsub.f32 %v23053_v9, %v23074_v20  ;;  %v23101_v56 = vand.u32 4294901760, %v23087_v62  ;;  %v4879_v61 = vld [vmem:[#allocation2 + $0x8] sm:$0xff] }
 0x53b   :  { %18327 = vmatpush3.msra.mxu1 %v5857_v36  ;;  %18282 = vmatprep.subr.mxu0 %v22872_v30  ;;  %v5892_v36 = vand.u32 4294901760, %v5891_v26  ;;  %v5912_v57 = vsub.f32 %v23077_v0, %v23094_v10  ;;  %v23112_v26 = vand.u32 4294901760, %v4879_v61 }
 0x53c   :  { %18328 = vmatprep.subr.mxu1 %v5864_v25  ;;  %18283 = vmatpush3.msra.mxu0 %v22872_v30  ;;  %v5919_v21 = vsub.f32 %v23087_v62, %v23101_v56 }
 0x53d   :  { %18329 = vmatpush3.msra.mxu1 %v5864_v25  ;;  %18284 = vmatprep.subr.mxu0 %v22881_v40  ;;  %v5899_v25 = vand.u32 4294901760, %v5898_v15  ;;  %v5913_v15 = vand.u32 4294901760, %v5912_v57  ;;  %v23124_v57 = vand.u32 4294901760, %v4881_v38 }
 0x53e   :  { %18330 = vmatprep.subr.mxu1 %v5871_v44  ;;  %18285 = vmatpush3.msra.mxu0 %v22881_v40 }
 0x53f   :  { %18331 = vmatpush3.msra.mxu1 %v5871_v44  ;;  %18286 = vmatprep.subr.mxu0 %v22906_v33  ;;  %v5906_v44 = vand.u32 4294901760, %v5905_v47  ;;  %v5920_v47 = vand.u32 4294901760, %v5919_v21 }
 0x540   :  { %18332 = vmatprep.subr.mxu1 %v5878_v24  ;;  %18287 = vmatpush3.msra.mxu0 %v22906_v33 }
 0x541   :  { %18333 = vmatpush3.msra.mxu1 %v5878_v24  ;;  %18288 = vmatprep.subr.mxu0 %v22920_v22  ;;  %v4880_v24 = vld [vmem:[#allocation2 + $0x18] sm:$0xff] }
 0x542   :  { %18334 = vmatprep.subr.mxu1 %v5885_v14  ;;  %18289 = vmatpush3.msra.mxu0 %v22920_v22 }
 0x543   :  { %18335 = vmatpush3.msra.mxu1 %v5885_v14  ;;  %18290 = vmatprep.subr.mxu0 %v22934_v29  ;;  %v23116_v14 = vand.u32 4294901760, %v4880_v24 }
 0x544   :  { %18336 = vmatprep.subr.mxu1 %v5892_v36  ;;  %18291 = vmatpush3.msra.mxu0 %v22934_v29 }
 0x545   :  { %18337 = vmatpush3.msra.mxu1 %v5892_v36  ;;  %18292 = vmatprep.subr.mxu0 %v22957_v41  ;;  %v23121_v36 = vsub.f32 %v4879_v61, %v23112_v26 }
 0x546   :  { %18338 = vmatprep.subr.mxu1 %v5899_v25  ;;  %18293 = vmatpush3.msra.mxu0 %v22957_v41 }
 0x547   :  { %18339 = vmatpush3.msra.mxu1 %v5899_v25  ;;  %18294 = vmatprep.subr.mxu0 %v22967_v13  ;;  %v23128_v25 = vsub.f32 %v4880_v24, %v23116_v14  ;;  %v26918_v61 = vand.u32 4294901760, %v23121_v36 }
 0x548   :  { %18340 = vmatprep.subr.mxu1 %v5906_v44  ;;  %18295 = vmatpush3.msra.mxu0 %v22967_v13 }
 0x549   :  { %18341 = vmatpush3.msra.mxu1 %v5906_v44  ;;  %18296 = vmatprep.subr.mxu0 %v22989_v53  ;;  %v23136_v44 = vsub.f32 %v4881_v38, %v23124_v57  ;;  %v26921_v21 = vand.u32 4294901760, %v23128_v25  ;;  %v5783_v24 = vsub.f32 %v23121_v36, %v26918_v61 }
 0x54a   :  { %18342 = vmatprep.subr.mxu1 %v5913_v15  ;;  %18297 = vmatpush3.msra.mxu0 %v22989_v53 }
 0x54b   :  { %18343 = vmatpush3.msra.mxu1 %v5913_v15  ;;  %18298 = vmatprep.subr.mxu0 %v23005_v59  ;;  %v5802_v38 = vand.u32 4294901760, %v23136_v44  ;;  %v5793_v15 = vsub.f32 %v23128_v25, %v26921_v21  ;;  %v5784_v61 = vand.u32 4294901760, %v5783_v24 }
 0x54c   :  { %18344 = vmatprep.subr.mxu1 %v5920_v47  ;;  %18299 = vmatpush3.msra.mxu0 %v23005_v59 }
 0x54d   :  { %18345 = vmatpush3.msra.mxu1 %v5920_v47  ;;  %18300 = vmatprep.subr.mxu0 %v23021_v35  ;;  %v27146_v47 = vand.u32 4294901760, %v22976_v37  ;;  %v5803_v16 = vsub.f32 %v23136_v44, %v5802_v38  ;;  %v5794_v21 = vand.u32 4294901760, %v5793_v15 }
 0x54e   :  { %18347 = vmatmul.mubr.f32.vlgmr.msra.gmra.mxu1 %v23112_v26  ;;  %18390 = vmatprep.subr.mxu1 %v22829_v32 }
 0x54f   :  { %18301 = vmatpush3.msra.mxu0 %v23021_v35  ;;  %18349 = vmatprep.mubr.f32.mxu1 %v23116_v14  ;;  %v5804_v24 = vand.u32 4294901760, %v5803_v16  ;;  %v27147_v16 = vand.u32 4294901760, %v23121_v36 }
 0x550   :  { %18391 = vmatpush3.msra.mxu1 %v22829_v32  ;;  %18302 = vmatprep.subr.mxu0 %v23039_v39 }
 0x551   :  { %18392 = vmatprep.subr.mxu1 %v22843_v50  ;;  %18303 = vmatpush3.msra.mxu0 %v23039_v39 }
 0x552   :  { %18393 = vmatpush3.msra.mxu1 %v22843_v50  ;;  %18304 = vmatprep.subr.mxu0 %v23055_v28 }
 0x553   :  { %18350 = vmatmul.mubr.f32.gmra.mxu1 %v23124_v57  ;;  %18394 = vmatprep.subr.mxu1 %v22852_v45 }
 0x554   :  { %18305 = vmatpush3.msra.mxu0 %v23055_v28  ;;  %18395 = vmatpush3.msra.mxu1 %v22852_v45 }
 0x555   :  { %18422 = vmatprep.mubr.f32.mxu1 %v27146_v47  ;;  %18306 = vmatprep.subr.mxu0 %v23067_v42  ;;  %v15245_v47 = vld [vmem:[%s26747_s2 + $0x118] sm:$0xff] }
 0x556   :  { %18396 = vmatprep.subr.mxu1 %v22872_v30  ;;  %18307 = vmatpush3.msra.mxu0 %v23067_v42 }
 0x557   :  { %18397 = vmatpush3.msra.mxu1 %v22872_v30  ;;  %18309 = vmatmul.mubr.f32.vlgmr.msra.gmra.mxu0 %v5784_v61 }
 0x558   :  { %18352 = vmatprep.subr.mxu0 %v22848_v43  ;;  %18398 = vmatprep.subr.mxu1 %v22881_v40 }
 0x559   :  { %18311 = vmatprep.mubr.f32.mxu0 %v5794_v21  ;;  %18353 = vmatpush3.msra.mxu0 %v22848_v43  ;;  %v27148_v43 = vand.u32 4294901760, %v23128_v25 }
 0x55a   :  { %18399 = vmatpush3.msra.mxu1 %v22881_v40  ;;  %18354 = vmatprep.subr.mxu0 %v22862_v5 }
 0x55b   :  { %18400 = vmatprep.subr.mxu1 %v22906_v33  ;;  %18355 = vmatpush3.msra.mxu0 %v22862_v5  ;;  %v15255_v5 = vld [vmem:[%s26747_s2 + $0x168] sm:$0xff] }
 0x55c   :  { %18401 = vmatpush3.msra.mxu1 %v22906_v33  ;;  %18312 = vmatmul.mubr.f32.gmra.mxu0 %v5804_v24 }
 0x55d   :  { %18356 = vmatprep.subr.mxu0 %v22877_v58  ;;  %18402 = vmatprep.subr.mxu1 %v22920_v22 }
 0x55e   :  { %18357 = vmatpush3.msra.mxu0 %v22877_v58  ;;  %18384 = vmatprep.mubr.f32.mxu0 %v22976_v37  ;;  %v23280_v58 = vand.u32 4294901760, %v15255_v5 }
 0x55f   :  { %18403 = vmatpush3.msra.mxu1 %v22920_v22  ;;  %18358 = vmatprep.subr.mxu0 %v22896_v17 }
 0x560   :  { %18404 = vmatprep.subr.mxu1 %v22934_v29  ;;  %18359 = vmatpush3.msra.mxu0 %v22896_v17  ;;  %v15253_v17 = vld [vmem:[%s26747_s2 + $0x158] sm:$0xff] }
 0x561   :  { %18405 = vmatpush3.msra.mxu1 %v22934_v29  ;;  %18360 = vmatprep.subr.mxu0 %v22911_v11 }
 0x562   :  { %18406 = vmatprep.subr.mxu1 %v22957_v41  ;;  %18361 = vmatpush3.msra.mxu0 %v22911_v11  ;;  %v23305_v11 = vsub.f32 %v15255_v5, %v23280_v58 }
 0x563   :  { %18407 = vmatpush3.msra.mxu1 %v22957_v41  ;;  %18362 = vmatprep.subr.mxu0 %v22932_v8 }
 0x564   :  { %18408 = vmatprep.subr.mxu1 %v22967_v13  ;;  %18363 = vmatpush3.msra.mxu0 %v22932_v8 }
 0x565   :  { %18409 = vmatpush3.msra.mxu1 %v22967_v13  ;;  %18364 = vmatprep.subr.mxu0 %v22952_v19 }
 0x566   :  { %18410 = vmatprep.subr.mxu1 %v22989_v53  ;;  %18365 = vmatpush3.msra.mxu0 %v22952_v19  ;;  %v23332_v19 = vand.u32 4294901760, %v23305_v11 }
 0x567   :  { %18411 = vmatpush3.msra.mxu1 %v22989_v53  ;;  %18366 = vmatprep.subr.mxu0 %v22965_v6 }
 0x568   :  { %18412 = vmatprep.subr.mxu1 %v23005_v59  ;;  %18367 = vmatpush3.msra.mxu0 %v22965_v6 }
 0x569   :  { %18413 = vmatpush3.msra.mxu1 %v23005_v59  ;;  %18368 = vmatprep.subr.mxu0 %v22987_v48 }
 0x56a   :  { %18414 = vmatprep.subr.mxu1 %v23021_v35  ;;  %18369 = vmatpush3.msra.mxu0 %v22987_v48 }
 0x56b   :  { %18415 = vmatpush3.msra.mxu1 %v23021_v35  ;;  %18370 = vmatprep.subr.mxu0 %v22998_v1 }
 0x56c   :  { %18416 = vmatprep.subr.mxu1 %v23039_v39  ;;  %18371 = vmatpush3.msra.mxu0 %v22998_v1 }
 0x56d   :  { %18417 = vmatpush3.msra.mxu1 %v23039_v39  ;;  %18372 = vmatprep.subr.mxu0 %v23019_v60 }
 0x56e   :  { %18418 = vmatprep.subr.mxu1 %v23055_v28  ;;  %18373 = vmatpush3.msra.mxu0 %v23019_v60  ;;  %v15249_v60 = vld [vmem:[%s26747_s2 + $0x138] sm:$0xff] }
 0x56f   :  { %18419 = vmatpush3.msra.mxu1 %v23055_v28  ;;  %18374 = vmatprep.subr.mxu0 %v23037_v4 }
 0x570   :  { %18420 = vmatprep.subr.mxu1 %v23067_v42  ;;  %18375 = vmatpush3.msra.mxu0 %v23037_v4 }
 0x571   :  { %18421 = vmatpush3.msra.mxu1 %v23067_v42  ;;  %18376 = vmatprep.subr.mxu0 %v23053_v9 }
 0x572   :  { %18423 = vmatmul.mubr.f32.vlgmr.msra.gmra.mxu1 %v27147_v16  ;;  %18466 = vmatprep.subr.mxu1 %v22829_v32 }
 0x573   :  { %18377 = vmatpush3.msra.mxu0 %v23053_v9  ;;  %18425 = vmatprep.mubr.f32.mxu1 %v27148_v43  ;;  %v23385_v9 = vand.u32 4294901760, %v15249_v60 }
 0x574   :  { %18467 = vmatpush3.msra.mxu1 %v22829_v32  ;;  %18378 = vmatprep.subr.mxu0 %v23065_v23  ;;  %v15257_v32 = vld [vmem:[%s26747_s2 + $0x178] sm:$0xff] }
 0x575   :  { %18468 = vmatprep.subr.mxu1 %v22843_v50  ;;  %18379 = vmatpush3.msra.mxu0 %v23065_v23 }
 0x576   :  { %18469 = vmatpush3.msra.mxu1 %v22843_v50  ;;  %18380 = vmatprep.subr.mxu0 %v23077_v0  ;;  %v23257_v50 = vand.u32 4294901760, %v15257_v32 }
 0x577   :  { %18426 = vmatmul.mubr.f32.gmra.mxu1 %v5802_v38  ;;  %18470 = vmatprep.subr.mxu1 %v22852_v45 }
 0x578   :  { %18381 = vmatpush3.msra.mxu0 %v23077_v0  ;;  %18471 = vmatpush3.msra.mxu1 %v22852_v45  ;;  %v15256_v45 = vld [vmem:[%s26747_s2 + $0x170] sm:$0xff]  ;;  %v15247_v0 = vld [vmem:[%s26747_s2 + $0x128] sm:$0xff] }
 0x579   :  { %18498 = vmatprep.mubr.f32.mxu1 %v22941_v54  ;;  %18382 = vmatprep.subr.mxu0 %v23087_v62  ;;  %v23417_v21 = vand.u32 4294901760, %v15247_v0 }
 0x57a   :  { %18472 = vmatprep.subr.mxu1 %v22872_v30  ;;  %18383 = vmatpush3.msra.mxu0 %v23087_v62 }
 0x57b   :  { %18473 = vmatpush3.msra.mxu1 %v22872_v30  ;;  %18385 = vmatmul.mubr.f32.vlgmr.msra.gmra.mxu0 %v23121_v36  ;;  %v23276_v30 = vsub.f32 %v15257_v32, %v23257_v50  ;;  %v23447_v5 = vsub.f32 %v15247_v0, %v23417_v21 }
 0x57c   :  { %18428 = vmatprep.subr.mxu0 %v22870_v18  ;;  %18474 = vmatprep.subr.mxu1 %v22881_v40 }
 0x57d   :  { %18387 = vmatprep.mubr.f32.mxu0 %v23128_v25  ;;  %18429 = vmatpush3.msra.mxu0 %v22870_v18  ;;  %v23271_v18 = vand.u32 4294901760, %v15256_v45  ;;  %v15246_v25 = vld [vmem:[%s26747_s2 + $0x120] sm:$0xff] }
 0x57e   :  { %18475 = vmatpush3.msra.mxu1 %v22881_v40  ;;  %18430 = vmatprep.subr.mxu0 %v22889_v49  ;;  %v15254_v40 = vld [vmem:[%s26747_s2 + $0x160] sm:$0xff]  ;;  %v23433_v43 = vand.u32 4294901760, %v15246_v25 }
 0x57f   :  { %18476 = vmatprep.subr.mxu1 %v22906_v33  ;;  %18431 = vmatpush3.msra.mxu0 %v22889_v49  ;;  %v23290_v49 = vsub.f32 %v15256_v45, %v23271_v18  ;;  %v15244_v45 = vld [vmem:[%s26747_s2 + $0x110] sm:$0xff] }
 0x580   :  { %18477 = vmatpush3.msra.mxu1 %v22906_v33  ;;  %18388 = vmatmul.mubr.f32.gmra.mxu0 %v23136_v44  ;;  %v23300_v33 = vand.u32 4294901760, %v15254_v40  ;;  %v23415_v44 = vsub.f32 %v15249_v60, %v23385_v9 }
 0x581   :  { %18432 = vmatprep.subr.mxu0 %v22904_v51  ;;  %18478 = vmatprep.subr.mxu1 %v22920_v22  ;;  %v23317_v8 = vand.u32 4294901760, %v23290_v49 }
 0x582   :  { %18433 = vmatpush3.msra.mxu0 %v22904_v51  ;;  %18460 = vmatprep.mubr.f32.mxu0 %v22941_v54  ;;  %v23298_v51 = vand.u32 4294901760, %v23276_v30  ;;  %v23324_v54 = vsub.f32 %v15254_v40, %v23300_v33  ;;  %v23449_v40 = vand.u32 4294901760, %v15245_v47 }
 0x583   :  { %18479 = vmatpush3.msra.mxu1 %v22920_v22  ;;  %18434 = vmatprep.subr.mxu0 %v22925_v7  ;;  %v23309_v22 = vand.u32 4294901760, %v15253_v17  ;;  %v6612_v37 = vsub.f32 %v23290_v49, %v23317_v8 }
 0x584   :  { %18480 = vmatprep.subr.mxu1 %v22934_v29  ;;  %18435 = vmatpush3.msra.mxu0 %v22925_v7  ;;  %v15252_v7 = vld [vmem:[%s26747_s2 + $0x150] sm:$0xff]  ;;  %v23481_v60 = vsub.f32 %v15245_v47, %v23449_v40 }
 0x585   :  { %18481 = vmatpush3.msra.mxu1 %v22934_v29  ;;  %18436 = vmatprep.subr.mxu0 %v22944_v63  ;;  %v6605_v29 = vsub.f32 %v23276_v30, %v23298_v51  ;;  %v23339_v6 = vsub.f32 %v15253_v17, %v23309_v22 }
 0x586   :  { %18482 = vmatprep.subr.mxu1 %v22957_v41  ;;  %18437 = vmatpush3.msra.mxu0 %v22944_v63  ;;  %v15251_v63 = vld [vmem:[%s26747_s2 + $0x148] sm:$0xff] }
 0x587   :  { %18483 = vmatpush3.msra.mxu1 %v22957_v41  ;;  %18438 = vmatprep.subr.mxu0 %v22962_v3  ;;  %v23334_v41 = vand.u32 4294901760, %v15252_v7  ;;  %v6606_v48 = vand.u32 4294901760, %v6605_v29 }
 0x588   :  { %18484 = vmatprep.subr.mxu1 %v22967_v13  ;;  %18439 = vmatpush3.msra.mxu0 %v22962_v3  ;;  %v6459_v3 = vld [vmem:[#allocation2 + $0x2] sm:$0xff] }
 0x589   :  { %18485 = vmatpush3.msra.mxu1 %v22967_v13  ;;  %18440 = vmatprep.subr.mxu0 %v22980_v27  ;;  %v15250_v13 = vld [vmem:[%s26747_s2 + $0x140] sm:$0xff]  ;;  %v23359_v1 = vand.u32 4294901760, %v6459_v3 }
 0x58a   :  { %18486 = vmatprep.subr.mxu1 %v22989_v53  ;;  %18441 = vmatpush3.msra.mxu0 %v22980_v27  ;;  %v23348_v27 = vand.u32 4294901760, %v15251_v63 }
 0x58b   :  { %18487 = vmatpush3.msra.mxu1 %v22989_v53  ;;  %18442 = vmatprep.subr.mxu0 %v22995_v34  ;;  %v23353_v53 = vand.u32 4294901760, %v23324_v54  ;;  %v23393_v23 = vsub.f32 %v6459_v3, %v23359_v1  ;;  %v23467_v3 = vand.u32 4294901760, %v15244_v45 }
 0x58c   :  { %18488 = vmatprep.subr.mxu1 %v23005_v59  ;;  %18443 = vmatpush3.msra.mxu0 %v22995_v34  ;;  %v6619_v34 = vsub.f32 %v23305_v11, %v23332_v19  ;;  %v23377_v4 = vsub.f32 %v15251_v63, %v23348_v27 }
 0x58d   :  { %18489 = vmatpush3.msra.mxu1 %v23005_v59  ;;  %18444 = vmatprep.subr.mxu0 %v23016_v52  ;;  %v23362_v59 = vsub.f32 %v15252_v7, %v23334_v41  ;;  %v6563_v38 = vand.u32 4294901760, %v23393_v23  ;;  %v23493_v0 = vsub.f32 %v15244_v45, %v23467_v3 }
 0x58e   :  { %18490 = vmatprep.subr.mxu1 %v23021_v35  ;;  %18445 = vmatpush3.msra.mxu0 %v23016_v52  ;;  %v23364_v52 = vand.u32 4294901760, %v15250_v13  ;;  %v23408_v36 = vand.u32 4294901760, %v23377_v4 }
 0x58f   :  { %18491 = vmatpush3.msra.mxu1 %v23021_v35  ;;  %18446 = vmatprep.subr.mxu0 %v23027_v31  ;;  %v23372_v35 = vand.u32 4294901760, %v23339_v6  ;;  %v6564_v7 = vsub.f32 %v23393_v23, %v6563_v38 }
 0x590   :  { %18492 = vmatprep.subr.mxu1 %v23039_v39  ;;  %18447 = vmatpush3.msra.mxu0 %v23027_v31  ;;  %v6613_v31 = vand.u32 4294901760, %v6612_v37  ;;  %v6647_v32 = vsub.f32 %v23377_v4, %v23408_v36  ;;  %v15242_v37 = vld [vmem:[%s26747_s2 + $0x100] sm:$0xff] }
 0x591   :  { %18493 = vmatpush3.msra.mxu1 %v23039_v39  ;;  %18448 = vmatprep.subr.mxu0 %v23050_v55  ;;  %v15248_v39 = vld [vmem:[%s26747_s2 + $0x130] sm:$0xff] }
 0x592   :  { %18494 = vmatprep.subr.mxu1 %v23055_v28  ;;  %18449 = vmatpush3.msra.mxu0 %v23050_v55  ;;  %v6626_v55 = vsub.f32 %v23324_v54, %v23353_v53  ;;  %v23404_v62 = vand.u32 4294901760, %v15248_v39 }
 0x593   :  { %18495 = vmatpush3.msra.mxu1 %v23055_v28  ;;  %18450 = vmatprep.subr.mxu0 %v23062_v2  ;;  %v6620_v28 = vand.u32 4294901760, %v6619_v34  ;;  %v23478_v34 = vand.u32 4294901760, %v23447_v5 }
 0x594   :  { %18496 = vmatprep.subr.mxu1 %v23067_v42  ;;  %18451 = vmatpush3.msra.mxu0 %v23062_v2  ;;  %v23390_v2 = vand.u32 4294901760, %v23362_v59  ;;  %v6627_v61 = vand.u32 4294901760, %v6626_v55  ;;  %v23431_v16 = vsub.f32 %v15248_v39, %v23404_v62 }
 0x595   :  { %18497 = vmatpush3.msra.mxu1 %v23067_v42  ;;  %18452 = vmatprep.subr.mxu0 %v23074_v20  ;;  %v23396_v42 = vsub.f32 %v15250_v13, %v23364_v52  ;;  %v6648_v13 = vand.u32 4294901760, %v6647_v32  ;;  %v23512_v32 = vand.u32 4294901760, %v23493_v0 }
 0x596   :  { %18499 = vmatmul.mubr.f32.vlgmr.msra.gmra.mxu1 %v23112_v26  ;;  %18542 = vmatprep.subr.mxu1 %v6606_v48  ;;  %v23462_v63 = vand.u32 4294901760, %v23431_v16 }
 0x597   :  { %18453 = vmatpush3.msra.mxu0 %v23074_v20  ;;  %18501 = vmatprep.mubr.f32.mxu1 %v23116_v14  ;;  %v6633_v20 = vsub.f32 %v23339_v6, %v23372_v35  ;;  %v23424_v15 = vand.u32 4294901760, %v23396_v42 }
 0x598   :  { %18543 = vmatpush3.msra.mxu1 %v6606_v48  ;;  %18454 = vmatprep.subr.mxu0 %v23084_v12  ;;  %v6668_v55 = vsub.f32 %v23431_v16, %v23462_v63 }
 0x599   :  { %18544 = vmatprep.subr.mxu1 %v6613_v31  ;;  %18455 = vmatpush3.msra.mxu0 %v23084_v12  ;;  %v6640_v12 = vsub.f32 %v23362_v59, %v23390_v2  ;;  %v6634_v24 = vand.u32 4294901760, %v6633_v20  ;;  %v6654_v29 = vsub.f32 %v23396_v42, %v23424_v15  ;;  %v23495_v20 = vand.u32 4294901760, %v15242_v37 }
 0x59a   :  { %18545 = vmatpush3.msra.mxu1 %v6613_v31  ;;  %18456 = vmatprep.subr.mxu0 %v23094_v10  ;;  %v6565_v31 = vand.u32 4294901760, %v6564_v7  ;;  %v6669_v47 = vand.u32 4294901760, %v6668_v55 }
 0x59b   :  { %18502 = vmatmul.mubr.f32.gmra.mxu1 %v23124_v57  ;;  %18546 = vmatprep.subr.mxu1 %v6620_v28  ;;  %v6641_v17 = vand.u32 4294901760, %v6640_v12  ;;  %v6655_v39 = vand.u32 4294901760, %v6654_v29  ;;  %v23515_v45 = vsub.f32 %v15242_v37, %v23495_v20 }
 0x59c   :  { %18457 = vmatpush3.msra.mxu0 %v23094_v10  ;;  %18547 = vmatpush3.msra.mxu1 %v6620_v28  ;;  %v23444_v10 = vand.u32 4294901760, %v23415_v44 }
 0x59d   :  { %18574 = vmatprep.mubr.f32.mxu1 %v23359_v1  ;;  %18458 = vmatprep.subr.mxu0 %v23101_v56  ;;  %v23529_v37 = vand.u32 4294901760, %v23515_v45 }
 0x59e   :  { %18548 = vmatprep.subr.mxu1 %v6627_v61  ;;  %18459 = vmatpush3.msra.mxu0 %v23101_v56  ;;  %v15243_v56 = vld [vmem:[%s26747_s2 + $0x108] sm:$0xff]  ;;  %v6661_v48 = vsub.f32 %v23415_v44, %v23444_v10 }
 0x59f   :  { %18549 = vmatpush3.msra.mxu1 %v6627_v61  ;;  %18461 = vmatmul.mubr.f32.vlgmr.msra.gmra.mxu0 %v23112_v26  ;;  %v23465_v26 = vsub.f32 %v15246_v25, %v23433_v43  ;;  %v23502_v61 = vand.u32 4294901760, %v23481_v60 }
 0x5a0   :  { %18504 = vmatprep.subr.mxu0 %v23257_v50  ;;  %18550 = vmatprep.subr.mxu1 %v6634_v24  ;;  %v6662_v25 = vand.u32 4294901760, %v6661_v48 }
 0x5a1   :  { %18463 = vmatprep.mubr.f32.mxu0 %v23116_v14  ;;  %18505 = vmatpush3.msra.mxu0 %v23257_v50  ;;  %v23483_v14 = vand.u32 4294901760, %v15243_v56  ;;  %v23490_v28 = vand.u32 4294901760, %v23465_v26  ;;  %v6689_v7 = vsub.f32 %v23481_v60, %v23502_v61 }
 0x5a2   :  { %18551 = vmatpush3.msra.mxu1 %v6634_v24  ;;  %18506 = vmatprep.subr.mxu0 %v23271_v18 }
 0x5a3   :  { %18552 = vmatprep.subr.mxu1 %v6641_v17  ;;  %18507 = vmatpush3.msra.mxu0 %v23271_v18  ;;  %v23505_v12 = vsub.f32 %v15243_v56, %v23483_v14  ;;  %v6682_v24 = vsub.f32 %v23465_v26, %v23490_v28  ;;  %v6690_v48 = vand.u32 4294901760, %v6689_v7  ;;  %v6462_v7 = vld [vmem:[#allocation2 + $0x22] sm:$0xff] }
 0x5a4   :  { %18553 = vmatpush3.msra.mxu1 %v6641_v17  ;;  %18464 = vmatmul.mubr.f32.gmra.mxu0 %v23124_v57  ;;  %v6675_v57 = vsub.f32 %v23447_v5, %v23478_v34 }
 0x5a5   :  { %18508 = vmatprep.subr.mxu0 %v23280_v58  ;;  %18554 = vmatprep.subr.mxu1 %v6648_v13  ;;  %v23522_v29 = vand.u32 4294901760, %v23505_v12  ;;  %v6683_v56 = vand.u32 4294901760, %v6682_v24 }
 0x5a6   :  { %18509 = vmatpush3.msra.mxu0 %v23280_v58  ;;  %18536 = vmatprep.mubr.f32.mxu0 %v6565_v31  ;;  %v6676_v17 = vand.u32 4294901760, %v6675_v57  ;;  %v6461_v57 = vld [vmem:[#allocation2 + $0x1a] sm:$0xff] }
 0x5a7   :  { %18555 = vmatpush3.msra.mxu1 %v6648_v13  ;;  %18510 = vmatprep.subr.mxu0 %v23300_v33  ;;  %v6696_v13 = vsub.f32 %v23493_v0, %v23512_v32  ;;  %v6703_v31 = vsub.f32 %v23505_v12, %v23522_v29 }
 0x5a8   :  { %18556 = vmatprep.subr.mxu1 %v6655_v39  ;;  %18511 = vmatpush3.msra.mxu0 %v23300_v33 }
 0x5a9   :  { %18557 = vmatpush3.msra.mxu1 %v6655_v39  ;;  %18512 = vmatprep.subr.mxu0 %v23309_v22  ;;  %v6460_v39 = vld [vmem:[#allocation2 + $0xa] sm:$0xff]  ;;  %v6697_v55 = vand.u32 4294901760, %v6696_v13  ;;  %v6704_v24 = vand.u32 4294901760, %v6703_v31  ;;  %v23552_v31 = vand.u32 4294901760, %v6462_v7 }
 0x5aa   :  { %18558 = vmatprep.subr.mxu1 %v6662_v25  ;;  %18513 = vmatpush3.msra.mxu0 %v23309_v22 }
 0x5ab   :  { %18559 = vmatpush3.msra.mxu1 %v6662_v25  ;;  %18514 = vmatprep.subr.mxu0 %v23334_v41  ;;  %v6710_v25 = vsub.f32 %v23515_v45, %v23529_v37 }
 0x5ac   :  { %18560 = vmatprep.subr.mxu1 %v6669_v47  ;;  %18515 = vmatpush3.msra.mxu0 %v23334_v41 }
 0x5ad   :  { %18561 = vmatpush3.msra.mxu1 %v6669_v47  ;;  %18516 = vmatprep.subr.mxu0 %v23348_v27  ;;  %v23540_v47 = vand.u32 4294901760, %v6460_v39  ;;  %v6711_v13 = vand.u32 4294901760, %v6710_v25 }
 0x5ae   :  { %18562 = vmatprep.subr.mxu1 %v6676_v17  ;;  %18517 = vmatpush3.msra.mxu0 %v23348_v27 }
 0x5af   :  { %18563 = vmatpush3.msra.mxu1 %v6676_v17  ;;  %18518 = vmatprep.subr.mxu0 %v23364_v52  ;;  %v23544_v17 = vand.u32 4294901760, %v6461_v57 }
 0x5b0   :  { %18564 = vmatprep.subr.mxu1 %v6683_v56  ;;  %18519 = vmatpush3.msra.mxu0 %v23364_v52 }
 0x5b1   :  { %18565 = vmatpush3.msra.mxu1 %v6683_v56  ;;  %18520 = vmatprep.subr.mxu0 %v23385_v9  ;;  %v23549_v56 = vsub.f32 %v6460_v39, %v23540_v47 }
 0x5b2   :  { %18566 = vmatprep.subr.mxu1 %v6690_v48  ;;  %18521 = vmatpush3.msra.mxu0 %v23385_v9 }
 0x5b3   :  { %18567 = vmatpush3.msra.mxu1 %v6690_v48  ;;  %18522 = vmatprep.subr.mxu0 %v23404_v62  ;;  %v23556_v48 = vsub.f32 %v6461_v57, %v23544_v17  ;;  %v26922_v39 = vand.u32 4294901760, %v23549_v56 }
 0x5b4   :  { %18568 = vmatprep.subr.mxu1 %v6697_v55  ;;  %18523 = vmatpush3.msra.mxu0 %v23404_v62 }
 0x5b5   :  { %18569 = vmatpush3.msra.mxu1 %v6697_v55  ;;  %18524 = vmatprep.subr.mxu0 %v23417_v21  ;;  %v23564_v55 = vsub.f32 %v6462_v7, %v23552_v31  ;;  %v26923_v25 = vand.u32 4294901760, %v23556_v48  ;;  %v6574_v57 = vsub.f32 %v23549_v56, %v26922_v39 }
 0x5b6   :  { %18570 = vmatprep.subr.mxu1 %v6704_v24  ;;  %18525 = vmatpush3.msra.mxu0 %v23417_v21 }
 0x5b7   :  { %18571 = vmatpush3.msra.mxu1 %v6704_v24  ;;  %18526 = vmatprep.subr.mxu0 %v23433_v43  ;;  %v6593_v24 = vand.u32 4294901760, %v23564_v55  ;;  %v6584_v7 = vsub.f32 %v23556_v48, %v26923_v25 }
 0x5b8   :  { %18572 = vmatprep.subr.mxu1 %v6711_v13  ;;  %18527 = vmatpush3.msra.mxu0 %v23433_v43 }
 0x5b9   :  { %18573 = vmatpush3.msra.mxu1 %v6711_v13  ;;  %18528 = vmatprep.subr.mxu0 %v23449_v40  ;;  %v6575_v13 = vand.u32 4294901760, %v6574_v57  ;;  %v6594_v39 = vsub.f32 %v23564_v55, %v6593_v24  ;;  %v6585_v25 = vand.u32 4294901760, %v6584_v7 }
 0x5ba   :  { %18575 = vmatmul.mubr.f32.vlgmr.msra.gmra.mxu1 %v23540_v47  ;;  %18618 = vmatprep.subr.mxu1 %v23257_v50 }
 0x5bb   :  { %18529 = vmatpush3.msra.mxu0 %v23449_v40  ;;  %18577 = vmatprep.mubr.f32.mxu1 %v23544_v17 }
 0x5bc   :  { %18619 = vmatpush3.msra.mxu1 %v23257_v50  ;;  %18530 = vmatprep.subr.mxu0 %v23467_v3 }
 0x5bd   :  { %18620 = vmatprep.subr.mxu1 %v23271_v18  ;;  %18531 = vmatpush3.msra.mxu0 %v23467_v3 }
 0x5be   :  { %18621 = vmatpush3.msra.mxu1 %v23271_v18  ;;  %18532 = vmatprep.subr.mxu0 %v23483_v14 }
 0x5bf   :  { %18578 = vmatmul.mubr.f32.gmra.mxu1 %v23552_v31  ;;  %18622 = vmatprep.subr.mxu1 %v23280_v58 }
 0x5c0   :  { %18533 = vmatpush3.msra.mxu0 %v23483_v14  ;;  %18623 = vmatpush3.msra.mxu1 %v23280_v58 }
 0x5c1   :  { %18650 = vmatprep.mubr.f32.mxu1 %v6563_v38  ;;  %18534 = vmatprep.subr.mxu0 %v23495_v20  ;;  %v6595_v38 = vand.u32 4294901760, %v6594_v39 }
 0x5c2   :  { %18624 = vmatprep.subr.mxu1 %v23300_v33  ;;  %18535 = vmatpush3.msra.mxu0 %v23495_v20 }
 0x5c3   :  { %18625 = vmatpush3.msra.mxu1 %v23300_v33  ;;  %18537 = vmatmul.mubr.f32.vlgmr.msra.gmra.mxu0 %v6575_v13 }
 0x5c4   :  { %18580 = vmatprep.subr.mxu0 %v23276_v30  ;;  %18626 = vmatprep.subr.mxu1 %v23309_v22 }
 0x5c5   :  { %18539 = vmatprep.mubr.f32.mxu0 %v6585_v25  ;;  %18581 = vmatpush3.msra.mxu0 %v23276_v30  ;;  %v27149_v30 = vand.u32 4294901760, %v23549_v56 }
 0x5c6   :  { %18627 = vmatpush3.msra.mxu1 %v23309_v22  ;;  %18582 = vmatprep.subr.mxu0 %v23290_v49 }
 0x5c7   :  { %18628 = vmatprep.subr.mxu1 %v23334_v41  ;;  %18583 = vmatpush3.msra.mxu0 %v23290_v49  ;;  %v27150_v49 = vand.u32 4294901760, %v23556_v48 }
 0x5c8   :  { %18629 = vmatpush3.msra.mxu1 %v23334_v41  ;;  %18540 = vmatmul.mubr.f32.gmra.mxu0 %v6595_v38 }
 0x5c9   :  { %18584 = vmatprep.subr.mxu0 %v23305_v11  ;;  %18630 = vmatprep.subr.mxu1 %v23348_v27 }
 0x5ca   :  { %18585 = vmatpush3.msra.mxu0 %v23305_v11  ;;  %18612 = vmatprep.mubr.f32.mxu0 %v23393_v23 }
 0x5cb   :  { %18631 = vmatpush3.msra.mxu1 %v23348_v27  ;;  %18586 = vmatprep.subr.mxu0 %v23324_v54 }
 0x5cc   :  { %18632 = vmatprep.subr.mxu1 %v23364_v52  ;;  %18587 = vmatpush3.msra.mxu0 %v23324_v54 }
 0x5cd   :  { %18633 = vmatpush3.msra.mxu1 %v23364_v52  ;;  %18588 = vmatprep.subr.mxu0 %v23339_v6 }
 0x5ce   :  { %18634 = vmatprep.subr.mxu1 %v23385_v9  ;;  %18589 = vmatpush3.msra.mxu0 %v23339_v6 }
 0x5cf   :  { %18635 = vmatpush3.msra.mxu1 %v23385_v9  ;;  %18590 = vmatprep.subr.mxu0 %v23362_v59 }
 0x5d0   :  { %18636 = vmatprep.subr.mxu1 %v23404_v62  ;;  %18591 = vmatpush3.msra.mxu0 %v23362_v59 }
 0x5d1   :  { %18637 = vmatpush3.msra.mxu1 %v23404_v62  ;;  %18592 = vmatprep.subr.mxu0 %v23377_v4 }
 0x5d2   :  { %18638 = vmatprep.subr.mxu1 %v23417_v21  ;;  %18593 = vmatpush3.msra.mxu0 %v23377_v4 }
 0x5d3   :  { %18639 = vmatpush3.msra.mxu1 %v23417_v21  ;;  %18594 = vmatprep.subr.mxu0 %v23396_v42 }
 0x5d4   :  { %18640 = vmatprep.subr.mxu1 %v23433_v43  ;;  %18595 = vmatpush3.msra.mxu0 %v23396_v42 }
 0x5d5   :  { %18641 = vmatpush3.msra.mxu1 %v23433_v43  ;;  %18596 = vmatprep.subr.mxu0 %v23415_v44 }
 0x5d6   :  { %18642 = vmatprep.subr.mxu1 %v23449_v40  ;;  %18597 = vmatpush3.msra.mxu0 %v23415_v44 }
 0x5d7   :  { %18643 = vmatpush3.msra.mxu1 %v23449_v40  ;;  %18598 = vmatprep.subr.mxu0 %v23431_v16 }
 0x5d8   :  { %18644 = vmatprep.subr.mxu1 %v23467_v3  ;;  %18599 = vmatpush3.msra.mxu0 %v23431_v16 }
 0x5d9   :  { %18645 = vmatpush3.msra.mxu1 %v23467_v3  ;;  %18600 = vmatprep.subr.mxu0 %v23447_v5 }
 0x5da   :  { %18646 = vmatprep.subr.mxu1 %v23483_v14  ;;  %18601 = vmatpush3.msra.mxu0 %v23447_v5 }
 0x5db   :  { %18647 = vmatpush3.msra.mxu1 %v23483_v14  ;;  %18602 = vmatprep.subr.mxu0 %v23465_v26 }
 0x5dc   :  { %18648 = vmatprep.subr.mxu1 %v23495_v20  ;;  %18603 = vmatpush3.msra.mxu0 %v23465_v26 }
 0x5dd   :  { %18649 = vmatpush3.msra.mxu1 %v23495_v20  ;;  %18604 = vmatprep.subr.mxu0 %v23481_v60 }
 0x5de   :  { %18651 = vmatmul.mubr.f32.vlgmr.msra.gmra.mxu1 %v27149_v30  ;;  %18694 = vmatprep.subr.mxu1 %v23257_v50 }
 0x5df   :  { %18605 = vmatpush3.msra.mxu0 %v23481_v60  ;;  %18653 = vmatprep.mubr.f32.mxu1 %v27150_v49 }
 0x5e0   :  { %18695 = vmatpush3.msra.mxu1 %v23257_v50  ;;  %18606 = vmatprep.subr.mxu0 %v23493_v0  ;;  %v27151_v50 = vld [vmem:[#allocation74_spill] sm:$0xff] }
 0x5e1   :  { %18696 = vmatprep.subr.mxu1 %v23271_v18  ;;  %18607 = vmatpush3.msra.mxu0 %v23493_v0 }
 0x5e2   :  { %18697 = vmatpush3.msra.mxu1 %v23271_v18  ;;  %18608 = vmatprep.subr.mxu0 %v23505_v12  ;;  %v18120_v18 = vpop.f32.mrf.mxu1 }
 0x5e3   :  { %18654 = vmatmul.mubr.f32.gmra.mxu1 %v6593_v24  ;;  %18698 = vmatprep.subr.mxu1 %v23280_v58 }
 0x5e4   :  { %18609 = vmatpush3.msra.mxu0 %v23505_v12  ;;  %18699 = vmatpush3.msra.mxu1 %v23280_v58  ;;  %v5187_v58 = vpop.f32.mrf.mxu1 }
 0x5e5   :  { %18726 = vmatprep.mubr.f32.mxu1 %v23359_v1  ;;  %18610 = vmatprep.subr.mxu0 %v23515_v45 }
 0x5e6   :  { %18700 = vmatprep.subr.mxu1 %v23300_v33  ;;  %18611 = vmatpush3.msra.mxu0 %v23515_v45 }
 0x5e7   :  { %18701 = vmatpush3.msra.mxu1 %v23300_v33  ;;  %18613 = vmatmul.mubr.f32.vlgmr.msra.gmra.mxu0 %v23549_v56  ;;  %v18123_v33 = vpop.f32.mrf.mxu1 }
 0x5e8   :  { %18656 = vmatprep.subr.mxu0 %v23298_v51  ;;  %18702 = vmatprep.subr.mxu1 %v23309_v22 }
 0x5e9   :  { %18615 = vmatprep.mubr.f32.mxu0 %v23556_v48  ;;  %18657 = vmatpush3.msra.mxu0 %v23298_v51  ;;  %v18082_v51 = vpop.f32.mrf.mxu0 }
 0x5ea   :  { %18703 = vmatpush3.msra.mxu1 %v23309_v22  ;;  %18658 = vmatprep.subr.mxu0 %v23317_v8  ;;  %v5199_v22 = vpop.f32.mrf.mxu1  ;;  %v5194_v48 = vadd.f32 %v18120_v18, %v18082_v51 }
 0x5eb   :  { %18704 = vmatprep.subr.mxu1 %v23334_v41  ;;  %18659 = vmatpush3.msra.mxu0 %v23317_v8  ;;  %v5006_v11 = vpop.f32.mrf.mxu0 }
 0x5ec   :  { %18705 = vmatpush3.msra.mxu1 %v23334_v41  ;;  %18616 = vmatmul.mubr.f32.gmra.mxu0 %v23564_v55  ;;  %v18196_v54 = vpop.f32.mrf.mxu1  ;;  %v5188_v39 = vadd.f32 %v5187_v58, %v5006_v11 }
 0x5ed   :  { %18660 = vmatprep.subr.mxu0 %v23332_v19  ;;  %18706 = vmatprep.subr.mxu1 %v23348_v27  ;;  %v18085_v8 = vpop.f32.mrf.mxu0 }
 0x5ee   :  { %18661 = vmatpush3.msra.mxu0 %v23332_v19  ;;  %18688 = vmatprep.mubr.f32.mxu0 %v23359_v1  ;;  %v5419_v41 = vpop.f32.mrf.mxu1  ;;  %v5206_v25 = vadd.f32 %v18123_v33, %v18085_v8 }
 0x5ef   :  { %18707 = vmatpush3.msra.mxu1 %v23348_v27  ;;  %18662 = vmatprep.subr.mxu0 %v23353_v53  ;;  %v5026_v19 = vpop.f32.mrf.mxu0 }
 0x5f0   :  { %18708 = vmatprep.subr.mxu1 %v23364_v52  ;;  %18663 = vmatpush3.msra.mxu0 %v23353_v53  ;;  %v18199_v27 = vpop.f32.mrf.mxu1  ;;  %v5200_v13 = vadd.f32 %v5199_v22, %v5026_v19 }
 0x5f1   :  { %18709 = vmatpush3.msra.mxu1 %v23364_v52  ;;  %18664 = vmatprep.subr.mxu0 %v23372_v35  ;;  %v18158_v6 = vpop.f32.mrf.mxu0 }
 0x5f2   :  { %18710 = vmatprep.subr.mxu1 %v23385_v9  ;;  %18665 = vmatpush3.msra.mxu0 %v23372_v35  ;;  %v5435_v1 = vpop.f32.mrf.mxu1  ;;  %v5317_v55 = vadd.f32 %v18158_v6, %v5194_v48 }
 0x5f3   :  { %18711 = vmatpush3.msra.mxu1 %v23385_v9  ;;  %18666 = vmatprep.subr.mxu0 %v23390_v2  ;;  %v5309_v53 = vpop.f32.mrf.mxu0 }
 0x5f4   :  { %18712 = vmatprep.subr.mxu1 %v23404_v62  ;;  %18667 = vmatpush3.msra.mxu0 %v23390_v2  ;;  %v18272_v52 = vpop.f32.mrf.mxu1  ;;  %v5310_v57 = vadd.f32 %v5309_v53, %v5188_v39  ;;  %v5428_v30 = vadd.f32 %v18196_v54, %v5317_v55 }
 0x5f5   :  { %18713 = vmatpush3.msra.mxu1 %v23404_v62  ;;  %18668 = vmatprep.subr.mxu0 %v23408_v36  ;;  %v18161_v59 = vpop.f32.mrf.mxu0 }
 0x5f6   :  { %18714 = vmatprep.subr.mxu1 %v23417_v21  ;;  %18669 = vmatpush3.msra.mxu0 %v23408_v36  ;;  %v5667_v4 = vpop.f32.mrf.mxu1  ;;  %v5331_v38 = vadd.f32 %v18161_v59, %v5206_v25  ;;  %v5420_v46 = vadd.f32 %v5419_v41, %v5310_v57 }
 0x5f7   :  { %18715 = vmatpush3.msra.mxu1 %v23417_v21  ;;  %18670 = vmatprep.subr.mxu0 %v23424_v15  ;;  %v5323_v35 = vpop.f32.mrf.mxu0 }
 0x5f8   :  { %18716 = vmatprep.subr.mxu1 %v23433_v43  ;;  %18671 = vmatpush3.msra.mxu0 %v23424_v15  ;;  %v18275_v2 = vpop.f32.mrf.mxu1  ;;  %v5324_v49 = vadd.f32 %v5323_v35, %v5200_v13 }
 0x5f9   :  { %18717 = vmatpush3.msra.mxu1 %v23433_v43  ;;  %18672 = vmatprep.subr.mxu0 %v23444_v10  ;;  %v18234_v9 = vpop.f32.mrf.mxu0 }
 0x5fa   :  { %18718 = vmatprep.subr.mxu1 %v23449_v40  ;;  %18673 = vmatpush3.msra.mxu0 %v23444_v10  ;;  %v5679_v42 = vpop.f32.mrf.mxu1 }
 0x5fb   :  { %18719 = vmatpush3.msra.mxu1 %v23449_v40  ;;  %18674 = vmatprep.subr.mxu0 %v23462_v63  ;;  %v5562_v23 = vpop.f32.mrf.mxu0 }
 0x5fc   :  { %18720 = vmatprep.subr.mxu1 %v23467_v3  ;;  %18675 = vmatpush3.msra.mxu0 %v23462_v63 }
 0x5fd   :  { %18721 = vmatpush3.msra.mxu1 %v23467_v3  ;;  %18676 = vmatprep.subr.mxu0 %v23478_v34  ;;  %v18237_v62 = vpop.f32.mrf.mxu0 }
 0x5fe   :  { %18722 = vmatprep.subr.mxu1 %v23483_v14  ;;  %18677 = vmatpush3.msra.mxu0 %v23478_v34 }
 0x5ff   :  { %18723 = vmatpush3.msra.mxu1 %v23483_v14  ;;  %18678 = vmatprep.subr.mxu0 %v23490_v28  ;;  %v5574_v44 = vpop.f32.mrf.mxu0 }
 0x600   :  { %18724 = vmatprep.subr.mxu1 %v23495_v20  ;;  %18679 = vmatpush3.msra.mxu0 %v23490_v28 }
 0x601   :  { %18725 = vmatpush3.msra.mxu1 %v23495_v20  ;;  %18680 = vmatprep.subr.mxu0 %v23502_v61 }
 0x602   :  { %18727 = vmatmul.mubr.f32.vlgmr.msra.gmra.mxu1 %v23540_v47  ;;  %18681 = vmatpush3.msra.mxu0 %v23502_v61 }
 0x603   :  { %18729 = vmatprep.mubr.f32.mxu1 %v23544_v17  ;;  %18682 = vmatprep.subr.mxu0 %v23512_v32 }
 0x604   :  { %18683 = vmatpush3.msra.mxu0 %v23512_v32  ;;  %18743 = vmatprep.subr.mxu1 %v27151_v50 }
 0x605   :  { %18684 = vmatprep.subr.mxu0 %v23522_v29 }
 0x606   :  { %18730 = vmatmul.mubr.f32.gmra.mxu1 %v23552_v31  ;;  %18685 = vmatpush3.msra.mxu0 %v23522_v29 }
 0x607   :  { %18686 = vmatprep.subr.mxu0 %v23529_v37  ;;  %18751 = vmatprep.mubr.msk.f32.mxu1 %vm20609_vm1, %v27151_v50 }
 0x608   :  { %18687 = vmatpush3.msra.mxu0 %v23529_v37 }
 0x609   :  { %18689 = vmatmul.mubr.f32.vlgmr.msra.gmra.mxu0 %v23540_v47  ;;  %18732 = vmatprep.subr.mxu0 %v27151_v50 }
 0x60a   :  { %18691 = vmatprep.mubr.f32.mxu0 %v23544_v17 }
 0x60d   :  { %18692 = vmatmul.mubr.f32.gmra.mxu0 %v23552_v31 }
 0x60e   :  { %18740 = vmatprep.mubr.msk.f32.mxu0 %vm20609_vm1, %v27151_v50  ;;  %v18348_v36 = vpop.f32.mrf.mxu1 }
 0x610   :  { %v5957_v21 = vpop.f32.mrf.mxu1 }
 0x613   :  { %v23739_v16 = vpop.f32.mrf.mxu1 }
 0x615   :  { %v23741_v10 = vpop.f32.mrf.mxu1 }
 0x617   :  { %v18310_v15 = vpop.f32.mrf.mxu0 }
 0x619   :  { %v5776_v43 = vpop.f32.mrf.mxu0 }
 0x61c   :  { %v18313_v5 = vpop.f32.mrf.mxu0 }
 0x61e   :  { %v5796_v63 = vpop.f32.mrf.mxu0 }
 0x632   :  { %v23743_v40 = vpop.f32.mrf.mxu1 }
 0x634   :  { %v23745_v26 = vpop.f32.mrf.mxu1 }
 0x637   :  { %v23747_v34 = vpop.f32.mrf.mxu1 }
 0x639   :  { %v23749_v14 = vpop.f32.mrf.mxu1 }
 0x63a   :  { %27152 = vst [vmem:[#allocation5_spill] sm:$0xff] %v23749_v14 }
 0x63b   :  { %v18386_v3 = vpop.f32.mrf.mxu0 }
 0x63d   :  { %v6079_v60 = vpop.f32.mrf.mxu0 }
 0x640   :  { %v18389_v28 = vpop.f32.mrf.mxu0 }
 0x641   :  { %v27160_v48 = vld [vmem:[#allocation5_spill] sm:$0xff] }
 0x642   :  { %v6093_v20 = vpop.f32.mrf.mxu0 }
 0x656   :  { %v23751_v0 = vpop.f32.mrf.mxu1 }
 0x657   :  { %27153 = vst [vmem:[#allocation3_spill] sm:$0xff] %v23751_v0  ;;  %v5444_v0 = vadd.f32 %v18199_v27, %v5331_v38 }
 0x658   :  { %v23753_v61 = vpop.f32.mrf.mxu1 }
 0x659   :  { %27154 = vst [vmem:[#allocation7_spill] sm:$0xff] %v23753_v61  ;;  %v5563_v61 = vadd.f32 %v5562_v23, %v5420_v46  ;;  %v5581_v14 = vadd.f32 %v18237_v62, %v5444_v0 }
 0x65b   :  { %v23755_v32 = vpop.f32.mrf.mxu1  ;;  %v5668_v33 = vadd.f32 %v5667_v4, %v5563_v61  ;;  %v5686_v19 = vadd.f32 %v18275_v2, %v5581_v14 }
 0x65c   :  { %27155 = vst [vmem:[#allocation9_spill] sm:$0xff] %v23755_v32  ;;  %v5569_v32 = vadd.f32 %v18234_v9, %v5428_v30 }
 0x65d   :  { %v23759_v29 = vpop.f32.mrf.mxu1  ;;  %v5777_v22 = vadd.f32 %v5776_v43, %v5668_v33  ;;  %v5807_v54 = vadd.f32 %v18313_v5, %v5686_v19 }
 0x65e   :  { %27156 = vst [vmem:[#allocation79_spill] sm:$0xff] %v23759_v29  ;;  %v5674_v58 = vadd.f32 %v18272_v52, %v5569_v32 }
 0x65f   :  { %v18462_v12 = vpop.f32.mrf.mxu0  ;;  %v5958_v46 = vadd.f32 %v5957_v21, %v5777_v22 }
 0x660   :  { %v5787_v6 = vadd.f32 %v18310_v15, %v5674_v58 }
 0x661   :  { %v23757_v45 = vpop.f32.mrf.mxu0  ;;  %v6080_v62 = vadd.f32 %v6079_v60, %v5958_v46 }
 0x662   :  { %v5964_v35 = vadd.f32 %v18348_v36, %v5787_v6 }
 0x663   :  { %v6190_v21 = vadd.f32 %v23745_v26, %v6080_v62  ;;  %v27161_v26 = vld [vmem:[#allocation3_spill] sm:$0xff] }
 0x664   :  { %v23761_v37 = vpop.f32.mrf.mxu0  ;;  %v6087_v27 = vadd.f32 %v18386_v3, %v5964_v35 }
 0x665   :  { %27157 = vst [vmem:[#allocation80_spill] sm:$0xff] %v23761_v37  ;;  %v5436_v37 = vadd.f32 %v5435_v1, %v5324_v49  ;;  %v5976_v1 = vadd.f32 %v23739_v16, %v5807_v54  ;;  %v6333_v32 = vadd.f32 %v23757_v45, %v6190_v21  ;;  %v27167_v19 = vld [vmem:[#allocation79_spill] sm:$0xff] }
 0x666   :  { %v23763_v17 = vpop.f32.mrf.mxu0 }
 0x667   :  { %27158 = vst [vmem:[#allocation81_spill] sm:$0xff] %v23763_v17  ;;  %v5575_v51 = vadd.f32 %v5574_v44, %v5436_v37  ;;  %v6101_v61 = vadd.f32 %v18389_v28, %v5976_v1  ;;  %v27170_v1 = vld [vmem:[#allocation74_spill] sm:$0xff] }
 0x669   :  { %v5680_v53 = vadd.f32 %v5679_v42, %v5575_v51  ;;  %v6198_v42 = vadd.f32 %v23743_v40, %v6087_v27  ;;  %v6214_v37 = vadd.f32 %v23747_v34, %v6101_v61 }
 0x66b   :  { %v5797_v9 = vadd.f32 %v5796_v63, %v5680_v53  ;;  %v6339_v3 = vadd.f32 %v18462_v12, %v6198_v42 }
 0x66c   :  { %v27159_v40 = vld [vmem:[#allocation80_spill] sm:$0xff] }
 0x66d   :  { %v5970_v15 = vadd.f32 %v23741_v10, %v5797_v9  ;;  %v6444_v55 = vadd.f32 %v27161_v26, %v6339_v3 }
 0x66e   :  { %v27163_v45 = vld [vmem:[#allocation81_spill] sm:$0xff] }
 0x66f   :  { %v6094_v36 = vadd.f32 %v6093_v20, %v5970_v15 }
 0x671   :  { %v6206_v20 = vadd.f32 %v27160_v48, %v6094_v36 }
 0x67a   :  { %v18576_v47 = vpop.f32.mrf.mxu1 }
 0x67c   :  { %v6748_v56 = vpop.f32.mrf.mxu1 }
 0x67f   :  { %v18579_v24 = vpop.f32.mrf.mxu1 }
 0x681   :  { %v6760_v50 = vpop.f32.mrf.mxu1 }
 0x683   :  { %v18538_v31 = vpop.f32.mrf.mxu0 }
 0x684   :  { %v6755_v23 = vadd.f32 %v18576_v47, %v18538_v31 }
 0x685   :  { %v6567_v7 = vpop.f32.mrf.mxu0 }
 0x686   :  { %v6749_v4 = vadd.f32 %v6748_v56, %v6567_v7 }
 0x688   :  { %v18541_v29 = vpop.f32.mrf.mxu0 }
 0x689   :  { %v6767_v43 = vadd.f32 %v18579_v24, %v18541_v29  ;;  %v6351_v29 = vadd.f32 %v27159_v40, %v6214_v37  ;;  %v6345_v24 = vadd.f32 %v27163_v45, %v6206_v20  ;;  %v27174_v40 = vld [vmem:[#allocation6_spill] sm:$0xff] }
 0x68a   :  { %v6587_v18 = vpop.f32.mrf.mxu0 }
 0x68b   :  { %v6761_v60 = vadd.f32 %v6760_v50, %v6587_v18  ;;  %v27165_v18 = vld [vmem:[#allocation9_spill] sm:$0xff]  ;;  %v6450_v54 = vadd.f32 %v27167_v19, %v6345_v24  ;;  %v27184_v19 = vld [vmem:[#allocation28_spill] sm:$0xff] }
 0x68c   :  { %v6456_v58 = vadd.f32 %v27165_v18, %v6351_v29  ;;  %v27177_v18 = vld [vmem:[#allocation22_spill] sm:$0xff] }
 0x69e   :  { %v18652_v17 = vpop.f32.mrf.mxu1 }
 0x6a0   :  { %v6980_v11 = vpop.f32.mrf.mxu1 }
 0x6a3   :  { %v18655_v41 = vpop.f32.mrf.mxu1 }
 0x6a5   :  { %v6996_v52 = vpop.f32.mrf.mxu1 }
 0x6a7   :  { %v18614_v8 = vpop.f32.mrf.mxu0 }
 0x6a8   :  { %v6878_v0 = vadd.f32 %v18614_v8, %v6755_v23 }
 0x6a9   :  { %v6870_v59 = vpop.f32.mrf.mxu0 }
 0x6aa   :  { %v6871_v5 = vadd.f32 %v6870_v59, %v6749_v4  ;;  %v6989_v16 = vadd.f32 %v18652_v17, %v6878_v0  ;;  %v27162_v17 = vld [vmem:[#allocation7_spill] sm:$0xff] }
 0x6ab   :  { %v6438_v57 = vadd.f32 %v27162_v17, %v6333_v32 }
 0x6ac   :  { %v18617_v44 = vpop.f32.mrf.mxu0  ;;  %v6981_v31 = vadd.f32 %v6980_v11, %v6871_v5  ;;  %v27171_v5 = vld [vmem:[#allocation8_spill] sm:$0xff] }
 0x6ad   :  { %v6892_v14 = vadd.f32 %v18617_v44, %v6767_v43 }
 0x6ae   :  { %v6884_v63 = vpop.f32.mrf.mxu0 }
 0x6af   :  { %v6885_v10 = vadd.f32 %v6884_v63, %v6761_v60  ;;  %v7005_v25 = vadd.f32 %v18655_v41, %v6892_v14  ;;  %v27172_v60 = vmov 1.0  }
 0x6b1   :  { %v6997_v49 = vadd.f32 %v6996_v52, %v6885_v10 }
 0x6c2   :  { %v18728_v2 = vpop.f32.mrf.mxu1 }
 0x6c4   :  { %v7228_v28 = vpop.f32.mrf.mxu1 }
 0x6c6   :  { %v18731_v34 = vpop.f32.mrf.mxu1 }
 0x6c8   :  { %v7240_v22 = vpop.f32.mrf.mxu1 }
 0x6c9   :  { %v18690_v47 = vpop.f32.mrf.mxu0 }
 0x6ca   :  { %v7130_v56 = vadd.f32 %v18690_v47, %v6989_v16  ;;  %v27173_v16 = vld [vmem:[#allocation4_spill] sm:$0xff] }
 0x6cb   :  { %v7123_v39 = vpop.f32.mrf.mxu0 }
 0x6cc   :  { %v7235_v12 = vadd.f32 %v18728_v2, %v7130_v56  ;;  %v7124_v50 = vadd.f32 %v7123_v39, %v6981_v31 }
 0x6cd   :  { %v18693_v7 = vpop.f32.mrf.mxu0 }
 0x6ce   :  { %v23776_v13 = vadd.f32 %v7235_v12, %v6444_v55  ;;  %v7229_v38 = vadd.f32 %v7228_v28, %v7124_v50  ;;  %v7142_v30 = vadd.f32 %v18693_v7, %v7005_v25 }
 0x6cf   :  { %v7135_v51 = vpop.f32.mrf.mxu0 }
 0x6d0   :  { %27164 = vst [vmem:[#allocation82_spill] sm:$0xff] %v23776_v13  ;;  %v23779_v33 = vadd.f32 %v7229_v38, %v6438_v57  ;;  %v7247_v11 = vadd.f32 %v18731_v34, %v7142_v30  ;;  %v7136_v8 = vadd.f32 %v7135_v51, %v6997_v49  ;;  %v23782_v6 = vand.u32 4294901760, %v23776_v13  ;;  %v27175_v30 = vld [vmem:[#allocation11_spill] sm:$0xff]  ;;  %v27176_v49 = vld [vmem:[#allocation10_spill] sm:$0xff] }
 0x6d1   :  { %v7740_v28 = vmul.f32 %v23776_v13, %v23776_v13  ;;  %v27179_v51 = vld [vmem:[#allocation23_spill] sm:$0xff] }
 0x6d2   :  { %27166 = vst [vmem:[#allocation83_spill] sm:$0xff] %v23779_v33  ;;  %v23785_v53 = vadd.f32 %v7247_v11, %v6456_v58  ;;  %v7241_v41 = vadd.f32 %v7240_v22, %v7136_v8  ;;  %v23788_v59 = vand.u32 4294901760, %v23779_v33  ;;  %v7373_v46 = vsub.f32 %v23776_v13, %v23782_v6  ;;  %v27178_v58 = vld [vmem:[#allocation13_spill] sm:$0xff]  ;;  %v27180_v11 = vld [vmem:[#allocation15_spill] sm:$0xff]  ;;  %v27181_v8 = vld [vmem:[#allocation24_spill] sm:$0xff] }
 0x6d3   :  { %v7739_v10 = vmul.f32 %v23779_v33, %v23779_v33  ;;  %v23858_v31 = vand.u32 4294901760, %v7740_v28  ;;  %v27183_v22 = vld [vmem:[#allocation25_spill] sm:$0xff]  ;;  %v27234_v13 = vld [vmem:[#allocation56_spill] sm:$0xff] }
 0x6d4   :  { %27168 = vst [vmem:[#allocation84_spill] sm:$0xff] %v23785_v53  ;;  %v23790_v35 = vadd.f32 %v7241_v41, %v6450_v54  ;;  %v23793_v9 = vand.u32 4294901760, %v23785_v53  ;;  %v23805_v62 = vsub.f32 %v23779_v33, %v23788_v59  ;;  %v7374_v4 = vand.u32 4294901760, %v7373_v46  ;;  %v27185_v54 = vld [vmem:[#allocation33_spill] sm:$0xff]  ;;  %v27186_v41 = vld [vmem:[#allocation32_spill] sm:$0xff]  ;;  %v27235_v33 = vld [vmem:[#allocation59_spill] sm:$0xff] }
 0x6d5   :  { %v7742_v14 = vmul.f32 %v23785_v53, %v23785_v53  ;;  %v23868_v48 = vand.u32 4294901760, %v7739_v10  ;;  %v7862_v20 = vsub.f32 %v7740_v28, %v23858_v31 }
 0x6d6   :  { %27169 = vst [vmem:[#allocation80_spill] sm:$0xff] %v23790_v35  ;;  %18733 = vmatpush3.msra.mxu0 %v23793_v9  ;;  %v23799_v27 = vand.u32 4294901760, %v23790_v35  ;;  %v7359_v23 = vsub.f32 %v23785_v53, %v23793_v9  ;;  %v7381_v15 = vand.u32 4294901760, %v23805_v62  ;;  %v7375_v43 = vsub.f32 %v7373_v46, %v7374_v4  ;;  %v27232_v53 = vld [vmem:[#allocation48_spill] sm:$0xff] }
 0x6d7   :  { %18734 = vmatprep.subr.mxu0 %v27170_v1  ;;  %v7741_v32 = vmul.f32 %v23790_v35, %v23790_v35  ;;  %v23841_v37 = vand.u32 4294901760, %v7742_v14  ;;  %v7869_v26 = vsub.f32 %v7739_v10, %v23868_v48  ;;  %v7863_v50 = vand.u32 4294901760, %v7862_v20 }
 0x6d8   :  { %18735 = vmatpush3.msra.mxu0 %v23799_v27  ;;  %v7360_v52 = vand.u32 4294901760, %v7359_v23  ;;  %v7366_v44 = vsub.f32 %v23790_v35, %v23799_v27  ;;  %v7382_v21 = vsub.f32 %v23805_v62, %v7381_v15  ;;  %v7376_v63 = vand.u32 4294901760, %v7375_v43  ;;  %v27201_v43 = vld [vmem:[#allocation58_spill] sm:$0xff] }
 0x6d9   :  { %18736 = vmatprep.subr.mxu0 %v27170_v1  ;;  %v23848_v47 = vand.u32 4294901760, %v7741_v32  ;;  %v23856_v56 = vsub.f32 %v7742_v14, %v23841_v37  ;;  %v7870_v17 = vand.u32 4294901760, %v7869_v26  ;;  %v7864_v45 = vsub.f32 %v7862_v20, %v7863_v50  ;;  %v27206_v14 = vld [vmem:[#allocation73_spill] sm:$0xff]  ;;  %v27233_v35 = vld [vmem:[#allocation54_spill] sm:$0xff] }
 0x6da   :  { %18737 = vmatpush3.msra.mxu0 %v23782_v6  ;;  %v7361_v0 = vsub.f32 %v7359_v23, %v7360_v52  ;;  %v7367_v61 = vand.u32 4294901760, %v7366_v44  ;;  %v7383_v3 = vand.u32 4294901760, %v7382_v21  ;;  %v27203_v21 = vld [vmem:[#allocation61_spill] sm:$0xff] }
 0x6db   :  { %18738 = vmatprep.subr.mxu0 %v27170_v1  ;;  %v23866_v29 = vsub.f32 %v7741_v32, %v23848_v47  ;;  %v7849_v39 = vand.u32 4294901760, %v23856_v56  ;;  %v7871_v34 = vsub.f32 %v7869_v26, %v7870_v17  ;;  %v7865_v7 = vand.u32 4294901760, %v7864_v45 }
 0x6dc   :  { %18739 = vmatpush3.msra.mxu0 %v23788_v59  ;;  %v7362_v2 = vand.u32 4294901760, %v7361_v0  ;;  %v7368_v42 = vsub.f32 %v7366_v44, %v7367_v61  ;;  %v27196_v0 = vld [vmem:[#allocation49_spill] sm:$0xff] }
 0x6dd   :  { %18754 = vmatprep.subr.mxu0 %v27170_v1  ;;  %18741 = vmatmul.mubr.f32.vlgmr.msra.gmra.mxu0 %v27171_v5  ;;  %v7856_v55 = vand.u32 4294901760, %v23866_v29  ;;  %v7850_v12 = vsub.f32 %v23856_v56, %v7849_v39  ;;  %v7872_v38 = vand.u32 4294901760, %v7871_v34 }
 0x6de   :  { %18744 = vmatpush3.msra.mxu1 %v7362_v2  ;;  %18755 = vmatpush3.msra.mxu0 %v7359_v23  ;;  %v7369_v36 = vand.u32 4294901760, %v7368_v42  ;;  %v27191_v23 = vld [vmem:[#allocation47_spill] sm:$0xff]  ;;  %v27199_v2 = vld [vmem:[#allocation53_spill] sm:$0xff] }
 0x6df   :  { %18745 = vmatprep.subr.mxu1 %v27170_v1  ;;  %18756 = vmatprep.subr.mxu0 %v27170_v1  ;;  %v7857_v25 = vsub.f32 %v23866_v29, %v7856_v55  ;;  %v7851_v57 = vand.u32 4294901760, %v7850_v12  ;;  %v27200_v42 = vld [vmem:[#allocation67_spill] sm:$0xff] }
 0x6e0   :  { %18746 = vmatpush3.msra.mxu1 %v7369_v36  ;;  %18757 = vmatpush3.msra.mxu0 %v7366_v44  ;;  %v27194_v44 = vld [vmem:[#allocation46_spill] sm:$0xff] }
 0x6e1   :  { %18747 = vmatprep.subr.mxu1 %v27170_v1  ;;  %18758 = vmatprep.subr.mxu0 %v27170_v1  ;;  %v7858_v24 = vand.u32 4294901760, %v7857_v25  ;;  %v27202_v36 = vld [vmem:[#allocation70_spill] sm:$0xff] }
 0x6e2   :  { %18748 = vmatpush3.msra.mxu1 %v7376_v63  ;;  %18759 = vmatpush3.msra.mxu0 %v7373_v46  ;;  %v27189_v46 = vld [vmem:[#allocation43_spill] sm:$0xff]  ;;  %v27204_v63 = vld [vmem:[#allocation72_spill] sm:$0xff] }
 0x6e3   :  { %18749 = vmatprep.subr.mxu1 %v27170_v1  ;;  %18760 = vmatprep.subr.mxu0 %v27170_v1 }
 0x6e4   :  { %18750 = vmatpush3.msra.mxu1 %v7383_v3  ;;  %18761 = vmatpush3.msra.mxu0 %v23805_v62  ;;  %v27192_v62 = vld [vmem:[#allocation42_spill] sm:$0xff] }
 0x6e5   :  { %18752 = vmatmul.mubr.msk.f32.vlgmr.msra.gmra.mxu1 %vm2124_vm2, %v27172_v60  ;;  %18762 = vmatprep.mubr.msk.f32.mxu0 %vm20609_vm1, %v27170_v1  ;;  %v27205_v3 = vld [vmem:[#allocation66_spill] sm:$0xff] }
 0x6e6   :  { %18765 = vmatprep.subr.mxu1 %v27170_v1  ;;  %18776 = vmatprep.subr.mxu0 %v27170_v1 }
 0x6e7   :  { %18763 = vmatmul.mubr.f32.vlgmr.msra.gmra.mxu0 %v27173_v16  ;;  %18766 = vmatpush3.msra.mxu1 %v23793_v9 }
 0x6e8   :  { %18777 = vmatpush3.msra.mxu0 %v7360_v52  ;;  %18767 = vmatprep.subr.mxu1 %v27170_v1  ;;  %v27193_v52 = vld [vmem:[#allocation51_spill] sm:$0xff] }
 0x6e9   :  { %18778 = vmatprep.subr.mxu0 %v27170_v1  ;;  %18768 = vmatpush3.msra.mxu1 %v23799_v27 }
 0x6ea   :  { %18779 = vmatpush3.msra.mxu0 %v7367_v61  ;;  %18769 = vmatprep.subr.mxu1 %v27170_v1  ;;  %v27197_v61 = vld [vmem:[#allocation62_spill] sm:$0xff] }
 0x6eb   :  { %18780 = vmatprep.subr.mxu0 %v27170_v1  ;;  %18770 = vmatpush3.msra.mxu1 %v23782_v6 }
 0x6ec   :  { %18781 = vmatpush3.msra.mxu0 %v7374_v4  ;;  %18771 = vmatprep.subr.mxu1 %v27170_v1  ;;  %v27195_v4 = vld [vmem:[#allocation55_spill] sm:$0xff] }
 0x6ed   :  { %18782 = vmatprep.subr.mxu0 %v27170_v1  ;;  %18772 = vmatpush3.msra.mxu1 %v23788_v59 }
 0x6ee   :  { %18773 = vmatprep.mubr.msk.f32.mxu1 %vm20609_vm1, %v27170_v1  ;;  %18783 = vmatpush3.msra.mxu0 %v7381_v15  ;;  %v27198_v15 = vld [vmem:[#allocation63_spill] sm:$0xff] }
 0x6ef   :  { %18774 = vmatmul.mubr.f32.vlgmr.msra.gmra.mxu1 %v27174_v40  ;;  %18784 = vmatprep.mubr.msk.f32.mxu0 %vm20609_vm1, %v27170_v1 }
 0x6f0   :  { %18787 = vmatprep.subr.mxu1 %v27170_v1  ;;  %18798 = vmatprep.subr.mxu0 %v27170_v1 }
 0x6f1   :  { %18785 = vmatmul.mubr.msk.f32.vlgmr.msra.gmra.mxu0 %vm2124_vm2, %v27172_v60  ;;  %18788 = vmatpush3.msra.mxu1 %v23793_v9  ;;  %v27188_v9 = vld [vmem:[#allocation35_spill] sm:$0xff] }
 0x6f2   :  { %18799 = vmatpush3.msra.mxu0 %v23841_v37  ;;  %18789 = vmatprep.subr.mxu1 %v27170_v1 }
 0x6f3   :  { %18800 = vmatprep.subr.mxu0 %v27170_v1  ;;  %18790 = vmatpush3.msra.mxu1 %v23799_v27  ;;  %v27190_v27 = vld [vmem:[#allocation39_spill] sm:$0xff] }
 0x6f4   :  { %18801 = vmatpush3.msra.mxu0 %v23848_v47  ;;  %18791 = vmatprep.subr.mxu1 %v27170_v1 }
 0x6f5   :  { %18802 = vmatprep.subr.mxu0 %v27170_v1  ;;  %18792 = vmatpush3.msra.mxu1 %v23782_v6  ;;  %v27182_v6 = vld [vmem:[#allocation26_spill] sm:$0xff] }
 0x6f6   :  { %18803 = vmatpush3.msra.mxu0 %v23858_v31  ;;  %18793 = vmatprep.subr.mxu1 %v27170_v1 }
 0x6f7   :  { %18804 = vmatprep.subr.mxu0 %v27170_v1  ;;  %18794 = vmatpush3.msra.mxu1 %v23788_v59  ;;  %v27187_v59 = vld [vmem:[#allocation36_spill] sm:$0xff] }
 0x6f8   :  { %18795 = vmatprep.mubr.msk.f32.mxu1 %vm20609_vm1, %v27170_v1  ;;  %18805 = vmatpush3.msra.mxu0 %v23868_v48 }
 0x6f9   :  { %18796 = vmatmul.mubr.msk.f32.vlgmr.msra.gmra.mxu1 %vm2124_vm2, %v27172_v60  ;;  %18806 = vmatprep.mubr.msk.f32.mxu0 %vm20609_vm1, %v27170_v1 }
 0x6fa   :  { %18809 = vmatprep.subr.mxu1 %v27170_v1  ;;  %18820 = vmatprep.subr.mxu0 %v27170_v1 }
 0x6fb   :  { %18807 = vmatmul.mubr.f32.vlgmr.msra.gmra.mxu0 %v27171_v5  ;;  %18810 = vmatpush3.msra.mxu1 %v7851_v57  ;;  %v27231_v5 = vld [vmem:[#allocation44_spill] sm:$0xff] }
 0x6fc   :  { %18821 = vmatpush3.msra.mxu0 %v23856_v56  ;;  %18811 = vmatprep.subr.mxu1 %v27170_v1 }
 0x6fd   :  { %18822 = vmatprep.subr.mxu0 %v27170_v1  ;;  %18812 = vmatpush3.msra.mxu1 %v7858_v24 }
 0x6fe   :  { %18823 = vmatpush3.msra.mxu0 %v23866_v29  ;;  %18813 = vmatprep.subr.mxu1 %v27170_v1 }
 0x6ff   :  { %18824 = vmatprep.subr.mxu0 %v27170_v1  ;;  %18814 = vmatpush3.msra.mxu1 %v7865_v7 }
 0x700   :  { %18825 = vmatpush3.msra.mxu0 %v7862_v20  ;;  %18815 = vmatprep.subr.mxu1 %v27170_v1 }
 0x701   :  { %18826 = vmatprep.subr.mxu0 %v27170_v1  ;;  %18816 = vmatpush3.msra.mxu1 %v7872_v38 }
 0x702   :  { %18827 = vmatpush3.msra.mxu0 %v7869_v26  ;;  %18817 = vmatprep.mubr.msk.f32.mxu1 %vm20609_vm1, %v27170_v1 }
 0x703   :  { %18828 = vmatprep.mubr.msk.f32.mxu0 %vm20609_vm1, %v27170_v1  ;;  %18831 = vmatprep.subr.mxu1 %v27170_v1 }
 0x704   :  { %18842 = vmatprep.subr.mxu0 %v27170_v1  ;;  %18818 = vmatmul.mubr.msk.f32.vlgmr.msra.gmra.mxu1 %vm2124_vm2, %v27172_v60 }
 0x705   :  { %18829 = vmatmul.mubr.f32.vlgmr.msra.gmra.mxu0 %v27173_v16  ;;  %18832 = vmatpush3.msra.mxu1 %v23841_v37  ;;  %v27229_v16 = vld [vmem:[#allocation37_spill] sm:$0xff] }
 0x706   :  { %18843 = vmatpush3.msra.mxu0 %v7849_v39  ;;  %18833 = vmatprep.subr.mxu1 %v27170_v1 }
 0x707   :  { %18844 = vmatprep.subr.mxu0 %v27170_v1  ;;  %18834 = vmatpush3.msra.mxu1 %v23848_v47 }
 0x708   :  { %18845 = vmatpush3.msra.mxu0 %v7856_v55  ;;  %18835 = vmatprep.subr.mxu1 %v27170_v1 }
 0x709   :  { %18846 = vmatprep.subr.mxu0 %v27170_v1  ;;  %18836 = vmatpush3.msra.mxu1 %v23858_v31 }
 0x70a   :  { %18847 = vmatpush3.msra.mxu0 %v7863_v50  ;;  %18837 = vmatprep.subr.mxu1 %v27170_v1 }
 0x70b   :  { %18848 = vmatprep.subr.mxu0 %v27170_v1  ;;  %18838 = vmatpush3.msra.mxu1 %v23868_v48 }
 0x70c   :  { %18849 = vmatpush3.msra.mxu0 %v7870_v17  ;;  %18839 = vmatprep.mubr.msk.f32.mxu1 %vm20609_vm1, %v27170_v1 }
 0x70d   :  { %18853 = vmatprep.subr.mxu1 %v27170_v1  ;;  %18840 = vmatmul.mubr.f32.vlgmr.msra.gmra.mxu1 %v27174_v40  ;;  %v27228_v40 = vld [vmem:[#allocation31_spill] sm:$0xff] }
 0x70e   :  { %18854 = vmatpush3.msra.mxu1 %v23841_v37  ;;  %18850 = vmatprep.mubr.msk.f32.mxu0 %vm20609_vm1, %v27170_v1 }
 0x70f   :  { %18855 = vmatprep.subr.mxu1 %v27170_v1  ;;  %18851 = vmatmul.mubr.msk.f32.vlgmr.msra.gmra.mxu0 %vm2124_vm2, %v27172_v60 }
 0x710   :  { %18856 = vmatpush3.msra.mxu1 %v23848_v47  ;;  %18861 = vmatprep.mubr.msk.f32.mxu1 %vm20609_vm1, %v27170_v1 }
 0x711   :  { %18857 = vmatprep.subr.mxu1 %v27170_v1  ;;  %18864 = vmatprep.subr.mxu0 %v27170_v1 }
 0x712   :  { %18858 = vmatpush3.msra.mxu1 %v23858_v31  ;;  %18865 = vmatpush3.msra.mxu0 %v27175_v30 }
 0x713   :  { %18859 = vmatprep.subr.mxu1 %v27170_v1  ;;  %18866 = vmatprep.subr.mxu0 %v27170_v1 }
 0x714   :  { %18860 = vmatpush3.msra.mxu1 %v23868_v48  ;;  %18867 = vmatpush3.msra.mxu0 %v27176_v49 }
 0x715   :  { %18862 = vmatmul.mubr.msk.f32.vlgmr.msra.gmra.mxu1 %vm2124_vm2, %v27172_v60  ;;  %18899 = vmatprep.subr.mxu1 %v27170_v1  ;;  %v27230_v60 = vld [vmem:[#allocation40_spill] sm:$0xff] }
 0x716   :  { %18900 = vmatpush3.msra.mxu1 %v27177_v18  ;;  %18868 = vmatprep.subr.mxu0 %v27170_v1 }
 0x717   :  { %18901 = vmatprep.subr.mxu1 %v27170_v1  ;;  %18869 = vmatpush3.msra.mxu0 %v27178_v58 }
 0x718   :  { %18902 = vmatpush3.msra.mxu1 %v27179_v51  ;;  %18870 = vmatprep.subr.mxu0 %v27170_v1 }
 0x719   :  { %18903 = vmatprep.subr.mxu1 %v27170_v1  ;;  %18871 = vmatpush3.msra.mxu0 %v27180_v11 }
 0x71a   :  { %18904 = vmatpush3.msra.mxu1 %v27181_v8  ;;  %18872 = vmatprep.subr.mxu0 %v27170_v1 }
 0x71b   :  { %18905 = vmatprep.subr.mxu1 %v27170_v1  ;;  %18873 = vmatpush3.msra.mxu0 %v27182_v6 }
 0x71c   :  { %18906 = vmatpush3.msra.mxu1 %v27183_v22  ;;  %18874 = vmatprep.subr.mxu0 %v27170_v1 }
 0x71d   :  { %18907 = vmatprep.subr.mxu1 %v27170_v1  ;;  %18875 = vmatpush3.msra.mxu0 %v27184_v19 }
 0x71e   :  { %18908 = vmatpush3.msra.mxu1 %v27185_v54  ;;  %18876 = vmatprep.subr.mxu0 %v27170_v1 }
 0x71f   :  { %18909 = vmatprep.subr.mxu1 %v27170_v1  ;;  %18877 = vmatpush3.msra.mxu0 %v27186_v41 }
 0x720   :  { %18910 = vmatpush3.msra.mxu1 %v27187_v59  ;;  %18878 = vmatprep.subr.mxu0 %v27170_v1 }
 0x721   :  { %18911 = vmatprep.subr.mxu1 %v27170_v1  ;;  %18879 = vmatpush3.msra.mxu0 %v27188_v9 }
 0x722   :  { %18912 = vmatpush3.msra.mxu1 %v27189_v46  ;;  %18880 = vmatprep.subr.mxu0 %v27170_v1 }
 0x723   :  { %18913 = vmatprep.subr.mxu1 %v27170_v1  ;;  %18881 = vmatpush3.msra.mxu0 %v27190_v27 }
 0x724   :  { %18914 = vmatpush3.msra.mxu1 %v27191_v23  ;;  %18882 = vmatprep.subr.mxu0 %v27170_v1 }
 0x725   :  { %18915 = vmatprep.subr.mxu1 %v27170_v1  ;;  %18883 = vmatpush3.msra.mxu0 %v27192_v62 }
 0x726   :  { %18916 = vmatpush3.msra.mxu1 %v27193_v52  ;;  %18884 = vmatprep.subr.mxu0 %v27170_v1 }
 0x727   :  { %18917 = vmatprep.subr.mxu1 %v27170_v1  ;;  %18885 = vmatpush3.msra.mxu0 %v27194_v44 }
 0x728   :  { %18918 = vmatpush3.msra.mxu1 %v27195_v4  ;;  %18886 = vmatprep.subr.mxu0 %v27170_v1 }
 0x729   :  { %18919 = vmatprep.subr.mxu1 %v27170_v1  ;;  %18887 = vmatpush3.msra.mxu0 %v27196_v0 }
 0x72a   :  { %18920 = vmatpush3.msra.mxu1 %v27197_v61  ;;  %18888 = vmatprep.subr.mxu0 %v27170_v1 }
 0x72b   :  { %18921 = vmatprep.subr.mxu1 %v27170_v1  ;;  %18931 = vmatprep.mubr.msk.f32.mxu1 %vm20609_vm1, %v27170_v1 }
 0x72c   :  { %18922 = vmatpush3.msra.mxu1 %v27198_v15  ;;  %18889 = vmatpush3.msra.mxu0 %v27199_v2 }
 0x72d   :  { %18923 = vmatprep.subr.mxu1 %v27170_v1  ;;  %18890 = vmatprep.subr.mxu0 %v27170_v1 }
 0x72e   :  { %18924 = vmatpush3.msra.mxu1 %v27200_v42  ;;  %18891 = vmatpush3.msra.mxu0 %v27201_v43 }
 0x72f   :  { %18925 = vmatprep.subr.mxu1 %v27170_v1  ;;  %18892 = vmatprep.subr.mxu0 %v27170_v1 }
 0x730   :  { %18926 = vmatpush3.msra.mxu1 %v27202_v36  ;;  %18893 = vmatpush3.msra.mxu0 %v27203_v21 }
 0x731   :  { %18927 = vmatprep.subr.mxu1 %v27170_v1  ;;  %18894 = vmatprep.subr.mxu0 %v27170_v1 }
 0x732   :  { %18928 = vmatpush3.msra.mxu1 %v27204_v63  ;;  %18895 = vmatpush3.msra.mxu0 %v27205_v3 }
 0x733   :  { %18929 = vmatprep.subr.mxu1 %v27170_v1  ;;  %18896 = vmatprep.mubr.msk.f32.mxu0 %vm20609_vm1, %v27170_v1 }
 0x734   :  { %18930 = vmatpush3.msra.mxu1 %v27206_v14  ;;  %18934 = vmatprep.subr.mxu0 %v27170_v1 }
 0x735   :  { %18969 = vmatprep.subr.mxu1 %v27170_v1 }
 0x79d   :  { %v7329_v32 = vpop.f32.mrf.mxu0 }
 0x79f   :  { %v18742_v37 = vpop.f32.mrf.mxu0 }
 0x7a5   :  { %v7420_v28 = vpop.f32.mrf.mxu1 }
 0x7a6   :  { %v7421_v31 = vadd.f32 %v7420_v28, %v7329_v32 }
 0x7a7   :  { %v18753_v47 = vpop.f32.mrf.mxu1  ;;  %v7500_v10 = vpop.f32.mrf.mxu0 }
 0x7a8   :  { %v7501_v39 = vadd.f32 %v7500_v10, %v7421_v31 }
 0x7a9   :  { %v18764_v56 = vpop.f32.mrf.mxu0 }
 0x7aa   :  { %v27207_v56 = vld [vmem:[#allocation12_spill] sm:$0xff] }
 0x7af   :  { %v7577_v29 = vpop.f32.mrf.mxu1 }
 0x7b0   :  { %v7578_v55 = vadd.f32 %v7577_v29, %v7501_v39  ;;  %v27210_v39 = vld [vmem:[#allocation19_spill] sm:$0xff] }
 0x7b1   :  { %v18775_v48 = vpop.f32.mrf.mxu1  ;;  %v7660_v20 = vpop.f32.mrf.mxu0 }
 0x7b2   :  { %v7661_v12 = vadd.f32 %v7660_v20, %v7578_v55  ;;  %v27208_v48 = vld [vmem:[#allocation14_spill] sm:$0xff]  ;;  %v27209_v20 = vld [vmem:[#allocation17_spill] sm:$0xff] }
 0x7b3   :  { %v18786_v26 = vpop.f32.mrf.mxu0 }
 0x7b9   :  { %v7735_v50 = vpop.f32.mrf.mxu1 }
 0x7ba   :  { %v7736_v25 = vadd.f32 %v7735_v50, %v7661_v12  ;;  %v27211_v12 = vld [vmem:[#allocation27_spill] sm:$0xff] }
 0x7bb   :  { %v18797_v17 = vpop.f32.mrf.mxu1  ;;  %v7818_v57 = vpop.f32.mrf.mxu0 }
 0x7bc   :  { %v24019_v45 = vand.u32 4294901760, %v7736_v25 }
 0x7bd   :  { %v18808_v24 = vpop.f32.mrf.mxu0 }
 0x7be   :  { %v24022_v34 = vsub.f32 %v7736_v25, %v24019_v45  ;;  %18932 = vmatmul.mubr.f32.vlgmr.msra.gmra.mxu1 %v24019_v45 }
 0x7bf   :  { %18970 = vmatpush3.msra.mxu1 %v27175_v30  ;;  %19001 = vmatprep.mubr.msk.f32.mxu1 %vm20609_vm1, %v27170_v1 }
 0x7c0   :  { %v8311_v7 = vand.u32 4294901760, %v24022_v34  ;;  %18971 = vmatprep.subr.mxu1 %v27170_v1 }
 0x7c1   :  { %18972 = vmatpush3.msra.mxu1 %v27176_v49 }
 0x7c2   :  { %v8312_v38 = vsub.f32 %v24022_v34, %v8311_v7  ;;  %18973 = vmatprep.subr.mxu1 %v27170_v1 }
 0x7c3   :  { %18974 = vmatpush3.msra.mxu1 %v27178_v58 }
 0x7c4   :  { %v8313_v32 = vand.u32 4294901760, %v8312_v38  ;;  %18975 = vmatprep.subr.mxu1 %v27170_v1  ;;  %v7909_v37 = vpop.f32.mrf.mxu1  ;;  %v27213_v38 = vld [vmem:[#allocation34_spill] sm:$0xff] }
 0x7c5   :  { %18976 = vmatpush3.msra.mxu1 %v27180_v11  ;;  %v7910_v28 = vadd.f32 %v7909_v37, %v7818_v57  ;;  %v7989_v47 = vpop.f32.mrf.mxu0  ;;  %v27212_v57 = vld [vmem:[#allocation30_spill] sm:$0xff] }
 0x7c6   :  { %18977 = vmatprep.subr.mxu1 %v27170_v1  ;;  %18897 = vmatmul.mubr.f32.vlgmr.msra.gmra.mxu0 %v8313_v32  ;;  %v18819_v10 = vpop.f32.mrf.mxu1  ;;  %v27214_v32 = vld [vmem:[#allocation38_spill] sm:$0xff] }
 0x7c7   :  { %18935 = vmatpush3.msra.mxu0 %v27207_v56  ;;  %18978 = vmatpush3.msra.mxu1 %v27182_v6  ;;  %v7990_v31 = vadd.f32 %v7989_v47, %v7910_v28  ;;  %v18830_v29 = vpop.f32.mrf.mxu0  ;;  %v27215_v47 = vld [vmem:[#allocation41_spill] sm:$0xff] }
 0x7c8   :  { %18936 = vmatprep.subr.mxu0 %v27170_v1  ;;  %18979 = vmatprep.subr.mxu1 %v27170_v1  ;;  %v27217_v29 = vld [vmem:[#allocation50_spill] sm:$0xff] }
 0x7c9   :  { %18937 = vmatpush3.msra.mxu0 %v27208_v48  ;;  %18980 = vmatpush3.msra.mxu1 %v27184_v19 }
 0x7ca   :  { %18938 = vmatprep.subr.mxu0 %v27170_v1  ;;  %18981 = vmatprep.subr.mxu1 %v27170_v1 }
 0x7cb   :  { %18939 = vmatpush3.msra.mxu0 %v27209_v20  ;;  %18982 = vmatpush3.msra.mxu1 %v27186_v41 }
 0x7cc   :  { %18940 = vmatprep.subr.mxu0 %v27170_v1  ;;  %18983 = vmatprep.subr.mxu1 %v27170_v1 }
 0x7cd   :  { %18941 = vmatpush3.msra.mxu0 %v27210_v39  ;;  %18984 = vmatpush3.msra.mxu1 %v27188_v9  ;;  %v8066_v26 = vpop.f32.mrf.mxu1 }
 0x7ce   :  { %18942 = vmatprep.subr.mxu0 %v27170_v1  ;;  %18985 = vmatprep.subr.mxu1 %v27170_v1  ;;  %v8067_v55 = vadd.f32 %v8066_v26, %v7990_v31  ;;  %v27216_v31 = vld [vmem:[#allocation45_spill] sm:$0xff]  ;;  %v27218_v26 = vld [vmem:[#allocation52_spill] sm:$0xff] }
 0x7cf   :  { %18943 = vmatpush3.msra.mxu0 %v27211_v12  ;;  %18986 = vmatpush3.msra.mxu1 %v27190_v27  ;;  %v18841_v50 = vpop.f32.mrf.mxu1  ;;  %v8149_v25 = vpop.f32.mrf.mxu0 }
 0x7d0   :  { %18944 = vmatprep.subr.mxu0 %v27170_v1  ;;  %18987 = vmatprep.subr.mxu1 %v27170_v1  ;;  %v8150_v17 = vadd.f32 %v8149_v25, %v8067_v55  ;;  %v27219_v55 = vld [vmem:[#allocation57_spill] sm:$0xff]  ;;  %v27220_v50 = vld [vmem:[#allocation60_spill] sm:$0xff] }
 0x7d1   :  { %18945 = vmatpush3.msra.mxu0 %v27212_v57  ;;  %18988 = vmatpush3.msra.mxu1 %v27192_v62  ;;  %v18852_v24 = vpop.f32.mrf.mxu0  ;;  %v27221_v25 = vld [vmem:[#allocation65_spill] sm:$0xff] }
 0x7d2   :  { %18946 = vmatprep.subr.mxu0 %v27170_v1  ;;  %18989 = vmatprep.subr.mxu1 %v27170_v1  ;;  %v27224_v24 = vld [vmem:[#allocation18_spill] sm:$0xff] }
 0x7d3   :  { %18947 = vmatpush3.msra.mxu0 %v27213_v38  ;;  %18990 = vmatpush3.msra.mxu1 %v27194_v44 }
 0x7d4   :  { %18948 = vmatprep.subr.mxu0 %v27170_v1  ;;  %18991 = vmatprep.subr.mxu1 %v27170_v1 }
 0x7d5   :  { %18949 = vmatpush3.msra.mxu0 %v27214_v32  ;;  %18992 = vmatpush3.msra.mxu1 %v27196_v0  ;;  %v8224_v37 = vpop.f32.mrf.mxu1 }
 0x7d6   :  { %18950 = vmatprep.subr.mxu0 %v27170_v1  ;;  %18993 = vmatprep.subr.mxu1 %v27170_v1  ;;  %v24071_v28 = vadd.f32 %v8224_v37, %v8150_v17  ;;  %v27223_v17 = vld [vmem:[#allocation16_spill] sm:$0xff]  ;;  %v27226_v37 = vld [vmem:[#allocation21_spill] sm:$0xff] }
 0x7d7   :  { %18951 = vmatpush3.msra.mxu0 %v27215_v47  ;;  %18994 = vmatpush3.msra.mxu1 %v27199_v2  ;;  %v18863_v10 = vpop.f32.mrf.mxu1 }
 0x7d8   :  { %18952 = vmatprep.subr.mxu0 %v27170_v1  ;;  %18995 = vmatprep.subr.mxu1 %v27170_v1  ;;  %v27227_v10 = vld [vmem:[#allocation29_spill] sm:$0xff] }
 0x7d9   :  { %18953 = vmatpush3.msra.mxu0 %v27216_v31  ;;  %18996 = vmatpush3.msra.mxu1 %v27201_v43 }
 0x7da   :  { %18954 = vmatprep.subr.mxu0 %v27170_v1  ;;  %18997 = vmatprep.subr.mxu1 %v27170_v1 }
 0x7db   :  { %18955 = vmatpush3.msra.mxu0 %v27217_v29  ;;  %18998 = vmatpush3.msra.mxu1 %v27203_v21 }
 0x7dc   :  { %18956 = vmatprep.subr.mxu0 %v27170_v1  ;;  %18999 = vmatprep.subr.mxu1 %v27170_v1 }
 0x7dd   :  { %18957 = vmatpush3.msra.mxu0 %v27218_v26  ;;  %19000 = vmatpush3.msra.mxu1 %v27205_v3 }
 0x7de   :  { %18958 = vmatprep.subr.mxu0 %v27170_v1  ;;  %19002 = vmatmul.mubr.f32.vlgmr.msra.gmra.mxu1 %v8311_v7  ;;  %v27222_v7 = vld [vmem:[#allocation69_spill] sm:$0xff] }
 0x7df   :  { %19039 = vmatprep.subr.mxu1 %v27170_v1  ;;  %18959 = vmatpush3.msra.mxu0 %v27219_v55 }
 0x7e0   :  { %19040 = vmatpush3.msra.mxu1 %v27175_v30  ;;  %18960 = vmatprep.subr.mxu0 %v27170_v1 }
 0x7e1   :  { %19041 = vmatprep.subr.mxu1 %v27170_v1  ;;  %18961 = vmatpush3.msra.mxu0 %v27220_v50 }
 0x7e2   :  { %19042 = vmatpush3.msra.mxu1 %v27176_v49  ;;  %18962 = vmatprep.subr.mxu0 %v27170_v1 }
 0x7e3   :  { %19043 = vmatprep.subr.mxu1 %v27170_v1  ;;  %18963 = vmatpush3.msra.mxu0 %v27221_v25 }
 0x7e4   :  { %19044 = vmatpush3.msra.mxu1 %v27178_v58  ;;  %18964 = vmatprep.subr.mxu0 %v27170_v1 }
 0x7e5   :  { %19045 = vmatprep.subr.mxu1 %v27170_v1  ;;  %18965 = vmatpush3.msra.mxu0 %v27222_v7 }
 0x7e6   :  { %18966 = vmatprep.mubr.msk.f32.mxu0 %vm20609_vm1, %v27170_v1  ;;  %19046 = vmatpush3.msra.mxu1 %v27180_v11 }
 0x7e7   :  { %18967 = vmatmul.mubr.f32.vlgmr.msra.gmra.mxu0 %v24022_v34  ;;  %19004 = vmatprep.subr.mxu0 %v27170_v1  ;;  %v27225_v34 = vld [vmem:[#allocation20_spill] sm:$0xff] }
 0x7e8   :  { %19047 = vmatprep.subr.mxu1 %v27170_v1  ;;  %19005 = vmatpush3.msra.mxu0 %v27223_v17 }
 0x7e9   :  { %19048 = vmatpush3.msra.mxu1 %v27182_v6  ;;  %19006 = vmatprep.subr.mxu0 %v27170_v1 }
 0x7ea   :  { %19049 = vmatprep.subr.mxu1 %v27170_v1  ;;  %19007 = vmatpush3.msra.mxu0 %v27224_v24 }
 0x7eb   :  { %19050 = vmatpush3.msra.mxu1 %v27184_v19  ;;  %19008 = vmatprep.subr.mxu0 %v27170_v1 }
 0x7ec   :  { %19051 = vmatprep.subr.mxu1 %v27170_v1  ;;  %19009 = vmatpush3.msra.mxu0 %v27225_v34 }
 0x7ed   :  { %19052 = vmatpush3.msra.mxu1 %v27186_v41  ;;  %19010 = vmatprep.subr.mxu0 %v27170_v1 }
 0x7ee   :  { %19053 = vmatprep.subr.mxu1 %v27170_v1  ;;  %19011 = vmatpush3.msra.mxu0 %v27226_v37 }
 0x7ef   :  { %19054 = vmatpush3.msra.mxu1 %v27188_v9  ;;  %19012 = vmatprep.subr.mxu0 %v27170_v1 }
 0x7f0   :  { %19055 = vmatprep.subr.mxu1 %v27170_v1  ;;  %19013 = vmatpush3.msra.mxu0 %v27227_v10 }
 0x7f1   :  { %19056 = vmatpush3.msra.mxu1 %v27190_v27  ;;  %19014 = vmatprep.subr.mxu0 %v27170_v1 }
 0x7f2   :  { %19057 = vmatprep.subr.mxu1 %v27170_v1  ;;  %19015 = vmatpush3.msra.mxu0 %v27228_v40 }
 0x7f3   :  { %19058 = vmatpush3.msra.mxu1 %v27192_v62  ;;  %19016 = vmatprep.subr.mxu0 %v27170_v1 }
 0x7f4   :  { %19059 = vmatprep.subr.mxu1 %v27170_v1  ;;  %19017 = vmatpush3.msra.mxu0 %v27229_v16 }
 0x7f5   :  { %19060 = vmatpush3.msra.mxu1 %v27194_v44  ;;  %19018 = vmatprep.subr.mxu0 %v27170_v1 }
 0x7f6   :  { %19061 = vmatprep.subr.mxu1 %v27170_v1  ;;  %19019 = vmatpush3.msra.mxu0 %v27230_v60 }
 0x7f7   :  { %19062 = vmatpush3.msra.mxu1 %v27196_v0  ;;  %19020 = vmatprep.subr.mxu0 %v27170_v1 }
 0x7f8   :  { %19063 = vmatprep.subr.mxu1 %v27170_v1  ;;  %19021 = vmatpush3.msra.mxu0 %v27231_v5 }
 0x7f9   :  { %19064 = vmatpush3.msra.mxu1 %v27199_v2  ;;  %19022 = vmatprep.subr.mxu0 %v27170_v1 }
 0x7fa   :  { %19065 = vmatprep.subr.mxu1 %v27170_v1  ;;  %19023 = vmatpush3.msra.mxu0 %v27232_v53 }
 0x7fb   :  { %19066 = vmatpush3.msra.mxu1 %v27201_v43  ;;  %19024 = vmatprep.subr.mxu0 %v27170_v1 }
 0x7fc   :  { %19067 = vmatprep.subr.mxu1 %v27170_v1  ;;  %19025 = vmatpush3.msra.mxu0 %v27233_v35  ;;  %v27237_v35 = vld [vmem:[#allocation68_spill] sm:$0xff] }
 0x7fd   :  { %19068 = vmatpush3.msra.mxu1 %v27203_v21  ;;  %19026 = vmatprep.subr.mxu0 %v27170_v1 }
 0x7fe   :  { %19069 = vmatprep.subr.mxu1 %v27170_v1  ;;  %19027 = vmatpush3.msra.mxu0 %v27234_v13  ;;  %v27236_v13 = vld [vmem:[#allocation64_spill] sm:$0xff] }
 0x7ff   :  { %19070 = vmatpush3.msra.mxu1 %v27205_v3  ;;  %19071 = vmatprep.mubr.msk.f32.mxu1 %vm20609_vm1, %v27170_v1 }
 0x800   :  { %19028 = vmatprep.subr.mxu0 %v27170_v1  ;;  %19072 = vmatmul.mubr.f32.vlgmr.msra.gmra.mxu1 %v24019_v45 }
 0x801   :  { %19109 = vmatprep.subr.mxu1 %v27170_v1  ;;  %19029 = vmatpush3.msra.mxu0 %v27235_v33 }
 0x802   :  { %19110 = vmatpush3.msra.mxu1 %v27177_v18  ;;  %19030 = vmatprep.subr.mxu0 %v27170_v1  ;;  %v27238_v18 = vld [vmem:[#allocation71_spill] sm:$0xff] }
 0x803   :  { %19111 = vmatprep.subr.mxu1 %v27170_v1  ;;  %19031 = vmatpush3.msra.mxu0 %v27236_v13 }
 0x804   :  { %19112 = vmatpush3.msra.mxu1 %v27179_v51  ;;  %19032 = vmatprep.subr.mxu0 %v27170_v1  ;;  %v24210_v51 = vand.u32 4294901760, %v24071_v28 }
 0x805   :  { %19113 = vmatprep.subr.mxu1 %v27170_v1  ;;  %19033 = vmatpush3.msra.mxu0 %v27237_v35 }
 0x806   :  { %19114 = vmatpush3.msra.mxu1 %v27181_v8  ;;  %19034 = vmatprep.subr.mxu0 %v27170_v1  ;;  %v24222_v8 = vsub.f32 %v24071_v28, %v24210_v51  ;;  %v15279_v28 = vld [vmem:[%s26748_s3 + $0xf8] sm:$0xff] }
 0x807   :  { %19115 = vmatprep.subr.mxu1 %v27170_v1  ;;  %19035 = vmatpush3.msra.mxu0 %v27238_v18 }
 0x808   :  { %19036 = vmatprep.mubr.msk.f32.mxu0 %vm20609_vm1, %v27170_v1  ;;  %19116 = vmatpush3.msra.mxu1 %v27183_v22  ;;  %v8952_v22 = vand.u32 4294901760, %v24222_v8 }
 0x809   :  { %19037 = vmatmul.mubr.f32.vlgmr.msra.gmra.mxu0 %v24019_v45  ;;  %19074 = vmatprep.subr.mxu0 %v27170_v1 }
 0x80a   :  { %19117 = vmatprep.subr.mxu1 %v27170_v1  ;;  %19075 = vmatpush3.msra.mxu0 %v27175_v30 }
 0x80b   :  { %19118 = vmatpush3.msra.mxu1 %v27185_v54  ;;  %19076 = vmatprep.subr.mxu0 %v27170_v1  ;;  %v8953_v54 = vsub.f32 %v24222_v8, %v8952_v22 }
 0x80c   :  { %19119 = vmatprep.subr.mxu1 %v27170_v1  ;;  %19077 = vmatpush3.msra.mxu0 %v27176_v49 }
 0x80d   :  { %19120 = vmatpush3.msra.mxu1 %v27187_v59  ;;  %19078 = vmatprep.subr.mxu0 %v27170_v1  ;;  %v8954_v59 = vand.u32 4294901760, %v8953_v54 }
 0x80e   :  { %19121 = vmatprep.subr.mxu1 %v27170_v1  ;;  %19079 = vmatpush3.msra.mxu0 %v27178_v58 }
 0x80f   :  { %19122 = vmatpush3.msra.mxu1 %v27189_v46  ;;  %19080 = vmatprep.subr.mxu0 %v27170_v1 }
 0x810   :  { %19123 = vmatprep.subr.mxu1 %v27170_v1  ;;  %19081 = vmatpush3.msra.mxu0 %v27180_v11 }
 0x811   :  { %19124 = vmatpush3.msra.mxu1 %v27191_v23  ;;  %19082 = vmatprep.subr.mxu0 %v27170_v1 }
 0x812   :  { %19125 = vmatprep.subr.mxu1 %v27170_v1  ;;  %19083 = vmatpush3.msra.mxu0 %v27182_v6 }
 0x813   :  { %19126 = vmatpush3.msra.mxu1 %v27193_v52  ;;  %19084 = vmatprep.subr.mxu0 %v27170_v1 }
 0x814   :  { %19127 = vmatprep.subr.mxu1 %v27170_v1  ;;  %19085 = vmatpush3.msra.mxu0 %v27184_v19 }
 0x815   :  { %19128 = vmatpush3.msra.mxu1 %v27195_v4  ;;  %19086 = vmatprep.subr.mxu0 %v27170_v1 }
 0x816   :  { %19129 = vmatprep.subr.mxu1 %v27170_v1  ;;  %19087 = vmatpush3.msra.mxu0 %v27186_v41 }
 0x817   :  { %19130 = vmatpush3.msra.mxu1 %v27197_v61  ;;  %19088 = vmatprep.subr.mxu0 %v27170_v1 }
 0x818   :  { %19131 = vmatprep.subr.mxu1 %v27170_v1  ;;  %19089 = vmatpush3.msra.mxu0 %v27188_v9 }
 0x819   :  { %19132 = vmatpush3.msra.mxu1 %v27198_v15  ;;  %19090 = vmatprep.subr.mxu0 %v27170_v1 }
 0x81a   :  { %19133 = vmatprep.subr.mxu1 %v27170_v1  ;;  %19091 = vmatpush3.msra.mxu0 %v27190_v27 }
 0x81b   :  { %19134 = vmatpush3.msra.mxu1 %v27200_v42  ;;  %19092 = vmatprep.subr.mxu0 %v27170_v1 }
 0x81c   :  { %19135 = vmatprep.subr.mxu1 %v27170_v1  ;;  %19093 = vmatpush3.msra.mxu0 %v27192_v62 }
 0x81d   :  { %19136 = vmatpush3.msra.mxu1 %v27202_v36  ;;  %19094 = vmatprep.subr.mxu0 %v27170_v1 }
 0x81e   :  { %19137 = vmatprep.subr.mxu1 %v27170_v1  ;;  %19095 = vmatpush3.msra.mxu0 %v27194_v44 }
 0x81f   :  { %19138 = vmatpush3.msra.mxu1 %v27204_v63  ;;  %19096 = vmatprep.subr.mxu0 %v27170_v1 }
 0x820   :  { %19139 = vmatprep.subr.mxu1 %v27170_v1  ;;  %19097 = vmatpush3.msra.mxu0 %v27196_v0 }
 0x821   :  { %19140 = vmatpush3.msra.mxu1 %v27206_v14  ;;  %19141 = vmatprep.mubr.msk.f32.mxu1 %vm20609_vm1, %v27170_v1 }
 0x822   :  { %19098 = vmatprep.subr.mxu0 %v27170_v1  ;;  %19142 = vmatmul.mubr.f32.vlgmr.msra.gmra.mxu1 %v24210_v51 }
 0x823   :  { %19179 = vmatprep.subr.mxu1 %v27170_v1  ;;  %19099 = vmatpush3.msra.mxu0 %v27199_v2 }
 0x824   :  { %19180 = vmatpush3.msra.mxu1 %v27175_v30  ;;  %19100 = vmatprep.subr.mxu0 %v27170_v1 }
 0x825   :  { %19181 = vmatprep.subr.mxu1 %v27170_v1  ;;  %19101 = vmatpush3.msra.mxu0 %v27201_v43 }
 0x826   :  { %19182 = vmatpush3.msra.mxu1 %v27176_v49  ;;  %19102 = vmatprep.subr.mxu0 %v27170_v1 }
 0x827   :  { %19183 = vmatprep.subr.mxu1 %v27170_v1  ;;  %19103 = vmatpush3.msra.mxu0 %v27203_v21 }
 0x828   :  { %19184 = vmatpush3.msra.mxu1 %v27178_v58  ;;  %19104 = vmatprep.subr.mxu0 %v27170_v1 }
 0x829   :  { %19185 = vmatprep.subr.mxu1 %v27170_v1  ;;  %19105 = vmatpush3.msra.mxu0 %v27205_v3 }
 0x82a   :  { %19106 = vmatprep.mubr.msk.f32.mxu0 %vm20609_vm1, %v27170_v1  ;;  %19186 = vmatpush3.msra.mxu1 %v27180_v11 }
 0x82b   :  { %19107 = vmatmul.mubr.f32.vlgmr.msra.gmra.mxu0 %v8954_v59  ;;  %19144 = vmatprep.subr.mxu0 %v27170_v1 }
 0x82c   :  { %19187 = vmatprep.subr.mxu1 %v27170_v1  ;;  %19145 = vmatpush3.msra.mxu0 %v27207_v56 }
 0x82d   :  { %19188 = vmatpush3.msra.mxu1 %v27182_v6  ;;  %19146 = vmatprep.subr.mxu0 %v27170_v1 }
 0x82e   :  { %19189 = vmatprep.subr.mxu1 %v27170_v1  ;;  %19147 = vmatpush3.msra.mxu0 %v27208_v48 }
 0x82f   :  { %19190 = vmatpush3.msra.mxu1 %v27184_v19  ;;  %19148 = vmatprep.subr.mxu0 %v27170_v1 }
 0x830   :  { %19191 = vmatprep.subr.mxu1 %v27170_v1  ;;  %19149 = vmatpush3.msra.mxu0 %v27209_v20 }
 0x831   :  { %19192 = vmatpush3.msra.mxu1 %v27186_v41  ;;  %19150 = vmatprep.subr.mxu0 %v27170_v1 }
 0x832   :  { %19193 = vmatprep.subr.mxu1 %v27170_v1  ;;  %19151 = vmatpush3.msra.mxu0 %v27210_v39 }
 0x833   :  { %19194 = vmatpush3.msra.mxu1 %v27188_v9  ;;  %19152 = vmatprep.subr.mxu0 %v27170_v1 }
 0x834   :  { %19195 = vmatprep.subr.mxu1 %v27170_v1  ;;  %19153 = vmatpush3.msra.mxu0 %v27211_v12 }
 0x835   :  { %19196 = vmatpush3.msra.mxu1 %v27190_v27  ;;  %19154 = vmatprep.subr.mxu0 %v27170_v1 }
 0x836   :  { %19197 = vmatprep.subr.mxu1 %v27170_v1  ;;  %19155 = vmatpush3.msra.mxu0 %v27212_v57 }
 0x837   :  { %19198 = vmatpush3.msra.mxu1 %v27192_v62  ;;  %19156 = vmatprep.subr.mxu0 %v27170_v1 }
 0x838   :  { %19199 = vmatprep.subr.mxu1 %v27170_v1  ;;  %19157 = vmatpush3.msra.mxu0 %v27213_v38 }
 0x839   :  { %19200 = vmatpush3.msra.mxu1 %v27194_v44  ;;  %19158 = vmatprep.subr.mxu0 %v27170_v1 }
 0x83a   :  { %19201 = vmatprep.subr.mxu1 %v27170_v1  ;;  %19159 = vmatpush3.msra.mxu0 %v27214_v32 }
 0x83b   :  { %19202 = vmatpush3.msra.mxu1 %v27196_v0  ;;  %19160 = vmatprep.subr.mxu0 %v27170_v1 }
 0x83c   :  { %19203 = vmatprep.subr.mxu1 %v27170_v1  ;;  %19161 = vmatpush3.msra.mxu0 %v27215_v47  ;;  %v27_v47 = vld [vmem:[%s26746_s5 + $0xe] sm:$0x1] }
 0x83d   :  { %19204 = vmatpush3.msra.mxu1 %v27199_v2  ;;  %19162 = vmatprep.subr.mxu0 %v27170_v1 }
 0x83e   :  { %19205 = vmatprep.subr.mxu1 %v27170_v1  ;;  %19163 = vmatpush3.msra.mxu0 %v27216_v31  ;;  %v24407_v31 = vand.u32 4294901760, %v15279_v28 }
 0x83f   :  { %19206 = vmatpush3.msra.mxu1 %v27201_v43  ;;  %19164 = vmatprep.subr.mxu0 %v27170_v1 }
 0x840   :  { %19207 = vmatprep.subr.mxu1 %v27170_v1  ;;  %19165 = vmatpush3.msra.mxu0 %v27217_v29 }
 0x841   :  { %19208 = vmatpush3.msra.mxu1 %v27203_v21  ;;  %19166 = vmatprep.subr.mxu0 %v27170_v1 }
 0x842   :  { %19209 = vmatprep.subr.mxu1 %v27170_v1  ;;  %19167 = vmatpush3.msra.mxu0 %v27218_v26 }
 0x843   :  { %19210 = vmatpush3.msra.mxu1 %v27205_v3  ;;  %19211 = vmatprep.mubr.msk.f32.mxu1 %vm20609_vm1, %v27170_v1 }
 0x844   :  { %19168 = vmatprep.subr.mxu0 %v27170_v1  ;;  %19212 = vmatmul.mubr.f32.vlgmr.msra.gmra.mxu1 %v8952_v22 }
 0x845   :  { %19249 = vmatprep.subr.mxu1 %v27170_v1  ;;  %19169 = vmatpush3.msra.mxu0 %v27219_v55  ;;  %v28_v55 = vld [vmem:[%s26746_s5 + $0xf] sm:$0x1] }
 0x846   :  { %19250 = vmatpush3.msra.mxu1 %v27175_v30  ;;  %19170 = vmatprep.subr.mxu0 %v27170_v1 }
 0x847   :  { %19251 = vmatprep.subr.mxu1 %v27170_v1  ;;  %19171 = vmatpush3.msra.mxu0 %v27220_v50 }
 0x848   :  { %19252 = vmatpush3.msra.mxu1 %v27176_v49  ;;  %19172 = vmatprep.subr.mxu0 %v27170_v1 }
 0x849   :  { %19253 = vmatprep.subr.mxu1 %v27170_v1  ;;  %19173 = vmatpush3.msra.mxu0 %v27221_v25  ;;  %v24413_v25 = vsub.f32 %v15279_v28, %v24407_v31 }
 0x84a   :  { %19254 = vmatpush3.msra.mxu1 %v27178_v58  ;;  %19174 = vmatprep.subr.mxu0 %v27170_v1 }
 0x84b   :  { %19255 = vmatprep.subr.mxu1 %v27170_v1  ;;  %19175 = vmatpush3.msra.mxu0 %v27222_v7 }
 0x84c   :  { %19176 = vmatprep.mubr.msk.f32.mxu0 %vm20609_vm1, %v27170_v1  ;;  %19256 = vmatpush3.msra.mxu1 %v27180_v11 }
 0x84d   :  { %19177 = vmatmul.mubr.f32.vlgmr.msra.gmra.mxu0 %v24222_v8  ;;  %19214 = vmatprep.subr.mxu0 %v27170_v1 }
 0x84e   :  { %19257 = vmatprep.subr.mxu1 %v27170_v1  ;;  %19215 = vmatpush3.msra.mxu0 %v27223_v17 }
 0x84f   :  { %19258 = vmatpush3.msra.mxu1 %v27182_v6  ;;  %19216 = vmatprep.subr.mxu0 %v27170_v1 }
 0x850   :  { %19259 = vmatprep.subr.mxu1 %v27170_v1  ;;  %19217 = vmatpush3.msra.mxu0 %v27224_v24  ;;  %v24416_v24 = vand.u32 4294901760, %v24413_v25 }
 0x851   :  { %19260 = vmatpush3.msra.mxu1 %v27184_v19  ;;  %19218 = vmatprep.subr.mxu0 %v27170_v1 }
 0x852   :  { %19261 = vmatprep.subr.mxu1 %v27170_v1  ;;  %19219 = vmatpush3.msra.mxu0 %v27225_v34 }
 0x853   :  { %19262 = vmatpush3.msra.mxu1 %v27186_v41  ;;  %19220 = vmatprep.subr.mxu0 %v27170_v1 }
 0x854   :  { %19263 = vmatprep.subr.mxu1 %v27170_v1  ;;  %19221 = vmatpush3.msra.mxu0 %v27226_v37 }
 0x855   :  { %19264 = vmatpush3.msra.mxu1 %v27188_v9  ;;  %19222 = vmatprep.subr.mxu0 %v27170_v1 }
 0x856   :  { %19265 = vmatprep.subr.mxu1 %v27170_v1  ;;  %19223 = vmatpush3.msra.mxu0 %v27227_v10 }
 0x857   :  { %19266 = vmatpush3.msra.mxu1 %v27190_v27  ;;  %19224 = vmatprep.subr.mxu0 %v27170_v1 }
 0x858   :  { %19267 = vmatprep.subr.mxu1 %v27170_v1  ;;  %19225 = vmatpush3.msra.mxu0 %v27228_v40 }
 0x859   :  { %19268 = vmatpush3.msra.mxu1 %v27192_v62  ;;  %19226 = vmatprep.subr.mxu0 %v27170_v1 }
 0x85a   :  { %19269 = vmatprep.subr.mxu1 %v27170_v1  ;;  %19227 = vmatpush3.msra.mxu0 %v27229_v16 }
 0x85b   :  { %19270 = vmatpush3.msra.mxu1 %v27194_v44  ;;  %19228 = vmatprep.subr.mxu0 %v27170_v1 }
 0x85c   :  { %19271 = vmatprep.subr.mxu1 %v27170_v1  ;;  %19229 = vmatpush3.msra.mxu0 %v27230_v60  ;;  %v27239_v60 = vld [vmem:[#allocation54_spill] sm:$0xff] }
 0x85d   :  { %19272 = vmatpush3.msra.mxu1 %v27196_v0  ;;  %19230 = vmatprep.subr.mxu0 %v27170_v1 }
 0x85e   :  { %19273 = vmatprep.subr.mxu1 %v27170_v1  ;;  %19231 = vmatpush3.msra.mxu0 %v27231_v5  ;;  %v27240_v5 = vld [vmem:[#allocation56_spill] sm:$0xff] }
 0x85f   :  { %19274 = vmatpush3.msra.mxu1 %v27199_v2  ;;  %19232 = vmatprep.subr.mxu0 %v27170_v1 }
 0x860   :  { %19275 = vmatprep.subr.mxu1 %v27170_v1  ;;  %19233 = vmatpush3.msra.mxu0 %v27232_v53  ;;  %v27241_v53 = vld [vmem:[#allocation78_spill] sm:$0xff] }
 0x861   :  { %19276 = vmatpush3.msra.mxu1 %v27201_v43  ;;  %19234 = vmatprep.subr.mxu0 %v27170_v1 }
 0x862   :  { %19277 = vmatprep.subr.mxu1 %v27170_v1  ;;  %19235 = vmatpush3.msra.mxu0 %v27239_v60  ;;  %v27243_v60 = vld [vmem:[#allocation76_spill] sm:$0xff] }
 0x863   :  { %19278 = vmatpush3.msra.mxu1 %v27203_v21  ;;  %19236 = vmatprep.subr.mxu0 %v27170_v1 }
 0x864   :  { %19279 = vmatprep.subr.mxu1 %v27170_v1  ;;  %19237 = vmatpush3.msra.mxu0 %v27240_v5  ;;  %v27244_v5 = vld [vmem:[#allocation77_spill] sm:$0xff] }
 0x865   :  { %19280 = vmatpush3.msra.mxu1 %v27205_v3  ;;  %19281 = vmatprep.mubr.msk.f32.mxu1 %vm20609_vm1, %v27170_v1 }
 0x866   :  { %19238 = vmatprep.subr.mxu0 %v27170_v1  ;;  %19282 = vmatmul.mubr.f32.vlgmr.msra.gmra.mxu1 %v24210_v51 }
 0x867   :  { %19239 = vmatpush3.msra.mxu0 %v27235_v33  ;;  %19246 = vmatprep.mubr.msk.f32.mxu0 %vm20609_vm1, %v27170_v1 }
 0x868   :  { %19240 = vmatprep.subr.mxu0 %v27170_v1  ;;  %19289 = vmatprep.subr.mxu1 %v27170_v1 }
 0x869   :  { %19241 = vmatpush3.msra.mxu0 %v27236_v13  ;;  %19290 = vmatpush3.msra.mxu1 %v27241_v53  ;;  %v27242_v13 = vld [vmem:[#allocation75_spill] sm:$0xff] }
 0x86a   :  { %19242 = vmatprep.subr.mxu0 %v27170_v1  ;;  %19291 = vmatprep.mubr.msk.f32.mxu1 %vm20609_vm1, %v27170_v1  ;;  %v15278_v53 = vld [vmem:[%s26748_s3 + $0xf0] sm:$0xff] }
 0x86b   :  { %19243 = vmatpush3.msra.mxu0 %v27237_v35  ;;  %19299 = vmatprep.subr.mxu1 %v27170_v1 }
 0x86c   :  { %19244 = vmatprep.subr.mxu0 %v27170_v1 }
 0x86d   :  { %19245 = vmatpush3.msra.mxu0 %v27238_v18  ;;  %v10142_v18 = vsub.f32 %v24413_v25, %v24416_v24 }
 0x86e   :  { %19247 = vmatmul.mubr.f32.vlgmr.msra.gmra.mxu0 %v24210_v51  ;;  %19284 = vmatprep.subr.mxu0 %v27170_v1 }
 0x86f   :  { %19285 = vmatpush3.msra.mxu0 %v27242_v13  ;;  %19286 = vmatprep.mubr.msk.f32.mxu0 %vm20609_vm1, %v27170_v1  ;;  %v10143_v22 = vand.u32 4294901760, %v10142_v18 }
 0x870   :  { %19294 = vmatprep.subr.mxu0 %v27170_v1 }
 0x87e   :  { %v8466_v33 = vpop.f32.mrf.mxu1 }
 0x880   :  { %v18933_v16 = vpop.f32.mrf.mxu1 }
 0x886   :  { %v8315_v35 = vpop.f32.mrf.mxu0 }
 0x887   :  { %v8467_v40 = vadd.f32 %v8466_v33, %v8315_v35  ;;  %v15277_v33 = vld [vmem:[%s26748_s3 + $0xe8] sm:$0xff] }
 0x888   :  { %v18898_v30 = vpop.f32.mrf.mxu0  ;;  %v24449_v35 = vand.u32 4294901760, %v15277_v33 }
 0x89e   :  { %v8659_v49 = vpop.f32.mrf.mxu1 }
 0x8a0   :  { %v19003_v58 = vpop.f32.mrf.mxu1 }
 0x8a7   :  { %v8570_v11 = vpop.f32.mrf.mxu0 }
 0x8a8   :  { %v8571_v6 = vadd.f32 %v8570_v11, %v8467_v40  ;;  %v15276_v40 = vld [vmem:[%s26748_s3 + $0xe0] sm:$0xff]  ;;  %v15275_v11 = vld [vmem:[%s26748_s3 + $0xd8] sm:$0xff] }
 0x8a9   :  { %v18968_v19 = vpop.f32.mrf.mxu0  ;;  %v24462_v58 = vand.u32 4294901760, %v15276_v40 }
 0x8aa   :  { %v8660_v41 = vadd.f32 %v8659_v49, %v8571_v6  ;;  %v24460_v49 = vsub.f32 %v15277_v33, %v24449_v35 }
 0x8ac   :  { %v24472_v19 = vand.u32 4294901760, %v24460_v49 }
 0x8c0   :  { %v8865_v9 = vpop.f32.mrf.mxu1 }
 0x8c2   :  { %v19073_v46 = vpop.f32.mrf.mxu1 }
 0x8c3   :  { %v15274_v46 = vld [vmem:[%s26748_s3 + $0xd0] sm:$0xff] }
 0x8c9   :  { %v8778_v27 = vpop.f32.mrf.mxu0 }
 0x8ca   :  { %v8779_v23 = vadd.f32 %v8778_v27, %v8660_v41  ;;  %v24475_v41 = vsub.f32 %v15276_v40, %v24462_v58  ;;  %v15266_v40 = vld [vmem:[%s26748_s3 + $0x90] sm:$0xff] }
 0x8cb   :  { %v19038_v62 = vpop.f32.mrf.mxu0 }
 0x8cc   :  { %v8866_v52 = vadd.f32 %v8865_v9, %v8779_v23  ;;  %v24477_v9 = vand.u32 4294901760, %v15275_v11  ;;  %v10156_v23 = vsub.f32 %v24460_v49, %v24472_v19  ;;  %v24487_v62 = vand.u32 4294901760, %v24475_v41 }
 0x8ce   :  { %v9510_v56 = vmul.f32 0.001953125, %v8866_v52  ;;  %v24490_v52 = vsub.f32 %v15275_v11, %v24477_v9 }
 0x8d0   :  { %v9512_v12 = vmul.f32 %v9510_v56, %v9510_v56 }
 0x8e2   :  { %v9107_v44 = vpop.f32.mrf.mxu1 }
 0x8e4   :  { %v19143_v4 = vpop.f32.mrf.mxu1 }
 0x8e5   :  { %v15273_v4 = vld [vmem:[%s26748_s3 + $0xc8] sm:$0xff] }
 0x8eb   :  { %v8956_v0 = vpop.f32.mrf.mxu0 }
 0x8ec   :  { %v9108_v21 = vadd.f32 %v9107_v44, %v8956_v0  ;;  %v24493_v44 = vand.u32 4294901760, %v15274_v46  ;;  %v10157_v0 = vand.u32 4294901760, %v10156_v23 }
 0x8ed   :  { %v19108_v61 = vpop.f32.mrf.mxu0 }
 0x8ee   :  { %v10163_v61 = vsub.f32 %v24475_v41, %v24487_v62 }
 0x904   :  { %v9300_v15 = vpop.f32.mrf.mxu1 }
 0x906   :  { %v19213_v2 = vpop.f32.mrf.mxu1 }
 0x907   :  { %v24504_v2 = vand.u32 4294901760, %v15273_v4 }
 0x90d   :  { %v9211_v42 = vpop.f32.mrf.mxu0 }
 0x90e   :  { %v9212_v3 = vadd.f32 %v9211_v42, %v9108_v21  ;;  %v24507_v42 = vsub.f32 %v15274_v46, %v24493_v44 }
 0x90f   :  { %v19178_v43 = vpop.f32.mrf.mxu0 }
 0x910   :  { %v9301_v14 = vadd.f32 %v9300_v15, %v9212_v3  ;;  %v24502_v15 = vand.u32 4294901760, %v24490_v52  ;;  %v15272_v43 = vld [vmem:[%s26748_s3 + $0xc0] sm:$0xff] }
 0x911   :  { %v24518_v3 = vand.u32 4294901760, %v15272_v43 }
 0x912   :  { %v10170_v21 = vsub.f32 %v24490_v52, %v24502_v15 }
 0x926   :  { %v9506_v36 = vpop.f32.mrf.mxu1 }
 0x928   :  { %v19283_v63 = vpop.f32.mrf.mxu1 }
 0x929   :  { %v24516_v63 = vsub.f32 %v15273_v4, %v24504_v2  ;;  %v15265_v4 = vld [vmem:[%s26748_s3 + $0x88] sm:$0xff] }
 0x92e   :  { %v9419_v45 = vpop.f32.mrf.mxu0 }
 0x92f   :  { %v9420_v48 = vadd.f32 %v9419_v45, %v9301_v14  ;;  %v24522_v14 = vand.u32 4294901760, %v24507_v42  ;;  %v15271_v45 = vld [vmem:[%s26748_s3 + $0xb8] sm:$0xff] }
 0x930   :  { %v19248_v20 = vpop.f32.mrf.mxu0 }
 0x931   :  { %v9507_v39 = vadd.f32 %v9506_v36, %v9420_v48  ;;  %v10164_v36 = vand.u32 4294901760, %v10163_v61  ;;  %v24529_v48 = vand.u32 4294901760, %v24516_v63  ;;  %v24532_v20 = vsub.f32 %v15272_v43, %v24518_v3 }
 0x933   :  { %v9511_v57 = vmul.f32 0.001953125, %v9507_v39  ;;  %v24534_v39 = vand.u32 4294901760, %v15271_v45 }
 0x935   :  { %v9513_v38 = vsub.f32 %v9511_v57, %v9512_v12  ;;  %v10177_v12 = vsub.f32 %v24507_v42, %v24522_v14  ;;  %v15270_v57 = vld [vmem:[%s26748_s3 + $0xb0] sm:$0xff]  ;;  %v24549_v28 = vsub.f32 %v15271_v45, %v24534_v39  ;;  %v15264_v45 = vld [vmem:[%s26748_s3 + $0x80] sm:$0xff] }
 0x937   :  { %v9514_v32 = vadd.f32 1e-05, %v9513_v38  ;;  %v10184_v38 = vsub.f32 %v24516_v63, %v24529_v48 }
 0x939   :  { %20587 = vrsqrt.f32 %v9514_v32  ;;  %v24546_v32 = vand.u32 4294901760, %v24532_v20 }
 0x946   :  { %v20588_v29 = vpop.eup %20587 }
 0x947   :  { %v9516_v26 = vmul.f32 %v20588_v29, %v27_v47  ;;  %v24551_v47 = vand.u32 4294901760, %v15270_v57  ;;  %v10178_v29 = vand.u32 4294901760, %v10177_v12 }
 0x949   :  { %v9517_v50 = vmul.f32 %v9516_v26, %v9510_v56  ;;  %v10171_v56 = vand.u32 4294901760, %v10170_v21 }
 0x94b   :  { %v9518_v7 = vsub.f32 %v28_v55, %v9517_v50  ;;  %v10185_v55 = vand.u32 4294901760, %v10184_v38  ;;  %v10191_v50 = vsub.f32 %v24532_v20, %v24546_v32 }
 0x94d   :  { %v9520_v17 = vrot.slane %v9518_v7, 7  ;;  %v24561_v7 = vand.u32 4294901760, %v24549_v28 }
 0x94f   :  { %v9522_v34 = vsel %vm4396_vm3, %v9516_v26, %v9520_v17  ;;  %v15269_v26 = vld [vmem:[%s26748_s3 + $0xa8] sm:$0xff]  ;;  %27245 = vst [vmem:[#allocation5_spill] sm:$0xff] %v24561_v7  ;;  %v24564_v17 = vsub.f32 %v15270_v57, %v24551_v47  ;;  %v10198_v18 = vsub.f32 %v24549_v28, %v24561_v7  ;;  %v27257_v7 = vld [vmem:[#allocation80_spill] sm:$0xff] }
 0x950   :  { %v9524_v37 = vsel %vm4398_vm4, %v9522_v34, 0  ;;  %v24567_v34 = vand.u32 4294901760, %v15269_v26 }
 0x951   :  { %v9592_v10 = vand.u32 4294901760, %v9524_v37 }
 0x953   :  { %v9593_v51 = vsub.f32 %v9524_v37, %v9592_v10  ;;  %19292 = vmatmul.mubr.f32.vlgmr.msra.gmra.mxu1 %v9592_v10  ;;  %v15268_v37 = vld [vmem:[%s26748_s3 + $0xa0] sm:$0xff] }
 0x954   :  { %19300 = vmatpush3.msra.mxu1 %v27242_v13  ;;  %19301 = vmatprep.mubr.msk.f32.mxu1 %vm20609_vm1, %v27170_v1 }
 0x955   :  { %v9594_v8 = vand.u32 4294901760, %v9593_v51  ;;  %19309 = vmatprep.subr.mxu1 %v27170_v1 }
 0x957   :  { %19302 = vmatmul.mubr.f32.vlgmr.msra.gmra.mxu1 %v9594_v8  ;;  %v9595_v54 = vsub.f32 %v9593_v51, %v9594_v8  ;;  %v24578_v8 = vand.u32 4294901760, %v15268_v37 }
 0x958   :  { %19310 = vmatpush3.msra.mxu1 %v27242_v13  ;;  %19311 = vmatprep.mubr.msk.f32.mxu1 %vm20609_vm1, %v27170_v1  ;;  %v24441_v13 = vand.u32 4294901760, %v15278_v53 }
 0x959   :  { %v9596_v59 = vand.u32 4294901760, %v9595_v54  ;;  %19352 = vmatprep.subr.mxu1 %v10143_v22  ;;  %v15267_v54 = vld [vmem:[%s26748_s3 + $0x98] sm:$0xff] }
 0x95a   :  { %v24447_v16 = vsub.f32 %v15278_v53, %v24441_v13  ;;  %v24593_v53 = vand.u32 4294901760, %v15267_v54 }
 0x95b   :  { %19287 = vmatmul.mubr.f32.vlgmr.msra.gmra.mxu0 %v9596_v59  ;;  %19312 = vmatmul.mubr.f32.vlgmr.msra.gmra.mxu1 %v9592_v10  ;;  %v10199_v59 = vand.u32 4294901760, %v10198_v18 }
 0x95c   :  { %19295 = vmatpush3.msra.mxu0 %v27243_v60  ;;  %19296 = vmatprep.mubr.msk.f32.mxu0 %vm20609_vm1, %v27170_v1  ;;  %v24457_v30 = vand.u32 4294901760, %v24447_v16  ;;  %v24607_v46 = vsub.f32 %v15267_v54, %v24593_v53 }
 0x95d   :  { %19304 = vmatprep.subr.mxu0 %v27170_v1  ;;  %19353 = vmatpush3.msra.mxu1 %v10143_v22  ;;  %v24582_v22 = vsub.f32 %v15269_v26, %v24567_v34 }
 0x95e   :  { %v10149_v6 = vsub.f32 %v24447_v16, %v24457_v30  ;;  %v24621_v61 = vand.u32 4294901760, %v24607_v46 }
 0x95f   :  { %19297 = vmatmul.mubr.f32.vlgmr.msra.gmra.mxu0 %v9593_v51  ;;  %v24576_v51 = vand.u32 4294901760, %v24564_v17  ;;  %v24597_v33 = vand.u32 4294901760, %v24582_v22 }
 0x960   :  { %19305 = vmatpush3.msra.mxu0 %v27244_v5  ;;  %19306 = vmatprep.mubr.msk.f32.mxu0 %vm20609_vm1, %v27170_v1  ;;  %v10150_v27 = vand.u32 4294901760, %v10149_v6  ;;  %v24591_v5 = vsub.f32 %v15268_v37, %v24578_v8  ;;  %27249 = vst [vmem:[#allocation9_spill] sm:$0xff] %v24621_v61  ;;  %v10226_v12 = vsub.f32 %v24607_v46, %v24621_v61  ;;  %v27254_v61 = vld [vmem:[#allocation86_spill] sm:$0xff] }
 0x961   :  { %19314 = vmatprep.subr.mxu0 %v24407_v31  ;;  %27246 = vst [vmem:[#allocation3_spill] sm:$0xff] %v24576_v51  ;;  %v10205_v60 = vsub.f32 %v24564_v17, %v24576_v51  ;;  %27247 = vst [vmem:[#allocation7_spill] sm:$0xff] %v24597_v33  ;;  %v10212_v23 = vsub.f32 %v24582_v22, %v24597_v33 }
 0x962   :  { %19354 = vmatprep.subr.mxu1 %v10150_v27  ;;  %v24604_v6 = vand.u32 4294901760, %v24591_v5  ;;  %v10227_v26 = vand.u32 4294901760, %v10226_v12 }
 0x963   :  { %19307 = vmatmul.mubr.f32.vlgmr.msra.gmra.mxu0 %v9592_v10  ;;  %19355 = vmatpush3.msra.mxu1 %v10150_v27  ;;  %v10192_v10 = vand.u32 4294901760, %v10191_v50  ;;  %v10206_v11 = vand.u32 4294901760, %v10205_v60  ;;  %v24609_v27 = vand.u32 4294901760, %v15266_v40  ;;  %v10213_v21 = vand.u32 4294901760, %v10212_v23 }
 0x964   :  { %19315 = vmatpush3.msra.mxu0 %v24407_v31  ;;  %19356 = vmatprep.subr.mxu1 %v10157_v0  ;;  %27248 = vst [vmem:[#allocation81_spill] sm:$0xff] %v24604_v6 }
 0x965   :  { %19316 = vmatprep.subr.mxu0 %v24441_v13  ;;  %19357 = vmatpush3.msra.mxu1 %v10157_v0  ;;  %v10219_v0 = vsub.f32 %v24591_v5, %v24604_v6  ;;  %v24624_v43 = vsub.f32 %v15266_v40, %v24609_v27 }
 0x966   :  { %19317 = vmatpush3.msra.mxu0 %v24441_v13  ;;  %19358 = vmatprep.subr.mxu1 %v10164_v36 }
 0x967   :  { %19318 = vmatprep.subr.mxu0 %v24449_v35  ;;  %19359 = vmatpush3.msra.mxu1 %v10164_v36  ;;  %v24626_v36 = vand.u32 4294901760, %v15265_v4  ;;  %v24636_v57 = vand.u32 4294901760, %v24624_v43 }
 0x968   :  { %19319 = vmatpush3.msra.mxu0 %v24449_v35  ;;  %19360 = vmatprep.subr.mxu1 %v10171_v56 }
 0x969   :  { %19320 = vmatprep.subr.mxu0 %v24462_v58  ;;  %19361 = vmatpush3.msra.mxu1 %v10171_v56  ;;  %v10220_v56 = vand.u32 4294901760, %v10219_v0  ;;  %27250 = vst [vmem:[#allocation79_spill] sm:$0xff] %v24636_v57  ;;  %v24639_v38 = vsub.f32 %v15265_v4, %v24626_v36 }
 0x96a   :  { %19321 = vmatpush3.msra.mxu0 %v24462_v58  ;;  %19362 = vmatprep.subr.mxu1 %v10178_v29 }
 0x96b   :  { %19322 = vmatprep.subr.mxu0 %v24477_v9  ;;  %19363 = vmatpush3.msra.mxu1 %v10178_v29  ;;  %v24642_v29 = vand.u32 4294901760, %v15264_v45  ;;  %v24648_v50 = vand.u32 4294901760, %v24639_v38 }
 0x96c   :  { %19323 = vmatpush3.msra.mxu0 %v24477_v9  ;;  %19364 = vmatprep.subr.mxu1 %v10185_v55 }
 0x96d   :  { %19324 = vmatprep.subr.mxu0 %v24493_v44  ;;  %19365 = vmatpush3.msra.mxu1 %v10185_v55  ;;  %v10233_v55 = vsub.f32 %v24624_v43, %v24636_v57  ;;  %27251 = vst [vmem:[#allocation11_spill] sm:$0xff] %v24648_v50  ;;  %v24652_v37 = vsub.f32 %v15264_v45, %v24642_v29 }
 0x96e   :  { %19325 = vmatpush3.msra.mxu0 %v24493_v44  ;;  %19366 = vmatprep.subr.mxu1 %v10192_v10  ;;  %v10240_v18 = vsub.f32 %v24639_v38, %v24648_v50 }
 0x96f   :  { %19326 = vmatprep.subr.mxu0 %v24504_v2  ;;  %19367 = vmatpush3.msra.mxu1 %v10192_v10  ;;  %v10234_v10 = vand.u32 4294901760, %v10233_v55  ;;  %v24659_v54 = vand.u32 4294901760, %v24652_v37 }
 0x970   :  { %19327 = vmatpush3.msra.mxu0 %v24504_v2  ;;  %19368 = vmatprep.subr.mxu1 %v10199_v59 }
 0x971   :  { %19328 = vmatprep.subr.mxu0 %v24518_v3  ;;  %19369 = vmatpush3.msra.mxu1 %v10199_v59  ;;  %27252 = vst [vmem:[#allocation10_spill] sm:$0xff] %v24659_v54  ;;  %v10241_v59 = vand.u32 4294901760, %v10240_v18  ;;  %v10247_v60 = vsub.f32 %v24652_v37, %v24659_v54 }
 0x972   :  { %19329 = vmatpush3.msra.mxu0 %v24518_v3  ;;  %19370 = vmatprep.subr.mxu1 %v10206_v11 }
 0x973   :  { %19330 = vmatprep.subr.mxu0 %v24534_v39  ;;  %19371 = vmatpush3.msra.mxu1 %v10206_v11  ;;  %v10248_v40 = vand.u32 4294901760, %v10247_v60 }
 0x974   :  { %19331 = vmatpush3.msra.mxu0 %v24534_v39  ;;  %19372 = vmatprep.subr.mxu1 %v10213_v21 }
 0x975   :  { %19332 = vmatprep.subr.mxu0 %v24551_v47  ;;  %19373 = vmatpush3.msra.mxu1 %v10213_v21 }
 0x976   :  { %19333 = vmatpush3.msra.mxu0 %v24551_v47  ;;  %19374 = vmatprep.subr.mxu1 %v10220_v56 }
 0x977   :  { %19334 = vmatprep.subr.mxu0 %v24567_v34  ;;  %19375 = vmatpush3.msra.mxu1 %v10220_v56 }
 0x978   :  { %19335 = vmatpush3.msra.mxu0 %v24567_v34  ;;  %19376 = vmatprep.subr.mxu1 %v10227_v26 }
 0x979   :  { %19336 = vmatprep.subr.mxu0 %v24578_v8  ;;  %19377 = vmatpush3.msra.mxu1 %v10227_v26 }
 0x97a   :  { %19337 = vmatpush3.msra.mxu0 %v24578_v8  ;;  %19378 = vmatprep.subr.mxu1 %v10234_v10 }
 0x97b   :  { %19338 = vmatprep.subr.mxu0 %v24593_v53  ;;  %19379 = vmatpush3.msra.mxu1 %v10234_v10 }
 0x97c   :  { %19339 = vmatpush3.msra.mxu0 %v24593_v53  ;;  %19380 = vmatprep.subr.mxu1 %v10241_v59 }
 0x97d   :  { %19340 = vmatprep.subr.mxu0 %v24609_v27  ;;  %19381 = vmatpush3.msra.mxu1 %v10241_v59 }
 0x97e   :  { %19341 = vmatpush3.msra.mxu0 %v24609_v27  ;;  %19382 = vmatprep.subr.mxu1 %v10248_v40 }
 0x97f   :  { %19342 = vmatprep.subr.mxu0 %v24626_v36  ;;  %19383 = vmatpush3.msra.mxu1 %v10248_v40  ;;  %v27253_v40 = vld [vmem:[#allocation85_spill] sm:$0xff] }
 0x980   :  { %19343 = vmatpush3.msra.mxu0 %v24626_v36  ;;  %19428 = vmatprep.subr.mxu1 %v24407_v31 }
 0x981   :  { %19344 = vmatprep.subr.mxu0 %v24642_v29 }
 0x982   :  { %19345 = vmatpush3.msra.mxu0 %v24642_v29 }
 0x983   :  { %19390 = vmatprep.subr.mxu0 %v24413_v25 }
 0xa13   :  { %v9674_v11 = vpop.f32.mrf.mxu1 }
 0xa15   :  { %v19293_v23 = vpop.f32.mrf.mxu1 }
 0xa16   :  { %v27255_v23 = vld [vmem:[#allocation83_spill] sm:$0xff] }
 0xa17   :  { %v9822_v4 = vpop.f32.mrf.mxu1 }
 0xa19   :  { %v19303_v0 = vpop.f32.mrf.mxu1 }
 0xa1a   :  { %v27256_v0 = vld [vmem:[#allocation82_spill] sm:$0xff] }
 0xa1b   :  { %v9598_v21 = vpop.f32.mrf.mxu0  ;;  %v9968_v45 = vpop.f32.mrf.mxu1 }
 0xa1c   :  { %v9675_v26 = vadd.f32 %v9674_v11, %v9598_v21 }
 0xa1d   :  { %v19288_v56 = vpop.f32.mrf.mxu0  ;;  %v19313_v12 = vpop.f32.mrf.mxu1 }
 0xa1e   :  { %v27258_v12 = vld [vmem:[#allocation84_spill] sm:$0xff] }
 0xa1f   :  { %v9748_v55 = vpop.f32.mrf.mxu0 }
 0xa20   :  { %v9749_v18 = vadd.f32 %v9748_v55, %v9675_v26 }
 0xa21   :  { %v19298_v1 = vpop.f32.mrf.mxu0 }
 0xa22   :  { %v9823_v10 = vadd.f32 %v9822_v4, %v9749_v18 }
 0xa23   :  { %v9896_v54 = vpop.f32.mrf.mxu0 }
 0xa24   :  { %v9897_v60 = vadd.f32 %v9896_v54, %v9823_v10 }
 0xa25   :  { %v19308_v59 = vpop.f32.mrf.mxu0 }
 0xa26   :  { %v9969_v50 = vadd.f32 %v9968_v45, %v9897_v60 }
 0xa28   :  { %v9975_v57 = vrot.slane %v9969_v50, %v27253_v40  ;;  %v9983_v6 = vrot.slane %v9969_v50, %v27254_v61 }
 0xa2a   :  { %v9976_v33 = vmul.f32 %v9975_v57, %v27255_v23  ;;  %v9977_v51 = vmul.f32 %v9975_v57, %v27256_v0  ;;  %v9978_v56 = vmul.f32 %v9975_v57, %v27257_v7  ;;  %v9979_v11 = vmul.f32 %v9975_v57, %v27258_v12 }
 0xa2c   :  { %v9984_v21 = vadd.f32 %v9983_v6, %v9976_v33  ;;  %v9985_v26 = vadd.f32 %v9983_v6, %v9977_v51  ;;  %v9986_v1 = vadd.f32 %v9983_v6, %v9978_v56  ;;  %v9987_v4 = vadd.f32 %v9983_v6, %v9979_v11 }
 0xa2e   :  { %v9988_v55 = vmax.f32 %v9984_v21, 0.0  ;;  %v9989_v54 = vmax.f32 %v9985_v26, 0.0  ;;  %v9990_v18 = vmax.f32 %v9986_v1, 0.0  ;;  %v9991_v45 = vmax.f32 %v9987_v4, 0.0 }
 0xa30   :  { %9992 = vst [vmem:[#allocation2 + $0x1] sm:$0xff] %v9988_v55  ;;  %9993 = vst [vmem:[#allocation2 + $0x9] sm:$0xff] %v9989_v54  ;;  %v24671_v50 = vand.u32 4294901760, %v9988_v55  ;;  %v24673_v10 = vand.u32 4294901760, %v9989_v54  ;;  %v24675_v60 = vand.u32 4294901760, %v9990_v18  ;;  %v24677_v7 = vand.u32 4294901760, %v9991_v45 }
 0xa31   :  { %9994 = vst [vmem:[#allocation2 + $0x19] sm:$0xff] %v9990_v18  ;;  %9995 = vst [vmem:[#allocation2 + $0x21] sm:$0xff] %v9991_v45 }
 0xa32   :  { %27259 = vst [vmem:[#allocation22_spill] sm:$0xff] %v24673_v10  ;;  %27260 = vst [vmem:[#allocation13_spill] sm:$0xff] %v24675_v60  ;;  %v24680_v51 = vsub.f32 %v9989_v54, %v24673_v10  ;;  %19384 = vmatprep.mubr.f32.mxu1 %v24671_v50  ;;  %v24684_v33 = vsub.f32 %v9988_v55, %v24671_v50  ;;  %v24687_v6 = vsub.f32 %v9990_v18, %v24675_v60  ;;  %v27278_v18 = vld [vmem:[#allocation9_spill] sm:$0xff] }
 0xa33   :  { %27261 = vst [vmem:[#allocation23_spill] sm:$0xff] %v24677_v7  ;;  %v24690_v57 = vsub.f32 %v9991_v45, %v24677_v7  ;;  %19385 = vmatmul.mubr.f32.vlgmr.msra.gmra.mxu1 %v24673_v10 }
 0xa34   :  { %27262 = vst [vmem:[#allocation15_spill] sm:$0xff] %v24680_v51  ;;  %27263 = vst [vmem:[#allocation24_spill] sm:$0xff] %v24684_v33  ;;  %19429 = vmatpush3.msra.mxu1 %v24407_v31  ;;  %19387 = vmatprep.mubr.f32.mxu1 %v24675_v60  ;;  %v24696_v59 = vand.u32 4294901760, %v24684_v33  ;;  %v24699_v23 = vand.u32 4294901760, %v24680_v51  ;;  %v24702_v0 = vand.u32 4294901760, %v24687_v6 }
 0xa35   :  { %27264 = vst [vmem:[#allocation26_spill] sm:$0xff] %v24687_v6  ;;  %27265 = vst [vmem:[#allocation25_spill] sm:$0xff] %v24690_v57  ;;  %19430 = vmatprep.subr.mxu1 %v24441_v13  ;;  %v24711_v11 = vand.u32 4294901760, %v24690_v57 }
 0xa36   :  { %27266 = vst [vmem:[#allocation28_spill] sm:$0xff] %v24696_v59  ;;  %27267 = vst [vmem:[#allocation33_spill] sm:$0xff] %v24699_v23  ;;  %19431 = vmatpush3.msra.mxu1 %v24441_v13  ;;  %v10101_v56 = vsub.f32 %v24684_v33, %v24696_v59  ;;  %v10111_v12 = vsub.f32 %v24680_v51, %v24699_v23  ;;  %v10121_v21 = vsub.f32 %v24687_v6, %v24702_v0 }
 0xa37   :  { %27268 = vst [vmem:[#allocation32_spill] sm:$0xff] %v24702_v0  ;;  %27269 = vst [vmem:[#allocation36_spill] sm:$0xff] %v24711_v11  ;;  %19432 = vmatprep.subr.mxu1 %v24449_v35  ;;  %19388 = vmatmul.mubr.f32.gmra.mxu1 %v24677_v7  ;;  %v10131_v4 = vsub.f32 %v24690_v57, %v24711_v11 }
 0xa38   :  { %19433 = vmatpush3.msra.mxu1 %v24449_v35  ;;  %19460 = vmatprep.mubr.f32.mxu1 %v24696_v59  ;;  %v24719_v26 = vand.u32 4294901760, %v10101_v56  ;;  %v24721_v1 = vand.u32 4294901760, %v10111_v12  ;;  %v24730_v55 = vand.u32 4294901760, %v10121_v21  ;;  %v9997_v59 = vld [vmem:[#allocation2 + $0xa] sm:$0xff] }
 0xa39   :  { %19434 = vmatprep.subr.mxu1 %v24462_v58  ;;  %v24738_v54 = vand.u32 4294901760, %v10131_v4 }
 0xa3a   :  { %27270 = vst [vmem:[#allocation35_spill] sm:$0xff] %v24719_v26  ;;  %27271 = vst [vmem:[#allocation43_spill] sm:$0xff] %v24721_v1  ;;  %19435 = vmatpush3.msra.mxu1 %v24462_v58  ;;  %19346 = vmatprep.mubr.f32.mxu0 %v24719_v26 }
 0xa3b   :  { %19436 = vmatprep.subr.mxu1 %v24477_v9  ;;  %19347 = vmatmul.mubr.f32.vlgmr.msra.gmra.mxu0 %v24721_v1  ;;  %27272 = vst [vmem:[#allocation39_spill] sm:$0xff] %v24730_v55  ;;  %27273 = vst [vmem:[#allocation47_spill] sm:$0xff] %v24738_v54 }
 0xa3c   :  { %19391 = vmatpush3.msra.mxu0 %v24413_v25  ;;  %19437 = vmatpush3.msra.mxu1 %v24477_v9 }
 0xa3d   :  { %19349 = vmatprep.mubr.f32.mxu0 %v24730_v55  ;;  %19392 = vmatprep.subr.mxu0 %v24447_v16 }
 0xa3e   :  { %19438 = vmatprep.subr.mxu1 %v24493_v44  ;;  %19393 = vmatpush3.msra.mxu0 %v24447_v16 }
 0xa3f   :  { %19439 = vmatpush3.msra.mxu1 %v24493_v44  ;;  %19394 = vmatprep.subr.mxu0 %v24460_v49 }
 0xa40   :  { %19440 = vmatprep.subr.mxu1 %v24504_v2  ;;  %19350 = vmatmul.mubr.f32.gmra.mxu0 %v24738_v54 }
 0xa41   :  { %19395 = vmatpush3.msra.mxu0 %v24460_v49  ;;  %19441 = vmatpush3.msra.mxu1 %v24504_v2  ;;  %v10816_v49 = vld [vmem:[%s26748_s3 + $0x60] sm:$0xff] }
 0xa42   :  { %19396 = vmatprep.subr.mxu0 %v24475_v41  ;;  %19422 = vmatprep.mubr.f32.mxu0 %v24684_v33 }
 0xa43   :  { %19442 = vmatprep.subr.mxu1 %v24518_v3  ;;  %19397 = vmatpush3.msra.mxu0 %v24475_v41 }
 0xa44   :  { %19443 = vmatpush3.msra.mxu1 %v24518_v3  ;;  %19398 = vmatprep.subr.mxu0 %v24490_v52 }
 0xa45   :  { %19444 = vmatprep.subr.mxu1 %v24534_v39  ;;  %19399 = vmatpush3.msra.mxu0 %v24490_v52 }
 0xa46   :  { %19445 = vmatpush3.msra.mxu1 %v24534_v39  ;;  %19400 = vmatprep.subr.mxu0 %v24507_v42 }
 0xa47   :  { %19446 = vmatprep.subr.mxu1 %v24551_v47  ;;  %19401 = vmatpush3.msra.mxu0 %v24507_v42 }
 0xa48   :  { %19447 = vmatpush3.msra.mxu1 %v24551_v47  ;;  %19402 = vmatprep.subr.mxu0 %v24516_v63 }
 0xa49   :  { %19448 = vmatprep.subr.mxu1 %v24567_v34  ;;  %19403 = vmatpush3.msra.mxu0 %v24516_v63 }
 0xa4a   :  { %19449 = vmatpush3.msra.mxu1 %v24567_v34  ;;  %19404 = vmatprep.subr.mxu0 %v24532_v20 }
 0xa4b   :  { %19450 = vmatprep.subr.mxu1 %v24578_v8  ;;  %19405 = vmatpush3.msra.mxu0 %v24532_v20 }
 0xa4c   :  { %19451 = vmatpush3.msra.mxu1 %v24578_v8  ;;  %19406 = vmatprep.subr.mxu0 %v24549_v28 }
 0xa4d   :  { %19452 = vmatprep.subr.mxu1 %v24593_v53  ;;  %19407 = vmatpush3.msra.mxu0 %v24549_v28  ;;  %v27276_v28 = vld [vmem:[#allocation7_spill] sm:$0xff] }
 0xa4e   :  { %19453 = vmatpush3.msra.mxu1 %v24593_v53  ;;  %19408 = vmatprep.subr.mxu0 %v24564_v17 }
 0xa4f   :  { %19454 = vmatprep.subr.mxu1 %v24609_v27  ;;  %19409 = vmatpush3.msra.mxu0 %v24564_v17  ;;  %v9996_v17 = vld [vmem:[#allocation2 + $0x2] sm:$0xff] }
 0xa50   :  { %19455 = vmatpush3.msra.mxu1 %v24609_v27  ;;  %19410 = vmatprep.subr.mxu0 %v24582_v22 }
 0xa51   :  { %19456 = vmatprep.subr.mxu1 %v24626_v36  ;;  %19411 = vmatpush3.msra.mxu0 %v24582_v22 }
 0xa52   :  { %19457 = vmatpush3.msra.mxu1 %v24626_v36  ;;  %19412 = vmatprep.subr.mxu0 %v24591_v5 }
 0xa53   :  { %19458 = vmatprep.subr.mxu1 %v24642_v29  ;;  %19413 = vmatpush3.msra.mxu0 %v24591_v5  ;;  %v27277_v5 = vld [vmem:[#allocation81_spill] sm:$0xff] }
 0xa54   :  { %19459 = vmatpush3.msra.mxu1 %v24642_v29  ;;  %19414 = vmatprep.subr.mxu0 %v24607_v46 }
 0xa55   :  { %19461 = vmatmul.mubr.f32.vlgmr.msra.gmra.mxu1 %v24699_v23  ;;  %19504 = vmatprep.subr.mxu1 %v24407_v31 }
 0xa56   :  { %19415 = vmatpush3.msra.mxu0 %v24607_v46  ;;  %19463 = vmatprep.mubr.f32.mxu1 %v24702_v0 }
 0xa57   :  { %19505 = vmatpush3.msra.mxu1 %v24407_v31  ;;  %19416 = vmatprep.subr.mxu0 %v24624_v43  ;;  %v10819_v31 = vld [vmem:[%s26748_s3 + $0x78] sm:$0xff] }
 0xa58   :  { %19506 = vmatprep.subr.mxu1 %v24441_v13  ;;  %19417 = vmatpush3.msra.mxu0 %v24624_v43  ;;  %v24821_v25 = vand.u32 4294901760, %v10819_v31  ;;  %v10811_v43 = vld [vmem:[%s26748_s3 + $0x38] sm:$0xff] }
 0xa59   :  { %19507 = vmatpush3.msra.mxu1 %v24441_v13  ;;  %19418 = vmatprep.subr.mxu0 %v24639_v38  ;;  %v10817_v13 = vld [vmem:[%s26748_s3 + $0x68] sm:$0xff]  ;;  %v24949_v21 = vand.u32 4294901760, %v10811_v43 }
 0xa5a   :  { %19464 = vmatmul.mubr.f32.gmra.mxu1 %v24711_v11  ;;  %19508 = vmatprep.subr.mxu1 %v24449_v35 }
 0xa5b   :  { %19419 = vmatpush3.msra.mxu0 %v24639_v38  ;;  %19509 = vmatpush3.msra.mxu1 %v24449_v35  ;;  %v24840_v35 = vsub.f32 %v10819_v31, %v24821_v25  ;;  %v24933_v38 = vand.u32 4294901760, %v9996_v17 }
 0xa5c   :  { %19536 = vmatprep.mubr.f32.mxu1 %v24671_v50  ;;  %19420 = vmatprep.subr.mxu0 %v24652_v37 }
 0xa5d   :  { %19510 = vmatprep.subr.mxu1 %v24462_v58  ;;  %19421 = vmatpush3.msra.mxu0 %v24652_v37  ;;  %v24862_v41 = vand.u32 4294901760, %v24840_v35  ;;  %v10810_v37 = vld [vmem:[%s26748_s3 + $0x30] sm:$0xff] }
 0xa5e   :  { %19511 = vmatpush3.msra.mxu1 %v24462_v58  ;;  %19423 = vmatmul.mubr.f32.vlgmr.msra.gmra.mxu0 %v24680_v51 }
 0xa5f   :  { %19466 = vmatprep.subr.mxu0 %v24416_v24  ;;  %19512 = vmatprep.subr.mxu1 %v24477_v9  ;;  %v10945_v42 = vsub.f32 %v24840_v35, %v24862_v41 }
 0xa60   :  { %19425 = vmatprep.mubr.f32.mxu0 %v24687_v6  ;;  %19467 = vmatpush3.msra.mxu0 %v24416_v24  ;;  %v10818_v24 = vld [vmem:[%s26748_s3 + $0x70] sm:$0xff]  ;;  %v10804_v6 = vld [vmem:[%s26748_s3] sm:$0xff] }
 0xa61   :  { %19513 = vmatpush3.msra.mxu1 %v24477_v9  ;;  %19468 = vmatprep.subr.mxu0 %v24457_v30  ;;  %v24835_v16 = vand.u32 4294901760, %v10818_v24  ;;  %v24864_v9 = vand.u32 4294901760, %v10816_v49 }
 0xa62   :  { %19514 = vmatprep.subr.mxu1 %v24493_v44  ;;  %19469 = vmatpush3.msra.mxu0 %v24457_v30  ;;  %v24844_v30 = vand.u32 4294901760, %v10817_v13 }
 0xa63   :  { %19515 = vmatpush3.msra.mxu1 %v24493_v44  ;;  %19426 = vmatmul.mubr.f32.gmra.mxu0 %v24690_v57  ;;  %v24854_v58 = vsub.f32 %v10818_v24, %v24835_v16  ;;  %v10814_v44 = vld [vmem:[%s26748_s3 + $0x50] sm:$0xff]  ;;  %v24888_v63 = vsub.f32 %v10816_v49, %v24864_v9  ;;  %v24959_v24 = vand.u32 4294901760, %v10810_v37 }
 0xa64   :  { %19470 = vmatprep.subr.mxu0 %v24472_v19  ;;  %19516 = vmatprep.subr.mxu1 %v24504_v2  ;;  %v24898_v20 = vand.u32 4294901760, %v10814_v44  ;;  %v27279_v49 = vld [vmem:[#allocation79_spill] sm:$0xff] }
 0xa65   :  { %19471 = vmatpush3.msra.mxu0 %v24472_v19  ;;  %19498 = vmatprep.mubr.f32.mxu0 %v24671_v50  ;;  %v10815_v19 = vld [vmem:[%s26748_s3 + $0x58] sm:$0xff]  ;;  %v24917_v22 = vand.u32 4294901760, %v24888_v63 }
 0xa66   :  { %19517 = vmatpush3.msra.mxu1 %v24504_v2  ;;  %19472 = vmatprep.subr.mxu0 %v24487_v62  ;;  %v24873_v52 = vand.u32 4294901760, %v10815_v19  ;;  %v24881_v2 = vand.u32 4294901760, %v24854_v58  ;;  %v24924_v46 = vsub.f32 %v10814_v44, %v24898_v20  ;;  %v24968_v44 = vsub.f32 %v9996_v17, %v24933_v38 }
 0xa67   :  { %19518 = vmatprep.subr.mxu1 %v24518_v3  ;;  %19473 = vmatpush3.msra.mxu0 %v24487_v62  ;;  %v24869_v62 = vsub.f32 %v10817_v13, %v24844_v30  ;;  %v10966_v12 = vsub.f32 %v24888_v63, %v24917_v22  ;;  %v10809_v13 = vld [vmem:[%s26748_s3 + $0x28] sm:$0xff] }
 0xa68   :  { %19519 = vmatpush3.msra.mxu1 %v24518_v3  ;;  %19474 = vmatprep.subr.mxu0 %v24502_v15  ;;  %v10813_v3 = vld [vmem:[%s26748_s3 + $0x48] sm:$0xff] }
 0xa69   :  { %19520 = vmatprep.subr.mxu1 %v24534_v39  ;;  %19475 = vmatpush3.msra.mxu0 %v24502_v15  ;;  %v27274_v15 = vld [vmem:[#allocation5_spill] sm:$0xff] }
 0xa6a   :  { %19521 = vmatpush3.msra.mxu1 %v24534_v39  ;;  %19476 = vmatprep.subr.mxu0 %v24522_v14  ;;  %v24903_v39 = vsub.f32 %v10815_v19, %v24873_v52 }
 0xa6b   :  { %19522 = vmatprep.subr.mxu1 %v24551_v47  ;;  %19477 = vmatpush3.msra.mxu0 %v24522_v14  ;;  %v27275_v14 = vld [vmem:[#allocation3_spill] sm:$0xff] }
 0xa6c   :  { %19523 = vmatpush3.msra.mxu1 %v24551_v47  ;;  %19478 = vmatprep.subr.mxu0 %v24529_v48  ;;  %v10952_v47 = vsub.f32 %v24854_v58, %v24881_v2 }
 0xa6d   :  { %19524 = vmatprep.subr.mxu1 %v24567_v34  ;;  %19479 = vmatpush3.msra.mxu0 %v24529_v48  ;;  %v24896_v48 = vand.u32 4294901760, %v24869_v62 }
 0xa6e   :  { %19525 = vmatpush3.msra.mxu1 %v24567_v34  ;;  %19480 = vmatprep.subr.mxu0 %v24546_v32  ;;  %v24912_v34 = vand.u32 4294901760, %v10813_v3  ;;  %v10953_v45 = vand.u32 4294901760, %v10952_v47 }
 0xa6f   :  { %19526 = vmatprep.subr.mxu1 %v24578_v8  ;;  %19481 = vmatpush3.msra.mxu0 %v24546_v32  ;;  %v10812_v32 = vld [vmem:[%s26748_s3 + $0x40] sm:$0xff] }
 0xa70   :  { %19527 = vmatpush3.msra.mxu1 %v24578_v8  ;;  %19482 = vmatprep.subr.mxu0 %v27274_v15  ;;  %v10946_v8 = vand.u32 4294901760, %v10945_v42  ;;  %v24944_v56 = vsub.f32 %v10813_v3, %v24912_v34  ;;  %v10808_v42 = vld [vmem:[%s26748_s3 + $0x20] sm:$0xff]  ;;  %v27280_v3 = vld [vmem:[#allocation11_spill] sm:$0xff] }
 0xa71   :  { %19528 = vmatprep.subr.mxu1 %v24593_v53  ;;  %19483 = vmatpush3.msra.mxu0 %v27274_v15 }
 0xa72   :  { %19529 = vmatpush3.msra.mxu1 %v24593_v53  ;;  %19484 = vmatprep.subr.mxu0 %v27275_v14  ;;  %v10959_v53 = vsub.f32 %v24869_v62, %v24896_v48  ;;  %v24972_v15 = vand.u32 4294901760, %v24944_v56 }
 0xa73   :  { %19530 = vmatprep.subr.mxu1 %v24609_v27  ;;  %19485 = vmatpush3.msra.mxu0 %v27275_v14  ;;  %v10967_v14 = vand.u32 4294901760, %v10966_v12  ;;  %v10806_v12 = vld [vmem:[%s26748_s3 + $0x10] sm:$0xff] }
 0xa74   :  { %19531 = vmatpush3.msra.mxu1 %v24609_v27  ;;  %19486 = vmatprep.subr.mxu0 %v27276_v28  ;;  %v24926_v27 = vand.u32 4294901760, %v10812_v32  ;;  %v10960_v4 = vand.u32 4294901760, %v10959_v53 }
 0xa75   :  { %19532 = vmatprep.subr.mxu1 %v24626_v36  ;;  %19487 = vmatpush3.msra.mxu0 %v27276_v28  ;;  %v24981_v28 = vand.u32 4294901760, %v10809_v13 }
 0xa76   :  { %19533 = vmatpush3.msra.mxu1 %v24626_v36  ;;  %19488 = vmatprep.subr.mxu0 %v27277_v5  ;;  %v24936_v36 = vand.u32 4294901760, %v24903_v39  ;;  %v24957_v31 = vsub.f32 %v10812_v32, %v24926_v27  ;;  %v24979_v32 = vsub.f32 %v10811_v43, %v24949_v21 }
 0xa77   :  { %19534 = vmatprep.subr.mxu1 %v24642_v29  ;;  %19489 = vmatpush3.msra.mxu0 %v27277_v5  ;;  %v10807_v5 = vld [vmem:[%s26748_s3 + $0x18] sm:$0xff] }
 0xa78   :  { %19535 = vmatpush3.msra.mxu1 %v24642_v29  ;;  %19490 = vmatprep.subr.mxu0 %v27278_v18  ;;  %v24954_v29 = vand.u32 4294901760, %v24924_v46  ;;  %v10973_v19 = vsub.f32 %v24903_v39, %v24936_v36  ;;  %v24987_v17 = vand.u32 4294901760, %v24957_v31 }
 0xa79   :  { %19537 = vmatmul.mubr.f32.vlgmr.msra.gmra.mxu1 %v24673_v10  ;;  %19580 = vmatprep.subr.mxu1 %v10946_v8 }
 0xa7a   :  { %19491 = vmatpush3.msra.mxu0 %v27278_v18  ;;  %19539 = vmatprep.mubr.f32.mxu1 %v24675_v60  ;;  %v10980_v47 = vsub.f32 %v24924_v46, %v24954_v29  ;;  %v10974_v53 = vand.u32 4294901760, %v10973_v19  ;;  %v24997_v18 = vand.u32 4294901760, %v10808_v42  ;;  %v25013_v19 = vand.u32 4294901760, %v10807_v5 }
 0xa7b   :  { %19581 = vmatpush3.msra.mxu1 %v10946_v8  ;;  %19492 = vmatprep.subr.mxu0 %v27279_v49  ;;  %v24990_v8 = vsub.f32 %v10810_v37, %v24959_v24  ;;  %v10987_v37 = vsub.f32 %v24944_v56, %v24972_v15  ;;  %v10994_v43 = vsub.f32 %v24957_v31, %v24987_v17 }
 0xa7c   :  { %19582 = vmatprep.subr.mxu1 %v10953_v45  ;;  %19493 = vmatpush3.msra.mxu0 %v27279_v49  ;;  %v25011_v49 = vsub.f32 %v10809_v13, %v24981_v28  ;;  %v27282_v13 = vand.u32 4294901760, %v24968_v44  ;;  %v25029_v40 = vsub.f32 %v10808_v42, %v24997_v18  ;;  %v25045_v51 = vsub.f32 %v10807_v5, %v25013_v19 }
 0xa7d   :  { %19583 = vmatpush3.msra.mxu1 %v10953_v45  ;;  %19494 = vmatprep.subr.mxu0 %v27280_v3  ;;  %v27281_v45 = vld [vmem:[#allocation10_spill] sm:$0xff]  ;;  %v25019_v61 = vand.u32 4294901760, %v24990_v8  ;;  %v10988_v57 = vand.u32 4294901760, %v10987_v37  ;;  %v10995_v37 = vand.u32 4294901760, %v10994_v43  ;;  %v25059_v5 = vand.u32 4294901760, %v10804_v6 }
 0xa7e   :  { %19540 = vmatmul.mubr.f32.gmra.mxu1 %v24677_v7  ;;  %19584 = vmatprep.subr.mxu1 %v10960_v4  ;;  %v25042_v42 = vand.u32 4294901760, %v25011_v49  ;;  %v25054_v23 = vand.u32 4294901760, %v25029_v40 }
 0xa7f   :  { %19495 = vmatpush3.msra.mxu0 %v27280_v3  ;;  %19585 = vmatpush3.msra.mxu1 %v10960_v4  ;;  %v25008_v4 = vand.u32 4294901760, %v24979_v32  ;;  %v10981_v3 = vand.u32 4294901760, %v10980_v47  ;;  %v25031_v47 = vand.u32 4294901760, %v10806_v12  ;;  %v25079_v55 = vsub.f32 %v10804_v6, %v25059_v5 }
 0xa80   :  { %19612 = vmatprep.mubr.f32.mxu1 %v24933_v38  ;;  %19496 = vmatprep.subr.mxu0 %v27281_v45 }
 0xa81   :  { %19586 = vmatprep.subr.mxu1 %v10967_v14  ;;  %19497 = vmatpush3.msra.mxu0 %v27281_v45  ;;  %v10805_v45 = vld [vmem:[%s26748_s3 + $0x8] sm:$0xff]  ;;  %v25057_v33 = vsub.f32 %v10806_v12, %v25031_v47  ;;  %v25093_v1 = vand.u32 4294901760, %v25079_v55 }
 0xa82   :  { %19587 = vmatpush3.msra.mxu1 %v10967_v14  ;;  %19499 = vmatmul.mubr.f32.vlgmr.msra.gmra.mxu0 %v24673_v10  ;;  %v10904_v14 = vsub.f32 %v24968_v44, %v27282_v13  ;;  %v11001_v13 = vsub.f32 %v24979_v32, %v25008_v4  ;;  %v25047_v11 = vand.u32 4294901760, %v10805_v45  ;;  %v9999_v10 = vld [vmem:[#allocation2 + $0x22] sm:$0xff] }
 0xa83   :  { %19542 = vmatprep.subr.mxu0 %v24821_v25  ;;  %19588 = vmatprep.subr.mxu1 %v10974_v53 }
 0xa84   :  { %19501 = vmatprep.mubr.f32.mxu0 %v24675_v60  ;;  %19543 = vmatpush3.msra.mxu0 %v24821_v25  ;;  %v10905_v0 = vand.u32 4294901760, %v10904_v14  ;;  %v11002_v43 = vand.u32 4294901760, %v11001_v13  ;;  %v25066_v14 = vand.u32 4294901760, %v25045_v51  ;;  %v25069_v54 = vsub.f32 %v10805_v45, %v25047_v11 }
 0xa85   :  { %19589 = vmatpush3.msra.mxu1 %v10974_v53  ;;  %19544 = vmatprep.subr.mxu0 %v24835_v16  ;;  %v11008_v53 = vsub.f32 %v24990_v8, %v25019_v61  ;;  %v25076_v13 = vand.u32 4294901760, %v25057_v33  ;;  %v25104_v60 = vand.u32 4294901760, %v9997_v59 }
 0xa86   :  { %19590 = vmatprep.subr.mxu1 %v10981_v3  ;;  %19545 = vmatpush3.msra.mxu0 %v24835_v16  ;;  %v11029_v45 = vsub.f32 %v25045_v51, %v25066_v14 }
 0xa87   :  { %19591 = vmatpush3.msra.mxu1 %v10981_v3  ;;  %19502 = vmatmul.mubr.f32.gmra.mxu0 %v24677_v7  ;;  %v11015_v3 = vsub.f32 %v25011_v49, %v25042_v42  ;;  %v11009_v12 = vand.u32 4294901760, %v11008_v53  ;;  %v25086_v53 = vand.u32 4294901760, %v25069_v54  ;;  %v9998_v7 = vld [vmem:[#allocation2 + $0x1a] sm:$0xff] }
 0xa88   :  { %19546 = vmatprep.subr.mxu0 %v24844_v30  ;;  %19592 = vmatprep.subr.mxu1 %v10988_v57 }
 0xa89   :  { %19547 = vmatpush3.msra.mxu0 %v24844_v30  ;;  %19574 = vmatprep.mubr.f32.mxu0 %v10905_v0  ;;  %v11022_v0 = vsub.f32 %v25029_v40, %v25054_v23 }
 0xa8a   :  { %19593 = vmatpush3.msra.mxu1 %v10988_v57  ;;  %19548 = vmatprep.subr.mxu0 %v24864_v9  ;;  %v11016_v57 = vand.u32 4294901760, %v11015_v3  ;;  %v11030_v3 = vand.u32 4294901760, %v11029_v45 }
 0xa8b   :  { %19594 = vmatprep.subr.mxu1 %v10995_v37  ;;  %19549 = vmatpush3.msra.mxu0 %v24864_v9  ;;  %v11023_v6 = vand.u32 4294901760, %v11022_v0 }
 0xa8c   :  { %19595 = vmatpush3.msra.mxu1 %v10995_v37  ;;  %19550 = vmatprep.subr.mxu0 %v24873_v52  ;;  %v11036_v37 = vsub.f32 %v25057_v33, %v25076_v13 }
 0xa8d   :  { %19596 = vmatprep.subr.mxu1 %v11002_v43  ;;  %19551 = vmatpush3.msra.mxu0 %v24873_v52 }
 0xa8e   :  { %19597 = vmatpush3.msra.mxu1 %v11002_v43  ;;  %19552 = vmatprep.subr.mxu0 %v24898_v20  ;;  %v11043_v43 = vsub.f32 %v25069_v54, %v25086_v53  ;;  %v11037_v0 = vand.u32 4294901760, %v11036_v37 }
 0xa8f   :  { %19598 = vmatprep.subr.mxu1 %v11009_v12  ;;  %19553 = vmatpush3.msra.mxu0 %v24898_v20 }
 0xa90   :  { %19599 = vmatpush3.msra.mxu1 %v11009_v12  ;;  %19554 = vmatprep.subr.mxu0 %v24912_v34  ;;  %v11050_v12 = vsub.f32 %v25079_v55, %v25093_v1  ;;  %v11044_v45 = vand.u32 4294901760, %v11043_v43  ;;  %v25116_v43 = vand.u32 4294901760, %v9999_v10 }
 0xa91   :  { %19600 = vmatprep.subr.mxu1 %v11016_v57  ;;  %19555 = vmatpush3.msra.mxu0 %v24912_v34 }
 0xa92   :  { %19601 = vmatpush3.msra.mxu1 %v11016_v57  ;;  %19556 = vmatprep.subr.mxu0 %v24926_v27  ;;  %v25108_v57 = vand.u32 4294901760, %v9998_v7  ;;  %v11051_v37 = vand.u32 4294901760, %v11050_v12 }
 0xa93   :  { %19602 = vmatprep.subr.mxu1 %v11023_v6  ;;  %19557 = vmatpush3.msra.mxu0 %v24926_v27 }
 0xa94   :  { %19603 = vmatpush3.msra.mxu1 %v11023_v6  ;;  %19558 = vmatprep.subr.mxu0 %v24949_v21  ;;  %v25113_v6 = vsub.f32 %v9997_v59, %v25104_v60 }
 0xa95   :  { %19604 = vmatprep.subr.mxu1 %v11030_v3  ;;  %19559 = vmatpush3.msra.mxu0 %v24949_v21 }
 0xa96   :  { %19605 = vmatpush3.msra.mxu1 %v11030_v3  ;;  %19560 = vmatprep.subr.mxu0 %v24959_v24  ;;  %v25120_v3 = vsub.f32 %v9998_v7, %v25108_v57  ;;  %v26969_v59 = vand.u32 4294901760, %v25113_v6 }
 0xa97   :  { %19606 = vmatprep.subr.mxu1 %v11037_v0  ;;  %19561 = vmatpush3.msra.mxu0 %v24959_v24 }
 0xa98   :  { %19607 = vmatpush3.msra.mxu1 %v11037_v0  ;;  %19562 = vmatprep.subr.mxu0 %v24981_v28  ;;  %v25128_v0 = vsub.f32 %v9999_v10, %v25116_v43  ;;  %v26971_v7 = vand.u32 4294901760, %v25120_v3  ;;  %v10914_v12 = vsub.f32 %v25113_v6, %v26969_v59 }
 0xa99   :  { %19608 = vmatprep.subr.mxu1 %v11044_v45  ;;  %19563 = vmatpush3.msra.mxu0 %v24981_v28 }
 0xa9a   :  { %19609 = vmatpush3.msra.mxu1 %v11044_v45  ;;  %19564 = vmatprep.subr.mxu0 %v24997_v18  ;;  %v10933_v10 = vand.u32 4294901760, %v25128_v0  ;;  %v10924_v45 = vsub.f32 %v25120_v3, %v26971_v7  ;;  %v10915_v59 = vand.u32 4294901760, %v10914_v12 }
 0xa9b   :  { %19610 = vmatprep.subr.mxu1 %v11051_v37  ;;  %19565 = vmatpush3.msra.mxu0 %v24997_v18 }
 0xa9c   :  { %19611 = vmatpush3.msra.mxu1 %v11051_v37  ;;  %19566 = vmatprep.subr.mxu0 %v25013_v19  ;;  %v27283_v37 = vand.u32 4294901760, %v24968_v44  ;;  %v10934_v26 = vsub.f32 %v25128_v0, %v10933_v10  ;;  %v10925_v7 = vand.u32 4294901760, %v10924_v45 }
 0xa9d   :  { %19613 = vmatmul.mubr.f32.vlgmr.msra.gmra.mxu1 %v25104_v60  ;;  %19656 = vmatprep.subr.mxu1 %v24821_v25 }
 0xa9e   :  { %19567 = vmatpush3.msra.mxu0 %v25013_v19  ;;  %19615 = vmatprep.mubr.f32.mxu1 %v25108_v57  ;;  %v10935_v12 = vand.u32 4294901760, %v10934_v26  ;;  %v27284_v26 = vand.u32 4294901760, %v25113_v6 }
 0xa9f   :  { %19657 = vmatpush3.msra.mxu1 %v24821_v25  ;;  %19568 = vmatprep.subr.mxu0 %v25031_v47 }
 0xaa0   :  { %19658 = vmatprep.subr.mxu1 %v24835_v16  ;;  %19569 = vmatpush3.msra.mxu0 %v25031_v47 }
 0xaa1   :  { %19659 = vmatpush3.msra.mxu1 %v24835_v16  ;;  %19570 = vmatprep.subr.mxu0 %v25047_v11 }
 0xaa2   :  { %19616 = vmatmul.mubr.f32.gmra.mxu1 %v25116_v43  ;;  %19660 = vmatprep.subr.mxu1 %v24844_v30 }
 0xaa3   :  { %19571 = vmatpush3.msra.mxu0 %v25047_v11  ;;  %19661 = vmatpush3.msra.mxu1 %v24844_v30 }
 0xaa4   :  { %19688 = vmatprep.mubr.f32.mxu1 %v27283_v37  ;;  %19572 = vmatprep.subr.mxu0 %v25059_v5 }
 0xaa5   :  { %19662 = vmatprep.subr.mxu1 %v24864_v9  ;;  %19573 = vmatpush3.msra.mxu0 %v25059_v5 }
 0xaa6   :  { %19663 = vmatpush3.msra.mxu1 %v24864_v9  ;;  %19575 = vmatmul.mubr.f32.vlgmr.msra.gmra.mxu0 %v10915_v59 }
 0xaa7   :  { %19618 = vmatprep.subr.mxu0 %v24840_v35  ;;  %19664 = vmatprep.subr.mxu1 %v24873_v52 }
 0xaa8   :  { %19577 = vmatprep.mubr.f32.mxu0 %v10925_v7  ;;  %19619 = vmatpush3.msra.mxu0 %v24840_v35  ;;  %v27285_v35 = vand.u32 4294901760, %v25120_v3 }
 0xaa9   :  { %19665 = vmatpush3.msra.mxu1 %v24873_v52  ;;  %19620 = vmatprep.subr.mxu0 %v24854_v58 }
 0xaaa   :  { %19666 = vmatprep.subr.mxu1 %v24898_v20  ;;  %19621 = vmatpush3.msra.mxu0 %v24854_v58 }
 0xaab   :  { %19667 = vmatpush3.msra.mxu1 %v24898_v20  ;;  %19578 = vmatmul.mubr.f32.gmra.mxu0 %v10935_v12  ;;  %v15282_v12 = vld [vmem:[%s26748_s3 + $0x110] sm:$0xff] }
 0xaac   :  { %19622 = vmatprep.subr.mxu0 %v24869_v62  ;;  %19668 = vmatprep.subr.mxu1 %v24912_v34 }
 0xaad   :  { %19623 = vmatpush3.msra.mxu0 %v24869_v62  ;;  %19650 = vmatprep.mubr.f32.mxu0 %v24968_v44  ;;  %v15287_v44 = vld [vmem:[%s26748_s3 + $0x138] sm:$0xff] }
 0xaae   :  { %19669 = vmatpush3.msra.mxu1 %v24912_v34  ;;  %19624 = vmatprep.subr.mxu0 %v24888_v63 }
 0xaaf   :  { %19670 = vmatprep.subr.mxu1 %v24926_v27  ;;  %19625 = vmatpush3.msra.mxu0 %v24888_v63  ;;  %v15290_v63 = vld [vmem:[%s26748_s3 + $0x150] sm:$0xff] }
 0xab0   :  { %19671 = vmatpush3.msra.mxu1 %v24926_v27  ;;  %19626 = vmatprep.subr.mxu0 %v24903_v39 }
 0xab1   :  { %19672 = vmatprep.subr.mxu1 %v24949_v21  ;;  %19627 = vmatpush3.msra.mxu0 %v24903_v39 }
 0xab2   :  { %19673 = vmatpush3.msra.mxu1 %v24949_v21  ;;  %19628 = vmatprep.subr.mxu0 %v24924_v46 }
 0xab3   :  { %19674 = vmatprep.subr.mxu1 %v24959_v24  ;;  %19629 = vmatpush3.msra.mxu0 %v24924_v46  ;;  %v25326_v46 = vand.u32 4294901760, %v15290_v63 }
 0xab4   :  { %19675 = vmatpush3.msra.mxu1 %v24959_v24  ;;  %19630 = vmatprep.subr.mxu0 %v24944_v56 }
 0xab5   :  { %19676 = vmatprep.subr.mxu1 %v24981_v28  ;;  %19631 = vmatpush3.msra.mxu0 %v24944_v56 }
 0xab6   :  { %19677 = vmatpush3.msra.mxu1 %v24981_v28  ;;  %19632 = vmatprep.subr.mxu0 %v24957_v31 }
 0xab7   :  { %19678 = vmatprep.subr.mxu1 %v24997_v18  ;;  %19633 = vmatpush3.msra.mxu0 %v24957_v31  ;;  %v25352_v31 = vsub.f32 %v15290_v63, %v25326_v46  ;;  %v15280_v63 = vld [vmem:[%s26748_s3 + $0x100] sm:$0xff] }
 0xab8   :  { %19679 = vmatpush3.msra.mxu1 %v24997_v18  ;;  %19634 = vmatprep.subr.mxu0 %v24979_v32 }
 0xab9   :  { %19680 = vmatprep.subr.mxu1 %v25013_v19  ;;  %19635 = vmatpush3.msra.mxu0 %v24979_v32 }
 0xaba   :  { %19681 = vmatpush3.msra.mxu1 %v25013_v19  ;;  %19636 = vmatprep.subr.mxu0 %v24990_v8 }
 0xabb   :  { %19682 = vmatprep.subr.mxu1 %v25031_v47  ;;  %19637 = vmatpush3.msra.mxu0 %v24990_v8 }
 0xabc   :  { %19683 = vmatpush3.msra.mxu1 %v25031_v47  ;;  %19638 = vmatprep.subr.mxu0 %v25011_v49 }
 0xabd   :  { %19684 = vmatprep.subr.mxu1 %v25047_v11  ;;  %19639 = vmatpush3.msra.mxu0 %v25011_v49  ;;  %v15285_v49 = vld [vmem:[%s26748_s3 + $0x128] sm:$0xff] }
 0xabe   :  { %19685 = vmatpush3.msra.mxu1 %v25047_v11  ;;  %19640 = vmatprep.subr.mxu0 %v25029_v40 }
 0xabf   :  { %19686 = vmatprep.subr.mxu1 %v25059_v5  ;;  %19641 = vmatpush3.msra.mxu0 %v25029_v40  ;;  %v15295_v40 = vld [vmem:[%s26748_s3 + $0x178] sm:$0xff] }
 0xac0   :  { %19687 = vmatpush3.msra.mxu1 %v25059_v5  ;;  %19642 = vmatprep.subr.mxu0 %v25045_v51 }
 0xac1   :  { %19689 = vmatmul.mubr.f32.vlgmr.msra.gmra.mxu1 %v27284_v26  ;;  %19732 = vmatprep.subr.mxu1 %v24821_v25 }
 0xac2   :  { %19643 = vmatpush3.msra.mxu0 %v25045_v51  ;;  %19691 = vmatprep.mubr.f32.mxu1 %v27285_v35  ;;  %v25249_v51 = vand.u32 4294901760, %v15295_v40 }
 0xac3   :  { %19733 = vmatpush3.msra.mxu1 %v24821_v25  ;;  %19644 = vmatprep.subr.mxu0 %v25057_v33 }
 0xac4   :  { %19734 = vmatprep.subr.mxu1 %v24835_v16  ;;  %19645 = vmatpush3.msra.mxu0 %v25057_v33  ;;  %v15294_v33 = vld [vmem:[%s26748_s3 + $0x170] sm:$0xff]  ;;  %v25268_v25 = vsub.f32 %v15295_v40, %v25249_v51 }
 0xac5   :  { %19735 = vmatpush3.msra.mxu1 %v24835_v16  ;;  %19646 = vmatprep.subr.mxu0 %v25069_v54 }
 0xac6   :  { %19692 = vmatmul.mubr.f32.gmra.mxu1 %v10933_v10  ;;  %19736 = vmatprep.subr.mxu1 %v24844_v30 }
 0xac7   :  { %19647 = vmatpush3.msra.mxu0 %v25069_v54  ;;  %19737 = vmatpush3.msra.mxu1 %v24844_v30  ;;  %v25263_v54 = vand.u32 4294901760, %v15294_v33  ;;  %v15292_v30 = vld [vmem:[%s26748_s3 + $0x160] sm:$0xff] }
 0xac8   :  { %19764 = vmatprep.mubr.f32.mxu1 %v24933_v38  ;;  %19648 = vmatprep.subr.mxu0 %v25079_v55  ;;  %v25292_v62 = vand.u32 4294901760, %v15292_v30 }
 0xac9   :  { %19738 = vmatprep.subr.mxu1 %v24864_v9  ;;  %19649 = vmatpush3.msra.mxu0 %v25079_v55  ;;  %v15293_v55 = vld [vmem:[%s26748_s3 + $0x168] sm:$0xff]  ;;  %v25282_v58 = vsub.f32 %v15294_v33, %v25263_v54 }
 0xaca   :  { %19739 = vmatpush3.msra.mxu1 %v24864_v9  ;;  %19651 = vmatmul.mubr.f32.vlgmr.msra.gmra.mxu0 %v25113_v6  ;;  %v25272_v16 = vand.u32 4294901760, %v15293_v55  ;;  %v25290_v9 = vand.u32 4294901760, %v25268_v25  ;;  %v25316_v39 = vsub.f32 %v15292_v30, %v25292_v62 }
 0xacb   :  { %19694 = vmatprep.subr.mxu0 %v24862_v41  ;;  %19740 = vmatprep.subr.mxu1 %v24873_v52 }
 0xacc   :  { %19653 = vmatprep.mubr.f32.mxu0 %v25120_v3  ;;  %19695 = vmatpush3.msra.mxu0 %v24862_v41  ;;  %v15291_v41 = vld [vmem:[%s26748_s3 + $0x158] sm:$0xff]  ;;  %v25404_v3 = vand.u32 4294901760, %v15285_v49 }
 0xacd   :  { %19741 = vmatpush3.msra.mxu1 %v24873_v52  ;;  %19696 = vmatprep.subr.mxu0 %v24881_v2  ;;  %v25297_v52 = vsub.f32 %v15293_v55, %v25272_v16  ;;  %v15281_v55 = vld [vmem:[%s26748_s3 + $0x108] sm:$0xff] }
 0xace   :  { %19742 = vmatprep.subr.mxu1 %v24898_v20  ;;  %19697 = vmatpush3.msra.mxu0 %v24881_v2  ;;  %v25301_v2 = vand.u32 4294901760, %v15291_v41  ;;  %v25433_v26 = vsub.f32 %v15285_v49, %v25404_v3 }
 0xacf   :  { %19743 = vmatpush3.msra.mxu1 %v24898_v20  ;;  %19654 = vmatmul.mubr.f32.gmra.mxu0 %v25128_v0  ;;  %v11715_v20 = vsub.f32 %v25268_v25, %v25290_v9  ;;  %v15283_v0 = vld [vmem:[%s26748_s3 + $0x118] sm:$0xff] }
 0xad0   :  { %19698 = vmatprep.subr.mxu0 %v24896_v48  ;;  %19744 = vmatprep.subr.mxu1 %v24912_v34  ;;  %v25435_v35 = vand.u32 4294901760, %v15283_v0 }
 0xad1   :  { %19699 = vmatpush3.msra.mxu0 %v24896_v48  ;;  %19726 = vmatprep.mubr.f32.mxu0 %v24933_v38  ;;  %v25309_v48 = vand.u32 4294901760, %v25282_v58  ;;  %v15288_v38 = vld [vmem:[%s26748_s3 + $0x140] sm:$0xff] }
 0xad2   :  { %19745 = vmatpush3.msra.mxu1 %v24912_v34  ;;  %19700 = vmatprep.subr.mxu0 %v24917_v22  ;;  %v15289_v34 = vld [vmem:[%s26748_s3 + $0x148] sm:$0xff] }
 0xad3   :  { %19746 = vmatprep.subr.mxu1 %v24926_v27  ;;  %19701 = vmatpush3.msra.mxu0 %v24917_v22  ;;  %v25324_v22 = vand.u32 4294901760, %v25297_v52  ;;  %v25340_v56 = vand.u32 4294901760, %v15289_v34 }
 0xad4   :  { %19747 = vmatpush3.msra.mxu1 %v24926_v27  ;;  %19702 = vmatprep.subr.mxu0 %v24936_v36  ;;  %v25331_v27 = vsub.f32 %v15291_v41, %v25301_v2  ;;  %v25450_v41 = vand.u32 4294901760, %v15282_v12 }
 0xad5   :  { %19748 = vmatprep.subr.mxu1 %v24949_v21  ;;  %19703 = vmatpush3.msra.mxu0 %v24936_v36  ;;  %v11722_v36 = vsub.f32 %v25282_v58, %v25309_v48  ;;  %v25367_v32 = vsub.f32 %v15289_v34, %v25340_v56  ;;  %v25461_v34 = vand.u32 4294901760, %v25433_v26 }
 0xad6   :  { %19749 = vmatpush3.msra.mxu1 %v24949_v21  ;;  %19704 = vmatprep.subr.mxu0 %v24954_v29  ;;  %v25345_v21 = vand.u32 4294901760, %v25316_v39 }
 0xad7   :  { %19750 = vmatprep.subr.mxu1 %v24959_v24  ;;  %19705 = vmatpush3.msra.mxu0 %v24954_v29  ;;  %v11729_v29 = vsub.f32 %v25297_v52, %v25324_v22 }
 0xad8   :  { %19751 = vmatpush3.msra.mxu1 %v24959_v24  ;;  %19706 = vmatprep.subr.mxu0 %v24972_v15  ;;  %v25354_v24 = vand.u32 4294901760, %v15288_v38 }
 0xad9   :  { %19752 = vmatprep.subr.mxu1 %v24981_v28  ;;  %19707 = vmatpush3.msra.mxu0 %v24972_v15  ;;  %v11723_v15 = vand.u32 4294901760, %v11722_v36  ;;  %v11730_v8 = vand.u32 4294901760, %v11729_v29 }
 0xada   :  { %19753 = vmatpush3.msra.mxu1 %v24981_v28  ;;  %19708 = vmatprep.subr.mxu0 %v24987_v17  ;;  %v15286_v28 = vld [vmem:[%s26748_s3 + $0x130] sm:$0xff] }
 0xadb   :  { %19754 = vmatprep.subr.mxu1 %v24997_v18  ;;  %19709 = vmatpush3.msra.mxu0 %v24987_v17  ;;  %v25375_v17 = vand.u32 4294901760, %v15287_v44 }
 0xadc   :  { %19755 = vmatpush3.msra.mxu1 %v24997_v18  ;;  %19710 = vmatprep.subr.mxu0 %v25008_v4  ;;  %v25380_v18 = vand.u32 4294901760, %v25352_v31 }
 0xadd   :  { %19756 = vmatprep.subr.mxu1 %v25013_v19  ;;  %19711 = vmatpush3.msra.mxu0 %v25008_v4  ;;  %v25383_v4 = vsub.f32 %v15288_v38, %v25354_v24  ;;  %v25402_v6 = vsub.f32 %v15287_v44, %v25375_v17  ;;  %v25464_v38 = vsub.f32 %v15283_v0, %v25435_v35 }
 0xade   :  { %19757 = vmatpush3.msra.mxu1 %v25013_v19  ;;  %19712 = vmatprep.subr.mxu0 %v25019_v61  ;;  %v25476_v44 = vsub.f32 %v15282_v12, %v25450_v41 }
 0xadf   :  { %19758 = vmatprep.subr.mxu1 %v25031_v47  ;;  %19713 = vmatpush3.msra.mxu0 %v25019_v61  ;;  %v11716_v61 = vand.u32 4294901760, %v11715_v20  ;;  %v25410_v59 = vand.u32 4294901760, %v25383_v4 }
 0xae0   :  { %19759 = vmatpush3.msra.mxu1 %v25031_v47  ;;  %19714 = vmatprep.subr.mxu0 %v25042_v42  ;;  %v25391_v47 = vand.u32 4294901760, %v15286_v28 }
 0xae1   :  { %19760 = vmatprep.subr.mxu1 %v25047_v11  ;;  %19715 = vmatpush3.msra.mxu0 %v25042_v42  ;;  %v25395_v42 = vand.u32 4294901760, %v25367_v32  ;;  %v11764_v33 = vsub.f32 %v25383_v4, %v25410_v59 }
 0xae2   :  { %19761 = vmatpush3.msra.mxu1 %v25047_v11  ;;  %19716 = vmatprep.subr.mxu0 %v25054_v23  ;;  %v25362_v11 = vand.u32 4294901760, %v25331_v27  ;;  %v25417_v10 = vsub.f32 %v15286_v28, %v25391_v47  ;;  %v27286_v28 = vld [vmem:[#allocation35_spill] sm:$0xff] }
 0xae3   :  { %19762 = vmatprep.subr.mxu1 %v25059_v5  ;;  %19717 = vmatpush3.msra.mxu0 %v25054_v23  ;;  %v11736_v23 = vsub.f32 %v25316_v39, %v25345_v21  ;;  %v11757_v37 = vsub.f32 %v25367_v32, %v25395_v42  ;;  %v11765_v36 = vand.u32 4294901760, %v11764_v33 }
 0xae4   :  { %19763 = vmatpush3.msra.mxu1 %v25059_v5  ;;  %19718 = vmatprep.subr.mxu0 %v25066_v14  ;;  %v11743_v19 = vsub.f32 %v25331_v27, %v25362_v11  ;;  %v15284_v5 = vld [vmem:[%s26748_s3 + $0x120] sm:$0xff] }
 0xae5   :  { %19765 = vmatmul.mubr.f32.vlgmr.msra.gmra.mxu1 %v25104_v60  ;;  %19808 = vmatprep.subr.mxu1 %v11716_v61  ;;  %v25419_v45 = vand.u32 4294901760, %v15284_v5 }
 0xae6   :  { %19719 = vmatpush3.msra.mxu0 %v25066_v14  ;;  %19767 = vmatprep.mubr.f32.mxu1 %v25108_v57  ;;  %v11737_v14 = vand.u32 4294901760, %v11736_v23  ;;  %v11744_v7 = vand.u32 4294901760, %v11743_v19 }
 0xae7   :  { %19809 = vmatpush3.msra.mxu1 %v11716_v61  ;;  %19720 = vmatprep.subr.mxu0 %v25076_v13  ;;  %v25448_v30 = vsub.f32 %v15284_v5, %v25419_v45 }
 0xae8   :  { %19810 = vmatprep.subr.mxu1 %v11723_v15  ;;  %19721 = vmatpush3.msra.mxu0 %v25076_v13  ;;  %v11750_v13 = vsub.f32 %v25352_v31, %v25380_v18 }
 0xae9   :  { %19811 = vmatpush3.msra.mxu1 %v11723_v15  ;;  %19722 = vmatprep.subr.mxu0 %v25086_v53  ;;  %v25473_v29 = vand.u32 4294901760, %v25448_v30  ;;  %v25478_v15 = vand.u32 4294901760, %v15280_v63 }
 0xaea   :  { %19768 = vmatmul.mubr.f32.gmra.mxu1 %v25116_v43  ;;  %19812 = vmatprep.subr.mxu1 %v11730_v8  ;;  %v11751_v40 = vand.u32 4294901760, %v11750_v13 }
 0xaeb   :  { %19723 = vmatpush3.msra.mxu0 %v25086_v53  ;;  %19813 = vmatpush3.msra.mxu1 %v11730_v8  ;;  %v25430_v53 = vand.u32 4294901760, %v25402_v6  ;;  %v25486_v8 = vand.u32 4294901760, %v25464_v38  ;;  %v11792_v5 = vsub.f32 %v25448_v30, %v25473_v29  ;;  %v25499_v13 = vsub.f32 %v15280_v63, %v25478_v15 }
 0xaec   :  { %19840 = vmatprep.mubr.f32.mxu1 %v24671_v50  ;;  %19724 = vmatprep.subr.mxu0 %v25093_v1 }
 0xaed   :  { %19814 = vmatprep.subr.mxu1 %v11737_v14  ;;  %19725 = vmatpush3.msra.mxu0 %v25093_v1  ;;  %v25445_v1 = vand.u32 4294901760, %v25417_v10  ;;  %v11771_v20 = vsub.f32 %v25402_v6, %v25430_v53 }
 0xaee   :  { %19815 = vmatpush3.msra.mxu1 %v11737_v14  ;;  %19727 = vmatmul.mubr.f32.vlgmr.msra.gmra.mxu0 %v25104_v60  ;;  %v11758_v60 = vand.u32 4294901760, %v11757_v37  ;;  %v25496_v14 = vand.u32 4294901760, %v25476_v44 }
 0xaef   :  { %19770 = vmatprep.subr.mxu0 %v25249_v51  ;;  %19816 = vmatprep.subr.mxu1 %v11744_v7  ;;  %v11778_v61 = vsub.f32 %v25417_v10, %v25445_v1  ;;  %v11772_v23 = vand.u32 4294901760, %v11771_v20 }
 0xaf0   :  { %19729 = vmatprep.mubr.f32.mxu0 %v25108_v57  ;;  %19771 = vmatpush3.msra.mxu0 %v25249_v51  ;;  %v25466_v57 = vand.u32 4294901760, %v15281_v55  ;;  %v11806_v33 = vsub.f32 %v25476_v44, %v25496_v14 }
 0xaf1   :  { %19817 = vmatpush3.msra.mxu1 %v11744_v7  ;;  %19772 = vmatprep.subr.mxu0 %v25263_v54  ;;  %v11779_v19 = vand.u32 4294901760, %v11778_v61  ;;  %v11799_v7 = vsub.f32 %v25464_v38, %v25486_v8 }
 0xaf2   :  { %19818 = vmatprep.subr.mxu1 %v11751_v40  ;;  %19773 = vmatpush3.msra.mxu0 %v25263_v54  ;;  %v25489_v49 = vsub.f32 %v15281_v55, %v25466_v57  ;;  %v25513_v55 = vand.u32 4294901760, %v25499_v13 }
 0xaf3   :  { %19819 = vmatpush3.msra.mxu1 %v11751_v40  ;;  %19730 = vmatmul.mubr.f32.gmra.mxu0 %v25116_v43  ;;  %v11785_v43 = vsub.f32 %v25433_v26, %v25461_v34  ;;  %v19386_v12 = vpop.f32.mrf.mxu1  ;;  %v11793_v40 = vand.u32 4294901760, %v11792_v5  ;;  %v11800_v20 = vand.u32 4294901760, %v11799_v7  ;;  %v27287_v7 = vld [vmem:[#allocation22_spill] sm:$0xff] }
 0xaf4   :  { %19774 = vmatprep.subr.mxu0 %v25272_v16  ;;  %19820 = vmatprep.subr.mxu1 %v11758_v60  ;;  %v25506_v37 = vand.u32 4294901760, %v25489_v49 }
 0xaf5   :  { %19775 = vmatpush3.msra.mxu0 %v25272_v16  ;;  %19802 = vmatprep.mubr.f32.mxu0 %v27286_v28  ;;  %v11786_v0 = vand.u32 4294901760, %v11785_v43  ;;  %v10285_v61 = vpop.f32.mrf.mxu1  ;;  %v11807_v43 = vand.u32 4294901760, %v11806_v33  ;;  %v27290_v33 = vld [vmem:[#allocation28_spill] sm:$0xff] }
 0xaf6   :  { %19821 = vmatpush3.msra.mxu1 %v11758_v60  ;;  %19776 = vmatprep.subr.mxu0 %v25292_v62 }
 0xaf7   :  { %19822 = vmatprep.subr.mxu1 %v11765_v36  ;;  %19777 = vmatpush3.msra.mxu0 %v25292_v62 }
 0xaf8   :  { %19823 = vmatpush3.msra.mxu1 %v11765_v36  ;;  %19778 = vmatprep.subr.mxu0 %v25301_v2  ;;  %v11813_v36 = vsub.f32 %v25489_v49, %v25506_v37 }
 0xaf9   :  { %19824 = vmatprep.subr.mxu1 %v11772_v23  ;;  %19779 = vmatpush3.msra.mxu0 %v25301_v2 }
 0xafa   :  { %19825 = vmatpush3.msra.mxu1 %v11772_v23  ;;  %19780 = vmatprep.subr.mxu0 %v25326_v46  ;;  %v11814_v5 = vand.u32 4294901760, %v11813_v36  ;;  %v27293_v36 = vld [vmem:[#allocation47_spill] sm:$0xff] }
 0xafb   :  { %19826 = vmatprep.subr.mxu1 %v11779_v19  ;;  %19781 = vmatpush3.msra.mxu0 %v25326_v46  ;;  %v19348_v60 = vpop.f32.mrf.mxu0 }
 0xafc   :  { %19827 = vmatpush3.msra.mxu1 %v11779_v19  ;;  %19782 = vmatprep.subr.mxu0 %v25340_v56  ;;  %v25516_v63 = vadd.f32 %v19386_v12, %v19348_v60  ;;  %v11820_v19 = vsub.f32 %v25499_v13, %v25513_v55  ;;  %v27288_v12 = vld [vmem:[#allocation13_spill] sm:$0xff]  ;;  %v27291_v60 = vld [vmem:[#allocation43_spill] sm:$0xff] }
 0xafd   :  { %19828 = vmatprep.subr.mxu1 %v11786_v0  ;;  %19783 = vmatpush3.msra.mxu0 %v25340_v56  ;;  %v10104_v28 = vpop.f32.mrf.mxu0 }
 0xafe   :  { %19829 = vmatpush3.msra.mxu1 %v11786_v0  ;;  %19784 = vmatprep.subr.mxu0 %v25354_v24  ;;  %v25522_v23 = vadd.f32 %v10285_v61, %v10104_v28  ;;  %v11821_v0 = vand.u32 4294901760, %v11820_v19  ;;  %v27294_v61 = vld [vmem:[#allocation24_spill] sm:$0xff]  ;;  %v20597_v28 = vld [vmem:[%s26745_s4 + $0x50] sm:$0xff] }
 0xaff   :  { %19830 = vmatprep.subr.mxu1 %v11793_v40  ;;  %19785 = vmatpush3.msra.mxu0 %v25354_v24 }
 0xb00   :  { %19831 = vmatpush3.msra.mxu1 %v11793_v40  ;;  %19786 = vmatprep.subr.mxu0 %v25375_v17  ;;  %v27289_v40 = vld [vmem:[#allocation23_spill] sm:$0xff] }
 0xb01   :  { %19832 = vmatprep.subr.mxu1 %v11800_v20  ;;  %19787 = vmatpush3.msra.mxu0 %v25375_v17 }
 0xb02   :  { %19833 = vmatpush3.msra.mxu1 %v11800_v20  ;;  %19788 = vmatprep.subr.mxu0 %v25391_v47  ;;  %v27292_v20 = vld [vmem:[#allocation39_spill] sm:$0xff] }
 0xb03   :  { %19834 = vmatprep.subr.mxu1 %v11807_v43  ;;  %19789 = vmatpush3.msra.mxu0 %v25391_v47 }
 0xb04   :  { %19835 = vmatpush3.msra.mxu1 %v11807_v43  ;;  %19790 = vmatprep.subr.mxu0 %v25404_v3 }
 0xb05   :  { %19836 = vmatprep.subr.mxu1 %v11814_v5  ;;  %19791 = vmatpush3.msra.mxu0 %v25404_v3 }
 0xb06   :  { %19837 = vmatpush3.msra.mxu1 %v11814_v5  ;;  %19792 = vmatprep.subr.mxu0 %v25419_v45  ;;  %v20598_v5 = vld [vmem:[%s26745_s4 + $0x48] sm:$0xff] }
 0xb07   :  { %19838 = vmatprep.subr.mxu1 %v11821_v0  ;;  %19793 = vmatpush3.msra.mxu0 %v25419_v45 }
 0xb08   :  { %19839 = vmatpush3.msra.mxu1 %v11821_v0  ;;  %19794 = vmatprep.subr.mxu0 %v25435_v35  ;;  %v20599_v0 = vld [vmem:[%s26745_s4 + $0x40] sm:$0xff] }
 0xb09   :  { %19841 = vmatmul.mubr.f32.vlgmr.msra.gmra.mxu1 %v27287_v7  ;;  %19884 = vmatprep.subr.mxu1 %v25249_v51 }
 0xb0a   :  { %19795 = vmatpush3.msra.mxu0 %v25435_v35  ;;  %19843 = vmatprep.mubr.f32.mxu1 %v27288_v12 }
 0xb0b   :  { %19885 = vmatpush3.msra.mxu1 %v25249_v51  ;;  %19796 = vmatprep.subr.mxu0 %v25450_v41 }
 0xb0c   :  { %19886 = vmatprep.subr.mxu1 %v25263_v54  ;;  %19797 = vmatpush3.msra.mxu0 %v25450_v41 }
 0xb0d   :  { %19887 = vmatpush3.msra.mxu1 %v25263_v54  ;;  %19798 = vmatprep.subr.mxu0 %v25466_v57 }
 0xb0e   :  { %19844 = vmatmul.mubr.f32.gmra.mxu1 %v27289_v40  ;;  %19888 = vmatprep.subr.mxu1 %v25272_v16 }
 0xb0f   :  { %19799 = vmatpush3.msra.mxu0 %v25466_v57  ;;  %19889 = vmatpush3.msra.mxu1 %v25272_v16 }
 0xb10   :  { %19916 = vmatprep.mubr.f32.mxu1 %v27290_v33  ;;  %19800 = vmatprep.subr.mxu0 %v25478_v15  ;;  %v20601_v33 = vld [vmem:[%s26745_s4 + $0x30] sm:$0xff] }
 0xb11   :  { %19890 = vmatprep.subr.mxu1 %v25292_v62  ;;  %19801 = vmatpush3.msra.mxu0 %v25478_v15 }
 0xb12   :  { %19891 = vmatpush3.msra.mxu1 %v25292_v62  ;;  %19803 = vmatmul.mubr.f32.vlgmr.msra.gmra.mxu0 %v27291_v60 }
 0xb13   :  { %19846 = vmatprep.subr.mxu0 %v25268_v25  ;;  %19892 = vmatprep.subr.mxu1 %v25301_v2 }
 0xb14   :  { %19805 = vmatprep.mubr.f32.mxu0 %v27292_v20  ;;  %19847 = vmatpush3.msra.mxu0 %v25268_v25  ;;  %v27295_v25 = vld [vmem:[#allocation33_spill] sm:$0xff] }
 0xb15   :  { %19893 = vmatpush3.msra.mxu1 %v25301_v2  ;;  %19848 = vmatprep.subr.mxu0 %v25282_v58 }
 0xb16   :  { %19894 = vmatprep.subr.mxu1 %v25326_v46  ;;  %19849 = vmatpush3.msra.mxu0 %v25282_v58  ;;  %v27296_v58 = vld [vmem:[#allocation32_spill] sm:$0xff] }
 0xb17   :  { %19895 = vmatpush3.msra.mxu1 %v25326_v46  ;;  %19806 = vmatmul.mubr.f32.gmra.mxu0 %v27293_v36 }
 0xb18   :  { %19850 = vmatprep.subr.mxu0 %v25297_v52  ;;  %19896 = vmatprep.subr.mxu1 %v25340_v56 }
 0xb19   :  { %19851 = vmatpush3.msra.mxu0 %v25297_v52  ;;  %19878 = vmatprep.mubr.f32.mxu0 %v27294_v61  ;;  %v27297_v52 = vld [vmem:[#allocation36_spill] sm:$0xff]  ;;  %v20602_v61 = vld [vmem:[%s26745_s4 + $0x28] sm:$0xff] }
 0xb1a   :  { %19897 = vmatpush3.msra.mxu1 %v25340_v56  ;;  %19852 = vmatprep.subr.mxu0 %v25316_v39 }
 0xb1b   :  { %19898 = vmatprep.subr.mxu1 %v25354_v24  ;;  %19853 = vmatpush3.msra.mxu0 %v25316_v39 }
 0xb1c   :  { %19899 = vmatpush3.msra.mxu1 %v25354_v24  ;;  %19854 = vmatprep.subr.mxu0 %v25331_v27 }
 0xb1d   :  { %19900 = vmatprep.subr.mxu1 %v25375_v17  ;;  %19855 = vmatpush3.msra.mxu0 %v25331_v27 }
 0xb1e   :  { %19901 = vmatpush3.msra.mxu1 %v25375_v17  ;;  %19856 = vmatprep.subr.mxu0 %v25352_v31 }
 0xb1f   :  { %19902 = vmatprep.subr.mxu1 %v25391_v47  ;;  %19857 = vmatpush3.msra.mxu0 %v25352_v31 }
 0xb20   :  { %19903 = vmatpush3.msra.mxu1 %v25391_v47  ;;  %19858 = vmatprep.subr.mxu0 %v25367_v32 }
 0xb21   :  { %19904 = vmatprep.subr.mxu1 %v25404_v3  ;;  %19859 = vmatpush3.msra.mxu0 %v25367_v32 }
 0xb22   :  { %19905 = vmatpush3.msra.mxu1 %v25404_v3  ;;  %19860 = vmatprep.subr.mxu0 %v25383_v4 }
 0xb23   :  { %19906 = vmatprep.subr.mxu1 %v25419_v45  ;;  %19861 = vmatpush3.msra.mxu0 %v25383_v4 }
 0xb24   :  { %19907 = vmatpush3.msra.mxu1 %v25419_v45  ;;  %19862 = vmatprep.subr.mxu0 %v25402_v6 }
 0xb25   :  { %19908 = vmatprep.subr.mxu1 %v25435_v35  ;;  %19863 = vmatpush3.msra.mxu0 %v25402_v6 }
 0xb26   :  { %19909 = vmatpush3.msra.mxu1 %v25435_v35  ;;  %19864 = vmatprep.subr.mxu0 %v25417_v10 }
 0xb27   :  { %19910 = vmatprep.subr.mxu1 %v25450_v41  ;;  %19865 = vmatpush3.msra.mxu0 %v25417_v10 }
 0xb28   :  { %19911 = vmatpush3.msra.mxu1 %v25450_v41  ;;  %19866 = vmatprep.subr.mxu0 %v25433_v26 }
 0xb29   :  { %19912 = vmatprep.subr.mxu1 %v25466_v57  ;;  %19867 = vmatpush3.msra.mxu0 %v25433_v26 }
 0xb2a   :  { %19913 = vmatpush3.msra.mxu1 %v25466_v57  ;;  %19868 = vmatprep.subr.mxu0 %v25448_v30 }
 0xb2b   :  { %19914 = vmatprep.subr.mxu1 %v25478_v15  ;;  %19869 = vmatpush3.msra.mxu0 %v25448_v30 }
 0xb2c   :  { %19915 = vmatpush3.msra.mxu1 %v25478_v15  ;;  %19870 = vmatprep.subr.mxu0 %v25464_v38 }
 0xb2d   :  { %19917 = vmatmul.mubr.f32.vlgmr.msra.gmra.mxu1 %v27295_v25  ;;  %19960 = vmatprep.subr.mxu1 %v25249_v51  ;;  %v20603_v25 = vld [vmem:[%s26745_s4 + $0x20] sm:$0xff] }
 0xb2e   :  { %19871 = vmatpush3.msra.mxu0 %v25464_v38  ;;  %19919 = vmatprep.mubr.f32.mxu1 %v27296_v58 }
 0xb2f   :  { %19961 = vmatpush3.msra.mxu1 %v25249_v51  ;;  %19872 = vmatprep.subr.mxu0 %v25476_v44  ;;  %v27298_v51 = vld [vmem:[#allocation15_spill] sm:$0xff] }
 0xb30   :  { %19962 = vmatprep.subr.mxu1 %v25263_v54  ;;  %19873 = vmatpush3.msra.mxu0 %v25476_v44  ;;  %v20593_v44 = vld [vmem:[%s26745_s4 + $0x68] sm:$0xff] }
 0xb31   :  { %19963 = vmatpush3.msra.mxu1 %v25263_v54  ;;  %19874 = vmatprep.subr.mxu0 %v25489_v49  ;;  %v27299_v54 = vld [vmem:[#allocation26_spill] sm:$0xff] }
 0xb32   :  { %19920 = vmatmul.mubr.f32.gmra.mxu1 %v27297_v52  ;;  %19964 = vmatprep.subr.mxu1 %v25272_v16 }
 0xb33   :  { %19875 = vmatpush3.msra.mxu0 %v25489_v49  ;;  %19965 = vmatpush3.msra.mxu1 %v25272_v16  ;;  %v27300_v16 = vld [vmem:[#allocation25_spill] sm:$0xff]  ;;  %v20594_v49 = vld [vmem:[%s26745_s4 + $0x70] sm:$0xff] }
 0xb34   :  { %19992 = vmatprep.mubr.f32.mxu1 %v24671_v50  ;;  %19876 = vmatprep.subr.mxu0 %v25499_v13 }
 0xb35   :  { %19966 = vmatprep.subr.mxu1 %v25292_v62  ;;  %19877 = vmatpush3.msra.mxu0 %v25499_v13 }
 0xb36   :  { %19967 = vmatpush3.msra.mxu1 %v25292_v62  ;;  %19879 = vmatmul.mubr.f32.vlgmr.msra.gmra.mxu0 %v27298_v51  ;;  %v25701_v62 = vpop.f32.mrf.mxu0 }
 0xb37   :  { %19922 = vmatprep.subr.mxu0 %v25290_v9  ;;  %19968 = vmatprep.subr.mxu1 %v25301_v2 }
 0xb38   :  { %19881 = vmatprep.mubr.f32.mxu0 %v27299_v54  ;;  %19923 = vmatpush3.msra.mxu0 %v25290_v9  ;;  %v25699_v9 = vpop.f32.mrf.mxu1  ;;  %v25707_v39 = vpop.f32.mrf.mxu0  ;;  %v20604_v54 = vld [vmem:[%s26745_s4 + $0x18] sm:$0xff] }
 0xb39   :  { %19969 = vmatpush3.msra.mxu1 %v25301_v2  ;;  %19924 = vmatprep.subr.mxu0 %v25309_v48 }
 0xb3a   :  { %19970 = vmatprep.subr.mxu1 %v25326_v46  ;;  %19925 = vmatpush3.msra.mxu0 %v25309_v48  ;;  %v25703_v2 = vpop.f32.mrf.mxu1 }
 0xb3b   :  { %19971 = vmatpush3.msra.mxu1 %v25326_v46  ;;  %19882 = vmatmul.mubr.f32.gmra.mxu0 %v27300_v16  ;;  %v20605_v16 = vld [vmem:[%s26745_s4 + $0x10] sm:$0xff] }
 0xb3c   :  { %19926 = vmatprep.subr.mxu0 %v25324_v22  ;;  %19972 = vmatprep.subr.mxu1 %v25340_v56  ;;  %v25705_v48 = vpop.f32.mrf.mxu1 }
 0xb3d   :  { %19927 = vmatpush3.msra.mxu0 %v25324_v22  ;;  %19954 = vmatprep.mubr.f32.mxu0 %v24671_v50  ;;  %v27301_v50 = vld [vmem:[#allocation74_spill] sm:$0xff]  ;;  %v25709_v22 = vpop.f32.mrf.mxu0 }
 0xb3e   :  { %19973 = vmatpush3.msra.mxu1 %v25340_v56  ;;  %19928 = vmatprep.subr.mxu0 %v25345_v21  ;;  %v25711_v46 = vpop.f32.mrf.mxu1 }
 0xb3f   :  { %19974 = vmatprep.subr.mxu1 %v25354_v24  ;;  %19929 = vmatpush3.msra.mxu0 %v25345_v21  ;;  %v25713_v27 = vpop.f32.mrf.mxu0 }
 0xb40   :  { %19975 = vmatpush3.msra.mxu1 %v25354_v24  ;;  %19930 = vmatprep.subr.mxu0 %v25362_v11  ;;  %v25715_v56 = vpop.f32.mrf.mxu1 }
 0xb41   :  { %19976 = vmatprep.subr.mxu1 %v25375_v17  ;;  %19931 = vmatpush3.msra.mxu0 %v25362_v11  ;;  %v25717_v21 = vpop.f32.mrf.mxu0 }
 0xb42   :  { %19977 = vmatpush3.msra.mxu1 %v25375_v17  ;;  %19932 = vmatprep.subr.mxu0 %v25380_v18  ;;  %v25719_v31 = vpop.f32.mrf.mxu1 }
 0xb43   :  { %19978 = vmatprep.subr.mxu1 %v25391_v47  ;;  %19933 = vmatpush3.msra.mxu0 %v25380_v18  ;;  %v25723_v11 = vpop.f32.mrf.mxu0 }
 0xb44   :  { %19979 = vmatpush3.msra.mxu1 %v25391_v47  ;;  %19934 = vmatprep.subr.mxu0 %v25395_v42  ;;  %v25721_v24 = vpop.f32.mrf.mxu1 }
 0xb45   :  { %19980 = vmatprep.subr.mxu1 %v25404_v3  ;;  %19935 = vmatpush3.msra.mxu0 %v25395_v42  ;;  %v25725_v32 = vpop.f32.mrf.mxu0 }
 0xb46   :  { %19981 = vmatpush3.msra.mxu1 %v25404_v3  ;;  %19936 = vmatprep.subr.mxu0 %v25410_v59  ;;  %v25727_v17 = vpop.f32.mrf.mxu1 }
 0xb47   :  { %19982 = vmatprep.subr.mxu1 %v25419_v45  ;;  %19937 = vmatpush3.msra.mxu0 %v25410_v59  ;;  %v25729_v18 = vpop.f32.mrf.mxu0 }
 0xb48   :  { %19983 = vmatpush3.msra.mxu1 %v25419_v45  ;;  %19938 = vmatprep.subr.mxu0 %v25430_v53  ;;  %v25731_v4 = vpop.f32.mrf.mxu1 }
 0xb49   :  { %19984 = vmatprep.subr.mxu1 %v25435_v35  ;;  %19939 = vmatpush3.msra.mxu0 %v25430_v53  ;;  %v25733_v47 = vpop.f32.mrf.mxu0 }
 0xb4a   :  { %19985 = vmatpush3.msra.mxu1 %v25435_v35  ;;  %19940 = vmatprep.subr.mxu0 %v25445_v1  ;;  %v25735_v42 = vpop.f32.mrf.mxu1 }
 0xb4b   :  { %19986 = vmatprep.subr.mxu1 %v25450_v41  ;;  %19941 = vmatpush3.msra.mxu0 %v25445_v1  ;;  %v25737_v3 = vpop.f32.mrf.mxu0 }
 0xb4c   :  { %19987 = vmatpush3.msra.mxu1 %v25450_v41  ;;  %19942 = vmatprep.subr.mxu0 %v25461_v34 }
 0xb4d   :  { %19988 = vmatprep.subr.mxu1 %v25466_v57  ;;  %19943 = vmatpush3.msra.mxu0 %v25461_v34 }
 0xb4e   :  { %19989 = vmatpush3.msra.mxu1 %v25466_v57  ;;  %19944 = vmatprep.subr.mxu0 %v25473_v29 }
 0xb4f   :  { %19990 = vmatprep.subr.mxu1 %v25478_v15  ;;  %19945 = vmatpush3.msra.mxu0 %v25473_v29  ;;  %v20592_v29 = vld [vmem:[%s26745_s4 + $0x78] sm:$0xff] }
 0xb50   :  { %19991 = vmatpush3.msra.mxu1 %v25478_v15  ;;  %19946 = vmatprep.subr.mxu0 %v25486_v8 }
 0xb51   :  { %19993 = vmatmul.mubr.f32.vlgmr.msra.gmra.mxu1 %v27287_v7  ;;  %19947 = vmatpush3.msra.mxu0 %v25486_v8 }
 0xb52   :  { %19995 = vmatprep.mubr.f32.mxu1 %v27288_v12  ;;  %19948 = vmatprep.subr.mxu0 %v25496_v14 }
 0xb53   :  { %19949 = vmatpush3.msra.mxu0 %v25496_v14  ;;  %20009 = vmatprep.subr.mxu1 %v27301_v50  ;;  %v20595_v14 = vld [vmem:[%s26745_s4 + $0x60] sm:$0xff] }
 0xb54   :  { %19950 = vmatprep.subr.mxu0 %v25506_v37  ;;  %13392 = vrot.lane.b32.xlu0 %v20592_v29, %s20612_s17 }
 0xb55   :  { %19996 = vmatmul.mubr.f32.gmra.mxu1 %v27289_v40  ;;  %19951 = vmatpush3.msra.mxu0 %v25506_v37 }
 0xb56   :  { %19952 = vmatprep.subr.mxu0 %v25513_v55  ;;  %20017 = vmatprep.mubr.msk.f32.mxu1 %vm20609_vm1, %v27301_v50 }
 0xb57   :  { %19953 = vmatpush3.msra.mxu0 %v25513_v55  ;;  %13388 = vrot.lane.b32.xlu1 %v20593_v44, %s20612_s17  ;;  %v20596_v55 = vld [vmem:[%s26745_s4 + $0x58] sm:$0xff] }
 0xb58   :  { %19955 = vmatmul.mubr.f32.vlgmr.msra.gmra.mxu0 %v27287_v7  ;;  %19998 = vmatprep.subr.mxu0 %v27301_v50 }
 0xb59   :  { %19957 = vmatprep.mubr.f32.mxu0 %v27288_v12  ;;  %13390 = vrot.lane.b32.xlu0 %v20594_v49, %s20612_s17 }
 0xb5b   :  { %13386 = vrot.lane.b32.xlu1 %v20595_v14, %s20612_s17 }
 0xb5c   :  { %19958 = vmatmul.mubr.f32.gmra.mxu0 %v27289_v40  ;;  %v20600_v40 = vld [vmem:[%s26745_s4 + $0x38] sm:$0xff] }
 0xb5d   :  { %20006 = vmatprep.mubr.msk.f32.mxu0 %vm20609_vm1, %v27301_v50  ;;  %v19614_v6 = vpop.f32.mrf.mxu1  ;;  %13384 = vrot.lane.b32.xlu0 %v20596_v55, %s20612_s17 }
 0xb5f   :  { %v11088_v10 = vpop.f32.mrf.mxu1  ;;  %13382 = vrot.lane.b32.xlu1 %v20597_v28, %s20612_s17  ;;  %v20606_v28 = vld [vmem:[%s26745_s4 + $0x8] sm:$0xff] }
 0xb61   :  { %13380 = vrot.lane.b32.xlu0 %v20598_v5, %s20612_s17  ;;  %v20607_v5 = vld [vmem:[%s26745_s4] sm:$0xff] }
 0xb62   :  { %v19617_v53 = vpop.f32.mrf.mxu1 }
 0xb63   :  { %13378 = vrot.lane.b32.xlu1 %v20599_v0, %s20612_s17 }
 0xb64   :  { %v25739_v35 = vpop.f32.mrf.mxu1 }
 0xb65   :  { %13376 = vrot.lane.b32.xlu0 %v20600_v40, %s20612_s17 }
 0xb66   :  { %v19576_v59 = vpop.f32.mrf.mxu0 }
 0xb67   :  { %13374 = vrot.lane.b32.xlu1 %v20601_v33, %s20612_s17  ;;  %v11095_v29 = vadd.f32 %v19614_v6, %v19576_v59 }
 0xb68   :  { %v10907_v45 = vpop.f32.mrf.mxu0 }
 0xb69   :  { %13372 = vrot.lane.b32.xlu0 %v20602_v61, %s20612_s17  ;;  %v11089_v49 = vadd.f32 %v11088_v10, %v10907_v45 }
 0xb6b   :  { %v19579_v26 = vpop.f32.mrf.mxu0  ;;  %13370 = vrot.lane.b32.xlu1 %v20603_v25, %s20612_s17 }
 0xb6c   :  { %v11107_v0 = vadd.f32 %v19617_v53, %v19579_v26 }
 0xb6d   :  { %v25741_v30 = vpop.f32.mrf.mxu0  ;;  %13368 = vrot.lane.b32.xlu0 %v20604_v54, %s20612_s17 }
 0xb6e   :  { %v11101_v45 = vadd.f32 %v25739_v35, %v25741_v30 }
 0xb6f   :  { %13366 = vrot.lane.b32.xlu1 %v20605_v16, %s20612_s17 }
 0xb71   :  { %13364 = vrot.lane.b32.xlu0 %v20606_v28, %s20612_s17 }
 0xb73   :  { %13362 = vrot.lane.b32.xlu1 %v20607_v5, %s20612_s17 }
 0xb81   :  { %v19690_v1 = vpop.f32.mrf.mxu1 }
 0xb83   :  { %v25743_v34 = vpop.f32.mrf.mxu1 }
 0xb86   :  { %v25745_v57 = vpop.f32.mrf.mxu1 }
 0xb88   :  { %v25755_v8 = vpop.f32.mrf.mxu1 }
 0xb8a   :  { %v19652_v41 = vpop.f32.mrf.mxu0 }
 0xb8b   :  { %v11218_v14 = vadd.f32 %v19652_v41, %v11095_v29 }
 0xb8c   :  { %v11210_v38 = vpop.f32.mrf.mxu0 }
 0xb8d   :  { %v11211_v40 = vadd.f32 %v11210_v38, %v11089_v49  ;;  %v11329_v59 = vadd.f32 %v19690_v1, %v11218_v14 }
 0xb8f   :  { %v19655_v15 = vpop.f32.mrf.mxu0  ;;  %v11321_v61 = vadd.f32 %v25743_v34, %v11211_v40  ;;  %v10415_v34 = vadd.f32 %v25709_v22, %v25516_v63 }
 0xb90   :  { %v11232_v6 = vadd.f32 %v19655_v15, %v11107_v0 }
 0xb91   :  { %v11224_v37 = vpop.f32.mrf.mxu0 }
 0xb92   :  { %v11225_v54 = vadd.f32 %v11224_v37, %v11101_v45  ;;  %v11345_v28 = vadd.f32 %v25745_v57, %v11232_v6 }
 0xb94   :  { %v11337_v38 = vadd.f32 %v25755_v8, %v11225_v54  ;;  %v10408_v8 = vadd.f32 %v25713_v27, %v25522_v23 }
 0xba5   :  { %v19766_v13 = vpop.f32.mrf.mxu1 }
 0xba7   :  { %v11568_v19 = vpop.f32.mrf.mxu1 }
 0xbaa   :  { %v19769_v12 = vpop.f32.mrf.mxu1 }
 0xbac   :  { %v11580_v20 = vpop.f32.mrf.mxu1 }
 0xbae   :  { %v19728_v43 = vpop.f32.mrf.mxu0 }
 0xbaf   :  { %v11470_v41 = vadd.f32 %v19728_v43, %v11329_v59 }
 0xbb0   :  { %v11463_v7 = vpop.f32.mrf.mxu0 }
 0xbb1   :  { %v11464_v29 = vadd.f32 %v11463_v7, %v11321_v61  ;;  %v11575_v53 = vadd.f32 %v19766_v13, %v11470_v41  ;;  %v10304_v13 = vadd.f32 %v25699_v9, %v25701_v62  ;;  %v10518_v62 = vadd.f32 %v25711_v46, %v10408_v8 }
 0xbb3   :  { %v19731_v60 = vpop.f32.mrf.mxu0  ;;  %v11569_v15 = vadd.f32 %v11568_v19, %v11464_v29 }
 0xbb4   :  { %v11482_v5 = vadd.f32 %v19731_v60, %v11345_v28 }
 0xbb5   :  { %v11475_v58 = vpop.f32.mrf.mxu0 }
 0xbb6   :  { %v11476_v49 = vadd.f32 %v11475_v58, %v11337_v38  ;;  %v11587_v30 = vadd.f32 %v19769_v12, %v11482_v5 }
 0xbb8   :  { %v11581_v0 = vadd.f32 %v11580_v20, %v11476_v49  ;;  %v10298_v20 = vadd.f32 %v25703_v2, %v25707_v39 }
 0xbc9   :  { %v19842_v36 = vpop.f32.mrf.mxu1 }
 0xbcb   :  { %v11858_v51 = vpop.f32.mrf.mxu1 }
 0xbce   :  { %v19845_v55 = vpop.f32.mrf.mxu1 }
 0xbd0   :  { %v11870_v10 = vpop.f32.mrf.mxu1 }
 0xbd2   :  { %v19804_v52 = vpop.f32.mrf.mxu0 }
 0xbd3   :  { %v11688_v1 = vadd.f32 %v19804_v52, %v11575_v53  ;;  %v10526_v52 = vadd.f32 %v25705_v48, %v10415_v34 }
 0xbd4   :  { %v11677_v44 = vpop.f32.mrf.mxu0 }
 0xbd5   :  { %v11678_v35 = vadd.f32 %v11677_v44, %v11569_v15  ;;  %v11865_v7 = vadd.f32 %v19842_v36, %v11688_v1  ;;  %v10429_v44 = vadd.f32 %v25717_v21, %v10304_v13  ;;  %v10667_v36 = vadd.f32 %v25725_v32, %v10526_v52 }
 0xbd7   :  { %v19807_v33 = vpop.f32.mrf.mxu0  ;;  %v11859_v58 = vadd.f32 %v11858_v51, %v11678_v35  ;;  %v10542_v21 = vadd.f32 %v25715_v56, %v10429_v44  ;;  %v25834_v2 = vadd.f32 %v25721_v24, %v10667_v36 }
 0xbd8   :  { %v11708_v37 = vadd.f32 %v19807_v33, %v11587_v30  ;;  %v10661_v33 = vadd.f32 %v25729_v18, %v10518_v62  ;;  %v27310_v30 = vld [vmem:[#allocation74_spill] sm:$0xff] }
 0xbd9   :  { %v11697_v16 = vpop.f32.mrf.mxu0  ;;  %27302 = vst [vmem:[#allocation42_spill] sm:$0xff] %v25834_v2  ;;  %v10679_v46 = vadd.f32 %v25733_v47, %v10542_v21 }
 0xbda   :  { %v11698_v12 = vadd.f32 %v11697_v16, %v11581_v0  ;;  %v11877_v63 = vadd.f32 %v19845_v55, %v11708_v37  ;;  %v25841_v18 = vadd.f32 %v25727_v17, %v10661_v33 }
 0xbdb   :  { %v25849_v28 = vadd.f32 %v25731_v4, %v10679_v46  ;;  %v27314_v46 = vld [vmem:[#allocation6_spill] sm:$0xff] }
 0xbdc   :  { %v11871_v51 = vadd.f32 %v11870_v10, %v11698_v12  ;;  %27304 = vst [vmem:[#allocation46_spill] sm:$0xff] %v25841_v18  ;;  %v12849_v33 = vmul.f32 %v25841_v18, %v25841_v18 }
 0xbdd   :  { %27306 = vst [vmem:[#allocation49_spill] sm:$0xff] %v25849_v28 }
 0xbed   :  { %v19918_v25 = vpop.f32.mrf.mxu1 }
 0xbef   :  { %v12090_v26 = vpop.f32.mrf.mxu1 }
 0xbf2   :  { %v19921_v43 = vpop.f32.mrf.mxu1 }
 0xbf4   :  { %v12106_v60 = vpop.f32.mrf.mxu1 }
 0xbf6   :  { %v19880_v50 = vpop.f32.mrf.mxu0 }
 0xbf7   :  { %v11988_v19 = vadd.f32 %v19880_v50, %v11865_v7  ;;  %v10422_v50 = vadd.f32 %v25723_v11, %v10298_v20 }
 0xbf8   :  { %v11980_v14 = vpop.f32.mrf.mxu0 }
 0xbf9   :  { %v11981_v40 = vadd.f32 %v11980_v14, %v11859_v58  ;;  %v12099_v27 = vadd.f32 %v19918_v25, %v11988_v19  ;;  %v10534_v10 = vadd.f32 %v25719_v31, %v10422_v50  ;;  %v27311_v58 = vld [vmem:[#allocation8_spill] sm:$0xff] }
 0xbfb   :  { %v19883_v57 = vpop.f32.mrf.mxu0  ;;  %v12091_v59 = vadd.f32 %v12090_v26, %v11981_v40  ;;  %v10673_v16 = vadd.f32 %v25737_v3, %v10534_v10 }
 0xbfc   :  { %v12002_v23 = vadd.f32 %v19883_v57, %v11877_v63 }
 0xbfd   :  { %v11994_v9 = vpop.f32.mrf.mxu0  ;;  %v25860_v1 = vadd.f32 %v25735_v42, %v10673_v16 }
 0xbfe   :  { %v11995_v39 = vadd.f32 %v11994_v9, %v11871_v51  ;;  %v12115_v11 = vadd.f32 %v19921_v43, %v12002_v23  ;;  %v27312_v23 = vmov 1.0  }
 0xbff   :  { %27308 = vst [vmem:[#allocation63_spill] sm:$0xff] %v25860_v1  ;;  %v12851_v36 = vmul.f32 %v25860_v1, %v25860_v1 }
 0xc00   :  { %v12107_v47 = vadd.f32 %v12106_v60, %v11995_v39 }
 0xc11   :  { %v19994_v22 = vpop.f32.mrf.mxu1 }
 0xc13   :  { %v12338_v55 = vpop.f32.mrf.mxu1 }
 0xc15   :  { %v19997_v56 = vpop.f32.mrf.mxu1 }
 0xc17   :  { %v12350_v26 = vpop.f32.mrf.mxu1 }
 0xc18   :  { %v19956_v48 = vpop.f32.mrf.mxu0 }
 0xc19   :  { %v12240_v6 = vadd.f32 %v19956_v48, %v12099_v27  ;;  %v12850_v27 = vmul.f32 %v25834_v2, %v25834_v2  ;;  %v27313_v48 = vld [vmem:[#allocation4_spill] sm:$0xff] }
 0xc1a   :  { %v12233_v32 = vpop.f32.mrf.mxu0 }
 0xc1b   :  { %v25837_v45 = vadd.f32 %v19994_v22, %v12240_v6  ;;  %v12234_v41 = vadd.f32 %v12233_v32, %v12091_v59  ;;  %v12852_v22 = vmul.f32 %v25849_v28, %v25849_v28 }
 0xc1c   :  { %v19959_v61 = vpop.f32.mrf.mxu0 }
 0xc1d   :  { %27303 = vst [vmem:[#allocation51_spill] sm:$0xff] %v25837_v45  ;;  %v12361_v25 = vadd.f32 %v25837_v45, %v25834_v2  ;;  %v25845_v24 = vadd.f32 %v12338_v55, %v12234_v41  ;;  %v12252_v54 = vadd.f32 %v19959_v61, %v12115_v11  ;;  %v12854_v9 = vmul.f32 %v25837_v45, %v25837_v45 }
 0xc1e   :  { %v12245_v29 = vpop.f32.mrf.mxu0 }
 0xc1f   :  { %27305 = vst [vmem:[#allocation55_spill] sm:$0xff] %v25845_v24  ;;  %v12360_v31 = vadd.f32 %v25845_v24, %v25841_v18  ;;  %v25853_v5 = vadd.f32 %v19997_v56, %v12252_v54  ;;  %v12246_v17 = vadd.f32 %v12245_v29, %v12107_v47  ;;  %v25855_v53 = vand.u32 4294901760, %v12361_v25 }
 0xc20   :  { %v12853_v50 = vmul.f32 %v25845_v24, %v25845_v24  ;;  %v12858_v21 = vadd.f32 %v12854_v9, %v12850_v27 }
 0xc21   :  { %27307 = vst [vmem:[#allocation62_spill] sm:$0xff] %v25853_v5  ;;  %v12363_v38 = vadd.f32 %v25853_v5, %v25849_v28  ;;  %v25862_v3 = vadd.f32 %v12350_v26, %v12246_v17  ;;  %v25864_v15 = vand.u32 4294901760, %v12360_v31  ;;  %v25871_v14 = vsub.f32 %v12361_v25, %v25855_v53 }
 0xc22   :  { %v12856_v40 = vmul.f32 %v25853_v5, %v25853_v5  ;;  %v12857_v6 = vadd.f32 %v12853_v50, %v12849_v33  ;;  %v25938_v39 = vand.u32 4294901760, %v12858_v21 }
 0xc23   :  { %27309 = vst [vmem:[#allocation53_spill] sm:$0xff] %v25862_v3  ;;  %v25866_v4 = vand.u32 4294901760, %v12363_v38  ;;  %v12362_v49 = vadd.f32 %v25862_v3, %v25860_v1  ;;  %v25879_v43 = vsub.f32 %v12360_v31, %v25864_v15  ;;  %v12484_v7 = vand.u32 4294901760, %v25871_v14 }
 0xc24   :  { %v12855_v20 = vmul.f32 %v25862_v3, %v25862_v3  ;;  %v12860_v62 = vadd.f32 %v12856_v40, %v12852_v22  ;;  %v25948_v41 = vand.u32 4294901760, %v12857_v6  ;;  %v25960_v61 = vsub.f32 %v12858_v21, %v25938_v39 }
 0xc25   :  { %19999 = vmatpush3.msra.mxu0 %v25866_v4  ;;  %v12469_v35 = vsub.f32 %v12363_v38, %v25866_v4  ;;  %v25876_v42 = vand.u32 4294901760, %v12362_v49  ;;  %v12491_v13 = vand.u32 4294901760, %v25879_v43  ;;  %v12485_v19 = vsub.f32 %v25871_v14, %v12484_v7 }
 0xc26   :  { %20000 = vmatprep.subr.mxu0 %v27310_v30  ;;  %v12859_v51 = vadd.f32 %v12855_v20, %v12851_v36  ;;  %v25928_v55 = vand.u32 4294901760, %v12860_v62  ;;  %v25968_v25 = vsub.f32 %v12857_v6, %v25948_v41  ;;  %v12981_v16 = vand.u32 4294901760, %v25960_v61 }
 0xc27   :  { %v12470_v34 = vand.u32 4294901760, %v12469_v35  ;;  %20001 = vmatpush3.msra.mxu0 %v25876_v42  ;;  %v12476_v37 = vsub.f32 %v12362_v49, %v25876_v42  ;;  %v12492_v12 = vsub.f32 %v25879_v43, %v12491_v13  ;;  %v12486_v44 = vand.u32 4294901760, %v12485_v19  ;;  %v13389_v49 = vpop.permute.xlu1 %13388 }
 0xc28   :  { %20002 = vmatprep.subr.mxu0 %v27310_v30  ;;  %v25933_v59 = vand.u32 4294901760, %v12859_v51  ;;  %v25941_v32 = vsub.f32 %v12860_v62, %v25928_v55  ;;  %v12988_v29 = vand.u32 4294901760, %v25968_v25  ;;  %v12982_v17 = vsub.f32 %v25960_v61, %v12981_v16 }
 0xc29   :  { %v12471_v0 = vsub.f32 %v12469_v35, %v12470_v34  ;;  %20003 = vmatpush3.msra.mxu0 %v25855_v53  ;;  %v12477_v57 = vand.u32 4294901760, %v12476_v37  ;;  %v12493_v63 = vand.u32 4294901760, %v12492_v12 }
 0xc2a   :  { %20004 = vmatprep.subr.mxu0 %v27310_v30  ;;  %v25951_v11 = vsub.f32 %v12859_v51, %v25933_v59  ;;  %v12967_v10 = vand.u32 4294901760, %v25941_v32  ;;  %v12989_v26 = vsub.f32 %v25968_v25, %v12988_v29  ;;  %v12983_v38 = vand.u32 4294901760, %v12982_v17 }
 0xc2b   :  { %v12472_v8 = vand.u32 4294901760, %v12471_v0  ;;  %20005 = vmatpush3.msra.mxu0 %v25864_v15  ;;  %v12478_v60 = vsub.f32 %v12476_v37, %v12477_v57 }
 0xc2c   :  { %20020 = vmatprep.subr.mxu0 %v27310_v30  ;;  %20007 = vmatmul.mubr.f32.vlgmr.msra.gmra.mxu0 %v27311_v58  ;;  %v12974_v56 = vand.u32 4294901760, %v25951_v11  ;;  %v12968_v54 = vsub.f32 %v25941_v32, %v12967_v10 }
 0xc2d   :  { %20010 = vmatpush3.msra.mxu1 %v12472_v8  ;;  %20021 = vmatpush3.msra.mxu0 %v12469_v35  ;;  %v12479_v52 = vand.u32 4294901760, %v12478_v60  ;;  %v26020_v35 = vand.u32 4294901760, %v13389_v49 }
 0xc2e   :  { %20011 = vmatprep.subr.mxu1 %v27310_v30  ;;  %20022 = vmatprep.subr.mxu0 %v27310_v30  ;;  %v12975_v47 = vsub.f32 %v25951_v11, %v12974_v56  ;;  %v12969_v31 = vand.u32 4294901760, %v12968_v54 }
 0xc2f   :  { %20012 = vmatpush3.msra.mxu1 %v12479_v52  ;;  %20023 = vmatpush3.msra.mxu0 %v12476_v37  ;;  %v13387_v37 = vpop.permute.xlu1 %13386 }
 0xc30   :  { %20013 = vmatprep.subr.mxu1 %v27310_v30  ;;  %20024 = vmatprep.subr.mxu0 %v27310_v30 }
 0xc31   :  { %20014 = vmatpush3.msra.mxu1 %v12486_v44  ;;  %20025 = vmatpush3.msra.mxu0 %v25871_v14 }
 0xc32   :  { %20015 = vmatprep.subr.mxu1 %v27310_v30  ;;  %20026 = vmatprep.subr.mxu0 %v27310_v30 }
 0xc33   :  { %20016 = vmatpush3.msra.mxu1 %v12493_v63  ;;  %20027 = vmatpush3.msra.mxu0 %v25879_v43  ;;  %v26029_v43 = vsub.f32 %v13389_v49, %v26020_v35  ;;  %v13383_v52 = vpop.permute.xlu1 %13382 }
 0xc34   :  { %20018 = vmatmul.mubr.msk.f32.vlgmr.msra.gmra.mxu1 %vm2124_vm2, %v27312_v23  ;;  %20028 = vmatprep.mubr.msk.f32.mxu0 %vm20609_vm1, %v27310_v30  ;;  %v26083_v36 = vand.u32 4294901760, %v13383_v52 }
 0xc35   :  { %20031 = vmatprep.subr.mxu1 %v27310_v30  ;;  %20042 = vmatprep.subr.mxu0 %v27310_v30  ;;  %v26051_v8 = vand.u32 4294901760, %v26029_v43 }
 0xc36   :  { %20029 = vmatmul.mubr.f32.vlgmr.msra.gmra.mxu0 %v27313_v48  ;;  %20032 = vmatpush3.msra.mxu1 %v25866_v4  ;;  %v26103_v33 = vsub.f32 %v13383_v52, %v26083_v36 }
 0xc37   :  { %20043 = vmatpush3.msra.mxu0 %v12470_v34  ;;  %20033 = vmatprep.subr.mxu1 %v27310_v30  ;;  %v13519_v20 = vsub.f32 %v26029_v43, %v26051_v8  ;;  %v13379_v27 = vpop.permute.xlu1 %13378 }
 0xc38   :  { %20044 = vmatprep.subr.mxu0 %v27310_v30  ;;  %20034 = vmatpush3.msra.mxu1 %v25876_v42 }
 0xc39   :  { %20045 = vmatpush3.msra.mxu0 %v12477_v57  ;;  %20035 = vmatprep.subr.mxu1 %v27310_v30  ;;  %v26040_v57 = vand.u32 4294901760, %v13387_v37 }
 0xc3a   :  { %20046 = vmatprep.subr.mxu0 %v27310_v30  ;;  %20036 = vmatpush3.msra.mxu1 %v25855_v53 }
 0xc3b   :  { %20047 = vmatpush3.msra.mxu0 %v12484_v7  ;;  %20037 = vmatprep.subr.mxu1 %v27310_v30  ;;  %v26054_v60 = vsub.f32 %v13387_v37, %v26040_v57 }
 0xc3c   :  { %20048 = vmatprep.subr.mxu0 %v27310_v30  ;;  %20038 = vmatpush3.msra.mxu1 %v25864_v15 }
 0xc3d   :  { %20039 = vmatprep.mubr.msk.f32.mxu1 %vm20609_vm1, %v27310_v30  ;;  %20049 = vmatpush3.msra.mxu0 %v12491_v13  ;;  %v26068_v44 = vand.u32 4294901760, %v26054_v60 }
 0xc3e   :  { %20040 = vmatmul.mubr.f32.vlgmr.msra.gmra.mxu1 %v27314_v46  ;;  %20050 = vmatprep.mubr.msk.f32.mxu0 %vm20609_vm1, %v27310_v30 }
 0xc3f   :  { %20053 = vmatprep.subr.mxu1 %v27310_v30  ;;  %20064 = vmatprep.subr.mxu0 %v27310_v30  ;;  %v13526_v50 = vsub.f32 %v26054_v60, %v26068_v44 }
 0xc40   :  { %20051 = vmatmul.mubr.msk.f32.vlgmr.msra.gmra.mxu0 %vm2124_vm2, %v27312_v23  ;;  %20054 = vmatpush3.msra.mxu1 %v25866_v4  ;;  %v13393_v4 = vpop.permute.xlu0 %13392 }
 0xc41   :  { %20065 = vmatpush3.msra.mxu0 %v25928_v55  ;;  %20055 = vmatprep.subr.mxu1 %v27310_v30  ;;  %v26018_v14 = vand.u32 4294901760, %v13393_v4 }
 0xc42   :  { %20066 = vmatprep.subr.mxu0 %v27310_v30  ;;  %20056 = vmatpush3.msra.mxu1 %v25876_v42 }
 0xc43   :  { %20067 = vmatpush3.msra.mxu0 %v25933_v59  ;;  %20057 = vmatprep.subr.mxu1 %v27310_v30  ;;  %v26026_v42 = vsub.f32 %v13393_v4, %v26018_v14 }
 0xc44   :  { %20068 = vmatprep.subr.mxu0 %v27310_v30  ;;  %20058 = vmatpush3.msra.mxu1 %v25855_v53  ;;  %v12976_v53 = vand.u32 4294901760, %v12975_v47  ;;  %v13391_v34 = vpop.permute.xlu0 %13390 }
 0xc45   :  { %20069 = vmatpush3.msra.mxu0 %v25938_v39  ;;  %20059 = vmatprep.subr.mxu1 %v27310_v30  ;;  %v26036_v7 = vand.u32 4294901760, %v26026_v42  ;;  %v26038_v0 = vand.u32 4294901760, %v13391_v34 }
 0xc46   :  { %20070 = vmatprep.subr.mxu0 %v27310_v30  ;;  %20060 = vmatpush3.msra.mxu1 %v25864_v15  ;;  %v12990_v15 = vand.u32 4294901760, %v12989_v26 }
 0xc47   :  { %20061 = vmatprep.mubr.msk.f32.mxu1 %vm20609_vm1, %v27310_v30  ;;  %20071 = vmatpush3.msra.mxu0 %v25948_v41  ;;  %v26048_v13 = vsub.f32 %v13391_v34, %v26038_v0  ;;  %v13505_v19 = vsub.f32 %v26026_v42, %v26036_v7 }
 0xc48   :  { %20062 = vmatmul.mubr.msk.f32.vlgmr.msra.gmra.mxu1 %vm2124_vm2, %v27312_v23  ;;  %20072 = vmatprep.mubr.msk.f32.mxu0 %vm20609_vm1, %v27310_v30 }
 0xc49   :  { %20075 = vmatprep.subr.mxu1 %v27310_v30  ;;  %20086 = vmatprep.subr.mxu0 %v27310_v30  ;;  %v26065_v12 = vand.u32 4294901760, %v26048_v13  ;;  %v26076_v63 = vand.u32 4294901760, %v13505_v19 }
 0xc4a   :  { %20073 = vmatmul.mubr.f32.vlgmr.msra.gmra.mxu0 %v27311_v58  ;;  %20076 = vmatpush3.msra.mxu1 %v12969_v31  ;;  %v13385_v58 = vpop.permute.xlu0 %13384 }
 0xc4b   :  { %20087 = vmatpush3.msra.mxu0 %v25941_v32  ;;  %20077 = vmatprep.subr.mxu1 %v27310_v30  ;;  %v26071_v40 = vand.u32 4294901760, %v13385_v58  ;;  %27315 = vst [vmem:[#allocation67_spill] sm:$0xff] %v26076_v63  ;;  %v13512_v22 = vsub.f32 %v26048_v13, %v26065_v12  ;;  %v26125_v32 = vand.u32 4294901760, %v13379_v27 }
 0xc4c   :  { %20088 = vmatprep.subr.mxu0 %v27310_v30  ;;  %20078 = vmatpush3.msra.mxu1 %v12976_v53 }
 0xc4d   :  { %20089 = vmatpush3.msra.mxu0 %v25951_v11  ;;  %20079 = vmatprep.subr.mxu1 %v27310_v30  ;;  %v26088_v62 = vand.u32 4294901760, %v13512_v22  ;;  %v26095_v51 = vsub.f32 %v13385_v58, %v26071_v40 }
 0xc4e   :  { %20090 = vmatprep.subr.mxu0 %v27310_v30  ;;  %20080 = vmatpush3.msra.mxu1 %v12983_v38  ;;  %v13381_v9 = vpop.permute.xlu0 %13380 }
 0xc4f   :  { %20091 = vmatpush3.msra.mxu0 %v25960_v61  ;;  %20081 = vmatprep.subr.mxu1 %v27310_v30  ;;  %27316 = vst [vmem:[#allocation58_spill] sm:$0xff] %v26088_v62  ;;  %v26112_v21 = vand.u32 4294901760, %v26095_v51  ;;  %v26116_v6 = vand.u32 4294901760, %v13381_v9 }
 0xc50   :  { %20092 = vmatprep.subr.mxu0 %v27310_v30  ;;  %20082 = vmatpush3.msra.mxu1 %v12990_v15 }
 0xc51   :  { %20093 = vmatpush3.msra.mxu0 %v25968_v25  ;;  %20083 = vmatprep.mubr.msk.f32.mxu1 %vm20609_vm1, %v27310_v30  ;;  %v13533_v11 = vsub.f32 %v26095_v51, %v26112_v21  ;;  %v26151_v25 = vsub.f32 %v13379_v27, %v26125_v32 }
 0xc52   :  { %20094 = vmatprep.mubr.msk.f32.mxu0 %vm20609_vm1, %v27310_v30  ;;  %20097 = vmatprep.subr.mxu1 %v27310_v30 }
 0xc53   :  { %20108 = vmatprep.subr.mxu0 %v27310_v30  ;;  %20084 = vmatmul.mubr.msk.f32.vlgmr.msra.gmra.mxu1 %vm2124_vm2, %v27312_v23  ;;  %v26143_v61 = vand.u32 4294901760, %v13533_v11  ;;  %v26172_v53 = vand.u32 4294901760, %v26151_v25 }
 0xc54   :  { %20095 = vmatmul.mubr.f32.vlgmr.msra.gmra.mxu0 %v27313_v48  ;;  %20098 = vmatpush3.msra.mxu1 %v25928_v55  ;;  %v26100_v48 = vand.u32 4294901760, %v13519_v20 }
 0xc55   :  { %20109 = vmatpush3.msra.mxu0 %v12967_v10  ;;  %20099 = vmatprep.subr.mxu1 %v27310_v30  ;;  %v26138_v10 = vsub.f32 %v13381_v9, %v26116_v6  ;;  %27319 = vst [vmem:[#allocation72_spill] sm:$0xff] %v26143_v61  ;;  %v13554_v52 = vsub.f32 %v26151_v25, %v26172_v53 }
 0xc56   :  { %20110 = vmatprep.subr.mxu0 %v27310_v30  ;;  %20100 = vmatpush3.msra.mxu1 %v25933_v59  ;;  %27317 = vst [vmem:[#allocation70_spill] sm:$0xff] %v26100_v48 }
 0xc57   :  { %20111 = vmatpush3.msra.mxu0 %v12974_v56  ;;  %20101 = vmatprep.subr.mxu1 %v27310_v30  ;;  %v26165_v31 = vand.u32 4294901760, %v26138_v10 }
 0xc58   :  { %20112 = vmatprep.subr.mxu0 %v27310_v30  ;;  %20102 = vmatpush3.msra.mxu1 %v25938_v39 }
 0xc59   :  { %20113 = vmatpush3.msra.mxu0 %v12981_v16  ;;  %20103 = vmatprep.subr.mxu1 %v27310_v30  ;;  %v13547_v49 = vsub.f32 %v26138_v10, %v26165_v31 }
 0xc5a   :  { %20114 = vmatprep.subr.mxu0 %v27310_v30  ;;  %20104 = vmatpush3.msra.mxu1 %v25948_v41 }
 0xc5b   :  { %20115 = vmatpush3.msra.mxu0 %v12988_v29  ;;  %20105 = vmatprep.mubr.msk.f32.mxu1 %vm20609_vm1, %v27310_v30  ;;  %v26196_v58 = vand.u32 4294901760, %v13547_v49 }
 0xc5c   :  { %20119 = vmatprep.subr.mxu1 %v27310_v30  ;;  %20106 = vmatmul.mubr.f32.vlgmr.msra.gmra.mxu1 %v27314_v46 }
 0xc5d   :  { %20120 = vmatpush3.msra.mxu1 %v25928_v55  ;;  %20116 = vmatprep.mubr.msk.f32.mxu0 %vm20609_vm1, %v27310_v30  ;;  %v13377_v55 = vpop.permute.xlu0 %13376  ;;  %27321 = vst [vmem:[#allocation73_spill] sm:$0xff] %v26196_v58 }
 0xc5e   :  { %20121 = vmatprep.subr.mxu1 %v27310_v30  ;;  %20117 = vmatmul.mubr.msk.f32.vlgmr.msra.gmra.mxu0 %vm2124_vm2, %v27312_v23  ;;  %v26127_v46 = vand.u32 4294901760, %v13377_v55 }
 0xc5f   :  { %20122 = vmatpush3.msra.mxu1 %v25933_v59  ;;  %20127 = vmatprep.mubr.msk.f32.mxu1 %vm20609_vm1, %v27310_v30  ;;  %v13375_v59 = vpop.permute.xlu1 %13374 }
 0xc60   :  { %20123 = vmatprep.subr.mxu1 %v27310_v30  ;;  %20130 = vmatprep.subr.mxu0 %v27310_v30  ;;  %v26154_v54 = vsub.f32 %v13377_v55, %v26127_v46 }
 0xc61   :  { %20124 = vmatpush3.msra.mxu1 %v25938_v39  ;;  %20131 = vmatpush3.msra.mxu0 %v26018_v14  ;;  %v26121_v39 = vand.u32 4294901760, %v26103_v33  ;;  %v13373_v16 = vpop.permute.xlu0 %13372 }
 0xc62   :  { %20125 = vmatprep.subr.mxu1 %v27310_v30  ;;  %20132 = vmatprep.subr.mxu0 %v27310_v30  ;;  %v26175_v26 = vand.u32 4294901760, %v26154_v54  ;;  %v26177_v38 = vand.u32 4294901760, %v13373_v16 }
 0xc63   :  { %20126 = vmatpush3.msra.mxu1 %v25948_v41  ;;  %20133 = vmatpush3.msra.mxu0 %v26038_v0  ;;  %v26131_v41 = vand.u32 4294901760, %v13375_v59  ;;  %v13540_v56 = vsub.f32 %v26103_v33, %v26121_v39  ;;  %v13371_v17 = vpop.permute.xlu1 %13370 }
 0xc64   :  { %20128 = vmatmul.mubr.msk.f32.vlgmr.msra.gmra.mxu1 %vm2124_vm2, %v27312_v23  ;;  %20165 = vmatprep.subr.mxu1 %v27310_v30  ;;  %v26108_v23 = vand.u32 4294901760, %v13526_v50  ;;  %v26185_v4 = vand.u32 4294901760, %v13371_v17  ;;  %v26194_v19 = vsub.f32 %v13373_v16, %v26177_v38  ;;  %v13561_v20 = vsub.f32 %v26154_v54, %v26175_v26 }
 0xc65   :  { %20166 = vmatpush3.msra.mxu1 %v26076_v63  ;;  %20134 = vmatprep.subr.mxu0 %v27310_v30  ;;  %v26158_v47 = vsub.f32 %v13375_v59, %v26131_v41  ;;  %v26161_v29 = vand.u32 4294901760, %v13540_v56  ;;  %v13369_v34 = vpop.permute.xlu0 %13368  ;;  %v26215_v59 = vand.u32 4294901760, %v13554_v52 }
 0xc66   :  { %20167 = vmatprep.subr.mxu1 %v27310_v30  ;;  %20135 = vmatpush3.msra.mxu0 %v26020_v35  ;;  %27318 = vst [vmem:[#allocation61_spill] sm:$0xff] %v26108_v23  ;;  %v26190_v37 = vand.u32 4294901760, %v13369_v34  ;;  %v26209_v50 = vsub.f32 %v13371_v17, %v26185_v4  ;;  %v26217_v11 = vand.u32 4294901760, %v13561_v20  ;;  %v26226_v17 = vand.u32 4294901760, %v26194_v19 }
 0xc67   :  { %20168 = vmatpush3.msra.mxu1 %v26088_v62  ;;  %20136 = vmatprep.subr.mxu0 %v27310_v30  ;;  %27320 = vst [vmem:[#allocation66_spill] sm:$0xff] %v26161_v29  ;;  %v26182_v15 = vand.u32 4294901760, %v26158_v47  ;;  %v13367_v22 = vpop.permute.xlu1 %13366  ;;  %27322 = vst [vmem:[#allocation12_spill] sm:$0xff] %v26215_v59 }
 0xc68   :  { %20169 = vmatprep.subr.mxu1 %v27310_v30  ;;  %20137 = vmatpush3.msra.mxu0 %v26040_v57  ;;  %v26203_v9 = vand.u32 4294901760, %v13367_v22  ;;  %v26213_v55 = vsub.f32 %v13369_v34, %v26190_v37  ;;  %27323 = vst [vmem:[#allocation14_spill] sm:$0xff] %v26217_v11  ;;  %v13575_v3 = vsub.f32 %v26194_v19, %v26226_v17 }
 0xc69   :  { %20170 = vmatpush3.msra.mxu1 %v26100_v48  ;;  %20138 = vmatprep.subr.mxu0 %v27310_v30  ;;  %v13568_v27 = vsub.f32 %v26158_v47, %v26182_v15  ;;  %v13365_v56 = vpop.permute.xlu0 %13364 }
 0xc6a   :  { %20171 = vmatprep.subr.mxu1 %v27310_v30  ;;  %20139 = vmatpush3.msra.mxu0 %v26071_v40  ;;  %v26222_v16 = vsub.f32 %v13367_v22, %v26203_v9  ;;  %v26233_v52 = vand.u32 4294901760, %v13365_v56  ;;  %v26237_v22 = vand.u32 4294901760, %v26209_v50  ;;  %v26240_v20 = vand.u32 4294901760, %v26213_v55 }
 0xc6b   :  { %20172 = vmatpush3.msra.mxu1 %v26108_v23  ;;  %20140 = vmatprep.subr.mxu0 %v27310_v30  ;;  %v26229_v49 = vand.u32 4294901760, %v13568_v27  ;;  %v13363_v34 = vpop.permute.xlu1 %13362  ;;  %v26260_v24 = vand.u32 4294901760, %v13575_v3 }
 0xc6c   :  { %20173 = vmatprep.subr.mxu1 %v27310_v30  ;;  %20141 = vmatpush3.msra.mxu0 %v26083_v36  ;;  %27325 = vst [vmem:[#allocation19_spill] sm:$0xff] %v26237_v22  ;;  %27326 = vst [vmem:[#allocation27_spill] sm:$0xff] %v26240_v20  ;;  %v26245_v27 = vand.u32 4294901760, %v26222_v16  ;;  %v26248_v5 = vand.u32 4294901760, %v13363_v34  ;;  %v26258_v45 = vsub.f32 %v13365_v56, %v26233_v52 }
 0xc6d   :  { %20142 = vmatprep.subr.mxu0 %v27310_v30  ;;  %20197 = vmatprep.mubr.msk.f32.mxu1 %vm20609_vm1, %v27310_v30  ;;  %27324 = vst [vmem:[#allocation17_spill] sm:$0xff] %v26229_v49  ;;  %27328 = vst [vmem:[#allocation34_spill] sm:$0xff] %v26260_v24  ;;  %v13582_v28 = vsub.f32 %v26209_v50, %v26237_v22  ;;  %v13589_v1 = vsub.f32 %v26213_v55, %v26240_v20 }
 0xc6e   :  { %20143 = vmatpush3.msra.mxu0 %v26116_v6  ;;  %20162 = vmatprep.mubr.msk.f32.mxu0 %vm20609_vm1, %v27310_v30  ;;  %27327 = vst [vmem:[#allocation30_spill] sm:$0xff] %v26245_v27  ;;  %v13596_v2 = vsub.f32 %v26222_v16, %v26245_v27  ;;  %v26270_v18 = vsub.f32 %v13363_v34, %v26248_v5 }
 0xc6f   :  { %20144 = vmatprep.subr.mxu0 %v27310_v30  ;;  %20174 = vmatpush3.msra.mxu1 %v26143_v61  ;;  %v26273_v56 = vand.u32 4294901760, %v13582_v28  ;;  %v26275_v3 = vand.u32 4294901760, %v13589_v1 }
 0xc70   :  { %20145 = vmatpush3.msra.mxu0 %v26125_v32  ;;  %20175 = vmatprep.subr.mxu1 %v27310_v30  ;;  %v26286_v34 = vand.u32 4294901760, %v26270_v18 }
 0xc71   :  { %20146 = vmatprep.subr.mxu0 %v27310_v30  ;;  %20176 = vmatpush3.msra.mxu1 %v26161_v29  ;;  %27329 = vst [vmem:[#allocation38_spill] sm:$0xff] %v26273_v56  ;;  %27330 = vst [vmem:[#allocation41_spill] sm:$0xff] %v26275_v3 }
 0xc72   :  { %20147 = vmatpush3.msra.mxu0 %v26127_v46  ;;  %20177 = vmatprep.subr.mxu1 %v27310_v30  ;;  %27333 = vst [vmem:[#allocation52_spill] sm:$0xff] %v26286_v34 }
 0xc73   :  { %20148 = vmatprep.subr.mxu0 %v27310_v30  ;;  %20178 = vmatpush3.msra.mxu1 %v26196_v58 }
 0xc74   :  { %20149 = vmatpush3.msra.mxu0 %v26131_v41  ;;  %20179 = vmatprep.subr.mxu1 %v27310_v30 }
 0xc75   :  { %20150 = vmatprep.subr.mxu0 %v27310_v30  ;;  %20180 = vmatpush3.msra.mxu1 %v26215_v59 }
 0xc76   :  { %20151 = vmatpush3.msra.mxu0 %v26177_v38  ;;  %20181 = vmatprep.subr.mxu1 %v27310_v30 }
 0xc77   :  { %20152 = vmatprep.subr.mxu0 %v27310_v30  ;;  %20182 = vmatpush3.msra.mxu1 %v26217_v11  ;;  %v26282_v11 = vand.u32 4294901760, %v13596_v2  ;;  %v13610_v2 = vsub.f32 %v26270_v18, %v26286_v34 }
 0xc78   :  { %20153 = vmatpush3.msra.mxu0 %v26185_v4  ;;  %20183 = vmatprep.subr.mxu1 %v27310_v30 }
 0xc79   :  { %20154 = vmatprep.subr.mxu0 %v27310_v30  ;;  %20184 = vmatpush3.msra.mxu1 %v26229_v49  ;;  %v26279_v49 = vand.u32 4294901760, %v26258_v45  ;;  %27332 = vst [vmem:[#allocation50_spill] sm:$0xff] %v26282_v11 }
 0xc7a   :  { %20155 = vmatpush3.msra.mxu0 %v26190_v37  ;;  %20185 = vmatprep.subr.mxu1 %v27310_v30 }
 0xc7b   :  { %20156 = vmatprep.subr.mxu0 %v27310_v30  ;;  %20186 = vmatpush3.msra.mxu1 %v26260_v24  ;;  %27331 = vst [vmem:[#allocation45_spill] sm:$0xff] %v26279_v49  ;;  %v13603_v28 = vsub.f32 %v26258_v45, %v26279_v49 }
 0xc7c   :  { %20157 = vmatpush3.msra.mxu0 %v26203_v9  ;;  %20187 = vmatprep.subr.mxu1 %v27310_v30 }
 0xc7d   :  { %20158 = vmatprep.subr.mxu0 %v27310_v30  ;;  %20188 = vmatpush3.msra.mxu1 %v26273_v56  ;;  %v26294_v1 = vand.u32 4294901760, %v13603_v28  ;;  %v26299_v56 = vand.u32 4294901760, %v13610_v2 }
 0xc7e   :  { %20159 = vmatpush3.msra.mxu0 %v26233_v52  ;;  %20189 = vmatprep.subr.mxu1 %v27310_v30 }
 0xc7f   :  { %20160 = vmatprep.subr.mxu0 %v27310_v30  ;;  %20190 = vmatpush3.msra.mxu1 %v26275_v3  ;;  %27334 = vst [vmem:[#allocation57_spill] sm:$0xff] %v26294_v1  ;;  %27335 = vst [vmem:[#allocation60_spill] sm:$0xff] %v26299_v56 }
 0xc80   :  { %20161 = vmatpush3.msra.mxu0 %v26248_v5  ;;  %20191 = vmatprep.subr.mxu1 %v27310_v30 }
 0xc81   :  { %20200 = vmatprep.subr.mxu0 %v27310_v30  ;;  %20192 = vmatpush3.msra.mxu1 %v26282_v11 }
 0xc82   :  { %20193 = vmatprep.subr.mxu1 %v27310_v30 }
 0xc83   :  { %20194 = vmatpush3.msra.mxu1 %v26294_v1 }
 0xc84   :  { %20195 = vmatprep.subr.mxu1 %v27310_v30 }
 0xc85   :  { %20196 = vmatpush3.msra.mxu1 %v26299_v56 }
 0xc86   :  { %20235 = vmatprep.subr.mxu1 %v27310_v30 }
 0xcec   :  { %v12439_v11 = vpop.f32.mrf.mxu0 }
 0xcee   :  { %v20008_v3 = vpop.f32.mrf.mxu0 }
 0xcf4   :  { %v12530_v24 = vpop.f32.mrf.mxu1 }
 0xcf5   :  { %v12531_v29 = vadd.f32 %v12530_v24, %v12439_v11 }
 0xcf6   :  { %v20019_v59 = vpop.f32.mrf.mxu1  ;;  %v12610_v58 = vpop.f32.mrf.mxu0 }
 0xcf7   :  { %v12611_v48 = vadd.f32 %v12610_v58, %v12531_v29 }
 0xcf8   :  { %v20030_v28 = vpop.f32.mrf.mxu0 }
 0xcfe   :  { %v12687_v61 = vpop.f32.mrf.mxu1 }
 0xcff   :  { %v12688_v2 = vadd.f32 %v12687_v61, %v12611_v48 }
 0xd00   :  { %v20041_v23 = vpop.f32.mrf.mxu1  ;;  %v12770_v34 = vpop.f32.mrf.mxu0 }
 0xd01   :  { %v12771_v49 = vadd.f32 %v12770_v34, %v12688_v2 }
 0xd02   :  { %v20052_v1 = vpop.f32.mrf.mxu0 }
 0xd08   :  { %v12845_v62 = vpop.f32.mrf.mxu1 }
 0xd09   :  { %v12846_v27 = vadd.f32 %v12845_v62, %v12771_v49 }
 0xd0a   :  { %v20063_v63 = vpop.f32.mrf.mxu1  ;;  %v12936_v56 = vpop.f32.mrf.mxu0 }
 0xd0b   :  { %v26304_v20 = vand.u32 4294901760, %v12846_v27 }
 0xd0c   :  { %v20074_v22 = vpop.f32.mrf.mxu0 }
 0xd0d   :  { %v26307_v3 = vsub.f32 %v12846_v27, %v26304_v20  ;;  %20198 = vmatmul.mubr.f32.vlgmr.msra.gmra.mxu1 %v26304_v20 }
 0xd0e   :  { %20236 = vmatpush3.msra.mxu1 %v26018_v14  ;;  %20267 = vmatprep.mubr.msk.f32.mxu1 %vm20609_vm1, %v27310_v30 }
 0xd0f   :  { %v13493_v24 = vand.u32 4294901760, %v26307_v3  ;;  %20237 = vmatprep.subr.mxu1 %v27310_v30 }
 0xd10   :  { %20238 = vmatpush3.msra.mxu1 %v26038_v0 }
 0xd11   :  { %v13494_v63 = vsub.f32 %v26307_v3, %v13493_v24  ;;  %20239 = vmatprep.subr.mxu1 %v27310_v30 }
 0xd12   :  { %20240 = vmatpush3.msra.mxu1 %v26020_v35 }
 0xd13   :  { %v13495_v62 = vand.u32 4294901760, %v13494_v63  ;;  %20241 = vmatprep.subr.mxu1 %v27310_v30  ;;  %v13027_v48 = vpop.f32.mrf.mxu1  ;;  %v27338_v63 = vld [vmem:[#allocation67_spill] sm:$0xff] }
 0xd14   :  { %20242 = vmatpush3.msra.mxu1 %v26040_v57  ;;  %v13028_v23 = vadd.f32 %v13027_v48, %v12936_v56  ;;  %v13107_v61 = vpop.f32.mrf.mxu0  ;;  %v27340_v48 = vld [vmem:[#allocation58_spill] sm:$0xff] }
 0xd15   :  { %20243 = vmatprep.subr.mxu1 %v27310_v30  ;;  %20163 = vmatmul.mubr.f32.vlgmr.msra.gmra.mxu0 %v13495_v62  ;;  %v20085_v29 = vpop.f32.mrf.mxu1  ;;  %v27339_v62 = vld [vmem:[#allocation30_spill] sm:$0xff] }
 0xd16   :  { %20201 = vmatpush3.msra.mxu0 %v26026_v42  ;;  %20244 = vmatpush3.msra.mxu1 %v26071_v40  ;;  %v13108_v58 = vadd.f32 %v13107_v61, %v13028_v23  ;;  %v20096_v59 = vpop.f32.mrf.mxu0  ;;  %v27341_v23 = vld [vmem:[#allocation45_spill] sm:$0xff]  ;;  %v27342_v61 = vld [vmem:[#allocation70_spill] sm:$0xff]  ;;  %v27343_v29 = vld [vmem:[#allocation52_spill] sm:$0xff] }
 0xd17   :  { %20202 = vmatprep.subr.mxu0 %v27310_v30  ;;  %20245 = vmatprep.subr.mxu1 %v27310_v30  ;;  %v27345_v59 = vld [vmem:[#allocation72_spill] sm:$0xff] }
 0xd18   :  { %20203 = vmatpush3.msra.mxu0 %v26048_v13  ;;  %20246 = vmatpush3.msra.mxu1 %v26083_v36 }
 0xd19   :  { %20204 = vmatprep.subr.mxu0 %v27310_v30  ;;  %20247 = vmatprep.subr.mxu1 %v27310_v30 }
 0xd1a   :  { %20205 = vmatpush3.msra.mxu0 %v26029_v43  ;;  %20248 = vmatpush3.msra.mxu1 %v26116_v6 }
 0xd1b   :  { %20206 = vmatprep.subr.mxu0 %v27310_v30  ;;  %20249 = vmatprep.subr.mxu1 %v27310_v30 }
 0xd1c   :  { %20207 = vmatpush3.msra.mxu0 %v26054_v60  ;;  %20250 = vmatpush3.msra.mxu1 %v26125_v32  ;;  %v13184_v11 = vpop.f32.mrf.mxu1 }
 0xd1d   :  { %20208 = vmatprep.subr.mxu0 %v27310_v30  ;;  %20251 = vmatprep.subr.mxu1 %v27310_v30  ;;  %v13185_v49 = vadd.f32 %v13184_v11, %v13108_v58  ;;  %v27344_v58 = vld [vmem:[#allocation61_spill] sm:$0xff]  ;;  %v27346_v11 = vld [vmem:[#allocation66_spill] sm:$0xff] }
 0xd1e   :  { %20209 = vmatpush3.msra.mxu0 %v26095_v51  ;;  %20252 = vmatpush3.msra.mxu1 %v26127_v46  ;;  %v20107_v22 = vpop.f32.mrf.mxu1  ;;  %v13267_v27 = vpop.f32.mrf.mxu0 }
 0xd1f   :  { %20210 = vmatprep.subr.mxu0 %v27310_v30  ;;  %20253 = vmatprep.subr.mxu1 %v27310_v30  ;;  %v13268_v56 = vadd.f32 %v13267_v27, %v13185_v49  ;;  %v27348_v49 = vld [vmem:[#allocation12_spill] sm:$0xff]  ;;  %v27349_v22 = vld [vmem:[#allocation14_spill] sm:$0xff]  ;;  %v27350_v27 = vld [vmem:[#allocation17_spill] sm:$0xff] }
 0xd20   :  { %20211 = vmatpush3.msra.mxu0 %v26103_v33  ;;  %20254 = vmatpush3.msra.mxu1 %v26131_v41  ;;  %v20118_v34 = vpop.f32.mrf.mxu0 }
 0xd21   :  { %20212 = vmatprep.subr.mxu0 %v27310_v30  ;;  %20255 = vmatprep.subr.mxu1 %v27310_v30 }
 0xd22   :  { %20213 = vmatpush3.msra.mxu0 %v26138_v10  ;;  %20256 = vmatpush3.msra.mxu1 %v26177_v38 }
 0xd23   :  { %20214 = vmatprep.subr.mxu0 %v27310_v30  ;;  %20257 = vmatprep.subr.mxu1 %v27310_v30 }
 0xd24   :  { %20215 = vmatpush3.msra.mxu0 %v26151_v25  ;;  %20258 = vmatpush3.msra.mxu1 %v26185_v4  ;;  %v13342_v1 = vpop.f32.mrf.mxu1 }
 0xd25   :  { %20216 = vmatprep.subr.mxu0 %v27310_v30  ;;  %20259 = vmatprep.subr.mxu1 %v27310_v30  ;;  %v26356_v28 = vadd.f32 %v13342_v1, %v13268_v56  ;;  %v27351_v56 = vld [vmem:[#allocation34_spill] sm:$0xff] }
 0xd26   :  { %20217 = vmatpush3.msra.mxu0 %v26154_v54  ;;  %20260 = vmatpush3.msra.mxu1 %v26190_v37  ;;  %v20129_v2 = vpop.f32.mrf.mxu1  ;;  %v27352_v1 = vld [vmem:[#allocation38_spill] sm:$0xff] }
 0xd27   :  { %20218 = vmatprep.subr.mxu0 %v27310_v30  ;;  %20261 = vmatprep.subr.mxu1 %v27310_v30  ;;  %v26495_v34 = vand.u32 4294901760, %v26356_v28  ;;  %v27353_v2 = vld [vmem:[#allocation41_spill] sm:$0xff] }
 0xd28   :  { %20219 = vmatpush3.msra.mxu0 %v26158_v47  ;;  %20262 = vmatpush3.msra.mxu1 %v26203_v9 }
 0xd29   :  { %20220 = vmatprep.subr.mxu0 %v27310_v30  ;;  %20263 = vmatprep.subr.mxu1 %v27310_v30 }
 0xd2a   :  { %20221 = vmatpush3.msra.mxu0 %v26194_v19  ;;  %20264 = vmatpush3.msra.mxu1 %v26233_v52 }
 0xd2b   :  { %20222 = vmatprep.subr.mxu0 %v27310_v30  ;;  %20265 = vmatprep.subr.mxu1 %v27310_v30 }
 0xd2c   :  { %20223 = vmatpush3.msra.mxu0 %v26209_v50  ;;  %20266 = vmatpush3.msra.mxu1 %v26248_v5 }
 0xd2d   :  { %20224 = vmatprep.subr.mxu0 %v27310_v30  ;;  %20268 = vmatmul.mubr.f32.vlgmr.msra.gmra.mxu1 %v13493_v24  ;;  %v27337_v24 = vld [vmem:[#allocation27_spill] sm:$0xff] }
 0xd2e   :  { %20305 = vmatprep.subr.mxu1 %v27310_v30  ;;  %20225 = vmatpush3.msra.mxu0 %v26213_v55 }
 0xd2f   :  { %20306 = vmatpush3.msra.mxu1 %v26018_v14  ;;  %20226 = vmatprep.subr.mxu0 %v27310_v30 }
 0xd30   :  { %20307 = vmatprep.subr.mxu1 %v27310_v30  ;;  %20227 = vmatpush3.msra.mxu0 %v26222_v16 }
 0xd31   :  { %20308 = vmatpush3.msra.mxu1 %v26038_v0  ;;  %20228 = vmatprep.subr.mxu0 %v27310_v30 }
 0xd32   :  { %20309 = vmatprep.subr.mxu1 %v27310_v30  ;;  %20229 = vmatpush3.msra.mxu0 %v26258_v45 }
 0xd33   :  { %20310 = vmatpush3.msra.mxu1 %v26020_v35  ;;  %20230 = vmatprep.subr.mxu0 %v27310_v30 }
 0xd34   :  { %20311 = vmatprep.subr.mxu1 %v27310_v30  ;;  %20231 = vmatpush3.msra.mxu0 %v26270_v18 }
 0xd35   :  { %20232 = vmatprep.mubr.msk.f32.mxu0 %vm20609_vm1, %v27310_v30  ;;  %20312 = vmatpush3.msra.mxu1 %v26040_v57 }
 0xd36   :  { %20233 = vmatmul.mubr.f32.vlgmr.msra.gmra.mxu0 %v26307_v3  ;;  %20270 = vmatprep.subr.mxu0 %v27310_v30  ;;  %v27336_v3 = vld [vmem:[#allocation19_spill] sm:$0xff] }
 0xd37   :  { %20313 = vmatprep.subr.mxu1 %v27310_v30  ;;  %20271 = vmatpush3.msra.mxu0 %v26036_v7 }
 0xd38   :  { %20314 = vmatpush3.msra.mxu1 %v26071_v40  ;;  %20272 = vmatprep.subr.mxu0 %v27310_v30 }
 0xd39   :  { %20315 = vmatprep.subr.mxu1 %v27310_v30  ;;  %20273 = vmatpush3.msra.mxu0 %v26065_v12 }
 0xd3a   :  { %20316 = vmatpush3.msra.mxu1 %v26083_v36  ;;  %20274 = vmatprep.subr.mxu0 %v27310_v30 }
 0xd3b   :  { %20317 = vmatprep.subr.mxu1 %v27310_v30  ;;  %20275 = vmatpush3.msra.mxu0 %v26051_v8 }
 0xd3c   :  { %20318 = vmatpush3.msra.mxu1 %v26116_v6  ;;  %20276 = vmatprep.subr.mxu0 %v27310_v30 }
 0xd3d   :  { %20319 = vmatprep.subr.mxu1 %v27310_v30  ;;  %20277 = vmatpush3.msra.mxu0 %v26068_v44 }
 0xd3e   :  { %20320 = vmatpush3.msra.mxu1 %v26125_v32  ;;  %20278 = vmatprep.subr.mxu0 %v27310_v30 }
 0xd3f   :  { %20321 = vmatprep.subr.mxu1 %v27310_v30  ;;  %20279 = vmatpush3.msra.mxu0 %v26112_v21 }
 0xd40   :  { %20322 = vmatpush3.msra.mxu1 %v26127_v46  ;;  %20280 = vmatprep.subr.mxu0 %v27310_v30 }
 0xd41   :  { %20323 = vmatprep.subr.mxu1 %v27310_v30  ;;  %20281 = vmatpush3.msra.mxu0 %v26121_v39 }
 0xd42   :  { %20324 = vmatpush3.msra.mxu1 %v26131_v41  ;;  %20282 = vmatprep.subr.mxu0 %v27310_v30 }
 0xd43   :  { %20325 = vmatprep.subr.mxu1 %v27310_v30  ;;  %20283 = vmatpush3.msra.mxu0 %v26165_v31 }
 0xd44   :  { %20326 = vmatpush3.msra.mxu1 %v26177_v38  ;;  %20284 = vmatprep.subr.mxu0 %v27310_v30 }
 0xd45   :  { %20327 = vmatprep.subr.mxu1 %v27310_v30  ;;  %20285 = vmatpush3.msra.mxu0 %v26172_v53 }
 0xd46   :  { %20328 = vmatpush3.msra.mxu1 %v26185_v4  ;;  %20286 = vmatprep.subr.mxu0 %v27310_v30 }
 0xd47   :  { %20329 = vmatprep.subr.mxu1 %v27310_v30  ;;  %20287 = vmatpush3.msra.mxu0 %v26175_v26 }
 0xd48   :  { %20330 = vmatpush3.msra.mxu1 %v26190_v37  ;;  %20288 = vmatprep.subr.mxu0 %v27310_v30 }
 0xd49   :  { %20331 = vmatprep.subr.mxu1 %v27310_v30  ;;  %20289 = vmatpush3.msra.mxu0 %v26182_v15 }
 0xd4a   :  { %20332 = vmatpush3.msra.mxu1 %v26203_v9  ;;  %20290 = vmatprep.subr.mxu0 %v27310_v30 }
 0xd4b   :  { %20333 = vmatprep.subr.mxu1 %v27310_v30  ;;  %20291 = vmatpush3.msra.mxu0 %v26226_v17 }
 0xd4c   :  { %20334 = vmatpush3.msra.mxu1 %v26233_v52  ;;  %20292 = vmatprep.subr.mxu0 %v27310_v30 }
 0xd4d   :  { %20335 = vmatprep.subr.mxu1 %v27310_v30  ;;  %20293 = vmatpush3.msra.mxu0 %v27336_v3 }
 0xd4e   :  { %20336 = vmatpush3.msra.mxu1 %v26248_v5  ;;  %20337 = vmatprep.mubr.msk.f32.mxu1 %vm20609_vm1, %v27310_v30 }
 0xd4f   :  { %20294 = vmatprep.subr.mxu0 %v27310_v30  ;;  %20338 = vmatmul.mubr.f32.vlgmr.msra.gmra.mxu1 %v26304_v20 }
 0xd50   :  { %20375 = vmatprep.subr.mxu1 %v27310_v30  ;;  %20295 = vmatpush3.msra.mxu0 %v27337_v24 }
 0xd51   :  { %20376 = vmatpush3.msra.mxu1 %v27338_v63  ;;  %20296 = vmatprep.subr.mxu0 %v27310_v30  ;;  %v26507_v63 = vsub.f32 %v26356_v28, %v26495_v34  ;;  %v27356_v28 = vld [vmem:[#allocation60_spill] sm:$0xff] }
 0xd52   :  { %20377 = vmatprep.subr.mxu1 %v27310_v30  ;;  %20297 = vmatpush3.msra.mxu0 %v27339_v62 }
 0xd53   :  { %20378 = vmatpush3.msra.mxu1 %v27340_v48  ;;  %20298 = vmatprep.subr.mxu0 %v27310_v30  ;;  %v27354_v48 = vld [vmem:[#allocation50_spill] sm:$0xff] }
 0xd54   :  { %20379 = vmatprep.subr.mxu1 %v27310_v30  ;;  %20299 = vmatpush3.msra.mxu0 %v27341_v23 }
 0xd55   :  { %20380 = vmatpush3.msra.mxu1 %v27342_v61  ;;  %20300 = vmatprep.subr.mxu0 %v27310_v30  ;;  %v27355_v61 = vld [vmem:[#allocation57_spill] sm:$0xff] }
 0xd56   :  { %20381 = vmatprep.subr.mxu1 %v27310_v30  ;;  %20301 = vmatpush3.msra.mxu0 %v27343_v29 }
 0xd57   :  { %20302 = vmatprep.mubr.msk.f32.mxu0 %vm20609_vm1, %v27310_v30  ;;  %20382 = vmatpush3.msra.mxu1 %v27344_v58  ;;  %v14134_v58 = vand.u32 4294901760, %v26507_v63 }
 0xd58   :  { %20303 = vmatmul.mubr.f32.vlgmr.msra.gmra.mxu0 %v26304_v20  ;;  %20340 = vmatprep.subr.mxu0 %v27310_v30  ;;  %v27347_v20 = vld [vmem:[#allocation73_spill] sm:$0xff] }
 0xd59   :  { %20383 = vmatprep.subr.mxu1 %v27310_v30  ;;  %20341 = vmatpush3.msra.mxu0 %v26018_v14 }
 0xd5a   :  { %20384 = vmatpush3.msra.mxu1 %v27345_v59  ;;  %20342 = vmatprep.subr.mxu0 %v27310_v30  ;;  %v14135_v59 = vsub.f32 %v26507_v63, %v14134_v58 }
 0xd5b   :  { %20385 = vmatprep.subr.mxu1 %v27310_v30  ;;  %20343 = vmatpush3.msra.mxu0 %v26038_v0 }
 0xd5c   :  { %20386 = vmatpush3.msra.mxu1 %v27346_v11  ;;  %20344 = vmatprep.subr.mxu0 %v27310_v30  ;;  %v14136_v11 = vand.u32 4294901760, %v14135_v59 }
 0xd5d   :  { %20387 = vmatprep.subr.mxu1 %v27310_v30  ;;  %20345 = vmatpush3.msra.mxu0 %v26020_v35 }
 0xd5e   :  { %20388 = vmatpush3.msra.mxu1 %v27347_v20  ;;  %20346 = vmatprep.subr.mxu0 %v27310_v30 }
 0xd5f   :  { %20389 = vmatprep.subr.mxu1 %v27310_v30  ;;  %20347 = vmatpush3.msra.mxu0 %v26040_v57 }
 0xd60   :  { %20390 = vmatpush3.msra.mxu1 %v27348_v49  ;;  %20348 = vmatprep.subr.mxu0 %v27310_v30  ;;  %v30_v49 = vld [vmem:[%s26746_s5 + $0x11] sm:$0x1] }
 0xd61   :  { %20391 = vmatprep.subr.mxu1 %v27310_v30  ;;  %20349 = vmatpush3.msra.mxu0 %v26071_v40 }
 0xd62   :  { %20392 = vmatpush3.msra.mxu1 %v27349_v22  ;;  %20350 = vmatprep.subr.mxu0 %v27310_v30 }
 0xd63   :  { %20393 = vmatprep.subr.mxu1 %v27310_v30  ;;  %20351 = vmatpush3.msra.mxu0 %v26083_v36 }
 0xd64   :  { %20394 = vmatpush3.msra.mxu1 %v27350_v27  ;;  %20352 = vmatprep.subr.mxu0 %v27310_v30 }
 0xd65   :  { %20395 = vmatprep.subr.mxu1 %v27310_v30  ;;  %20353 = vmatpush3.msra.mxu0 %v26116_v6 }
 0xd66   :  { %20396 = vmatpush3.msra.mxu1 %v27351_v56  ;;  %20354 = vmatprep.subr.mxu0 %v27310_v30 }
 0xd67   :  { %20397 = vmatprep.subr.mxu1 %v27310_v30  ;;  %20355 = vmatpush3.msra.mxu0 %v26125_v32 }
 0xd68   :  { %20398 = vmatpush3.msra.mxu1 %v27352_v1  ;;  %20356 = vmatprep.subr.mxu0 %v27310_v30 }
 0xd69   :  { %20399 = vmatprep.subr.mxu1 %v27310_v30  ;;  %20357 = vmatpush3.msra.mxu0 %v26127_v46 }
 0xd6a   :  { %20400 = vmatpush3.msra.mxu1 %v27353_v2  ;;  %20358 = vmatprep.subr.mxu0 %v27310_v30 }
 0xd6b   :  { %20401 = vmatprep.subr.mxu1 %v27310_v30  ;;  %20359 = vmatpush3.msra.mxu0 %v26131_v41 }
 0xd6c   :  { %20402 = vmatpush3.msra.mxu1 %v27354_v48  ;;  %20360 = vmatprep.subr.mxu0 %v27310_v30 }
 0xd6d   :  { %20403 = vmatprep.subr.mxu1 %v27310_v30  ;;  %20361 = vmatpush3.msra.mxu0 %v26177_v38 }
 0xd6e   :  { %20404 = vmatpush3.msra.mxu1 %v27355_v61  ;;  %20362 = vmatprep.subr.mxu0 %v27310_v30 }
 0xd6f   :  { %20405 = vmatprep.subr.mxu1 %v27310_v30  ;;  %20363 = vmatpush3.msra.mxu0 %v26185_v4 }
 0xd70   :  { %20406 = vmatpush3.msra.mxu1 %v27356_v28  ;;  %20407 = vmatprep.mubr.msk.f32.mxu1 %vm20609_vm1, %v27310_v30 }
 0xd71   :  { %20364 = vmatprep.subr.mxu0 %v27310_v30  ;;  %20408 = vmatmul.mubr.f32.vlgmr.msra.gmra.mxu1 %v26495_v34 }
 0xd72   :  { %20445 = vmatprep.subr.mxu1 %v27310_v30  ;;  %20365 = vmatpush3.msra.mxu0 %v26190_v37 }
 0xd73   :  { %20446 = vmatpush3.msra.mxu1 %v26018_v14  ;;  %20366 = vmatprep.subr.mxu0 %v27310_v30 }
 0xd74   :  { %20447 = vmatprep.subr.mxu1 %v27310_v30  ;;  %20367 = vmatpush3.msra.mxu0 %v26203_v9 }
 0xd75   :  { %20448 = vmatpush3.msra.mxu1 %v26038_v0  ;;  %20368 = vmatprep.subr.mxu0 %v27310_v30 }
 0xd76   :  { %20449 = vmatprep.subr.mxu1 %v27310_v30  ;;  %20369 = vmatpush3.msra.mxu0 %v26233_v52 }
 0xd77   :  { %20450 = vmatpush3.msra.mxu1 %v26020_v35  ;;  %20370 = vmatprep.subr.mxu0 %v27310_v30 }
 0xd78   :  { %20451 = vmatprep.subr.mxu1 %v27310_v30  ;;  %20371 = vmatpush3.msra.mxu0 %v26248_v5 }
 0xd79   :  { %20372 = vmatprep.mubr.msk.f32.mxu0 %vm20609_vm1, %v27310_v30  ;;  %20452 = vmatpush3.msra.mxu1 %v26040_v57 }
 0xd7a   :  { %20373 = vmatmul.mubr.f32.vlgmr.msra.gmra.mxu0 %v14136_v11  ;;  %20410 = vmatprep.subr.mxu0 %v27310_v30 }
 0xd7b   :  { %20453 = vmatprep.subr.mxu1 %v27310_v30  ;;  %20411 = vmatpush3.msra.mxu0 %v26026_v42 }
 0xd7c   :  { %20454 = vmatpush3.msra.mxu1 %v26071_v40  ;;  %20412 = vmatprep.subr.mxu0 %v27310_v30 }
 0xd7d   :  { %20455 = vmatprep.subr.mxu1 %v27310_v30  ;;  %20413 = vmatpush3.msra.mxu0 %v26048_v13 }
 0xd7e   :  { %20456 = vmatpush3.msra.mxu1 %v26083_v36  ;;  %20414 = vmatprep.subr.mxu0 %v27310_v30 }
 0xd7f   :  { %20457 = vmatprep.subr.mxu1 %v27310_v30  ;;  %20415 = vmatpush3.msra.mxu0 %v26029_v43 }
 0xd80   :  { %20458 = vmatpush3.msra.mxu1 %v26116_v6  ;;  %20416 = vmatprep.subr.mxu0 %v27310_v30 }
 0xd81   :  { %20459 = vmatprep.subr.mxu1 %v27310_v30  ;;  %20417 = vmatpush3.msra.mxu0 %v26054_v60 }
 0xd82   :  { %20460 = vmatpush3.msra.mxu1 %v26125_v32  ;;  %20418 = vmatprep.subr.mxu0 %v27310_v30 }
 0xd83   :  { %20461 = vmatprep.subr.mxu1 %v27310_v30  ;;  %20419 = vmatpush3.msra.mxu0 %v26095_v51 }
 0xd84   :  { %20462 = vmatpush3.msra.mxu1 %v26127_v46  ;;  %20420 = vmatprep.subr.mxu0 %v27310_v30 }
 0xd85   :  { %20463 = vmatprep.subr.mxu1 %v27310_v30  ;;  %20421 = vmatpush3.msra.mxu0 %v26103_v33 }
 0xd86   :  { %20464 = vmatpush3.msra.mxu1 %v26131_v41  ;;  %20422 = vmatprep.subr.mxu0 %v27310_v30 }
 0xd87   :  { %20465 = vmatprep.subr.mxu1 %v27310_v30  ;;  %20423 = vmatpush3.msra.mxu0 %v26138_v10 }
 0xd88   :  { %20466 = vmatpush3.msra.mxu1 %v26177_v38  ;;  %20424 = vmatprep.subr.mxu0 %v27310_v30 }
 0xd89   :  { %20467 = vmatprep.subr.mxu1 %v27310_v30  ;;  %20425 = vmatpush3.msra.mxu0 %v26151_v25 }
 0xd8a   :  { %20468 = vmatpush3.msra.mxu1 %v26185_v4  ;;  %20426 = vmatprep.subr.mxu0 %v27310_v30 }
 0xd8b   :  { %20469 = vmatprep.subr.mxu1 %v27310_v30  ;;  %20427 = vmatpush3.msra.mxu0 %v26154_v54 }
 0xd8c   :  { %20470 = vmatpush3.msra.mxu1 %v26190_v37  ;;  %20428 = vmatprep.subr.mxu0 %v27310_v30 }
 0xd8d   :  { %20471 = vmatprep.subr.mxu1 %v27310_v30  ;;  %20429 = vmatpush3.msra.mxu0 %v26158_v47 }
 0xd8e   :  { %20472 = vmatpush3.msra.mxu1 %v26203_v9  ;;  %20430 = vmatprep.subr.mxu0 %v27310_v30 }
 0xd8f   :  { %20473 = vmatprep.subr.mxu1 %v27310_v30  ;;  %20431 = vmatpush3.msra.mxu0 %v26194_v19 }
 0xd90   :  { %20474 = vmatpush3.msra.mxu1 %v26233_v52  ;;  %20432 = vmatprep.subr.mxu0 %v27310_v30 }
 0xd91   :  { %20475 = vmatprep.subr.mxu1 %v27310_v30  ;;  %20433 = vmatpush3.msra.mxu0 %v26209_v50 }
 0xd92   :  { %20476 = vmatpush3.msra.mxu1 %v26248_v5  ;;  %20477 = vmatprep.mubr.msk.f32.mxu1 %vm20609_vm1, %v27310_v30 }
 0xd93   :  { %20434 = vmatprep.subr.mxu0 %v27310_v30  ;;  %20478 = vmatmul.mubr.f32.vlgmr.msra.gmra.mxu1 %v14134_v58 }
 0xd94   :  { %20515 = vmatprep.subr.mxu1 %v27310_v30  ;;  %20435 = vmatpush3.msra.mxu0 %v26213_v55 }
 0xd95   :  { %20516 = vmatpush3.msra.mxu1 %v26018_v14  ;;  %20436 = vmatprep.subr.mxu0 %v27310_v30 }
 0xd96   :  { %20517 = vmatprep.subr.mxu1 %v27310_v30  ;;  %20437 = vmatpush3.msra.mxu0 %v26222_v16 }
 0xd97   :  { %20518 = vmatpush3.msra.mxu1 %v26038_v0  ;;  %20438 = vmatprep.subr.mxu0 %v27310_v30 }
 0xd98   :  { %20519 = vmatprep.subr.mxu1 %v27310_v30  ;;  %20439 = vmatpush3.msra.mxu0 %v26258_v45 }
 0xd99   :  { %20520 = vmatpush3.msra.mxu1 %v26020_v35  ;;  %20440 = vmatprep.subr.mxu0 %v27310_v30 }
 0xd9a   :  { %20521 = vmatprep.subr.mxu1 %v27310_v30  ;;  %20441 = vmatpush3.msra.mxu0 %v26270_v18 }
 0xd9b   :  { %20442 = vmatprep.mubr.msk.f32.mxu0 %vm20609_vm1, %v27310_v30  ;;  %20522 = vmatpush3.msra.mxu1 %v26040_v57 }
 0xd9c   :  { %20443 = vmatmul.mubr.f32.vlgmr.msra.gmra.mxu0 %v26507_v63  ;;  %20480 = vmatprep.subr.mxu0 %v27310_v30 }
 0xd9d   :  { %20523 = vmatprep.subr.mxu1 %v27310_v30  ;;  %20481 = vmatpush3.msra.mxu0 %v26036_v7 }
 0xd9e   :  { %20524 = vmatpush3.msra.mxu1 %v26071_v40  ;;  %20482 = vmatprep.subr.mxu0 %v27310_v30 }
 0xd9f   :  { %20525 = vmatprep.subr.mxu1 %v27310_v30  ;;  %20483 = vmatpush3.msra.mxu0 %v26065_v12 }
 0xda0   :  { %20526 = vmatpush3.msra.mxu1 %v26083_v36  ;;  %20484 = vmatprep.subr.mxu0 %v27310_v30 }
 0xda1   :  { %20527 = vmatprep.subr.mxu1 %v27310_v30  ;;  %20485 = vmatpush3.msra.mxu0 %v26051_v8  ;;  %v24_v8 = vld [vmem:[%s26746_s5 + $0x8] sm:$0xf] }
 0xda2   :  { %20528 = vmatpush3.msra.mxu1 %v26116_v6  ;;  %20486 = vmatprep.subr.mxu0 %v27310_v30  ;;  %v14711_v60 = vsel %vm14709_vm5, %v24_v8, 0 }
 0xda3   :  { %20529 = vmatprep.subr.mxu1 %v27310_v30  ;;  %20487 = vmatpush3.msra.mxu0 %v26068_v44  ;;  %v14744_v12 = vand.u32 4294901760, %v14711_v60 }
 0xda4   :  { %20530 = vmatpush3.msra.mxu1 %v26125_v32  ;;  %20488 = vmatprep.subr.mxu0 %v27310_v30 }
 0xda5   :  { %20531 = vmatprep.subr.mxu1 %v27310_v30  ;;  %20489 = vmatpush3.msra.mxu0 %v26112_v21  ;;  %v26685_v44 = vsub.f32 %v14711_v60, %v14744_v12 }
 0xda6   :  { %20532 = vmatpush3.msra.mxu1 %v26127_v46  ;;  %20490 = vmatprep.subr.mxu0 %v27310_v30 }
 0xda7   :  { %20533 = vmatprep.subr.mxu1 %v27310_v30  ;;  %20491 = vmatpush3.msra.mxu0 %v26121_v39  ;;  %v14822_v40 = vand.u32 4294901760, %v26685_v44 }
 0xda8   :  { %20534 = vmatpush3.msra.mxu1 %v26131_v41  ;;  %20492 = vmatprep.subr.mxu0 %v27310_v30 }
 0xda9   :  { %20535 = vmatprep.subr.mxu1 %v27310_v30  ;;  %20493 = vmatpush3.msra.mxu0 %v26165_v31  ;;  %v14823_v51 = vsub.f32 %v26685_v44, %v14822_v40 }
 0xdaa   :  { %20536 = vmatpush3.msra.mxu1 %v26177_v38  ;;  %20494 = vmatprep.subr.mxu0 %v27310_v30 }
 0xdab   :  { %20537 = vmatprep.subr.mxu1 %v27310_v30  ;;  %20495 = vmatpush3.msra.mxu0 %v26172_v53  ;;  %v14824_v21 = vand.u32 4294901760, %v14823_v51  ;;  %v27359_v51 = vld [vmem:[#allocation46_spill] sm:$0xff] }
 0xdac   :  { %20538 = vmatpush3.msra.mxu1 %v26185_v4  ;;  %20496 = vmatprep.subr.mxu0 %v27310_v30 }
 0xdad   :  { %20539 = vmatprep.subr.mxu1 %v27310_v30  ;;  %20497 = vmatpush3.msra.mxu0 %v26175_v26 }
 0xdae   :  { %20540 = vmatpush3.msra.mxu1 %v26190_v37  ;;  %20498 = vmatprep.subr.mxu0 %v27310_v30 }
 0xdaf   :  { %20541 = vmatprep.subr.mxu1 %v27310_v30  ;;  %20499 = vmatpush3.msra.mxu0 %v26182_v15 }
 0xdb0   :  { %20542 = vmatpush3.msra.mxu1 %v26203_v9  ;;  %20500 = vmatprep.subr.mxu0 %v27310_v30 }
 0xdb1   :  { %20543 = vmatprep.subr.mxu1 %v27310_v30  ;;  %20501 = vmatpush3.msra.mxu0 %v26226_v17 }
 0xdb2   :  { %20544 = vmatpush3.msra.mxu1 %v26233_v52  ;;  %20502 = vmatprep.subr.mxu0 %v27310_v30 }
 0xdb3   :  { %20545 = vmatprep.subr.mxu1 %v27310_v30  ;;  %20503 = vmatpush3.msra.mxu0 %v27336_v3 }
 0xdb4   :  { %20546 = vmatpush3.msra.mxu1 %v26248_v5  ;;  %20547 = vmatprep.mubr.msk.f32.mxu1 %vm20609_vm1, %v27310_v30 }
 0xdb5   :  { %20504 = vmatprep.subr.mxu0 %v27310_v30  ;;  %20548 = vmatmul.mubr.f32.vlgmr.msra.gmra.mxu1 %v26495_v34 }
 0xdb6   :  { %20505 = vmatpush3.msra.mxu0 %v27337_v24  ;;  %20512 = vmatprep.mubr.msk.f32.mxu0 %vm20609_vm1, %v27310_v30 }
 0xdb7   :  { %20506 = vmatprep.subr.mxu0 %v27310_v30  ;;  %20555 = vmatprep.subr.mxu1 %v27310_v30 }
 0xdb8   :  { %20507 = vmatpush3.msra.mxu0 %v27339_v62  ;;  %20557 = vmatprep.mubr.msk.f32.mxu1 %vm20609_vm1, %v27310_v30 }
 0xdb9   :  { %20508 = vmatprep.subr.mxu0 %v27310_v30  ;;  %20556 = vmatpush3.msra.mxu1 %v14824_v21  ;;  %v27360_v21 = vld [vmem:[#allocation42_spill] sm:$0xff] }
 0xdba   :  { %20509 = vmatpush3.msra.mxu0 %v27341_v23  ;;  %20565 = vmatprep.subr.mxu1 %v27310_v30  ;;  %v29_v23 = vld [vmem:[%s26746_s5 + $0x10] sm:$0x1] }
 0xdbb   :  { %20510 = vmatprep.subr.mxu0 %v27310_v30 }
 0xdbc   :  { %20511 = vmatpush3.msra.mxu0 %v27343_v29 }
 0xdbd   :  { %20513 = vmatmul.mubr.f32.vlgmr.msra.gmra.mxu0 %v26495_v34  ;;  %20550 = vmatprep.subr.mxu0 %v27310_v30 }
 0xdbe   :  { %20552 = vmatprep.mubr.msk.f32.mxu0 %vm20609_vm1, %v27310_v30  ;;  %20551 = vmatpush3.msra.mxu0 %v14744_v12 }
 0xdbf   :  { %20560 = vmatprep.subr.mxu0 %v27310_v30 }
 0xdcd   :  { %v13648_v45 = vpop.f32.mrf.mxu1 }
 0xdcf   :  { %v20199_v18 = vpop.f32.mrf.mxu1 }
 0xdd5   :  { %v13497_v5 = vpop.f32.mrf.mxu0 }
 0xdd6   :  { %v13649_v14 = vadd.f32 %v13648_v45, %v13497_v5 }
 0xdd7   :  { %v20164_v35 = vpop.f32.mrf.mxu0 }
 0xded   :  { %v13841_v42 = vpop.f32.mrf.mxu1 }
 0xdef   :  { %v20269_v43 = vpop.f32.mrf.mxu1 }
 0xdf6   :  { %v13752_v7 = vpop.f32.mrf.mxu0 }
 0xdf7   :  { %v13753_v0 = vadd.f32 %v13752_v7, %v13649_v14 }
 0xdf8   :  { %v20234_v57 = vpop.f32.mrf.mxu0 }
 0xdf9   :  { %v13842_v13 = vadd.f32 %v13841_v42, %v13753_v0 }
 0xe0f   :  { %v14047_v36 = vpop.f32.mrf.mxu1 }
 0xe11   :  { %v20339_v33 = vpop.f32.mrf.mxu1 }
 0xe18   :  { %v13960_v6 = vpop.f32.mrf.mxu0 }
 0xe19   :  { %v13961_v39 = vadd.f32 %v13960_v6, %v13842_v13 }
 0xe1a   :  { %v20304_v32 = vpop.f32.mrf.mxu0 }
 0xe1b   :  { %v14048_v46 = vadd.f32 %v14047_v36, %v13961_v39  ;;  %v27361_v39 = vld [vmem:[#allocation63_spill] sm:$0xff] }
 0xe1d   :  { %v14692_v50 = vmul.f32 0.00048828125, %v14048_v46  ;;  %v27362_v46 = vld [vmem:[#allocation49_spill] sm:$0xff] }
 0xe1f   :  { %v14694_v52 = vmul.f32 %v14692_v50, %v14692_v50 }
 0xe31   :  { %v14289_v41 = vpop.f32.mrf.mxu1 }
 0xe33   :  { %v20409_v10 = vpop.f32.mrf.mxu1 }
 0xe34   :  { %v27363_v10 = vld [vmem:[#allocation55_spill] sm:$0xff] }
 0xe3a   :  { %v14138_v25 = vpop.f32.mrf.mxu0 }
 0xe3b   :  { %v14290_v15 = vadd.f32 %v14289_v41, %v14138_v25 }
 0xe3c   :  { %v20374_v54 = vpop.f32.mrf.mxu0 }
 0xe3d   :  { %v27364_v54 = vld [vmem:[#allocation51_spill] sm:$0xff] }
 0xe53   :  { %v14482_v47 = vpop.f32.mrf.mxu1 }
 0xe55   :  { %v20479_v31 = vpop.f32.mrf.mxu1 }
 0xe56   :  { %v27365_v31 = vld [vmem:[#allocation53_spill] sm:$0xff] }
 0xe5c   :  { %v14393_v53 = vpop.f32.mrf.mxu0 }
 0xe5d   :  { %v14394_v37 = vadd.f32 %v14393_v53, %v14290_v15 }
 0xe5e   :  { %v20444_v26 = vpop.f32.mrf.mxu0 }
 0xe5f   :  { %v14483_v19 = vadd.f32 %v14482_v47, %v14394_v37  ;;  %v27366_v26 = vld [vmem:[#allocation62_spill] sm:$0xff] }
 0xe75   :  { %v14688_v38 = vpop.f32.mrf.mxu1 }
 0xe77   :  { %v20549_v4 = vpop.f32.mrf.mxu1 }
 0xe7d   :  { %v14601_v9 = vpop.f32.mrf.mxu0 }
 0xe7e   :  { %v14602_v55 = vadd.f32 %v14601_v9, %v14483_v19 }
 0xe7f   :  { %v20514_v16 = vpop.f32.mrf.mxu0 }
 0xe80   :  { %v14689_v17 = vadd.f32 %v14688_v38, %v14602_v55 }
 0xe82   :  { %v14693_v3 = vmul.f32 0.00048828125, %v14689_v17 }
 0xe84   :  { %v14695_v24 = vsub.f32 %v14693_v3, %v14694_v52 }
 0xe86   :  { %v14696_v62 = vadd.f32 1e-05, %v14695_v24 }
 0xe88   :  { %20589 = vrsqrt.f32 %v14696_v62 }
 0xe95   :  { %v20590_v29 = vpop.eup %20589 }
 0xe96   :  { %v14698_v20 = vmul.f32 %v20590_v29, %v29_v23 }
 0xe98   :  { %v14699_v22 = vmul.f32 %v14698_v20, %v14692_v50 }
 0xe9a   :  { %v14700_v27 = vsub.f32 %v30_v49, %v14699_v22 }
 0xe9c   :  { %v14702_v56 = vrot.slane %v14700_v27, 7 }
 0xe9e   :  { %v14704_v34 = vsel %vm4396_vm3, %v14698_v20, %v14702_v56 }
 0xe9f   :  { %v14707_v1 = vsel %vm14705_vm6, %v14704_v34, 0 }
 0xea0   :  { %v14779_v2 = vand.u32 4294901760, %v14707_v1 }
 0xea2   :  { %v14780_v63 = vsub.f32 %v14707_v1, %v14779_v2  ;;  %20558 = vmatmul.mubr.f32.vlgmr.msra.gmra.mxu1 %v14779_v2 }
 0xea3   :  { %20566 = vmatpush3.msra.mxu1 %v14744_v12  ;;  %20567 = vmatprep.mubr.msk.f32.mxu1 %vm20609_vm1, %v27310_v30 }
 0xea4   :  { %v14781_v48 = vand.u32 4294901760, %v14780_v63  ;;  %20575 = vmatprep.subr.mxu1 %v27310_v30 }
 0xea6   :  { %20568 = vmatmul.mubr.f32.vlgmr.msra.gmra.mxu1 %v14781_v48  ;;  %v14782_v61 = vsub.f32 %v14780_v63, %v14781_v48 }
 0xea7   :  { %20576 = vmatpush3.msra.mxu1 %v14744_v12  ;;  %20577 = vmatprep.mubr.msk.f32.mxu1 %vm20609_vm1, %v27310_v30 }
 0xea8   :  { %v14783_v58 = vand.u32 4294901760, %v14782_v61 }
 0xeaa   :  { %20553 = vmatmul.mubr.f32.vlgmr.msra.gmra.mxu0 %v14783_v58  ;;  %20578 = vmatmul.mubr.f32.vlgmr.msra.gmra.mxu1 %v14779_v2 }
 0xeab   :  { %20561 = vmatpush3.msra.mxu0 %v26685_v44  ;;  %20562 = vmatprep.mubr.msk.f32.mxu0 %vm20609_vm1, %v27310_v30  ;;  %v27357_v44 = vld [vmem:[#allocation85_spill] sm:$0xff] }
 0xeac   :  { %20570 = vmatprep.subr.mxu0 %v27310_v30 }
 0xeae   :  { %20563 = vmatmul.mubr.f32.vlgmr.msra.gmra.mxu0 %v14780_v63 }
 0xeaf   :  { %20571 = vmatpush3.msra.mxu0 %v14822_v40  ;;  %20572 = vmatprep.mubr.msk.f32.mxu0 %vm20609_vm1, %v27310_v30  ;;  %v27358_v40 = vld [vmem:[#allocation86_spill] sm:$0xff] }
 0xeb2   :  { %20573 = vmatmul.mubr.f32.vlgmr.msra.gmra.mxu0 %v14779_v2 }
 0xf62   :  { %v14861_v28 = vpop.f32.mrf.mxu1 }
 0xf64   :  { %v20559_v59 = vpop.f32.mrf.mxu1 }
 0xf66   :  { %v15009_v11 = vpop.f32.mrf.mxu1 }
 0xf68   :  { %v20569_v45 = vpop.f32.mrf.mxu1 }
 0xf6a   :  { %v14785_v18 = vpop.f32.mrf.mxu0  ;;  %v15155_v5 = vpop.f32.mrf.mxu1 }
 0xf6b   :  { %v14862_v42 = vadd.f32 %v14861_v28, %v14785_v18 }
 0xf6c   :  { %v20554_v14 = vpop.f32.mrf.mxu0  ;;  %v20579_v35 = vpop.f32.mrf.mxu1 }
 0xf6e   :  { %v14935_v43 = vpop.f32.mrf.mxu0 }
 0xf6f   :  { %v14936_v7 = vadd.f32 %v14935_v43, %v14862_v42 }
 0xf70   :  { %v20564_v0 = vpop.f32.mrf.mxu0 }
 0xf71   :  { %v15010_v57 = vadd.f32 %v15009_v11, %v14936_v7 }
 0xf72   :  { %v15083_v13 = vpop.f32.mrf.mxu0 }
 0xf73   :  { %v15084_v8 = vadd.f32 %v15083_v13, %v15010_v57 }
 0xf74   :  { %v20574_v60 = vpop.f32.mrf.mxu0 }
 0xf75   :  { %v15156_v12 = vadd.f32 %v15155_v5, %v15084_v8 }
 0xf77   :  { %v15162_v30 = vrot.slane %v15156_v12, %v27357_v44  ;;  %v15170_v36 = vrot.slane %v15156_v12, %v27358_v40 }
 0xf79   :  { %v15163_v33 = vmul.f32 %v15162_v30, %v27359_v51  ;;  %v15164_v6 = vmul.f32 %v15162_v30, %v27360_v21  ;;  %v15165_v32 = vmul.f32 %v15162_v30, %v27361_v39  ;;  %v15166_v41 = vmul.f32 %v15162_v30, %v27362_v46 }
 0xf7a   :  { %v15183_v25 = vmul.f32 %v15162_v30, %v27363_v10  ;;  %v15184_v47 = vmul.f32 %v15162_v30, %v27364_v54  ;;  %v15185_v53 = vmul.f32 %v15162_v30, %v27365_v31  ;;  %v15186_v38 = vmul.f32 %v15162_v30, %v27366_v26 }
 0xf7b   :  { %v15171_v15 = vadd.f32 %v15170_v36, %v15163_v33  ;;  %v15172_v4 = vadd.f32 %v15170_v36, %v15164_v6  ;;  %v15173_v37 = vadd.f32 %v15170_v36, %v15165_v32  ;;  %v15174_v19 = vadd.f32 %v15170_v36, %v15166_v41 }
 0xf7c   :  { %v15187_v9 = vadd.f32 %v15183_v25, %v15170_v36  ;;  %v15188_v50 = vadd.f32 %v15184_v47, %v15170_v36  ;;  %v15189_v55 = vadd.f32 %v15185_v53, %v15170_v36  ;;  %v15190_v16 = vadd.f32 %v15186_v38, %v15170_v36 }
 0xf7d   :  { %v15175_v17 = vmax.f32 %v15171_v15, 0.0  ;;  %v15176_v52 = vmax.f32 %v15172_v4, 0.0  ;;  %v15177_v3 = vmax.f32 %v15173_v37, 0.0  ;;  %v15178_v24 = vmax.f32 %v15174_v19, 0.0 }
 0xf7e   :  { %v15191_v62 = vmax.f32 %v15187_v9, 0.0  ;;  %v15192_v23 = vmax.f32 %v15188_v50, 0.0  ;;  %v15193_v29 = vmax.f32 %v15189_v55, 0.0  ;;  %v15194_v20 = vmax.f32 %v15190_v16, 0.0 }
 0xf7f   :  { %15179 = vst [vmem:[%s26749_s6] sm:$0xff] %v15175_v17  ;;  %15180 = vst [vmem:[%s26749_s6 + $0x8] sm:$0xff] %v15176_v52 }
 0xf80   :  { %15181 = vst [vmem:[%s26749_s6 + $0x10] sm:$0xff] %v15177_v3  ;;  %15182 = vst [vmem:[%s26749_s6 + $0x18] sm:$0xff] %v15178_v24 }
 0xf81   :  { %15302 = vst [vmem:[%s26749_s6 + $0x20] sm:$0xff] %v15191_v62  ;;  %15303 = vst [vmem:[%s26749_s6 + $0x28] sm:$0xff] %v15192_v23 }
 0xf82   :  { %15304 = vst [vmem:[%s26749_s6 + $0x30] sm:$0xff] %v15193_v29  ;;  %15305 = vst [vmem:[%s26749_s6 + $0x38] sm:$0xff] %v15194_v20 }

</bundles_post_ra>
